<compile_context>
chip_gen: v7x
topology: tpu7x:2x2x1
jax: 0.10.0
libtpu: 0.0.40
codegen_flags: <defaults>
</compile_context>

<pallas_src>
import math

import numpy as np
import jax
import jax.numpy as jnp
from jax import lax
from jax.experimental import pallas as pl
from jax.experimental.pallas import tpu as pltpu


# ----------------------------------------------------------------------------
# Kernel factory: all shape/loop parameters are static (closed over).
# ----------------------------------------------------------------------------
def _build_fpm_kernel(N, bt, T, K, Dp, mxu_dtype):
    R = bt * N           # rows per block (flattened batch x nodes)
    G3 = 3 * Dp

    def kernel(abd_ref, at_ref, e_ref, wih_ref, whh_ref, bih_ref, bhh_ref, out_ref):
        cast = lambda x: x.astype(mxu_dtype)

        # ---- hoisted, loop-invariant loads ----------------------------------
        A_bd = cast(abd_ref[0])                               # [R, R] block-diagonal A
        At3 = at_ref[...].reshape(bt, N, N)                   # At3[b, i, t] = A[b, t, i]
        Wih = [cast(wih_ref[l]) for l in range(T)]            # [Dp, 3Dp]
        Whh = [cast(whh_ref[l]) for l in range(T)]
        # Bias broadcasts materialized ONCE (no per-step broadcast_in_dim).
        bih_b = [jnp.broadcast_to(bih_ref[l], (R, G3)) for l in range(T)]
        bhh_b = [jnp.broadcast_to(bhh_ref[l], (R, G3)) for l in range(T)]
        node_pos = lax.broadcasted_iota(jnp.int32, (R, 1), 0) % N   # node index per row

        def k_body(_, E):
            # Layer-0 hoist: gi0(t) = GM[t] - A[t,i] * GE,  GE = E @ W_ih0,
            #                GM = A @ GE + b_ih0   (one block-diag MXU call)
            GE = jnp.dot(cast(E), Wih[0],
                         preferred_element_type=jnp.float32)           # [R, 3Dp]
            GM = jnp.dot(A_bd, cast(GE),
                         preferred_element_type=jnp.float32) + bih_b[0]  # [R, 3Dp]
            GE3 = GE.reshape(bt, N, G3)
            GM3 = GM.reshape(bt, N, G3)

            hs = [E] * T                                    # h0 of every layer = E[i]
            for t in range(N):                              # statically unrolled time loop
                # layer-0 gates for step t: 3-D views + free contiguous reshape
                gi = (GM3[:, t:t + 1, :] - At3[:, :, t:t + 1] * GE3).reshape(R, G3)
                keep = node_pos == t                        # node i skips its own step

                new_hs = []
                for l in range(T):
                    h = hs[l]
                    gh = jnp.dot(cast(h), Whh[l],
                                 preferred_element_type=jnp.float32) + bhh_b[l]
                    rz = jax.nn.sigmoid(gi[:, :2 * Dp] + gh[:, :2 * Dp])   # fused r,z
                    r = rz[:, :Dp]
                    z = rz[:, Dp:]
                    n = jnp.tanh(gi[:, 2 * Dp:] + r * gh[:, 2 * Dp:])
                    h_new = (1.0 - z) * n + z * h
                    h_upd = jnp.where(keep, h, h_new)       # leave-one-out masking
                    new_hs.append(h_upd)
                    if l + 1 < T:                           # input to next layer
                        gi = jnp.dot(cast(h_upd), Wih[l + 1],
                                     preferred_element_type=jnp.float32) + bih_b[l + 1]
                hs = new_hs
            return hs[-1]                                   # new embedding for next k

        E0 = e_ref[...]                                     # [R, Dp] f32
        E_final = lax.fori_loop(0, K, k_body, E0) if K > 1 else k_body(0, E0)
        out_ref[...] = E_final.astype(out_ref.dtype)        # lane-dense store [R, Dp]

    return kernel


# ----------------------------------------------------------------------------
# Host-side helpers.
# ----------------------------------------------------------------------------
def _pad_gate_weights(w, D, Dp):
    # w: [T, D, 3D] -> [T, Dp, 3Dp]; gate g lands at lane offset g*Dp.
    T = w.shape[0]
    out = jnp.zeros((T, Dp, 3 * Dp), jnp.float32)
    for g in range(3):
        out = out.at[:, :D, g * Dp:g * Dp + D].set(
            w[:, :, g * D:(g + 1) * D].astype(jnp.float32))
    return out


def _pad_gate_bias(b, D, Dp):
    # b: [T, 3D] -> [T, 1, 3Dp]
    T = b.shape[0]
    out = jnp.zeros((T, 1, 3 * Dp), jnp.float32)
    for g in range(3):
        out = out.at[:, 0, g * Dp:g * Dp + D].set(
            b[:, g * D:(g + 1) * D].astype(jnp.float32))
    return out


def _device_kind():
    try:
        return (jax.devices()[0].device_kind or "").lower()
    except Exception:
        return ""


def _vmem_capacity_bytes(is_v7):
    try:
        return int(pltpu.get_tpu_info().vmem_capacity_bytes)
    except Exception:
        return 64 * 2 ** 20 if is_v7 else 128 * 2 ** 20


# ----------------------------------------------------------------------------
# Wrapper: one pallas_call covers all K_iter iterations.
# ----------------------------------------------------------------------------
def fpm_forward(A, emb, w_ih, w_hh, b_ih, b_hh, K_iter, *, mxu_dtype=jnp.float32):
    B, N, _ = A.shape
    D = emb.shape[-1]
    T = w_ih.shape[0]
    assert N % 8 == 0, "N must be a multiple of 8 (TODO(synk): zero-pad N otherwise)"

    Dp = ((D + 127) // 128) * 128          # lane-dense (padded) feature dim
    G3 = 3 * Dp
    f32 = jnp.float32

    kind = _device_kind()
    is_v7 = ("v7" in kind) or ("7x" in kind)

    # ---- batch-block selection: fill ~256 MXU rows per grid block -----------
    # v5e/v6e are single-TC: one block is strictly best.  Only v7x (2 TCs)
    # prefers grid >= 2, and only if each block still holds >= 128 rows.
    row_target = 256
    bt = max(1, min(B, -(-row_target // N)))
    while B % bt != 0:
        bt -= 1
    if is_v7 and B > 1 and B // bt < 2:
        cand = bt - 1
        while cand >= 1 and (B % cand != 0 or B // cand < 2):
            cand -= 1
        if cand >= 1 and cand * N >= 128:
            bt = cand
    grid_n = B // bt
    R = bt * N

    A32 = A.astype(f32)
    # Block-diagonal adjacency: one [R,R] @ [R,3Dp] MXU call covers all bt
    # batch elements (A is constant across k, so it is built once, host-side).
    if bt == 1:
        A_bd = A32
    else:
        A_bd = jnp.einsum('gbij,bc->gbicj',
                          A32.reshape(grid_n, bt, N, N),
                          jnp.eye(bt, dtype=f32)).reshape(grid_n, R, R)
    # A^T, flattened: row (b, i) holds A[b, :, i] (column access for a_col).
    At_flat = jnp.swapaxes(A32, 1, 2).reshape(B * N, N)
    emb_p = jnp.zeros((B, N, Dp), f32).at[:, :, :D].set(emb.astype(f32))
    e_flat = emb_p.reshape(B * N, Dp)

    w_ih_p = _pad_gate_weights(w_ih, D, Dp)
    w_hh_p = _pad_gate_weights(w_hh, D, Dp)
    b_ih_p = _pad_gate_bias(b_ih, D, Dp)
    b_hh_p = _pad_gate_bias(b_hh, D, Dp)

    # Generation-aware VMEM budget: <= 75% of physical (≈48 MiB cap on v7x).
    blk_bytes = 4 * (R * R + R * N + 2 * R * Dp)
    wt_bytes = 4 * (2 * T * Dp * G3 + 2 * T * G3)
    cap = int(0.75 * _vmem_capacity_bytes(is_v7))
    vmem_limit = int(max(16 * 2 ** 20,
                         min(cap, max(32 * 2 ** 20, 4 * (blk_bytes + wt_bytes)))))

    kernel = _build_fpm_kernel(N, bt, T, int(K_iter), Dp, mxu_dtype)

    out_flat = pl.pallas_call(
        kernel,
        out_shape=jax.ShapeDtypeStruct((B * N, Dp), f32),
        grid_spec=pltpu.PrefetchScalarGridSpec(
            num_scalar_prefetch=0,
            grid=(grid_n,),
            in_specs=[
                pl.BlockSpec((1, R, R), lambda g: (g, 0, 0)),     # block-diagonal A
                pl.BlockSpec((R, N), lambda g: (g, 0)),           # A^T, flattened
                pl.BlockSpec((R, Dp), lambda g: (g, 0)),          # embedding, flat + padded
                pl.BlockSpec((T, Dp, G3), lambda g: (0, 0, 0)),   # W_ih (per-gate padded)
                pl.BlockSpec((T, Dp, G3), lambda g: (0, 0, 0)),   # W_hh
                pl.BlockSpec((T, 1, G3), lambda g: (0, 0, 0)),    # b_ih
                pl.BlockSpec((T, 1, G3), lambda g: (0, 0, 0)),    # b_hh
            ],
            out_specs=pl.BlockSpec((R, Dp), lambda g: (g, 0)),
        ),
        compiler_params=pltpu.CompilerParams(
            dimension_semantics=("parallel",),
            vmem_limit_bytes=vmem_limit),
    )(A_bd, At_flat, e_flat, w_ih_p, w_hh_p, b_ih_p, b_hh_p)

    # TODO(synk): expose the padded [B, N, Dp] (or bf16) layout to downstream
    # consumers to cut the 4x padded f32 HBM writeback + slice when D << 128.
    return out_flat.reshape(B, N, Dp)[:, :, :D]


# ----------------------------------------------------------------------------
# Pure-JAX reference mirroring the PyTorch code (for verification only).
# ----------------------------------------------------------------------------
def _gru_cell_ref(x, h, w_ih, w_hh, b_ih, b_hh):
    D = h.shape[-1]
    gi = x @ w_ih + b_ih
    gh = h @ w_hh + b_hh
    r = jax.nn.sigmoid(gi[..., :D] + gh[..., :D])
    z = jax.nn.sigmoid(gi[..., D:2 * D] + gh[..., D:2 * D])
    n = jnp.tanh(gi[..., 2 * D:] + r * gh[..., 2 * D:])
    return (1.0 - z) * n + z * h


def _gru_ref(x_seq, h0, w_ih, w_hh, b_ih, b_hh):
    # x_seq: [B, L, D] (batch_first), h0: [T, B, D] -> returns h_n: [T, B, D]
    T = w_ih.shape[0]
    layer_in = x_seq
    finals = []
    for l in range(T):
        h = h0[l]
        outs = []
        for t in range(x_seq.shape[1]):
            h = _gru_cell_ref(layer_in[:, t], h, w_ih[l], w_hh[l], b_ih[l], b_hh[l])
            outs.append(h)
        layer_in = jnp.stack(outs, axis=1)
        finals.append(h)
    return jnp.stack(finals, axis=0)


def _one_iter_ref(A, emb, w_ih, w_hh, b_ih, b_hh):
    B, N, _ = A.shape
    T = w_ih.shape[0]
    outs = []
    for i in range(N):
        A_rows = jnp.concatenate([A[:, :i], A[:, i + 1:]], axis=1)
        A_mi = jnp.concatenate([A_rows[:, :, :i], A_rows[:, :, i + 1:]], axis=2)
        E_mi = jnp.concatenate([emb[:, :i], emb[:, i + 1:]], axis=1)
        m = jnp.einsum('bij,bjd->bid', A_mi, E_mi)
        h0 = jnp.broadcast_to(emb[:, i][None], (T, B, emb.shape[-1]))
        h_n = _gru_ref(m, h0, w_ih, w_hh, b_ih, b_hh)
        outs.append(h_n[-1][:, None])
    return jnp.concatenate(outs, axis=1)


# ----------------------------------------------------------------------------
if __name__ == "__main__":
    B, N, D, T_step, K_iter = 2, 8, 32, 2, 2

    key = jax.random.PRNGKey(0)
    k1, k2, k3, k4, k5, k6 = jax.random.split(key, 6)

    A = jax.random.normal(k1, (B, N, N), jnp.float32) * 0.5
    emb = jax.random.normal(k2, (B, N, D), jnp.float32)

    # Deterministic GRU parameters (PyTorch-style uniform init, gate order r,z,n).
    # Weights are stored pre-transposed: [T_step, D, 3D] so that x @ W works.
    bound = 1.0 / math.sqrt(D)
    w_ih = jax.random.uniform(k3, (T_step, D, 3 * D), jnp.float32, -bound, bound)
    w_hh = jax.random.uniform(k4, (T_step, D, 3 * D), jnp.float32, -bound, bound)
    b_ih = jax.random.uniform(k5, (T_step, 3 * D), jnp.float32, -bound, bound)
    b_hh = jax.random.uniform(k6, (T_step, 3 * D), jnp.float32, -bound, bound)

    out = fpm_forward(A, emb, w_ih, w_hh, b_ih, b_hh, K_iter)
    out = jax.block_until_ready(out)

    # Verify against a literal (concatenation-based) JAX port of the PyTorch code.
    ref = emb
    for _ in range(K_iter):
        ref = _one_iter_ref(A, ref, w_ih, w_hh, b_ih, b_hh)
    np.testing.assert_allclose(np.asarray(out), np.asarray(ref), atol=1e-4, rtol=1e-4)

    print("KERNEL_OK")
</pallas_src>

<mosaic_0001>
module attributes {stable_mosaic.version = 11 : i64} {
  func.func @kernel(%arg0: i32, %arg1: memref<1x16x16xf32, #tpu.memory_space<vmem>>, %arg2: memref<16x8xf32, #tpu.memory_space<vmem>>, %arg3: memref<16x128xf32, #tpu.memory_space<vmem>>, %arg4: memref<2x128x384xf32, #tpu.memory_space<vmem>>, %arg5: memref<2x128x384xf32, #tpu.memory_space<vmem>>, %arg6: memref<2x1x384xf32, #tpu.memory_space<vmem>>, %arg7: memref<2x1x384xf32, #tpu.memory_space<vmem>>, %arg8: memref<16x128xf32, #tpu.memory_space<vmem>>) attributes {dimension_semantics = [#tpu.dimension_semantics<parallel>], iteration_bounds = array<i64: 1>, scalar_prefetch = 0 : i64, scratch_operands = 0 : i64, tpu.core_type = #tpu.core_type<tc>, window_params = [{transform_indices = @transform_0, window_bounds = array<i64: 1, 16, 16>}, {transform_indices = @transform_1, window_bounds = array<i64: 16, 8>}, {transform_indices = @transform_2, window_bounds = array<i64: 16, 128>}, {pipeline_mode = #tpu.pipeline_mode<synchronous>, transform_indices = @transform_3, window_bounds = array<i64: 2, 128, 384>}, {pipeline_mode = #tpu.pipeline_mode<synchronous>, transform_indices = @transform_4, window_bounds = array<i64: 2, 128, 384>}, {pipeline_mode = #tpu.pipeline_mode<synchronous>, transform_indices = @transform_5, window_bounds = array<i64: 2, 1, 384>}, {pipeline_mode = #tpu.pipeline_mode<synchronous>, transform_indices = @transform_6, window_bounds = array<i64: 2, 1, 384>}, {transform_indices = @transform_7, window_bounds = array<i64: 16, 128>}]} {
    %c0 = arith.constant 0 : index
    %c0_0 = arith.constant 0 : index
    %c0_1 = arith.constant 0 : index
    %0 = vector.load %arg1[%c0, %c0_0, %c0_1] : memref<1x16x16xf32, #tpu.memory_space<vmem>>, vector<1x16x16xf32>
    %1 = vector.shape_cast %0 : vector<1x16x16xf32> to vector<16x16xf32>
    %c0_2 = arith.constant 0 : index
    %c0_3 = arith.constant 0 : index
    %2 = vector.load %arg2[%c0_2, %c0_3] : memref<16x8xf32, #tpu.memory_space<vmem>>, vector<16x8xf32>
    %3 = vector.shape_cast %2 : vector<16x8xf32> to vector<2x8x8xf32>
    %c0_4 = arith.constant 0 : index
    %c0_5 = arith.constant 0 : index
    %c0_6 = arith.constant 0 : index
    %4 = vector.load %arg4[%c0_4, %c0_5, %c0_6] : memref<2x128x384xf32, #tpu.memory_space<vmem>>, vector<1x128x384xf32>
    %5 = vector.shape_cast %4 : vector<1x128x384xf32> to vector<128x384xf32>
    %c1 = arith.constant 1 : index
    %c0_7 = arith.constant 0 : index
    %c0_8 = arith.constant 0 : index
    %6 = vector.load %arg4[%c1, %c0_7, %c0_8] : memref<2x128x384xf32, #tpu.memory_space<vmem>>, vector<1x128x384xf32>
    %7 = vector.shape_cast %6 : vector<1x128x384xf32> to vector<128x384xf32>
    %c0_9 = arith.constant 0 : index
    %c0_10 = arith.constant 0 : index
    %c0_11 = arith.constant 0 : index
    %8 = vector.load %arg5[%c0_9, %c0_10, %c0_11] : memref<2x128x384xf32, #tpu.memory_space<vmem>>, vector<1x128x384xf32>
    %9 = vector.shape_cast %8 : vector<1x128x384xf32> to vector<128x384xf32>
    %c1_12 = arith.constant 1 : index
    %c0_13 = arith.constant 0 : index
    %c0_14 = arith.constant 0 : index
    %10 = vector.load %arg5[%c1_12, %c0_13, %c0_14] : memref<2x128x384xf32, #tpu.memory_space<vmem>>, vector<1x128x384xf32>
    %11 = vector.shape_cast %10 : vector<1x128x384xf32> to vector<128x384xf32>
    %c0_15 = arith.constant 0 : index
    %c0_16 = arith.constant 0 : index
    %c0_17 = arith.constant 0 : index
    %12 = vector.load %arg6[%c0_15, %c0_16, %c0_17] : memref<2x1x384xf32, #tpu.memory_space<vmem>>, vector<1x1x384xf32>
    %13 = vector.shape_cast %12 : vector<1x1x384xf32> to vector<1x384xf32>
    %14 = vector.shape_cast %13 : vector<1x384xf32> to vector<1x384xf32>
    %15 = vector.broadcast %14 : vector<1x384xf32> to vector<16x384xf32>
    %c1_18 = arith.constant 1 : index
    %c0_19 = arith.constant 0 : index
    %c0_20 = arith.constant 0 : index
    %16 = vector.load %arg6[%c1_18, %c0_19, %c0_20] : memref<2x1x384xf32, #tpu.memory_space<vmem>>, vector<1x1x384xf32>
    %17 = vector.shape_cast %16 : vector<1x1x384xf32> to vector<1x384xf32>
    %18 = vector.shape_cast %17 : vector<1x384xf32> to vector<1x384xf32>
    %19 = vector.broadcast %18 : vector<1x384xf32> to vector<16x384xf32>
    %c0_21 = arith.constant 0 : index
    %c0_22 = arith.constant 0 : index
    %c0_23 = arith.constant 0 : index
    %20 = vector.load %arg7[%c0_21, %c0_22, %c0_23] : memref<2x1x384xf32, #tpu.memory_space<vmem>>, vector<1x1x384xf32>
    %21 = vector.shape_cast %20 : vector<1x1x384xf32> to vector<1x384xf32>
    %22 = vector.shape_cast %21 : vector<1x384xf32> to vector<1x384xf32>
    %23 = vector.broadcast %22 : vector<1x384xf32> to vector<16x384xf32>
    %c1_24 = arith.constant 1 : index
    %c0_25 = arith.constant 0 : index
    %c0_26 = arith.constant 0 : index
    %24 = vector.load %arg7[%c1_24, %c0_25, %c0_26] : memref<2x1x384xf32, #tpu.memory_space<vmem>>, vector<1x1x384xf32>
    %25 = vector.shape_cast %24 : vector<1x1x384xf32> to vector<1x384xf32>
    %26 = vector.shape_cast %25 : vector<1x384xf32> to vector<1x384xf32>
    %27 = vector.broadcast %26 : vector<1x384xf32> to vector<16x384xf32>
    %28 = tpu.iota {dimensions = array<i32: 0>} : vector<16x1xi32>
    %c8_i32 = arith.constant 8 : i32
    %c0_i32 = arith.constant 0 : i32
    %29 = arith.cmpi eq, %c8_i32, %c0_i32 : i32
    %c1_i32 = arith.constant 1 : i32
    %30 = arith.select %29, %c1_i32, %c8_i32 : i32
    %31 = vector.broadcast %30 : i32 to vector<16x1xi32>
    %32 = arith.remsi %28, %31 : vector<16x1xi32>
    %c0_i32_27 = arith.constant 0 : i32
    %33 = vector.broadcast %c0_i32_27 : i32 to vector<16x1xi32>
    %34 = arith.cmpi ne, %32, %33 : vector<16x1xi32>
    %c0_i32_28 = arith.constant 0 : i32
    %35 = vector.broadcast %c0_i32_28 : i32 to vector<16x1xi32>
    %36 = arith.cmpi slt, %32, %35 : vector<16x1xi32>
    %c0_i32_29 = arith.constant 0 : i32
    %37 = arith.cmpi slt, %30, %c0_i32_29 : i32
    %38 = vector.broadcast %37 : i1 to vector<16x1xi1>
    %39 = vector.broadcast %38 : vector<16x1xi1> to vector<16x1xi1>
    %40 = arith.xori %36, %39 : vector<16x1xi1>
    %41 = arith.andi %40, %34 : vector<16x1xi1>
    %42 = vector.broadcast %30 : i32 to vector<16x1xi32>
    %43 = arith.addi %32, %42 : vector<16x1xi32>
    %44 = arith.select %41, %43, %32 : vector<16x1xi1>, vector<16x1xi32>
    %c0_30 = arith.constant 0 : index
    %c0_31 = arith.constant 0 : index
    %45 = vector.load %arg3[%c0_30, %c0_31] : memref<16x128xf32, #tpu.memory_space<vmem>>, vector<16x128xf32>
    %c0_i32_32 = arith.constant 0 : i32
    %c2_i32 = arith.constant 2 : i32
    %46 = arith.addi %c0_i32_32, %c2_i32 : i32
    %c1_i32_33 = arith.constant 1 : i32
    %47 = scf.for %arg9 = %c0_i32_32 to %46 step %c1_i32_33 iter_args(%arg10 = %45) -> (vector<16x128xf32>)  : i32 {
      %cst = arith.constant dense<0.000000e+00> : vector<16x384xf32>
      %49 = tpu.matmul %arg10, %5, %cst {dimension_numbers = #tpu.dot_dimension_numbers<[1], [0], [0], [1], [0, 0, 1, 1], [], []>} : vector<16x128xf32>, vector<128x384xf32>, vector<16x384xf32> -> vector<16x384xf32>
      %cst_36 = arith.constant dense<0.000000e+00> : vector<16x384xf32>
      %50 = tpu.matmul %1, %49, %cst_36 {dimension_numbers = #tpu.dot_dimension_numbers<[1], [0], [0], [1], [0, 0, 1, 1], [], []>} : vector<16x16xf32>, vector<16x384xf32>, vector<16x384xf32> -> vector<16x384xf32>
      %51 = arith.addf %50, %15 : vector<16x384xf32>
      %52 = vector.shape_cast %49 : vector<16x384xf32> to vector<2x8x384xf32>
      %53 = vector.shape_cast %51 : vector<16x384xf32> to vector<2x8x384xf32>
      %54 = vector.extract_strided_slice %53 {offsets = [0, 0, 0], sizes = [2, 1, 384], strides = [1, 1, 1]} : vector<2x8x384xf32> to vector<2x1x384xf32>
      %55 = vector.extract_strided_slice %3 {offsets = [0, 0, 0], sizes = [2, 8, 1], strides = [1, 1, 1]} : vector<2x8x8xf32> to vector<2x8x1xf32>
      %56 = vector.broadcast %55 : vector<2x8x1xf32> to vector<2x8x384xf32>
      %57 = arith.mulf %56, %52 : vector<2x8x384xf32>
      %58 = vector.broadcast %54 : vector<2x1x384xf32> to vector<2x8x384xf32>
      %59 = arith.subf %58, %57 : vector<2x8x384xf32>
      %60 = vector.shape_cast %59 : vector<2x8x384xf32> to vector<16x384xf32>
      %c0_i32_37 = arith.constant 0 : i32
      %61 = vector.broadcast %c0_i32_37 : i32 to vector<16x1xi32>
      %62 = arith.cmpi eq, %44, %61 : vector<16x1xi32>
      %cst_38 = arith.constant dense<0.000000e+00> : vector<16x384xf32>
      %63 = tpu.matmul %arg10, %9, %cst_38 {dimension_numbers = #tpu.dot_dimension_numbers<[1], [0], [0], [1], [0, 0, 1, 1], [], []>} : vector<16x128xf32>, vector<128x384xf32>, vector<16x384xf32> -> vector<16x384xf32>
      %64 = arith.addf %63, %23 : vector<16x384xf32>
      %65 = vector.extract_strided_slice %60 {offsets = [0, 0], sizes = [16, 256], strides = [1, 1]} : vector<16x384xf32> to vector<16x256xf32>
      %66 = vector.extract_strided_slice %64 {offsets = [0, 0], sizes = [16, 256], strides = [1, 1]} : vector<16x384xf32> to vector<16x256xf32>
      %67 = arith.addf %65, %66 : vector<16x256xf32>
      %68 = arith.negf %67 : vector<16x256xf32>
      %69 = math.exp %68 : vector<16x256xf32>
      %cst_39 = arith.constant 1.000000e+00 : f32
      %70 = vector.broadcast %cst_39 : f32 to vector<16x256xf32>
      %71 = arith.addf %70, %69 : vector<16x256xf32>
      %72 = arith.divf %70, %71 : vector<16x256xf32>
      %73 = vector.extract_strided_slice %72 {offsets = [0, 0], sizes = [16, 128], strides = [1, 1]} : vector<16x256xf32> to vector<16x128xf32>
      %74 = vector.extract_strided_slice %72 {offsets = [0, 128], sizes = [16, 128], strides = [1, 1]} : vector<16x256xf32> to vector<16x128xf32>
      %75 = vector.extract_strided_slice %60 {offsets = [0, 256], sizes = [16, 128], strides = [1, 1]} : vector<16x384xf32> to vector<16x128xf32>
      %76 = vector.extract_strided_slice %64 {offsets = [0, 256], sizes = [16, 128], strides = [1, 1]} : vector<16x384xf32> to vector<16x128xf32>
      %77 = arith.mulf %73, %76 : vector<16x128xf32>
      %78 = arith.addf %75, %77 : vector<16x128xf32>
      %79 = math.tanh %78 : vector<16x128xf32>
      %cst_40 = arith.constant 1.000000e+00 : f32
      %80 = vector.broadcast %cst_40 : f32 to vector<16x128xf32>
      %81 = arith.subf %80, %74 : vector<16x128xf32>
      %82 = arith.mulf %81, %79 : vector<16x128xf32>
      %83 = arith.mulf %74, %arg10 : vector<16x128xf32>
      %84 = arith.addf %82, %83 : vector<16x128xf32>
      %85 = vector.shape_cast %62 : vector<16x1xi1> to vector<16x1xi1>
      %86 = vector.broadcast %85 : vector<16x1xi1> to vector<16x128xi1>
      %87 = arith.select %86, %arg10, %84 : vector<16x128xi1>, vector<16x128xf32>
      %cst_41 = arith.constant dense<0.000000e+00> : vector<16x384xf32>
      %88 = tpu.matmul %87, %7, %cst_41 {dimension_numbers = #tpu.dot_dimension_numbers<[1], [0], [0], [1], [0, 0, 1, 1], [], []>} : vector<16x128xf32>, vector<128x384xf32>, vector<16x384xf32> -> vector<16x384xf32>
      %89 = arith.addf %88, %19 : vector<16x384xf32>
      %cst_42 = arith.constant dense<0.000000e+00> : vector<16x384xf32>
      %90 = tpu.matmul %arg10, %11, %cst_42 {dimension_numbers = #tpu.dot_dimension_numbers<[1], [0], [0], [1], [0, 0, 1, 1], [], []>} : vector<16x128xf32>, vector<128x384xf32>, vector<16x384xf32> -> vector<16x384xf32>
      %91 = arith.addf %90, %27 : vector<16x384xf32>
      %92 = vector.extract_strided_slice %89 {offsets = [0, 0], sizes = [16, 256], strides = [1, 1]} : vector<16x384xf32> to vector<16x256xf32>
      %93 = vector.extract_strided_slice %91 {offsets = [0, 0], sizes = [16, 256], strides = [1, 1]} : vector<16x384xf32> to vector<16x256xf32>
      %94 = arith.addf %92, %93 : vector<16x256xf32>
      %95 = arith.negf %94 : vector<16x256xf32>
      %96 = math.exp %95 : vector<16x256xf32>
      %cst_43 = arith.constant 1.000000e+00 : f32
      %97 = vector.broadcast %cst_43 : f32 to vector<16x256xf32>
      %98 = arith.addf %97, %96 : vector<16x256xf32>
      %99 = arith.divf %97, %98 : vector<16x256xf32>
      %100 = vector.extract_strided_slice %99 {offsets = [0, 0], sizes = [16, 128], strides = [1, 1]} : vector<16x256xf32> to vector<16x128xf32>
      %101 = vector.extract_strided_slice %99 {offsets = [0, 128], sizes = [16, 128], strides = [1, 1]} : vector<16x256xf32> to vector<16x128xf32>
      %102 = vector.extract_strided_slice %89 {offsets = [0, 256], sizes = [16, 128], strides = [1, 1]} : vector<16x384xf32> to vector<16x128xf32>
      %103 = vector.extract_strided_slice %91 {offsets = [0, 256], sizes = [16, 128], strides = [1, 1]} : vector<16x384xf32> to vector<16x128xf32>
      %104 = arith.mulf %100, %103 : vector<16x128xf32>
      %105 = arith.addf %102, %104 : vector<16x128xf32>
      %106 = math.tanh %105 : vector<16x128xf32>
      %cst_44 = arith.constant 1.000000e+00 : f32
      %107 = vector.broadcast %cst_44 : f32 to vector<16x128xf32>
      %108 = arith.subf %107, %101 : vector<16x128xf32>
      %109 = arith.mulf %108, %106 : vector<16x128xf32>
      %110 = arith.mulf %101, %arg10 : vector<16x128xf32>
      %111 = arith.addf %109, %110 : vector<16x128xf32>
      %112 = vector.shape_cast %62 : vector<16x1xi1> to vector<16x1xi1>
      %113 = vector.broadcast %112 : vector<16x1xi1> to vector<16x128xi1>
      %114 = arith.select %113, %arg10, %111 : vector<16x128xi1>, vector<16x128xf32>
      %115 = vector.extract_strided_slice %53 {offsets = [0, 1, 0], sizes = [2, 1, 384], strides = [1, 1, 1]} : vector<2x8x384xf32> to vector<2x1x384xf32>
      %116 = vector.extract_strided_slice %3 {offsets = [0, 0, 1], sizes = [2, 8, 1], strides = [1, 1, 1]} : vector<2x8x8xf32> to vector<2x8x1xf32>
      %117 = vector.broadcast %116 : vector<2x8x1xf32> to vector<2x8x384xf32>
      %118 = arith.mulf %117, %52 : vector<2x8x384xf32>
      %119 = vector.broadcast %115 : vector<2x1x384xf32> to vector<2x8x384xf32>
      %120 = arith.subf %119, %118 : vector<2x8x384xf32>
      %121 = vector.shape_cast %120 : vector<2x8x384xf32> to vector<16x384xf32>
      %c1_i32_45 = arith.constant 1 : i32
      %122 = vector.broadcast %c1_i32_45 : i32 to vector<16x1xi32>
      %123 = arith.cmpi eq, %44, %122 : vector<16x1xi32>
      %cst_46 = arith.constant dense<0.000000e+00> : vector<16x384xf32>
      %124 = tpu.matmul %87, %9, %cst_46 {dimension_numbers = #tpu.dot_dimension_numbers<[1], [0], [0], [1], [0, 0, 1, 1], [], []>} : vector<16x128xf32>, vector<128x384xf32>, vector<16x384xf32> -> vector<16x384xf32>
      %125 = arith.addf %124, %23 : vector<16x384xf32>
      %126 = vector.extract_strided_slice %121 {offsets = [0, 0], sizes = [16, 256], strides = [1, 1]} : vector<16x384xf32> to vector<16x256xf32>
      %127 = vector.extract_strided_slice %125 {offsets = [0, 0], sizes = [16, 256], strides = [1, 1]} : vector<16x384xf32> to vector<16x256xf32>
      %128 = arith.addf %126, %127 : vector<16x256xf32>
      %129 = arith.negf %128 : vector<16x256xf32>
      %130 = math.exp %129 : vector<16x256xf32>
      %cst_47 = arith.constant 1.000000e+00 : f32
      %131 = vector.broadcast %cst_47 : f32 to vector<16x256xf32>
      %132 = arith.addf %131, %130 : vector<16x256xf32>
      %133 = arith.divf %131, %132 : vector<16x256xf32>
      %134 = vector.extract_strided_slice %133 {offsets = [0, 0], sizes = [16, 128], strides = [1, 1]} : vector<16x256xf32> to vector<16x128xf32>
      %135 = vector.extract_strided_slice %133 {offsets = [0, 128], sizes = [16, 128], strides = [1, 1]} : vector<16x256xf32> to vector<16x128xf32>
      %136 = vector.extract_strided_slice %121 {offsets = [0, 256], sizes = [16, 128], strides = [1, 1]} : vector<16x384xf32> to vector<16x128xf32>
      %137 = vector.extract_strided_slice %125 {offsets = [0, 256], sizes = [16, 128], strides = [1, 1]} : vector<16x384xf32> to vector<16x128xf32>
      %138 = arith.mulf %134, %137 : vector<16x128xf32>
      %139 = arith.addf %136, %138 : vector<16x128xf32>
      %140 = math.tanh %139 : vector<16x128xf32>
      %cst_48 = arith.constant 1.000000e+00 : f32
      %141 = vector.broadcast %cst_48 : f32 to vector<16x128xf32>
      %142 = arith.subf %141, %135 : vector<16x128xf32>
      %143 = arith.mulf %142, %140 : vector<16x128xf32>
      %144 = arith.mulf %135, %87 : vector<16x128xf32>
      %145 = arith.addf %143, %144 : vector<16x128xf32>
      %146 = vector.shape_cast %123 : vector<16x1xi1> to vector<16x1xi1>
      %147 = vector.broadcast %146 : vector<16x1xi1> to vector<16x128xi1>
      %148 = arith.select %147, %87, %145 : vector<16x128xi1>, vector<16x128xf32>
      %cst_49 = arith.constant dense<0.000000e+00> : vector<16x384xf32>
      %149 = tpu.matmul %148, %7, %cst_49 {dimension_numbers = #tpu.dot_dimension_numbers<[1], [0], [0], [1], [0, 0, 1, 1], [], []>} : vector<16x128xf32>, vector<128x384xf32>, vector<16x384xf32> -> vector<16x384xf32>
      %150 = arith.addf %149, %19 : vector<16x384xf32>
      %cst_50 = arith.constant dense<0.000000e+00> : vector<16x384xf32>
      %151 = tpu.matmul %114, %11, %cst_50 {dimension_numbers = #tpu.dot_dimension_numbers<[1], [0], [0], [1], [0, 0, 1, 1], [], []>} : vector<16x128xf32>, vector<128x384xf32>, vector<16x384xf32> -> vector<16x384xf32>
      %152 = arith.addf %151, %27 : vector<16x384xf32>
      %153 = vector.extract_strided_slice %150 {offsets = [0, 0], sizes = [16, 256], strides = [1, 1]} : vector<16x384xf32> to vector<16x256xf32>
      %154 = vector.extract_strided_slice %152 {offsets = [0, 0], sizes = [16, 256], strides = [1, 1]} : vector<16x384xf32> to vector<16x256xf32>
      %155 = arith.addf %153, %154 : vector<16x256xf32>
      %156 = arith.negf %155 : vector<16x256xf32>
      %157 = math.exp %156 : vector<16x256xf32>
      %cst_51 = arith.constant 1.000000e+00 : f32
      %158 = vector.broadcast %cst_51 : f32 to vector<16x256xf32>
      %159 = arith.addf %158, %157 : vector<16x256xf32>
      %160 = arith.divf %158, %159 : vector<16x256xf32>
      %161 = vector.extract_strided_slice %160 {offsets = [0, 0], sizes = [16, 128], strides = [1, 1]} : vector<16x256xf32> to vector<16x128xf32>
      %162 = vector.extract_strided_slice %160 {offsets = [0, 128], sizes = [16, 128], strides = [1, 1]} : vector<16x256xf32> to vector<16x128xf32>
      %163 = vector.extract_strided_slice %150 {offsets = [0, 256], sizes = [16, 128], strides = [1, 1]} : vector<16x384xf32> to vector<16x128xf32>
      %164 = vector.extract_strided_slice %152 {offsets = [0, 256], sizes = [16, 128], strides = [1, 1]} : vector<16x384xf32> to vector<16x128xf32>
      %165 = arith.mulf %161, %164 : vector<16x128xf32>
      %166 = arith.addf %163, %165 : vector<16x128xf32>
      %167 = math.tanh %166 : vector<16x128xf32>
      %cst_52 = arith.constant 1.000000e+00 : f32
      %168 = vector.broadcast %cst_52 : f32 to vector<16x128xf32>
      %169 = arith.subf %168, %162 : vector<16x128xf32>
      %170 = arith.mulf %169, %167 : vector<16x128xf32>
      %171 = arith.mulf %162, %114 : vector<16x128xf32>
      %172 = arith.addf %170, %171 : vector<16x128xf32>
      %173 = vector.shape_cast %123 : vector<16x1xi1> to vector<16x1xi1>
      %174 = vector.broadcast %173 : vector<16x1xi1> to vector<16x128xi1>
      %175 = arith.select %174, %114, %172 : vector<16x128xi1>, vector<16x128xf32>
      %176 = vector.extract_strided_slice %53 {offsets = [0, 2, 0], sizes = [2, 1, 384], strides = [1, 1, 1]} : vector<2x8x384xf32> to vector<2x1x384xf32>
      %177 = vector.extract_strided_slice %3 {offsets = [0, 0, 2], sizes = [2, 8, 1], strides = [1, 1, 1]} : vector<2x8x8xf32> to vector<2x8x1xf32>
      %178 = vector.broadcast %177 : vector<2x8x1xf32> to vector<2x8x384xf32>
      %179 = arith.mulf %178, %52 : vector<2x8x384xf32>
      %180 = vector.broadcast %176 : vector<2x1x384xf32> to vector<2x8x384xf32>
      %181 = arith.subf %180, %179 : vector<2x8x384xf32>
      %182 = vector.shape_cast %181 : vector<2x8x384xf32> to vector<16x384xf32>
      %c2_i32_53 = arith.constant 2 : i32
      %183 = vector.broadcast %c2_i32_53 : i32 to vector<16x1xi32>
      %184 = arith.cmpi eq, %44, %183 : vector<16x1xi32>
      %cst_54 = arith.constant dense<0.000000e+00> : vector<16x384xf32>
      %185 = tpu.matmul %148, %9, %cst_54 {dimension_numbers = #tpu.dot_dimension_numbers<[1], [0], [0], [1], [0, 0, 1, 1], [], []>} : vector<16x128xf32>, vector<128x384xf32>, vector<16x384xf32> -> vector<16x384xf32>
      %186 = arith.addf %185, %23 : vector<16x384xf32>
      %187 = vector.extract_strided_slice %182 {offsets = [0, 0], sizes = [16, 256], strides = [1, 1]} : vector<16x384xf32> to vector<16x256xf32>
      %188 = vector.extract_strided_slice %186 {offsets = [0, 0], sizes = [16, 256], strides = [1, 1]} : vector<16x384xf32> to vector<16x256xf32>
      %189 = arith.addf %187, %188 : vector<16x256xf32>
      %190 = arith.negf %189 : vector<16x256xf32>
      %191 = math.exp %190 : vector<16x256xf32>
      %cst_55 = arith.constant 1.000000e+00 : f32
      %192 = vector.broadcast %cst_55 : f32 to vector<16x256xf32>
      %193 = arith.addf %192, %191 : vector<16x256xf32>
      %194 = arith.divf %192, %193 : vector<16x256xf32>
      %195 = vector.extract_strided_slice %194 {offsets = [0, 0], sizes = [16, 128], strides = [1, 1]} : vector<16x256xf32> to vector<16x128xf32>
      %196 = vector.extract_strided_slice %194 {offsets = [0, 128], sizes = [16, 128], strides = [1, 1]} : vector<16x256xf32> to vector<16x128xf32>
      %197 = vector.extract_strided_slice %182 {offsets = [0, 256], sizes = [16, 128], strides = [1, 1]} : vector<16x384xf32> to vector<16x128xf32>
      %198 = vector.extract_strided_slice %186 {offsets = [0, 256], sizes = [16, 128], strides = [1, 1]} : vector<16x384xf32> to vector<16x128xf32>
      %199 = arith.mulf %195, %198 : vector<16x128xf32>
      %200 = arith.addf %197, %199 : vector<16x128xf32>
      %201 = math.tanh %200 : vector<16x128xf32>
      %cst_56 = arith.constant 1.000000e+00 : f32
      %202 = vector.broadcast %cst_56 : f32 to vector<16x128xf32>
      %203 = arith.subf %202, %196 : vector<16x128xf32>
      %204 = arith.mulf %203, %201 : vector<16x128xf32>
      %205 = arith.mulf %196, %148 : vector<16x128xf32>
      %206 = arith.addf %204, %205 : vector<16x128xf32>
      %207 = vector.shape_cast %184 : vector<16x1xi1> to vector<16x1xi1>
      %208 = vector.broadcast %207 : vector<16x1xi1> to vector<16x128xi1>
      %209 = arith.select %208, %148, %206 : vector<16x128xi1>, vector<16x128xf32>
      %cst_57 = arith.constant dense<0.000000e+00> : vector<16x384xf32>
      %210 = tpu.matmul %209, %7, %cst_57 {dimension_numbers = #tpu.dot_dimension_numbers<[1], [0], [0], [1], [0, 0, 1, 1], [], []>} : vector<16x128xf32>, vector<128x384xf32>, vector<16x384xf32> -> vector<16x384xf32>
      %211 = arith.addf %210, %19 : vector<16x384xf32>
      %cst_58 = arith.constant dense<0.000000e+00> : vector<16x384xf32>
      %212 = tpu.matmul %175, %11, %cst_58 {dimension_numbers = #tpu.dot_dimension_numbers<[1], [0], [0], [1], [0, 0, 1, 1], [], []>} : vector<16x128xf32>, vector<128x384xf32>, vector<16x384xf32> -> vector<16x384xf32>
      %213 = arith.addf %212, %27 : vector<16x384xf32>
      %214 = vector.extract_strided_slice %211 {offsets = [0, 0], sizes = [16, 256], strides = [1, 1]} : vector<16x384xf32> to vector<16x256xf32>
      %215 = vector.extract_strided_slice %213 {offsets = [0, 0], sizes = [16, 256], strides = [1, 1]} : vector<16x384xf32> to vector<16x256xf32>
      %216 = arith.addf %214, %215 : vector<16x256xf32>
      %217 = arith.negf %216 : vector<16x256xf32>
      %218 = math.exp %217 : vector<16x256xf32>
      %cst_59 = arith.constant 1.000000e+00 : f32
      %219 = vector.broadcast %cst_59 : f32 to vector<16x256xf32>
      %220 = arith.addf %219, %218 : vector<16x256xf32>
      %221 = arith.divf %219, %220 : vector<16x256xf32>
      %222 = vector.extract_strided_slice %221 {offsets = [0, 0], sizes = [16, 128], strides = [1, 1]} : vector<16x256xf32> to vector<16x128xf32>
      %223 = vector.extract_strided_slice %221 {offsets = [0, 128], sizes = [16, 128], strides = [1, 1]} : vector<16x256xf32> to vector<16x128xf32>
      %224 = vector.extract_strided_slice %211 {offsets = [0, 256], sizes = [16, 128], strides = [1, 1]} : vector<16x384xf32> to vector<16x128xf32>
      %225 = vector.extract_strided_slice %213 {offsets = [0, 256], sizes = [16, 128], strides = [1, 1]} : vector<16x384xf32> to vector<16x128xf32>
      %226 = arith.mulf %222, %225 : vector<16x128xf32>
      %227 = arith.addf %224, %226 : vector<16x128xf32>
      %228 = math.tanh %227 : vector<16x128xf32>
      %cst_60 = arith.constant 1.000000e+00 : f32
      %229 = vector.broadcast %cst_60 : f32 to vector<16x128xf32>
      %230 = arith.subf %229, %223 : vector<16x128xf32>
      %231 = arith.mulf %230, %228 : vector<16x128xf32>
      %232 = arith.mulf %223, %175 : vector<16x128xf32>
      %233 = arith.addf %231, %232 : vector<16x128xf32>
      %234 = vector.shape_cast %184 : vector<16x1xi1> to vector<16x1xi1>
      %235 = vector.broadcast %234 : vector<16x1xi1> to vector<16x128xi1>
      %236 = arith.select %235, %175, %233 : vector<16x128xi1>, vector<16x128xf32>
      %237 = vector.extract_strided_slice %53 {offsets = [0, 3, 0], sizes = [2, 1, 384], strides = [1, 1, 1]} : vector<2x8x384xf32> to vector<2x1x384xf32>
      %238 = vector.extract_strided_slice %3 {offsets = [0, 0, 3], sizes = [2, 8, 1], strides = [1, 1, 1]} : vector<2x8x8xf32> to vector<2x8x1xf32>
      %239 = vector.broadcast %238 : vector<2x8x1xf32> to vector<2x8x384xf32>
      %240 = arith.mulf %239, %52 : vector<2x8x384xf32>
      %241 = vector.broadcast %237 : vector<2x1x384xf32> to vector<2x8x384xf32>
      %242 = arith.subf %241, %240 : vector<2x8x384xf32>
      %243 = vector.shape_cast %242 : vector<2x8x384xf32> to vector<16x384xf32>
      %c3_i32 = arith.constant 3 : i32
      %244 = vector.broadcast %c3_i32 : i32 to vector<16x1xi32>
      %245 = arith.cmpi eq, %44, %244 : vector<16x1xi32>
      %cst_61 = arith.constant dense<0.000000e+00> : vector<16x384xf32>
      %246 = tpu.matmul %209, %9, %cst_61 {dimension_numbers = #tpu.dot_dimension_numbers<[1], [0], [0], [1], [0, 0, 1, 1], [], []>} : vector<16x128xf32>, vector<128x384xf32>, vector<16x384xf32> -> vector<16x384xf32>
      %247 = arith.addf %246, %23 : vector<16x384xf32>
      %248 = vector.extract_strided_slice %243 {offsets = [0, 0], sizes = [16, 256], strides = [1, 1]} : vector<16x384xf32> to vector<16x256xf32>
      %249 = vector.extract_strided_slice %247 {offsets = [0, 0], sizes = [16, 256], strides = [1, 1]} : vector<16x384xf32> to vector<16x256xf32>
      %250 = arith.addf %248, %249 : vector<16x256xf32>
      %251 = arith.negf %250 : vector<16x256xf32>
      %252 = math.exp %251 : vector<16x256xf32>
      %cst_62 = arith.constant 1.000000e+00 : f32
      %253 = vector.broadcast %cst_62 : f32 to vector<16x256xf32>
      %254 = arith.addf %253, %252 : vector<16x256xf32>
      %255 = arith.divf %253, %254 : vector<16x256xf32>
      %256 = vector.extract_strided_slice %255 {offsets = [0, 0], sizes = [16, 128], strides = [1, 1]} : vector<16x256xf32> to vector<16x128xf32>
      %257 = vector.extract_strided_slice %255 {offsets = [0, 128], sizes = [16, 128], strides = [1, 1]} : vector<16x256xf32> to vector<16x128xf32>
      %258 = vector.extract_strided_slice %243 {offsets = [0, 256], sizes = [16, 128], strides = [1, 1]} : vector<16x384xf32> to vector<16x128xf32>
      %259 = vector.extract_strided_slice %247 {offsets = [0, 256], sizes = [16, 128], strides = [1, 1]} : vector<16x384xf32> to vector<16x128xf32>
      %260 = arith.mulf %256, %259 : vector<16x128xf32>
      %261 = arith.addf %258, %260 : vector<16x128xf32>
      %262 = math.tanh %261 : vector<16x128xf32>
      %cst_63 = arith.constant 1.000000e+00 : f32
      %263 = vector.broadcast %cst_63 : f32 to vector<16x128xf32>
      %264 = arith.subf %263, %257 : vector<16x128xf32>
      %265 = arith.mulf %264, %262 : vector<16x128xf32>
      %266 = arith.mulf %257, %209 : vector<16x128xf32>
      %267 = arith.addf %265, %266 : vector<16x128xf32>
      %268 = vector.shape_cast %245 : vector<16x1xi1> to vector<16x1xi1>
      %269 = vector.broadcast %268 : vector<16x1xi1> to vector<16x128xi1>
      %270 = arith.select %269, %209, %267 : vector<16x128xi1>, vector<16x128xf32>
      %cst_64 = arith.constant dense<0.000000e+00> : vector<16x384xf32>
      %271 = tpu.matmul %270, %7, %cst_64 {dimension_numbers = #tpu.dot_dimension_numbers<[1], [0], [0], [1], [0, 0, 1, 1], [], []>} : vector<16x128xf32>, vector<128x384xf32>, vector<16x384xf32> -> vector<16x384xf32>
      %272 = arith.addf %271, %19 : vector<16x384xf32>
      %cst_65 = arith.constant dense<0.000000e+00> : vector<16x384xf32>
      %273 = tpu.matmul %236, %11, %cst_65 {dimension_numbers = #tpu.dot_dimension_numbers<[1], [0], [0], [1], [0, 0, 1, 1], [], []>} : vector<16x128xf32>, vector<128x384xf32>, vector<16x384xf32> -> vector<16x384xf32>
      %274 = arith.addf %273, %27 : vector<16x384xf32>
      %275 = vector.extract_strided_slice %272 {offsets = [0, 0], sizes = [16, 256], strides = [1, 1]} : vector<16x384xf32> to vector<16x256xf32>
      %276 = vector.extract_strided_slice %274 {offsets = [0, 0], sizes = [16, 256], strides = [1, 1]} : vector<16x384xf32> to vector<16x256xf32>
      %277 = arith.addf %275, %276 : vector<16x256xf32>
      %278 = arith.negf %277 : vector<16x256xf32>
      %279 = math.exp %278 : vector<16x256xf32>
      %cst_66 = arith.constant 1.000000e+00 : f32
      %280 = vector.broadcast %cst_66 : f32 to vector<16x256xf32>
      %281 = arith.addf %280, %279 : vector<16x256xf32>
      %282 = arith.divf %280, %281 : vector<16x256xf32>
      %283 = vector.extract_strided_slice %282 {offsets = [0, 0], sizes = [16, 128], strides = [1, 1]} : vector<16x256xf32> to vector<16x128xf32>
      %284 = vector.extract_strided_slice %282 {offsets = [0, 128], sizes = [16, 128], strides = [1, 1]} : vector<16x256xf32> to vector<16x128xf32>
      %285 = vector.extract_strided_slice %272 {offsets = [0, 256], sizes = [16, 128], strides = [1, 1]} : vector<16x384xf32> to vector<16x128xf32>
      %286 = vector.extract_strided_slice %274 {offsets = [0, 256], sizes = [16, 128], strides = [1, 1]} : vector<16x384xf32> to vector<16x128xf32>
      %287 = arith.mulf %283, %286 : vector<16x128xf32>
      %288 = arith.addf %285, %287 : vector<16x128xf32>
      %289 = math.tanh %288 : vector<16x128xf32>
      %cst_67 = arith.constant 1.000000e+00 : f32
      %290 = vector.broadcast %cst_67 : f32 to vector<16x128xf32>
      %291 = arith.subf %290, %284 : vector<16x128xf32>
      %292 = arith.mulf %291, %289 : vector<16x128xf32>
      %293 = arith.mulf %284, %236 : vector<16x128xf32>
      %294 = arith.addf %292, %293 : vector<16x128xf32>
      %295 = vector.shape_cast %245 : vector<16x1xi1> to vector<16x1xi1>
      %296 = vector.broadcast %295 : vector<16x1xi1> to vector<16x128xi1>
      %297 = arith.select %296, %236, %294 : vector<16x128xi1>, vector<16x128xf32>
      %298 = vector.extract_strided_slice %53 {offsets = [0, 4, 0], sizes = [2, 1, 384], strides = [1, 1, 1]} : vector<2x8x384xf32> to vector<2x1x384xf32>
      %299 = vector.extract_strided_slice %3 {offsets = [0, 0, 4], sizes = [2, 8, 1], strides = [1, 1, 1]} : vector<2x8x8xf32> to vector<2x8x1xf32>
      %300 = vector.broadcast %299 : vector<2x8x1xf32> to vector<2x8x384xf32>
      %301 = arith.mulf %300, %52 : vector<2x8x384xf32>
      %302 = vector.broadcast %298 : vector<2x1x384xf32> to vector<2x8x384xf32>
      %303 = arith.subf %302, %301 : vector<2x8x384xf32>
      %304 = vector.shape_cast %303 : vector<2x8x384xf32> to vector<16x384xf32>
      %c4_i32 = arith.constant 4 : i32
      %305 = vector.broadcast %c4_i32 : i32 to vector<16x1xi32>
      %306 = arith.cmpi eq, %44, %305 : vector<16x1xi32>
      %cst_68 = arith.constant dense<0.000000e+00> : vector<16x384xf32>
      %307 = tpu.matmul %270, %9, %cst_68 {dimension_numbers = #tpu.dot_dimension_numbers<[1], [0], [0], [1], [0, 0, 1, 1], [], []>} : vector<16x128xf32>, vector<128x384xf32>, vector<16x384xf32> -> vector<16x384xf32>
      %308 = arith.addf %307, %23 : vector<16x384xf32>
      %309 = vector.extract_strided_slice %304 {offsets = [0, 0], sizes = [16, 256], strides = [1, 1]} : vector<16x384xf32> to vector<16x256xf32>
      %310 = vector.extract_strided_slice %308 {offsets = [0, 0], sizes = [16, 256], strides = [1, 1]} : vector<16x384xf32> to vector<16x256xf32>
      %311 = arith.addf %309, %310 : vector<16x256xf32>
      %312 = arith.negf %311 : vector<16x256xf32>
      %313 = math.exp %312 : vector<16x256xf32>
      %cst_69 = arith.constant 1.000000e+00 : f32
      %314 = vector.broadcast %cst_69 : f32 to vector<16x256xf32>
      %315 = arith.addf %314, %313 : vector<16x256xf32>
      %316 = arith.divf %314, %315 : vector<16x256xf32>
      %317 = vector.extract_strided_slice %316 {offsets = [0, 0], sizes = [16, 128], strides = [1, 1]} : vector<16x256xf32> to vector<16x128xf32>
      %318 = vector.extract_strided_slice %316 {offsets = [0, 128], sizes = [16, 128], strides = [1, 1]} : vector<16x256xf32> to vector<16x128xf32>
      %319 = vector.extract_strided_slice %304 {offsets = [0, 256], sizes = [16, 128], strides = [1, 1]} : vector<16x384xf32> to vector<16x128xf32>
      %320 = vector.extract_strided_slice %308 {offsets = [0, 256], sizes = [16, 128], strides = [1, 1]} : vector<16x384xf32> to vector<16x128xf32>
      %321 = arith.mulf %317, %320 : vector<16x128xf32>
      %322 = arith.addf %319, %321 : vector<16x128xf32>
      %323 = math.tanh %322 : vector<16x128xf32>
      %cst_70 = arith.constant 1.000000e+00 : f32
      %324 = vector.broadcast %cst_70 : f32 to vector<16x128xf32>
      %325 = arith.subf %324, %318 : vector<16x128xf32>
      %326 = arith.mulf %325, %323 : vector<16x128xf32>
      %327 = arith.mulf %318, %270 : vector<16x128xf32>
      %328 = arith.addf %326, %327 : vector<16x128xf32>
      %329 = vector.shape_cast %306 : vector<16x1xi1> to vector<16x1xi1>
      %330 = vector.broadcast %329 : vector<16x1xi1> to vector<16x128xi1>
      %331 = arith.select %330, %270, %328 : vector<16x128xi1>, vector<16x128xf32>
      %cst_71 = arith.constant dense<0.000000e+00> : vector<16x384xf32>
      %332 = tpu.matmul %331, %7, %cst_71 {dimension_numbers = #tpu.dot_dimension_numbers<[1], [0], [0], [1], [0, 0, 1, 1], [], []>} : vector<16x128xf32>, vector<128x384xf32>, vector<16x384xf32> -> vector<16x384xf32>
      %333 = arith.addf %332, %19 : vector<16x384xf32>
      %cst_72 = arith.constant dense<0.000000e+00> : vector<16x384xf32>
      %334 = tpu.matmul %297, %11, %cst_72 {dimension_numbers = #tpu.dot_dimension_numbers<[1], [0], [0], [1], [0, 0, 1, 1], [], []>} : vector<16x128xf32>, vector<128x384xf32>, vector<16x384xf32> -> vector<16x384xf32>
      %335 = arith.addf %334, %27 : vector<16x384xf32>
      %336 = vector.extract_strided_slice %333 {offsets = [0, 0], sizes = [16, 256], strides = [1, 1]} : vector<16x384xf32> to vector<16x256xf32>
      %337 = vector.extract_strided_slice %335 {offsets = [0, 0], sizes = [16, 256], strides = [1, 1]} : vector<16x384xf32> to vector<16x256xf32>
      %338 = arith.addf %336, %337 : vector<16x256xf32>
      %339 = arith.negf %338 : vector<16x256xf32>
      %340 = math.exp %339 : vector<16x256xf32>
      %cst_73 = arith.constant 1.000000e+00 : f32
      %341 = vector.broadcast %cst_73 : f32 to vector<16x256xf32>
      %342 = arith.addf %341, %340 : vector<16x256xf32>
      %343 = arith.divf %341, %342 : vector<16x256xf32>
      %344 = vector.extract_strided_slice %343 {offsets = [0, 0], sizes = [16, 128], strides = [1, 1]} : vector<16x256xf32> to vector<16x128xf32>
      %345 = vector.extract_strided_slice %343 {offsets = [0, 128], sizes = [16, 128], strides = [1, 1]} : vector<16x256xf32> to vector<16x128xf32>
      %346 = vector.extract_strided_slice %333 {offsets = [0, 256], sizes = [16, 128], strides = [1, 1]} : vector<16x384xf32> to vector<16x128xf32>
      %347 = vector.extract_strided_slice %335 {offsets = [0, 256], sizes = [16, 128], strides = [1, 1]} : vector<16x384xf32> to vector<16x128xf32>
      %348 = arith.mulf %344, %347 : vector<16x128xf32>
      %349 = arith.addf %346, %348 : vector<16x128xf32>
      %350 = math.tanh %349 : vector<16x128xf32>
      %cst_74 = arith.constant 1.000000e+00 : f32
      %351 = vector.broadcast %cst_74 : f32 to vector<16x128xf32>
      %352 = arith.subf %351, %345 : vector<16x128xf32>
      %353 = arith.mulf %352, %350 : vector<16x128xf32>
      %354 = arith.mulf %345, %297 : vector<16x128xf32>
      %355 = arith.addf %353, %354 : vector<16x128xf32>
      %356 = vector.shape_cast %306 : vector<16x1xi1> to vector<16x1xi1>
      %357 = vector.broadcast %356 : vector<16x1xi1> to vector<16x128xi1>
      %358 = arith.select %357, %297, %355 : vector<16x128xi1>, vector<16x128xf32>
      %359 = vector.extract_strided_slice %53 {offsets = [0, 5, 0], sizes = [2, 1, 384], strides = [1, 1, 1]} : vector<2x8x384xf32> to vector<2x1x384xf32>
      %360 = vector.extract_strided_slice %3 {offsets = [0, 0, 5], sizes = [2, 8, 1], strides = [1, 1, 1]} : vector<2x8x8xf32> to vector<2x8x1xf32>
      %361 = vector.broadcast %360 : vector<2x8x1xf32> to vector<2x8x384xf32>
      %362 = arith.mulf %361, %52 : vector<2x8x384xf32>
      %363 = vector.broadcast %359 : vector<2x1x384xf32> to vector<2x8x384xf32>
      %364 = arith.subf %363, %362 : vector<2x8x384xf32>
      %365 = vector.shape_cast %364 : vector<2x8x384xf32> to vector<16x384xf32>
      %c5_i32 = arith.constant 5 : i32
      %366 = vector.broadcast %c5_i32 : i32 to vector<16x1xi32>
      %367 = arith.cmpi eq, %44, %366 : vector<16x1xi32>
      %cst_75 = arith.constant dense<0.000000e+00> : vector<16x384xf32>
      %368 = tpu.matmul %331, %9, %cst_75 {dimension_numbers = #tpu.dot_dimension_numbers<[1], [0], [0], [1], [0, 0, 1, 1], [], []>} : vector<16x128xf32>, vector<128x384xf32>, vector<16x384xf32> -> vector<16x384xf32>
      %369 = arith.addf %368, %23 : vector<16x384xf32>
      %370 = vector.extract_strided_slice %365 {offsets = [0, 0], sizes = [16, 256], strides = [1, 1]} : vector<16x384xf32> to vector<16x256xf32>
      %371 = vector.extract_strided_slice %369 {offsets = [0, 0], sizes = [16, 256], strides = [1, 1]} : vector<16x384xf32> to vector<16x256xf32>
      %372 = arith.addf %370, %371 : vector<16x256xf32>
      %373 = arith.negf %372 : vector<16x256xf32>
      %374 = math.exp %373 : vector<16x256xf32>
      %cst_76 = arith.constant 1.000000e+00 : f32
      %375 = vector.broadcast %cst_76 : f32 to vector<16x256xf32>
      %376 = arith.addf %375, %374 : vector<16x256xf32>
      %377 = arith.divf %375, %376 : vector<16x256xf32>
      %378 = vector.extract_strided_slice %377 {offsets = [0, 0], sizes = [16, 128], strides = [1, 1]} : vector<16x256xf32> to vector<16x128xf32>
      %379 = vector.extract_strided_slice %377 {offsets = [0, 128], sizes = [16, 128], strides = [1, 1]} : vector<16x256xf32> to vector<16x128xf32>
      %380 = vector.extract_strided_slice %365 {offsets = [0, 256], sizes = [16, 128], strides = [1, 1]} : vector<16x384xf32> to vector<16x128xf32>
      %381 = vector.extract_strided_slice %369 {offsets = [0, 256], sizes = [16, 128], strides = [1, 1]} : vector<16x384xf32> to vector<16x128xf32>
      %382 = arith.mulf %378, %381 : vector<16x128xf32>
      %383 = arith.addf %380, %382 : vector<16x128xf32>
      %384 = math.tanh %383 : vector<16x128xf32>
      %cst_77 = arith.constant 1.000000e+00 : f32
      %385 = vector.broadcast %cst_77 : f32 to vector<16x128xf32>
      %386 = arith.subf %385, %379 : vector<16x128xf32>
      %387 = arith.mulf %386, %384 : vector<16x128xf32>
      %388 = arith.mulf %379, %331 : vector<16x128xf32>
      %389 = arith.addf %387, %388 : vector<16x128xf32>
      %390 = vector.shape_cast %367 : vector<16x1xi1> to vector<16x1xi1>
      %391 = vector.broadcast %390 : vector<16x1xi1> to vector<16x128xi1>
      %392 = arith.select %391, %331, %389 : vector<16x128xi1>, vector<16x128xf32>
      %cst_78 = arith.constant dense<0.000000e+00> : vector<16x384xf32>
      %393 = tpu.matmul %392, %7, %cst_78 {dimension_numbers = #tpu.dot_dimension_numbers<[1], [0], [0], [1], [0, 0, 1, 1], [], []>} : vector<16x128xf32>, vector<128x384xf32>, vector<16x384xf32> -> vector<16x384xf32>
      %394 = arith.addf %393, %19 : vector<16x384xf32>
      %cst_79 = arith.constant dense<0.000000e+00> : vector<16x384xf32>
      %395 = tpu.matmul %358, %11, %cst_79 {dimension_numbers = #tpu.dot_dimension_numbers<[1], [0], [0], [1], [0, 0, 1, 1], [], []>} : vector<16x128xf32>, vector<128x384xf32>, vector<16x384xf32> -> vector<16x384xf32>
      %396 = arith.addf %395, %27 : vector<16x384xf32>
      %397 = vector.extract_strided_slice %394 {offsets = [0, 0], sizes = [16, 256], strides = [1, 1]} : vector<16x384xf32> to vector<16x256xf32>
      %398 = vector.extract_strided_slice %396 {offsets = [0, 0], sizes = [16, 256], strides = [1, 1]} : vector<16x384xf32> to vector<16x256xf32>
      %399 = arith.addf %397, %398 : vector<16x256xf32>
      %400 = arith.negf %399 : vector<16x256xf32>
      %401 = math.exp %400 : vector<16x256xf32>
      %cst_80 = arith.constant 1.000000e+00 : f32
      %402 = vector.broadcast %cst_80 : f32 to vector<16x256xf32>
      %403 = arith.addf %402, %401 : vector<16x256xf32>
      %404 = arith.divf %402, %403 : vector<16x256xf32>
      %405 = vector.extract_strided_slice %404 {offsets = [0, 0], sizes = [16, 128], strides = [1, 1]} : vector<16x256xf32> to vector<16x128xf32>
      %406 = vector.extract_strided_slice %404 {offsets = [0, 128], sizes = [16, 128], strides = [1, 1]} : vector<16x256xf32> to vector<16x128xf32>
      %407 = vector.extract_strided_slice %394 {offsets = [0, 256], sizes = [16, 128], strides = [1, 1]} : vector<16x384xf32> to vector<16x128xf32>
      %408 = vector.extract_strided_slice %396 {offsets = [0, 256], sizes = [16, 128], strides = [1, 1]} : vector<16x384xf32> to vector<16x128xf32>
      %409 = arith.mulf %405, %408 : vector<16x128xf32>
      %410 = arith.addf %407, %409 : vector<16x128xf32>
      %411 = math.tanh %410 : vector<16x128xf32>
      %cst_81 = arith.constant 1.000000e+00 : f32
      %412 = vector.broadcast %cst_81 : f32 to vector<16x128xf32>
      %413 = arith.subf %412, %406 : vector<16x128xf32>
      %414 = arith.mulf %413, %411 : vector<16x128xf32>
      %415 = arith.mulf %406, %358 : vector<16x128xf32>
      %416 = arith.addf %414, %415 : vector<16x128xf32>
      %417 = vector.shape_cast %367 : vector<16x1xi1> to vector<16x1xi1>
      %418 = vector.broadcast %417 : vector<16x1xi1> to vector<16x128xi1>
      %419 = arith.select %418, %358, %416 : vector<16x128xi1>, vector<16x128xf32>
      %420 = vector.extract_strided_slice %53 {offsets = [0, 6, 0], sizes = [2, 1, 384], strides = [1, 1, 1]} : vector<2x8x384xf32> to vector<2x1x384xf32>
      %421 = vector.extract_strided_slice %3 {offsets = [0, 0, 6], sizes = [2, 8, 1], strides = [1, 1, 1]} : vector<2x8x8xf32> to vector<2x8x1xf32>
      %422 = vector.broadcast %421 : vector<2x8x1xf32> to vector<2x8x384xf32>
      %423 = arith.mulf %422, %52 : vector<2x8x384xf32>
      %424 = vector.broadcast %420 : vector<2x1x384xf32> to vector<2x8x384xf32>
      %425 = arith.subf %424, %423 : vector<2x8x384xf32>
      %426 = vector.shape_cast %425 : vector<2x8x384xf32> to vector<16x384xf32>
      %c6_i32 = arith.constant 6 : i32
      %427 = vector.broadcast %c6_i32 : i32 to vector<16x1xi32>
      %428 = arith.cmpi eq, %44, %427 : vector<16x1xi32>
      %cst_82 = arith.constant dense<0.000000e+00> : vector<16x384xf32>
      %429 = tpu.matmul %392, %9, %cst_82 {dimension_numbers = #tpu.dot_dimension_numbers<[1], [0], [0], [1], [0, 0, 1, 1], [], []>} : vector<16x128xf32>, vector<128x384xf32>, vector<16x384xf32> -> vector<16x384xf32>
      %430 = arith.addf %429, %23 : vector<16x384xf32>
      %431 = vector.extract_strided_slice %426 {offsets = [0, 0], sizes = [16, 256], strides = [1, 1]} : vector<16x384xf32> to vector<16x256xf32>
      %432 = vector.extract_strided_slice %430 {offsets = [0, 0], sizes = [16, 256], strides = [1, 1]} : vector<16x384xf32> to vector<16x256xf32>
      %433 = arith.addf %431, %432 : vector<16x256xf32>
      %434 = arith.negf %433 : vector<16x256xf32>
      %435 = math.exp %434 : vector<16x256xf32>
      %cst_83 = arith.constant 1.000000e+00 : f32
      %436 = vector.broadcast %cst_83 : f32 to vector<16x256xf32>
      %437 = arith.addf %436, %435 : vector<16x256xf32>
      %438 = arith.divf %436, %437 : vector<16x256xf32>
      %439 = vector.extract_strided_slice %438 {offsets = [0, 0], sizes = [16, 128], strides = [1, 1]} : vector<16x256xf32> to vector<16x128xf32>
      %440 = vector.extract_strided_slice %438 {offsets = [0, 128], sizes = [16, 128], strides = [1, 1]} : vector<16x256xf32> to vector<16x128xf32>
      %441 = vector.extract_strided_slice %426 {offsets = [0, 256], sizes = [16, 128], strides = [1, 1]} : vector<16x384xf32> to vector<16x128xf32>
      %442 = vector.extract_strided_slice %430 {offsets = [0, 256], sizes = [16, 128], strides = [1, 1]} : vector<16x384xf32> to vector<16x128xf32>
      %443 = arith.mulf %439, %442 : vector<16x128xf32>
      %444 = arith.addf %441, %443 : vector<16x128xf32>
      %445 = math.tanh %444 : vector<16x128xf32>
      %cst_84 = arith.constant 1.000000e+00 : f32
      %446 = vector.broadcast %cst_84 : f32 to vector<16x128xf32>
      %447 = arith.subf %446, %440 : vector<16x128xf32>
      %448 = arith.mulf %447, %445 : vector<16x128xf32>
      %449 = arith.mulf %440, %392 : vector<16x128xf32>
      %450 = arith.addf %448, %449 : vector<16x128xf32>
      %451 = vector.shape_cast %428 : vector<16x1xi1> to vector<16x1xi1>
      %452 = vector.broadcast %451 : vector<16x1xi1> to vector<16x128xi1>
      %453 = arith.select %452, %392, %450 : vector<16x128xi1>, vector<16x128xf32>
      %cst_85 = arith.constant dense<0.000000e+00> : vector<16x384xf32>
      %454 = tpu.matmul %453, %7, %cst_85 {dimension_numbers = #tpu.dot_dimension_numbers<[1], [0], [0], [1], [0, 0, 1, 1], [], []>} : vector<16x128xf32>, vector<128x384xf32>, vector<16x384xf32> -> vector<16x384xf32>
      %455 = arith.addf %454, %19 : vector<16x384xf32>
      %cst_86 = arith.constant dense<0.000000e+00> : vector<16x384xf32>
      %456 = tpu.matmul %419, %11, %cst_86 {dimension_numbers = #tpu.dot_dimension_numbers<[1], [0], [0], [1], [0, 0, 1, 1], [], []>} : vector<16x128xf32>, vector<128x384xf32>, vector<16x384xf32> -> vector<16x384xf32>
      %457 = arith.addf %456, %27 : vector<16x384xf32>
      %458 = vector.extract_strided_slice %455 {offsets = [0, 0], sizes = [16, 256], strides = [1, 1]} : vector<16x384xf32> to vector<16x256xf32>
      %459 = vector.extract_strided_slice %457 {offsets = [0, 0], sizes = [16, 256], strides = [1, 1]} : vector<16x384xf32> to vector<16x256xf32>
      %460 = arith.addf %458, %459 : vector<16x256xf32>
      %461 = arith.negf %460 : vector<16x256xf32>
      %462 = math.exp %461 : vector<16x256xf32>
      %cst_87 = arith.constant 1.000000e+00 : f32
      %463 = vector.broadcast %cst_87 : f32 to vector<16x256xf32>
      %464 = arith.addf %463, %462 : vector<16x256xf32>
      %465 = arith.divf %463, %464 : vector<16x256xf32>
      %466 = vector.extract_strided_slice %465 {offsets = [0, 0], sizes = [16, 128], strides = [1, 1]} : vector<16x256xf32> to vector<16x128xf32>
      %467 = vector.extract_strided_slice %465 {offsets = [0, 128], sizes = [16, 128], strides = [1, 1]} : vector<16x256xf32> to vector<16x128xf32>
      %468 = vector.extract_strided_slice %455 {offsets = [0, 256], sizes = [16, 128], strides = [1, 1]} : vector<16x384xf32> to vector<16x128xf32>
      %469 = vector.extract_strided_slice %457 {offsets = [0, 256], sizes = [16, 128], strides = [1, 1]} : vector<16x384xf32> to vector<16x128xf32>
      %470 = arith.mulf %466, %469 : vector<16x128xf32>
      %471 = arith.addf %468, %470 : vector<16x128xf32>
      %472 = math.tanh %471 : vector<16x128xf32>
      %cst_88 = arith.constant 1.000000e+00 : f32
      %473 = vector.broadcast %cst_88 : f32 to vector<16x128xf32>
      %474 = arith.subf %473, %467 : vector<16x128xf32>
      %475 = arith.mulf %474, %472 : vector<16x128xf32>
      %476 = arith.mulf %467, %419 : vector<16x128xf32>
      %477 = arith.addf %475, %476 : vector<16x128xf32>
      %478 = vector.shape_cast %428 : vector<16x1xi1> to vector<16x1xi1>
      %479 = vector.broadcast %478 : vector<16x1xi1> to vector<16x128xi1>
      %480 = arith.select %479, %419, %477 : vector<16x128xi1>, vector<16x128xf32>
      %481 = vector.extract_strided_slice %53 {offsets = [0, 7, 0], sizes = [2, 1, 384], strides = [1, 1, 1]} : vector<2x8x384xf32> to vector<2x1x384xf32>
      %482 = vector.extract_strided_slice %3 {offsets = [0, 0, 7], sizes = [2, 8, 1], strides = [1, 1, 1]} : vector<2x8x8xf32> to vector<2x8x1xf32>
      %483 = vector.broadcast %482 : vector<2x8x1xf32> to vector<2x8x384xf32>
      %484 = arith.mulf %483, %52 : vector<2x8x384xf32>
      %485 = vector.broadcast %481 : vector<2x1x384xf32> to vector<2x8x384xf32>
      %486 = arith.subf %485, %484 : vector<2x8x384xf32>
      %487 = vector.shape_cast %486 : vector<2x8x384xf32> to vector<16x384xf32>
      %c7_i32 = arith.constant 7 : i32
      %488 = vector.broadcast %c7_i32 : i32 to vector<16x1xi32>
      %489 = arith.cmpi eq, %44, %488 : vector<16x1xi32>
      %cst_89 = arith.constant dense<0.000000e+00> : vector<16x384xf32>
      %490 = tpu.matmul %453, %9, %cst_89 {dimension_numbers = #tpu.dot_dimension_numbers<[1], [0], [0], [1], [0, 0, 1, 1], [], []>} : vector<16x128xf32>, vector<128x384xf32>, vector<16x384xf32> -> vector<16x384xf32>
      %491 = arith.addf %490, %23 : vector<16x384xf32>
      %492 = vector.extract_strided_slice %487 {offsets = [0, 0], sizes = [16, 256], strides = [1, 1]} : vector<16x384xf32> to vector<16x256xf32>
      %493 = vector.extract_strided_slice %491 {offsets = [0, 0], sizes = [16, 256], strides = [1, 1]} : vector<16x384xf32> to vector<16x256xf32>
      %494 = arith.addf %492, %493 : vector<16x256xf32>
      %495 = arith.negf %494 : vector<16x256xf32>
      %496 = math.exp %495 : vector<16x256xf32>
      %cst_90 = arith.constant 1.000000e+00 : f32
      %497 = vector.broadcast %cst_90 : f32 to vector<16x256xf32>
      %498 = arith.addf %497, %496 : vector<16x256xf32>
      %499 = arith.divf %497, %498 : vector<16x256xf32>
      %500 = vector.extract_strided_slice %499 {offsets = [0, 0], sizes = [16, 128], strides = [1, 1]} : vector<16x256xf32> to vector<16x128xf32>
      %501 = vector.extract_strided_slice %499 {offsets = [0, 128], sizes = [16, 128], strides = [1, 1]} : vector<16x256xf32> to vector<16x128xf32>
      %502 = vector.extract_strided_slice %487 {offsets = [0, 256], sizes = [16, 128], strides = [1, 1]} : vector<16x384xf32> to vector<16x128xf32>
      %503 = vector.extract_strided_slice %491 {offsets = [0, 256], sizes = [16, 128], strides = [1, 1]} : vector<16x384xf32> to vector<16x128xf32>
      %504 = arith.mulf %500, %503 : vector<16x128xf32>
      %505 = arith.addf %502, %504 : vector<16x128xf32>
      %506 = math.tanh %505 : vector<16x128xf32>
      %cst_91 = arith.constant 1.000000e+00 : f32
      %507 = vector.broadcast %cst_91 : f32 to vector<16x128xf32>
      %508 = arith.subf %507, %501 : vector<16x128xf32>
      %509 = arith.mulf %508, %506 : vector<16x128xf32>
      %510 = arith.mulf %501, %453 : vector<16x128xf32>
      %511 = arith.addf %509, %510 : vector<16x128xf32>
      %512 = vector.shape_cast %489 : vector<16x1xi1> to vector<16x1xi1>
      %513 = vector.broadcast %512 : vector<16x1xi1> to vector<16x128xi1>
      %514 = arith.select %513, %453, %511 : vector<16x128xi1>, vector<16x128xf32>
      %cst_92 = arith.constant dense<0.000000e+00> : vector<16x384xf32>
      %515 = tpu.matmul %514, %7, %cst_92 {dimension_numbers = #tpu.dot_dimension_numbers<[1], [0], [0], [1], [0, 0, 1, 1], [], []>} : vector<16x128xf32>, vector<128x384xf32>, vector<16x384xf32> -> vector<16x384xf32>
      %516 = arith.addf %515, %19 : vector<16x384xf32>
      %cst_93 = arith.constant dense<0.000000e+00> : vector<16x384xf32>
      %517 = tpu.matmul %480, %11, %cst_93 {dimension_numbers = #tpu.dot_dimension_numbers<[1], [0], [0], [1], [0, 0, 1, 1], [], []>} : vector<16x128xf32>, vector<128x384xf32>, vector<16x384xf32> -> vector<16x384xf32>
      %518 = arith.addf %517, %27 : vector<16x384xf32>
      %519 = vector.extract_strided_slice %516 {offsets = [0, 0], sizes = [16, 256], strides = [1, 1]} : vector<16x384xf32> to vector<16x256xf32>
      %520 = vector.extract_strided_slice %518 {offsets = [0, 0], sizes = [16, 256], strides = [1, 1]} : vector<16x384xf32> to vector<16x256xf32>
      %521 = arith.addf %519, %520 : vector<16x256xf32>
      %522 = arith.negf %521 : vector<16x256xf32>
      %523 = math.exp %522 : vector<16x256xf32>
      %cst_94 = arith.constant 1.000000e+00 : f32
      %524 = vector.broadcast %cst_94 : f32 to vector<16x256xf32>
      %525 = arith.addf %524, %523 : vector<16x256xf32>
      %526 = arith.divf %524, %525 : vector<16x256xf32>
      %527 = vector.extract_strided_slice %526 {offsets = [0, 0], sizes = [16, 128], strides = [1, 1]} : vector<16x256xf32> to vector<16x128xf32>
      %528 = vector.extract_strided_slice %526 {offsets = [0, 128], sizes = [16, 128], strides = [1, 1]} : vector<16x256xf32> to vector<16x128xf32>
      %529 = vector.extract_strided_slice %516 {offsets = [0, 256], sizes = [16, 128], strides = [1, 1]} : vector<16x384xf32> to vector<16x128xf32>
      %530 = vector.extract_strided_slice %518 {offsets = [0, 256], sizes = [16, 128], strides = [1, 1]} : vector<16x384xf32> to vector<16x128xf32>
      %531 = arith.mulf %527, %530 : vector<16x128xf32>
      %532 = arith.addf %529, %531 : vector<16x128xf32>
      %533 = math.tanh %532 : vector<16x128xf32>
      %cst_95 = arith.constant 1.000000e+00 : f32
      %534 = vector.broadcast %cst_95 : f32 to vector<16x128xf32>
      %535 = arith.subf %534, %528 : vector<16x128xf32>
      %536 = arith.mulf %535, %533 : vector<16x128xf32>
      %537 = arith.mulf %528, %480 : vector<16x128xf32>
      %538 = arith.addf %536, %537 : vector<16x128xf32>
      %539 = vector.shape_cast %489 : vector<16x1xi1> to vector<16x1xi1>
      %540 = vector.broadcast %539 : vector<16x1xi1> to vector<16x128xi1>
      %541 = arith.select %540, %480, %538 : vector<16x128xi1>, vector<16x128xf32>
      scf.yield %541 : vector<16x128xf32>
    }
    %c0_34 = arith.constant 0 : index
    %c0_35 = arith.constant 0 : index
    %48 = vector.load %arg8[%c0_34, %c0_35] : memref<16x128xf32, #tpu.memory_space<vmem>>, vector<16x128xf32>
    tpu.vector_store %arg8[%c0_34, %c0_35], %47 {strides = array<i32>} : memref<16x128xf32, #tpu.memory_space<vmem>>, vector<16x128xf32>,
    return
  }
  func.func @transform_0(%arg0: i32) -> (i32, i32, i32) {
    %c0_i32 = arith.constant 0 : i32
    %c0_i32_0 = arith.constant 0 : i32
    %c0_i32_1 = arith.constant 0 : i32
    return %arg0, %c0_i32, %c0_i32_0 : i32, i32, i32
  }
  func.func @transform_1(%arg0: i32) -> (i32, i32) {
    %c0_i32 = arith.constant 0 : i32
    %c0_i32_0 = arith.constant 0 : i32
    return %arg0, %c0_i32 : i32, i32
  }
  func.func @transform_2(%arg0: i32) -> (i32, i32) {
    %c0_i32 = arith.constant 0 : i32
    %c0_i32_0 = arith.constant 0 : i32
    return %arg0, %c0_i32 : i32, i32
  }
  func.func @transform_3(%arg0: i32) -> (i32, i32, i32) {
    %c0_i32 = arith.constant 0 : i32
    %c0_i32_0 = arith.constant 0 : i32
    %c0_i32_1 = arith.constant 0 : i32
    %c0_i32_2 = arith.constant 0 : i32
    return %c0_i32, %c0_i32_0, %c0_i32_1 : i32, i32, i32
  }
  func.func @transform_4(%arg0: i32) -> (i32, i32, i32) {
    %c0_i32 = arith.constant 0 : i32
    %c0_i32_0 = arith.constant 0 : i32
    %c0_i32_1 = arith.constant 0 : i32
    %c0_i32_2 = arith.constant 0 : i32
    return %c0_i32, %c0_i32_0, %c0_i32_1 : i32, i32, i32
  }
  func.func @transform_5(%arg0: i32) -> (i32, i32, i32) {
    %c0_i32 = arith.constant 0 : i32
    %c0_i32_0 = arith.constant 0 : i32
    %c0_i32_1 = arith.constant 0 : i32
    %c0_i32_2 = arith.constant 0 : i32
    return %c0_i32, %c0_i32_0, %c0_i32_1 : i32, i32, i32
  }
  func.func @transform_6(%arg0: i32) -> (i32, i32, i32) {
    %c0_i32 = arith.constant 0 : i32
    %c0_i32_0 = arith.constant 0 : i32
    %c0_i32_1 = arith.constant 0 : i32
    %c0_i32_2 = arith.constant 0 : i32
    return %c0_i32, %c0_i32_0, %c0_i32_1 : i32, i32, i32
  }
  func.func @transform_7(%arg0: i32) -> (i32, i32) {
    %c0_i32 = arith.constant 0 : i32
    %c0_i32_0 = arith.constant 0 : i32
    return %arg0, %c0_i32 : i32, i32
  }
}

</mosaic_0001>

<bundles_post_ra>
// kernel: tpu_custom_call.1
= control target key start
LH: loop header
LB: loop body
LE: loop exit
PB: predicated region body
PF: predicated region fallthrough
CT: control target
= control target key end

     0   :  { %12 = vsyncpa [#allocation3], 0  ;;  %s11786_s0 = inlined_call_operand.vmem [shape: f32[1,16,16], index: 0, kind: input, shape index: {}]   ;;  %s11787_s1 = inlined_call_operand.vmem [shape: f32[16,8], index: 1, kind: input, shape index: {}]   ;;  %s11788_s2 = inlined_call_operand.hbm [shape: f32[16,128], index: 2, kind: input, shape index: {}]   ;;  %s11789_s3 = inlined_call_operand.hbm [shape: f32[2,128,384], index: 3, kind: input, shape index: {}]   ;;  %s11790_s4 = inlined_call_operand.hbm [shape: f32[2,128,384], index: 4, kind: input, shape index: {}]   ;;  %s11791_s5 = inlined_call_operand.vmem [shape: f32[2,1,384], index: 5, kind: input, shape index: {}]   ;;  %s11792_s6 = inlined_call_operand.vmem [shape: f32[2,1,384], index: 6, kind: input, shape index: {}]   ;;  %s11793_s7 = inlined_call_operand.hbm [shape: f32[16,128], index: 7, kind: output, shape index: {}]  }
   0x1   :  { %13 = vsyncpa [#allocation6], 0 }
   0x2   :  { %14 = vsyncpa [#allocation4], 0  ;;  %s9071_s24 = smov [#allocation5]   ;;  %s8953_s28 = scalar_lea.hbm %s11789_s3, 12288 }
   0x3   :  { %s36_s25 = sshll.u32 %s9071_s24, 4  ;;  %p8954_p0 = scmp.ne.s32.totalorder %s11789_s3, %s8953_s28  ;;  %s37_s25 = int_to_ptr.vmem [resolvable:$true] %s36_s25 }
   0x4   :  { %p8957_p1 = scmp.lt.u32.totalorder %s8953_s28, %s11789_s3 }
   0x6   :  { %p8959_p2 = pnand %p8957_p1, %p8954_p0 }
   0x8   :  { %8962 = shalt.err (!%p8959_p2)
}
   0x9   :  { %s8963_s10 = scalar_lea.vmem %s37_s25, 12288  ;;  %p8968_p4 = scmp.lt.s32.totalorder %s37_s25, %s37_s25 }
   0xa   :  { %p8964_p3 = scmp.ne.s32.totalorder %s37_s25, %s8963_s10  ;;  %p8969_p5 = scmp.lt.s32.totalorder %s8963_s10, %s8963_s10 }
   0xc   :  { %p8970_p6 = por %p8969_p5, %p8968_p4 }
   0xe   :  { %p8971_p7 = pnand %p8970_p6, %p8964_p3 }
  0x10   :  { %8974 = shalt.err (!%p8971_p7)
}
  0x11   :  { %s9072_s11 = smov 384   ;;  %s9073_s12 = smov 24  }
  0x12   :  { %42 = dma.hbm_to_vmem [thread:$0]  %s11789_s3, 12288, %s37_s25, [#allocation6], %s9072_s11, %s9072_s11, %s9073_s12  }
  0x13   :  { %s9074_s15 = smov [#allocation2]   ;;  %s8975_s19 = scalar_lea.hbm %s11788_s2, 256 }
  0x14   :  { %s24_s16 = sshll.u32 %s9074_s15, 4  ;;  %p8976_p8 = scmp.ne.s32.totalorder %s11788_s2, %s8975_s19  ;;  %s25_s16 = int_to_ptr.vmem [resolvable:$true] %s24_s16 }
  0x15   :  { %p8979_p9 = scmp.lt.u32.totalorder %s8975_s19, %s11788_s2 }
  0x17   :  { %p8981_p10 = pnand %p8979_p9, %p8976_p8 }
  0x19   :  { %8984 = shalt.err (!%p8981_p10)
}
  0x1a   :  { %s8985_s24 = scalar_lea.vmem %s25_s16, 256  ;;  %p8990_p12 = scmp.lt.s32.totalorder %s25_s16, %s25_s16 }
  0x1b   :  { %p8986_p11 = scmp.ne.s32.totalorder %s25_s16, %s8985_s24  ;;  %p8991_p13 = scmp.lt.s32.totalorder %s8985_s24, %s8985_s24 }
  0x1d   :  { %p8992_p0 = por %p8991_p13, %p8990_p12 }
  0x1f   :  { %p8993_p1 = pnand %p8992_p0, %p8986_p11 }
  0x21   :  { %8996 = shalt.err (!%p8993_p1)
}
  0x22   :  { %s9075_s3 = smov 128   ;;  %s9076_s25 = smov 8  }
  0x23   :  { %30 = dma.hbm_to_vmem [thread:$0]  %s11788_s2, 256, %s25_s16, [#allocation3], %s9075_s3, %s9075_s3, %s9076_s25  }
  0x24   :  { %s9077_s28 = smov [#allocation7]   ;;  %s8997_s9 = scalar_lea.hbm %s11790_s4, 12288 }
  0x25   :  { %s48_s29 = sshll.u32 %s9077_s28, 4  ;;  %p8998_p2 = scmp.ne.s32.totalorder %s11790_s4, %s8997_s9  ;;  %s49_s29 = int_to_ptr.vmem [resolvable:$true] %s48_s29 }
  0x26   :  { %p9001_p3 = scmp.lt.u32.totalorder %s8997_s9, %s11790_s4 }
  0x28   :  { %p9003_p4 = pnand %p9001_p3, %p8998_p2 }
  0x2a   :  { %9006 = shalt.err (!%p9003_p4)
}
  0x2b   :  { %s9007_s17 = scalar_lea.vmem %s49_s29, 12288  ;;  %p9012_p6 = scmp.lt.s32.totalorder %s49_s29, %s49_s29 }
  0x2c   :  { %p9008_p5 = scmp.ne.s32.totalorder %s49_s29, %s9007_s17  ;;  %p9013_p7 = scmp.lt.s32.totalorder %s9007_s17, %s9007_s17 }
  0x2e   :  { %p9014_p8 = por %p9013_p7, %p9012_p6 }
  0x30   :  { %p9015_p9 = pnand %p9014_p8, %p9008_p5 }
  0x32   :  { %9018 = shalt.err (!%p9015_p9)
}
  0x33   :  { %54 = dma.hbm_to_vmem [thread:$0]  %s11790_s4, 12288, %s49_s29, [#allocation6], %s9072_s11, %s9072_s11, %s9073_s12  }
  0x34   :  { %9053 = dma.done.wait [#allocation3], 256  }
  0x35   :  { %9054 = vsyncadd [#allocation3], 4294967040 }
  0x36   :  { %9055 = dma.done.wait [#allocation6], 24576  }
  0x37   :  { %9056 = vsyncadd [#allocation6], 4294942720  ;;  %v268_v0 = vlaneseq  ;;  %v9184_v5 = vld [vmem:[%s11786_s0] sm:$0xff]  ;;  %v9189_v6 = vld [vmem:[%s11786_s0 + $0x8] sm:$0xff] }
  0x38   :  { %12054 = vst [vmem:[#allocation15_spill] sm:$0xff] %v9184_v5  ;;  %12055 = vst [vmem:[#allocation16_spill] sm:$0xff] %v9189_v6  ;;  %v9194_v7 = vld [vmem:[%s11787_s1] sm:$0xff]  ;;  %v9199_v8 = vld [vmem:[%s11787_s1 + $0x8] sm:$0xff] }
  0x39   :  { %v9173_v1 = vshrl.u32 %v268_v0, 7  ;;  %12056 = vst [vmem:[#allocation17_spill] sm:$0xff] %v9194_v7  ;;  %12057 = vst [vmem:[#allocation18_spill] sm:$0xff] %v9199_v8  ;;  %v9201_v9 = vld [vmem:[#allocation5] sm:$0xff]  ;;  %v9203_v10 = vld [vmem:[#allocation5 + $0x8] sm:$0xff] }
  0x3a   :  { %12058 = vst [vmem:[#allocation19_spill] sm:$0xff] %v9201_v9  ;;  %12059 = vst [vmem:[#allocation20_spill] sm:$0xff] %v9203_v10  ;;  %v9205_v11 = vld [vmem:[#allocation5 + $0x10] sm:$0xff]  ;;  %v9207_v12 = vld [vmem:[#allocation5 + $0x18] sm:$0xff] }
  0x3b   :  { %12051 = vst [vmem:[#allocation12_spill] sm:$0xff] %v9173_v1  ;;  %v338_v2 = vadd.s32 8, %v9173_v1  ;;  %v9177_v3 = vand.u32 7, %v9173_v1  ;;  %12060 = vst [vmem:[#allocation21_spill] sm:$0xff] %v9205_v11  ;;  %v9209_v13 = vld [vmem:[#allocation5 + $0x20] sm:$0xff]  ;;  %v9211_v14 = vld [vmem:[#allocation5 + $0x28] sm:$0xff] }
  0x3c   :  { %12061 = vst [vmem:[#allocation22_spill] sm:$0xff] %v9207_v12  ;;  %12062 = vst [vmem:[#allocation23_spill] sm:$0xff] %v9209_v13  ;;  %v9213_v15 = vld [vmem:[#allocation5 + $0x30] sm:$0xff]  ;;  %v9215_v16 = vld [vmem:[#allocation5 + $0x38] sm:$0xff] }
  0x3d   :  { %12052 = vst [vmem:[#allocation13_spill] sm:$0xff] %v9177_v3  ;;  %v9179_v4 = vand.u32 7, %v338_v2  ;;  %12063 = vst [vmem:[#allocation24_spill] sm:$0xff] %v9211_v14  ;;  %v9217_v17 = vld [vmem:[#allocation5 + $0x40] sm:$0xff]  ;;  %v9219_v18 = vld [vmem:[#allocation5 + $0x48] sm:$0xff] }
  0x3e   :  { %12064 = vst [vmem:[#allocation25_spill] sm:$0xff] %v9213_v15  ;;  %12065 = vst [vmem:[#allocation26_spill] sm:$0xff] %v9215_v16  ;;  %v9221_v19 = vld [vmem:[#allocation5 + $0x50] sm:$0xff]  ;;  %v9223_v20 = vld [vmem:[#allocation5 + $0x58] sm:$0xff] }
  0x3f   :  { %12053 = vst [vmem:[#allocation14_spill] sm:$0xff] %v9179_v4  ;;  %12066 = vst [vmem:[#allocation27_spill] sm:$0xff] %v9217_v17  ;;  %v9225_v21 = vld [vmem:[#allocation5 + $0x60] sm:$0xff]  ;;  %v9227_v22 = vld [vmem:[#allocation5 + $0x68] sm:$0xff] }
  0x40   :  { %12067 = vst [vmem:[#allocation28_spill] sm:$0xff] %v9219_v18  ;;  %12068 = vst [vmem:[#allocation29_spill] sm:$0xff] %v9221_v19  ;;  %v9229_v23 = vld [vmem:[#allocation5 + $0x70] sm:$0xff]  ;;  %v9231_v24 = vld [vmem:[#allocation5 + $0x78] sm:$0xff] }
  0x41   :  { %12069 = vst [vmem:[#allocation30_spill] sm:$0xff] %v9223_v20  ;;  %12070 = vst [vmem:[#allocation31_spill] sm:$0xff] %v9225_v21  ;;  %v9233_v25 = vld [vmem:[#allocation5 + $0x80] sm:$0xff]  ;;  %v9235_v26 = vld [vmem:[#allocation5 + $0x88] sm:$0xff] }
  0x42   :  { %12071 = vst [vmem:[#allocation32_spill] sm:$0xff] %v9227_v22  ;;  %12072 = vst [vmem:[#allocation33_spill] sm:$0xff] %v9229_v23  ;;  %v9237_v27 = vld [vmem:[#allocation5 + $0x90] sm:$0xff]  ;;  %v9239_v28 = vld [vmem:[#allocation5 + $0x98] sm:$0xff] }
  0x43   :  { %12073 = vst [vmem:[#allocation34_spill] sm:$0xff] %v9231_v24  ;;  %12074 = vst [vmem:[#allocation35_spill] sm:$0xff] %v9233_v25  ;;  %v9241_v29 = vld [vmem:[#allocation5 + $0xa0] sm:$0xff]  ;;  %v9243_v30 = vld [vmem:[#allocation5 + $0xa8] sm:$0xff] }
  0x44   :  { %12075 = vst [vmem:[#allocation36_spill] sm:$0xff] %v9235_v26  ;;  %12076 = vst [vmem:[#allocation37_spill] sm:$0xff] %v9237_v27  ;;  %v9245_v31 = vld [vmem:[#allocation5 + $0xb0] sm:$0xff]  ;;  %v9247_v32 = vld [vmem:[#allocation5 + $0xb8] sm:$0xff] }
  0x45   :  { %12077 = vst [vmem:[#allocation38_spill] sm:$0xff] %v9239_v28  ;;  %12078 = vst [vmem:[#allocation39_spill] sm:$0xff] %v9241_v29  ;;  %v9249_v33 = vld [vmem:[#allocation5 + $0xc0] sm:$0xff]  ;;  %v9251_v34 = vld [vmem:[#allocation5 + $0xc8] sm:$0xff] }
  0x46   :  { %12079 = vst [vmem:[#allocation40_spill] sm:$0xff] %v9243_v30  ;;  %12080 = vst [vmem:[#allocation41_spill] sm:$0xff] %v9245_v31  ;;  %v9253_v35 = vld [vmem:[#allocation5 + $0xd0] sm:$0xff]  ;;  %v9255_v36 = vld [vmem:[#allocation5 + $0xd8] sm:$0xff] }
  0x47   :  { %12081 = vst [vmem:[#allocation42_spill] sm:$0xff] %v9247_v32  ;;  %12082 = vst [vmem:[#allocation43_spill] sm:$0xff] %v9249_v33  ;;  %v9257_v37 = vld [vmem:[#allocation5 + $0xe0] sm:$0xff]  ;;  %v9259_v38 = vld [vmem:[#allocation5 + $0xe8] sm:$0xff] }
  0x48   :  { %12083 = vst [vmem:[#allocation44_spill] sm:$0xff] %v9251_v34  ;;  %12084 = vst [vmem:[#allocation45_spill] sm:$0xff] %v9253_v35  ;;  %v9261_v39 = vld [vmem:[#allocation5 + $0xf0] sm:$0xff]  ;;  %v9263_v40 = vld [vmem:[#allocation5 + $0xf8] sm:$0xff] }
  0x49   :  { %12085 = vst [vmem:[#allocation46_spill] sm:$0xff] %v9255_v36  ;;  %12086 = vst [vmem:[#allocation47_spill] sm:$0xff] %v9257_v37  ;;  %v9265_v41 = vld [vmem:[#allocation5 + $0x100] sm:$0xff]  ;;  %v9267_v42 = vld [vmem:[#allocation5 + $0x108] sm:$0xff] }
  0x4a   :  { %12087 = vst [vmem:[#allocation48_spill] sm:$0xff] %v9259_v38  ;;  %12088 = vst [vmem:[#allocation49_spill] sm:$0xff] %v9261_v39  ;;  %v9269_v43 = vld [vmem:[#allocation5 + $0x110] sm:$0xff]  ;;  %v9271_v44 = vld [vmem:[#allocation5 + $0x118] sm:$0xff] }
  0x4b   :  { %12089 = vst [vmem:[#allocation50_spill] sm:$0xff] %v9263_v40  ;;  %12090 = vst [vmem:[#allocation51_spill] sm:$0xff] %v9265_v41  ;;  %v9273_v45 = vld [vmem:[#allocation5 + $0x120] sm:$0xff]  ;;  %v9275_v46 = vld [vmem:[#allocation5 + $0x128] sm:$0xff] }
  0x4c   :  { %12091 = vst [vmem:[#allocation52_spill] sm:$0xff] %v9267_v42  ;;  %12092 = vst [vmem:[#allocation53_spill] sm:$0xff] %v9269_v43  ;;  %v9277_v47 = vld [vmem:[#allocation5 + $0x130] sm:$0xff]  ;;  %v9279_v48 = vld [vmem:[#allocation5 + $0x138] sm:$0xff] }
  0x4d   :  { %12093 = vst [vmem:[#allocation54_spill] sm:$0xff] %v9271_v44  ;;  %12094 = vst [vmem:[#allocation55_spill] sm:$0xff] %v9273_v45  ;;  %v9281_v49 = vld [vmem:[#allocation5 + $0x140] sm:$0xff]  ;;  %v9283_v50 = vld [vmem:[#allocation5 + $0x148] sm:$0xff] }
  0x4e   :  { %12095 = vst [vmem:[#allocation56_spill] sm:$0xff] %v9275_v46  ;;  %12096 = vst [vmem:[#allocation57_spill] sm:$0xff] %v9277_v47  ;;  %v9285_v51 = vld [vmem:[#allocation5 + $0x150] sm:$0xff]  ;;  %v9287_v52 = vld [vmem:[#allocation5 + $0x158] sm:$0xff] }
  0x4f   :  { %12097 = vst [vmem:[#allocation58_spill] sm:$0xff] %v9279_v48  ;;  %12098 = vst [vmem:[#allocation59_spill] sm:$0xff] %v9281_v49  ;;  %v9289_v53 = vld [vmem:[#allocation5 + $0x160] sm:$0xff]  ;;  %v9291_v54 = vld [vmem:[#allocation5 + $0x168] sm:$0xff] }
  0x50   :  { %12099 = vst [vmem:[#allocation60_spill] sm:$0xff] %v9283_v50  ;;  %12100 = vst [vmem:[#allocation61_spill] sm:$0xff] %v9285_v51  ;;  %v9293_v55 = vld [vmem:[#allocation5 + $0x170] sm:$0xff]  ;;  %v9295_v56 = vld [vmem:[#allocation5 + $0x178] sm:$0xff] }
  0x51   :  { %12101 = vst [vmem:[#allocation62_spill] sm:$0xff] %v9287_v52  ;;  %12102 = vst [vmem:[#allocation63_spill] sm:$0xff] %v9289_v53  ;;  %v9297_v57 = vld [vmem:[#allocation5 + $0x180] sm:$0xff]  ;;  %v9299_v58 = vld [vmem:[#allocation5 + $0x188] sm:$0xff] }
  0x52   :  { %12103 = vst [vmem:[#allocation64_spill] sm:$0xff] %v9291_v54  ;;  %12104 = vst [vmem:[#allocation65_spill] sm:$0xff] %v9293_v55  ;;  %v9301_v59 = vld [vmem:[#allocation5 + $0x190] sm:$0xff]  ;;  %v9303_v60 = vld [vmem:[#allocation5 + $0x198] sm:$0xff] }
  0x53   :  { %12105 = vst [vmem:[#allocation66_spill] sm:$0xff] %v9295_v56  ;;  %12106 = vst [vmem:[#allocation67_spill] sm:$0xff] %v9297_v57  ;;  %v9305_v61 = vld [vmem:[#allocation5 + $0x1a0] sm:$0xff]  ;;  %v9307_v62 = vld [vmem:[#allocation5 + $0x1a8] sm:$0xff] }
  0x54   :  { %12107 = vst [vmem:[#allocation68_spill] sm:$0xff] %v9299_v58  ;;  %12108 = vst [vmem:[#allocation69_spill] sm:$0xff] %v9301_v59  ;;  %v9309_v63 = vld [vmem:[#allocation5 + $0x1b0] sm:$0xff]  ;;  %v9311_v0 = vld [vmem:[#allocation5 + $0x1b8] sm:$0xff] }
  0x55   :  { %12109 = vst [vmem:[#allocation70_spill] sm:$0xff] %v9303_v60  ;;  %12110 = vst [vmem:[#allocation71_spill] sm:$0xff] %v9305_v61  ;;  %v9313_v2 = vld [vmem:[#allocation5 + $0x1c0] sm:$0xff]  ;;  %v9315_v4 = vld [vmem:[#allocation5 + $0x1c8] sm:$0xff] }
  0x56   :  { %12111 = vst [vmem:[#allocation72_spill] sm:$0xff] %v9307_v62  ;;  %12112 = vst [vmem:[#allocation73_spill] sm:$0xff] %v9309_v63  ;;  %v9317_v3 = vld [vmem:[#allocation5 + $0x1d0] sm:$0xff]  ;;  %v9319_v57 = vld [vmem:[#allocation5 + $0x1d8] sm:$0xff] }
  0x57   :  { %12113 = vst [vmem:[#allocation74_spill] sm:$0xff] %v9311_v0  ;;  %12114 = vst [vmem:[#allocation75_spill] sm:$0xff] %v9313_v2  ;;  %v9321_v58 = vld [vmem:[#allocation5 + $0x1e0] sm:$0xff]  ;;  %v9323_v59 = vld [vmem:[#allocation5 + $0x1e8] sm:$0xff] }
  0x58   :  { %12115 = vst [vmem:[#allocation76_spill] sm:$0xff] %v9315_v4  ;;  %12116 = vst [vmem:[#allocation77_spill] sm:$0xff] %v9317_v3  ;;  %v9325_v60 = vld [vmem:[#allocation5 + $0x1f0] sm:$0xff]  ;;  %v9327_v61 = vld [vmem:[#allocation5 + $0x1f8] sm:$0xff] }
  0x59   :  { %12117 = vst [vmem:[#allocation78_spill] sm:$0xff] %v9319_v57  ;;  %12118 = vst [vmem:[#allocation79_spill] sm:$0xff] %v9321_v58  ;;  %v9329_v62 = vld [vmem:[#allocation5 + $0x200] sm:$0xff]  ;;  %v9331_v63 = vld [vmem:[#allocation5 + $0x208] sm:$0xff] }
  0x5a   :  { %12119 = vst [vmem:[#allocation80_spill] sm:$0xff] %v9323_v59  ;;  %12120 = vst [vmem:[#allocation81_spill] sm:$0xff] %v9325_v60  ;;  %v9333_v0 = vld [vmem:[#allocation5 + $0x210] sm:$0xff]  ;;  %v9335_v2 = vld [vmem:[#allocation5 + $0x218] sm:$0xff] }
  0x5b   :  { %12121 = vst [vmem:[#allocation82_spill] sm:$0xff] %v9327_v61  ;;  %12122 = vst [vmem:[#allocation83_spill] sm:$0xff] %v9329_v62  ;;  %v9337_v4 = vld [vmem:[#allocation5 + $0x220] sm:$0xff]  ;;  %v9339_v3 = vld [vmem:[#allocation5 + $0x228] sm:$0xff] }
  0x5c   :  { %12123 = vst [vmem:[#allocation84_spill] sm:$0xff] %v9331_v63  ;;  %12124 = vst [vmem:[#allocation85_spill] sm:$0xff] %v9333_v0  ;;  %v9341_v57 = vld [vmem:[#allocation5 + $0x230] sm:$0xff]  ;;  %v9343_v58 = vld [vmem:[#allocation5 + $0x238] sm:$0xff] }
  0x5d   :  { %12125 = vst [vmem:[#allocation86_spill] sm:$0xff] %v9335_v2  ;;  %12126 = vst [vmem:[#allocation87_spill] sm:$0xff] %v9337_v4  ;;  %v9345_v59 = vld [vmem:[#allocation5 + $0x240] sm:$0xff]  ;;  %v9347_v60 = vld [vmem:[#allocation5 + $0x248] sm:$0xff] }
  0x5e   :  { %12127 = vst [vmem:[#allocation88_spill] sm:$0xff] %v9339_v3  ;;  %12128 = vst [vmem:[#allocation89_spill] sm:$0xff] %v9341_v57  ;;  %v9349_v61 = vld [vmem:[#allocation5 + $0x250] sm:$0xff]  ;;  %v9351_v62 = vld [vmem:[#allocation5 + $0x258] sm:$0xff] }
  0x5f   :  { %12129 = vst [vmem:[#allocation90_spill] sm:$0xff] %v9343_v58  ;;  %12130 = vst [vmem:[#allocation91_spill] sm:$0xff] %v9345_v59  ;;  %v9353_v63 = vld [vmem:[#allocation5 + $0x260] sm:$0xff]  ;;  %v9355_v0 = vld [vmem:[#allocation5 + $0x268] sm:$0xff] }
  0x60   :  { %12131 = vst [vmem:[#allocation92_spill] sm:$0xff] %v9347_v60  ;;  %12132 = vst [vmem:[#allocation93_spill] sm:$0xff] %v9349_v61  ;;  %v9357_v2 = vld [vmem:[#allocation5 + $0x270] sm:$0xff]  ;;  %v9359_v4 = vld [vmem:[#allocation5 + $0x278] sm:$0xff] }
  0x61   :  { %12133 = vst [vmem:[#allocation94_spill] sm:$0xff] %v9351_v62  ;;  %12134 = vst [vmem:[#allocation95_spill] sm:$0xff] %v9353_v63  ;;  %v9361_v3 = vld [vmem:[#allocation5 + $0x280] sm:$0xff]  ;;  %v9363_v57 = vld [vmem:[#allocation5 + $0x288] sm:$0xff] }
  0x62   :  { %12135 = vst [vmem:[#allocation96_spill] sm:$0xff] %v9355_v0  ;;  %12136 = vst [vmem:[#allocation97_spill] sm:$0xff] %v9357_v2  ;;  %v9365_v58 = vld [vmem:[#allocation5 + $0x290] sm:$0xff]  ;;  %v9367_v59 = vld [vmem:[#allocation5 + $0x298] sm:$0xff] }
  0x63   :  { %12137 = vst [vmem:[#allocation98_spill] sm:$0xff] %v9359_v4  ;;  %12138 = vst [vmem:[#allocation99_spill] sm:$0xff] %v9361_v3  ;;  %v9369_v60 = vld [vmem:[#allocation5 + $0x2a0] sm:$0xff]  ;;  %v9371_v61 = vld [vmem:[#allocation5 + $0x2a8] sm:$0xff] }
  0x64   :  { %12139 = vst [vmem:[#allocation100_spill] sm:$0xff] %v9363_v57  ;;  %12140 = vst [vmem:[#allocation101_spill] sm:$0xff] %v9365_v58  ;;  %v9373_v62 = vld [vmem:[#allocation5 + $0x2b0] sm:$0xff]  ;;  %v9375_v63 = vld [vmem:[#allocation5 + $0x2b8] sm:$0xff] }
  0x65   :  { %12141 = vst [vmem:[#allocation102_spill] sm:$0xff] %v9367_v59  ;;  %12142 = vst [vmem:[#allocation103_spill] sm:$0xff] %v9369_v60  ;;  %v9377_v0 = vld [vmem:[#allocation5 + $0x2c0] sm:$0xff]  ;;  %v9379_v2 = vld [vmem:[#allocation5 + $0x2c8] sm:$0xff] }
  0x66   :  { %12143 = vst [vmem:[#allocation104_spill] sm:$0xff] %v9371_v61  ;;  %12144 = vst [vmem:[#allocation105_spill] sm:$0xff] %v9373_v62  ;;  %v9381_v4 = vld [vmem:[#allocation5 + $0x2d0] sm:$0xff]  ;;  %v9383_v3 = vld [vmem:[#allocation5 + $0x2d8] sm:$0xff] }
  0x67   :  { %12145 = vst [vmem:[#allocation106_spill] sm:$0xff] %v9375_v63  ;;  %12146 = vst [vmem:[#allocation107_spill] sm:$0xff] %v9377_v0  ;;  %v9385_v57 = vld [vmem:[#allocation5 + $0x2e0] sm:$0xff]  ;;  %v9387_v58 = vld [vmem:[#allocation5 + $0x2e8] sm:$0xff] }
  0x68   :  { %12147 = vst [vmem:[#allocation108_spill] sm:$0xff] %v9379_v2  ;;  %12148 = vst [vmem:[#allocation109_spill] sm:$0xff] %v9381_v4  ;;  %v9389_v59 = vld [vmem:[#allocation5 + $0x2f0] sm:$0xff]  ;;  %v9391_v60 = vld [vmem:[#allocation5 + $0x2f8] sm:$0xff] }
  0x69   :  { %12149 = vst [vmem:[#allocation110_spill] sm:$0xff] %v9383_v3  ;;  %12150 = vst [vmem:[#allocation111_spill] sm:$0xff] %v9385_v57  ;;  %v9393_v61 = vld [vmem:[#allocation7] sm:$0xff]  ;;  %v9395_v62 = vld [vmem:[#allocation7 + $0x8] sm:$0xff] }
  0x6a   :  { %12151 = vst [vmem:[#allocation112_spill] sm:$0xff] %v9387_v58  ;;  %12152 = vst [vmem:[#allocation113_spill] sm:$0xff] %v9389_v59  ;;  %v9397_v63 = vld [vmem:[#allocation7 + $0x10] sm:$0xff]  ;;  %v9399_v0 = vld [vmem:[#allocation7 + $0x18] sm:$0xff] }
  0x6b   :  { %12153 = vst [vmem:[#allocation114_spill] sm:$0xff] %v9391_v60  ;;  %12154 = vst [vmem:[#allocation115_spill] sm:$0xff] %v9393_v61  ;;  %v9401_v2 = vld [vmem:[#allocation7 + $0x20] sm:$0xff]  ;;  %v9403_v4 = vld [vmem:[#allocation7 + $0x28] sm:$0xff] }
  0x6c   :  { %12155 = vst [vmem:[#allocation116_spill] sm:$0xff] %v9395_v62  ;;  %12156 = vst [vmem:[#allocation117_spill] sm:$0xff] %v9397_v63  ;;  %v9405_v3 = vld [vmem:[#allocation7 + $0x30] sm:$0xff]  ;;  %v9407_v57 = vld [vmem:[#allocation7 + $0x38] sm:$0xff] }
  0x6d   :  { %12157 = vst [vmem:[#allocation118_spill] sm:$0xff] %v9399_v0  ;;  %12158 = vst [vmem:[#allocation119_spill] sm:$0xff] %v9401_v2  ;;  %v9409_v58 = vld [vmem:[#allocation7 + $0x40] sm:$0xff]  ;;  %v9411_v59 = vld [vmem:[#allocation7 + $0x48] sm:$0xff] }
  0x6e   :  { %12159 = vst [vmem:[#allocation120_spill] sm:$0xff] %v9403_v4  ;;  %12160 = vst [vmem:[#allocation121_spill] sm:$0xff] %v9405_v3  ;;  %v9413_v60 = vld [vmem:[#allocation7 + $0x50] sm:$0xff]  ;;  %v9415_v61 = vld [vmem:[#allocation7 + $0x58] sm:$0xff] }
  0x6f   :  { %12161 = vst [vmem:[#allocation122_spill] sm:$0xff] %v9407_v57  ;;  %12162 = vst [vmem:[#allocation123_spill] sm:$0xff] %v9409_v58  ;;  %v9417_v6 = vld [vmem:[#allocation7 + $0x60] sm:$0xff]  ;;  %v9419_v62 = vld [vmem:[#allocation7 + $0x68] sm:$0xff] }
  0x70   :  { %12163 = vst [vmem:[#allocation124_spill] sm:$0xff] %v9411_v59  ;;  %12164 = vst [vmem:[#allocation125_spill] sm:$0xff] %v9413_v60  ;;  %v9421_v0 = vld [vmem:[#allocation7 + $0x70] sm:$0xff]  ;;  %v9423_v2 = vld [vmem:[#allocation7 + $0x78] sm:$0xff] }
  0x71   :  { %12165 = vst [vmem:[#allocation126_spill] sm:$0xff] %v9415_v61  ;;  %12166 = vst [vmem:[#allocation127_spill] sm:$0xff] %v9417_v6  ;;  %v9425_v4 = vld [vmem:[#allocation7 + $0x80] sm:$0xff]  ;;  %v9427_v3 = vld [vmem:[#allocation7 + $0x88] sm:$0xff] }
  0x72   :  { %12167 = vst [vmem:[#allocation128_spill] sm:$0xff] %v9419_v62  ;;  %12168 = vst [vmem:[#allocation129_spill] sm:$0xff] %v9421_v0  ;;  %v9429_v57 = vld [vmem:[#allocation7 + $0x90] sm:$0xff]  ;;  %v9431_v58 = vld [vmem:[#allocation7 + $0x98] sm:$0xff] }
  0x73   :  { %12169 = vst [vmem:[#allocation130_spill] sm:$0xff] %v9423_v2  ;;  %12170 = vst [vmem:[#allocation131_spill] sm:$0xff] %v9425_v4  ;;  %v9433_v59 = vld [vmem:[#allocation7 + $0xa0] sm:$0xff]  ;;  %v9435_v60 = vld [vmem:[#allocation7 + $0xa8] sm:$0xff] }
  0x74   :  { %12171 = vst [vmem:[#allocation132_spill] sm:$0xff] %v9427_v3  ;;  %12172 = vst [vmem:[#allocation133_spill] sm:$0xff] %v9429_v57  ;;  %v9437_v61 = vld [vmem:[#allocation7 + $0xb0] sm:$0xff]  ;;  %v9439_v6 = vld [vmem:[#allocation7 + $0xb8] sm:$0xff] }
  0x75   :  { %12173 = vst [vmem:[#allocation134_spill] sm:$0xff] %v9431_v58  ;;  %12174 = vst [vmem:[#allocation135_spill] sm:$0xff] %v9433_v59  ;;  %v9441_v62 = vld [vmem:[#allocation7 + $0xc0] sm:$0xff]  ;;  %v9443_v0 = vld [vmem:[#allocation7 + $0xc8] sm:$0xff] }
  0x76   :  { %12175 = vst [vmem:[#allocation136_spill] sm:$0xff] %v9435_v60  ;;  %12176 = vst [vmem:[#allocation137_spill] sm:$0xff] %v9437_v61  ;;  %v9445_v2 = vld [vmem:[#allocation7 + $0xd0] sm:$0xff]  ;;  %v9447_v4 = vld [vmem:[#allocation7 + $0xd8] sm:$0xff] }
  0x77   :  { %12177 = vst [vmem:[#allocation138_spill] sm:$0xff] %v9439_v6  ;;  %12178 = vst [vmem:[#allocation139_spill] sm:$0xff] %v9441_v62  ;;  %v9449_v3 = vld [vmem:[#allocation7 + $0xe0] sm:$0xff]  ;;  %v9451_v57 = vld [vmem:[#allocation7 + $0xe8] sm:$0xff] }
  0x78   :  { %12179 = vst [vmem:[#allocation140_spill] sm:$0xff] %v9443_v0  ;;  %12180 = vst [vmem:[#allocation141_spill] sm:$0xff] %v9445_v2  ;;  %v9453_v58 = vld [vmem:[#allocation7 + $0xf0] sm:$0xff]  ;;  %v9455_v59 = vld [vmem:[#allocation7 + $0xf8] sm:$0xff] }
  0x79   :  { %12181 = vst [vmem:[#allocation142_spill] sm:$0xff] %v9447_v4  ;;  %12182 = vst [vmem:[#allocation143_spill] sm:$0xff] %v9449_v3  ;;  %v9457_v60 = vld [vmem:[#allocation7 + $0x100] sm:$0xff]  ;;  %v9459_v61 = vld [vmem:[#allocation7 + $0x108] sm:$0xff] }
  0x7a   :  { %12183 = vst [vmem:[#allocation144_spill] sm:$0xff] %v9451_v57  ;;  %12184 = vst [vmem:[#allocation145_spill] sm:$0xff] %v9453_v58  ;;  %v9461_v6 = vld [vmem:[#allocation7 + $0x110] sm:$0xff]  ;;  %v9463_v62 = vld [vmem:[#allocation7 + $0x118] sm:$0xff] }
  0x7b   :  { %12185 = vst [vmem:[#allocation146_spill] sm:$0xff] %v9455_v59  ;;  %12186 = vst [vmem:[#allocation147_spill] sm:$0xff] %v9457_v60  ;;  %v9465_v0 = vld [vmem:[#allocation7 + $0x120] sm:$0xff]  ;;  %v9467_v2 = vld [vmem:[#allocation7 + $0x128] sm:$0xff] }
  0x7c   :  { %12187 = vst [vmem:[#allocation148_spill] sm:$0xff] %v9459_v61  ;;  %12188 = vst [vmem:[#allocation149_spill] sm:$0xff] %v9461_v6  ;;  %v9469_v4 = vld [vmem:[#allocation7 + $0x130] sm:$0xff]  ;;  %v9471_v3 = vld [vmem:[#allocation7 + $0x138] sm:$0xff] }
  0x7d   :  { %12189 = vst [vmem:[#allocation150_spill] sm:$0xff] %v9463_v62  ;;  %12190 = vst [vmem:[#allocation151_spill] sm:$0xff] %v9465_v0  ;;  %v9473_v57 = vld [vmem:[#allocation7 + $0x140] sm:$0xff]  ;;  %v9475_v58 = vld [vmem:[#allocation7 + $0x148] sm:$0xff] }
  0x7e   :  { %12191 = vst [vmem:[#allocation152_spill] sm:$0xff] %v9467_v2  ;;  %12192 = vst [vmem:[#allocation153_spill] sm:$0xff] %v9469_v4  ;;  %v9477_v59 = vld [vmem:[#allocation7 + $0x150] sm:$0xff]  ;;  %v9479_v60 = vld [vmem:[#allocation7 + $0x158] sm:$0xff] }
  0x7f   :  { %12193 = vst [vmem:[#allocation154_spill] sm:$0xff] %v9471_v3  ;;  %12194 = vst [vmem:[#allocation155_spill] sm:$0xff] %v9473_v57  ;;  %v9481_v61 = vld [vmem:[#allocation7 + $0x160] sm:$0xff]  ;;  %v9483_v6 = vld [vmem:[#allocation7 + $0x168] sm:$0xff] }
  0x80   :  { %12195 = vst [vmem:[#allocation156_spill] sm:$0xff] %v9475_v58  ;;  %12196 = vst [vmem:[#allocation157_spill] sm:$0xff] %v9477_v59  ;;  %v9485_v62 = vld [vmem:[#allocation7 + $0x170] sm:$0xff]  ;;  %v9487_v0 = vld [vmem:[#allocation7 + $0x178] sm:$0xff] }
  0x81   :  { %12197 = vst [vmem:[#allocation158_spill] sm:$0xff] %v9479_v60  ;;  %12198 = vst [vmem:[#allocation159_spill] sm:$0xff] %v9481_v61  ;;  %v9489_v2 = vld [vmem:[#allocation7 + $0x180] sm:$0xff]  ;;  %v9491_v4 = vld [vmem:[#allocation7 + $0x188] sm:$0xff] }
  0x82   :  { %12199 = vst [vmem:[#allocation160_spill] sm:$0xff] %v9483_v6  ;;  %12200 = vst [vmem:[#allocation161_spill] sm:$0xff] %v9485_v62  ;;  %v9493_v3 = vld [vmem:[#allocation7 + $0x190] sm:$0xff]  ;;  %v9495_v57 = vld [vmem:[#allocation7 + $0x198] sm:$0xff] }
  0x83   :  { %12201 = vst [vmem:[#allocation162_spill] sm:$0xff] %v9487_v0  ;;  %12202 = vst [vmem:[#allocation163_spill] sm:$0xff] %v9489_v2  ;;  %v9497_v58 = vld [vmem:[#allocation7 + $0x1a0] sm:$0xff]  ;;  %v9499_v59 = vld [vmem:[#allocation7 + $0x1a8] sm:$0xff] }
  0x84   :  { %12203 = vst [vmem:[#allocation164_spill] sm:$0xff] %v9491_v4  ;;  %12204 = vst [vmem:[#allocation165_spill] sm:$0xff] %v9493_v3  ;;  %v9501_v60 = vld [vmem:[#allocation7 + $0x1b0] sm:$0xff]  ;;  %v9503_v61 = vld [vmem:[#allocation7 + $0x1b8] sm:$0xff] }
  0x85   :  { %12205 = vst [vmem:[#allocation166_spill] sm:$0xff] %v9495_v57  ;;  %12206 = vst [vmem:[#allocation167_spill] sm:$0xff] %v9497_v58  ;;  %v9505_v6 = vld [vmem:[#allocation7 + $0x1c0] sm:$0xff]  ;;  %v9507_v62 = vld [vmem:[#allocation7 + $0x1c8] sm:$0xff] }
  0x86   :  { %12207 = vst [vmem:[#allocation168_spill] sm:$0xff] %v9499_v59  ;;  %12208 = vst [vmem:[#allocation169_spill] sm:$0xff] %v9501_v60  ;;  %v9509_v0 = vld [vmem:[#allocation7 + $0x1d0] sm:$0xff]  ;;  %v9511_v2 = vld [vmem:[#allocation7 + $0x1d8] sm:$0xff] }
  0x87   :  { %12209 = vst [vmem:[#allocation170_spill] sm:$0xff] %v9503_v61  ;;  %12210 = vst [vmem:[#allocation171_spill] sm:$0xff] %v9505_v6  ;;  %v9513_v4 = vld [vmem:[#allocation7 + $0x1e0] sm:$0xff]  ;;  %v9515_v3 = vld [vmem:[#allocation7 + $0x1e8] sm:$0xff] }
  0x88   :  { %12211 = vst [vmem:[#allocation172_spill] sm:$0xff] %v9507_v62  ;;  %12212 = vst [vmem:[#allocation173_spill] sm:$0xff] %v9509_v0  ;;  %v9517_v57 = vld [vmem:[#allocation7 + $0x1f0] sm:$0xff]  ;;  %v9519_v58 = vld [vmem:[#allocation7 + $0x1f8] sm:$0xff] }
  0x89   :  { %12213 = vst [vmem:[#allocation174_spill] sm:$0xff] %v9511_v2  ;;  %12214 = vst [vmem:[#allocation175_spill] sm:$0xff] %v9513_v4  ;;  %v9521_v59 = vld [vmem:[#allocation7 + $0x200] sm:$0xff]  ;;  %v9523_v60 = vld [vmem:[#allocation7 + $0x208] sm:$0xff] }
  0x8a   :  { %12215 = vst [vmem:[#allocation176_spill] sm:$0xff] %v9515_v3  ;;  %12216 = vst [vmem:[#allocation177_spill] sm:$0xff] %v9517_v57  ;;  %v9525_v61 = vld [vmem:[#allocation7 + $0x210] sm:$0xff]  ;;  %v9527_v6 = vld [vmem:[#allocation7 + $0x218] sm:$0xff] }
  0x8b   :  { %12217 = vst [vmem:[#allocation178_spill] sm:$0xff] %v9519_v58  ;;  %12218 = vst [vmem:[#allocation179_spill] sm:$0xff] %v9521_v59  ;;  %v9529_v62 = vld [vmem:[#allocation7 + $0x220] sm:$0xff]  ;;  %v9531_v0 = vld [vmem:[#allocation7 + $0x228] sm:$0xff] }
  0x8c   :  { %12219 = vst [vmem:[#allocation180_spill] sm:$0xff] %v9523_v60  ;;  %12220 = vst [vmem:[#allocation181_spill] sm:$0xff] %v9525_v61  ;;  %v9533_v2 = vld [vmem:[#allocation7 + $0x230] sm:$0xff]  ;;  %v9535_v4 = vld [vmem:[#allocation7 + $0x238] sm:$0xff] }
  0x8d   :  { %12221 = vst [vmem:[#allocation182_spill] sm:$0xff] %v9527_v6  ;;  %12222 = vst [vmem:[#allocation183_spill] sm:$0xff] %v9529_v62  ;;  %v9537_v3 = vld [vmem:[#allocation7 + $0x240] sm:$0xff]  ;;  %v9539_v57 = vld [vmem:[#allocation7 + $0x248] sm:$0xff] }
  0x8e   :  { %12223 = vst [vmem:[#allocation184_spill] sm:$0xff] %v9531_v0  ;;  %12224 = vst [vmem:[#allocation185_spill] sm:$0xff] %v9533_v2  ;;  %v9541_v58 = vld [vmem:[#allocation7 + $0x250] sm:$0xff]  ;;  %v9543_v59 = vld [vmem:[#allocation7 + $0x258] sm:$0xff] }
  0x8f   :  { %12225 = vst [vmem:[#allocation186_spill] sm:$0xff] %v9535_v4  ;;  %12226 = vst [vmem:[#allocation187_spill] sm:$0xff] %v9537_v3  ;;  %v9545_v60 = vld [vmem:[#allocation7 + $0x260] sm:$0xff]  ;;  %v9547_v61 = vld [vmem:[#allocation7 + $0x268] sm:$0xff] }
  0x90   :  { %12227 = vst [vmem:[#allocation188_spill] sm:$0xff] %v9539_v57  ;;  %12228 = vst [vmem:[#allocation189_spill] sm:$0xff] %v9541_v58  ;;  %v9549_v6 = vld [vmem:[#allocation7 + $0x270] sm:$0xff]  ;;  %v9551_v62 = vld [vmem:[#allocation7 + $0x278] sm:$0xff] }
  0x91   :  { %12229 = vst [vmem:[#allocation190_spill] sm:$0xff] %v9543_v59  ;;  %12230 = vst [vmem:[#allocation191_spill] sm:$0xff] %v9545_v60  ;;  %v9553_v0 = vld [vmem:[#allocation7 + $0x280] sm:$0xff]  ;;  %v9555_v2 = vld [vmem:[#allocation7 + $0x288] sm:$0xff] }
  0x92   :  { %12231 = vst [vmem:[#allocation192_spill] sm:$0xff] %v9547_v61  ;;  %12232 = vst [vmem:[#allocation193_spill] sm:$0xff] %v9549_v6  ;;  %v9557_v4 = vld [vmem:[#allocation7 + $0x290] sm:$0xff]  ;;  %v9559_v3 = vld [vmem:[#allocation7 + $0x298] sm:$0xff]  ;;  %v9572_v6 = vsub.s32 0, %v9173_v1 }
  0x93   :  { %12233 = vst [vmem:[#allocation194_spill] sm:$0xff] %v9551_v62  ;;  %12234 = vst [vmem:[#allocation195_spill] sm:$0xff] %v9553_v0  ;;  %v9561_v57 = vld [vmem:[#allocation7 + $0x2a0] sm:$0xff]  ;;  %v9563_v58 = vld [vmem:[#allocation7 + $0x2a8] sm:$0xff]  ;;  %v9575_v0 = vsub.s32 1, %v9173_v1 }
  0x94   :  { %12235 = vst [vmem:[#allocation196_spill] sm:$0xff] %v9555_v2  ;;  %12236 = vst [vmem:[#allocation197_spill] sm:$0xff] %v9557_v4  ;;  %v9565_v59 = vld [vmem:[#allocation7 + $0x2b0] sm:$0xff]  ;;  %v9567_v60 = vld [vmem:[#allocation7 + $0x2b8] sm:$0xff]  ;;  %v9578_v2 = vsub.s32 2, %v9173_v1 }
  0x95   :  { %12237 = vst [vmem:[#allocation198_spill] sm:$0xff] %v9559_v3  ;;  %12238 = vst [vmem:[#allocation199_spill] sm:$0xff] %v9561_v57  ;;  %v9569_v61 = vld [vmem:[#allocation7 + $0x2c0] sm:$0xff]  ;;  %v9580_v3 = vld [vmem:[#allocation7 + $0x2c8] sm:$0xff] }
  0x96   :  { %12239 = vst [vmem:[#allocation200_spill] sm:$0xff] %v9563_v58  ;;  %12240 = vst [vmem:[#allocation201_spill] sm:$0xff] %v9565_v59  ;;  %v9582_v57 = vld [vmem:[#allocation7 + $0x2d0] sm:$0xff]  ;;  %v9584_v58 = vld [vmem:[#allocation7 + $0x2d8] sm:$0xff] }
  0x97   :  { %12241 = vst [vmem:[#allocation202_spill] sm:$0xff] %v9567_v60  ;;  %12242 = vst [vmem:[#allocation203_spill] sm:$0xff] %v9569_v61  ;;  %v9586_v59 = vld [vmem:[#allocation7 + $0x2e0] sm:$0xff]  ;;  %v9588_v60 = vld [vmem:[#allocation7 + $0x2e8] sm:$0xff] }
  0x98   :  { %12243 = vst [vmem:[#allocation204_spill] sm:$0xff] %v9572_v6  ;;  %12244 = vst [vmem:[#allocation205_spill] sm:$0xff] %v9575_v0  ;;  %v9590_v61 = vld [vmem:[#allocation7 + $0x2f0] sm:$0xff]  ;;  %v9592_v4 = vld [vmem:[#allocation7 + $0x2f8] sm:$0xff] }
  0x99   :  { %12245 = vst [vmem:[#allocation206_spill] sm:$0xff] %v9578_v2  ;;  %12246 = vst [vmem:[#allocation207_spill] sm:$0xff] %v9580_v3  ;;  %v266_v62 = vld [vmem:[%s11791_s5] sm:$0x7]  ;;  %v9600_v3 = vld [vmem:[%s11791_s5 + $0x3] sm:$0x7] }
  0x9a   :  { %12247 = vst [vmem:[#allocation208_spill] sm:$0xff] %v9582_v57  ;;  %12248 = vst [vmem:[#allocation209_spill] sm:$0xff] %v9584_v58  ;;  %v9603_v57 = vrot.slane %v266_v62, %v9572_v6  ;;  %v9619_v58 = vld [vmem:[%s11792_s6 + $0x3] sm:$0x7]  ;;  %s9648_s5 = smov 0  }
  0x9b   :  { %12249 = vst [vmem:[#allocation210_spill] sm:$0xff] %v9586_v59  ;;  %12250 = vst [vmem:[#allocation211_spill] sm:$0xff] %v9588_v60  ;;  %v9606_v59 = vrot.slane %v266_v62, %v9575_v0  ;;  %v9609_v60 = vrot.slane %v266_v62, %v9578_v2  ;;  %v363_v1 = vld [vmem:[#allocation2] sm:$0xff]   ;;  %v9625_v62 = vrot.slane %v9600_v3, %v9578_v2 }
  0x9c   :  { %12251 = vst [vmem:[#allocation212_spill] sm:$0xff] %v9590_v61  ;;  %12252 = vst [vmem:[#allocation213_spill] sm:$0xff] %v9592_v4  ;;  %v301_v61 = vld [vmem:[%s11792_s6] sm:$0x7] }
  0x9d   :  { %12253 = vst [vmem:[#allocation214_spill] sm:$0xff] %v9600_v3  ;;  %12254 = vst [vmem:[#allocation215_spill] sm:$0xff] %v9603_v57  ;;  %v9631_v4 = vrot.slane %v301_v61, %v9575_v0  ;;  %v9634_v63 = vrot.slane %v301_v61, %v9578_v2  ;;  %v9642_v3 = vrot.slane %v9619_v58, %v9578_v2 }
  0x9e   :  { %12255 = vst [vmem:[#allocation216_spill] sm:$0xff] %v9606_v59  ;;  %12256 = vst [vmem:[#allocation217_spill] sm:$0xff] %v9609_v60  ;;  %v9628_v59 = vrot.slane %v301_v61, %v9572_v6  ;;  %v364_v60 = vld [vmem:[#allocation2 + $0x8] sm:$0xff]  }
  0x9f   :  { %12257 = vst [vmem:[#allocation218_spill] sm:$0xff] %v9619_v58  ;;  %12258 = vst [vmem:[#allocation219_spill] sm:$0xff] %v9625_v62 }
  0xa0   :  { %12259 = vst [vmem:[#allocation220_spill] sm:$0xff] %v9628_v59  ;;  %12260 = vst [vmem:[#allocation221_spill] sm:$0xff] %v9631_v4 }
  0xa1   :  { %12261 = vst [vmem:[#allocation222_spill] sm:$0xff] %v9634_v63  ;;  %12262 = vst [vmem:[#allocation223_spill] sm:$0xff] %v9642_v3 }
  0xa2 LB: > { %v12263_v0 = vld [vmem:[#allocation205_spill] sm:$0xff]  ;;  %v12264_v6 = vld [vmem:[#allocation204_spill] sm:$0xff]  ;;  %v12265_v2 = vld [vmem:[#allocation206_spill] sm:$0xff]  ;;  %12268 = vst [vmem:[#allocation224_spill] sm:$0xff] %v9061_v60  ;;  %6025 = vmatprep.mubr.f32.mxu1 %v9065_v1  ;;  %vm525_vm0 = vcmask 130048   ;;  %s370_s5 = sadd.s32 1, %s9069_s5   ;;  %v9065_v1 = vphi %v363_v1, %v12967_v1   ;;  %v9061_v60 = vphi %v364_v60, %v12966_v60   ;;  %s9069_s5 = sphi %s9648_s5, %s370_s5  }
  0xa3   : > { %v12266_v8 = vld [vmem:[#allocation18_spill] sm:$0xff]  ;;  %v12267_v7 = vld [vmem:[#allocation17_spill] sm:$0xff]  ;;  %12269 = vst [vmem:[#allocation225_spill] sm:$0xff] %v9065_v1  ;;  %v12270_v10 = vld [vmem:[#allocation20_spill] sm:$0xff]  ;;  %p367_p10 = scmp.ge.s32.totalorder %s370_s5, 2  }
  0xa4   : > { %v12271_v13 = vld [vmem:[#allocation23_spill] sm:$0xff]  ;;  %v12272_v11 = vld [vmem:[#allocation21_spill] sm:$0xff]  ;;  %v12273_v14 = vld [vmem:[#allocation24_spill] sm:$0xff]  ;;  %s9087_s6 = smov (%p367_p10), [#allocation8]  }
  0xa5   : > { %v6875_v61 = vpack.c.bf16 %v12271_v13, %v12270_v10  ;;  %v6907_v57 = vpack.c.bf16 %v12273_v14, %v12272_v11  ;;  %v12274_v9 = vld [vmem:[#allocation19_spill] sm:$0xff]  ;;  %v12275_v12 = vld [vmem:[#allocation22_spill] sm:$0xff]  ;;  %v12277_v19 = vld [vmem:[#allocation29_spill] sm:$0xff]  ;;  %v11809_v11 = vmov 0.0   ;;  %s5445_s30 = sshll.u32 (%p367_p10), %s9087_s6, 4  ;;  %s5446_s30 = int_to_ptr.vmem [resolvable:$true] %s5445_s30 }
  0xa6   : > { %v6877_v5 = vpack.c.bf16 %v12275_v12, %v12274_v9  ;;  %v12276_v16 = vld [vmem:[#allocation26_spill] sm:$0xff]  ;;  %v12278_v17 = vld [vmem:[#allocation27_spill] sm:$0xff]  ;;  %v12280_v15 = vld [vmem:[#allocation25_spill] sm:$0xff]  ;;  %437 = vmatprep.mubr.f32.mxu0 %v11809_v11  ;;  %v9080_v12 = vmov 0   ;;  %s9019_s8 = scalar_lea.vmem (%p367_p10), %s5446_s30, 256  ;;  %p9024_p12 = scmp.lt.s32.totalorder (%p367_p10), %s5446_s30, %s5446_s30 }
  0xa7   : > { %v6879_v62 = vpack.c.bf16 %v12277_v19, %v12276_v16  ;;  %v12279_v20 = vld [vmem:[#allocation30_spill] sm:$0xff]  ;;  %6876 = vmatprep.subr.bf16.mxu0 %v6875_v61  ;;  %6908 = vmatprep.subr.bf16.mxu1 %v6907_v57  ;;  %v12281_v18 = vld [vmem:[#allocation28_spill] sm:$0xff]  ;;  %v12283_v25 = vld [vmem:[#allocation35_spill] sm:$0xff]  ;;  %v9079_v61 = vmov 1   ;;  %p9020_p11 = scmp.ne.s32.totalorder (%p367_p10), %s5446_s30, %s9019_s8  ;;  %p9025_p13 = scmp.lt.s32.totalorder (%p367_p10), %s9019_s8, %s9019_s8 }
  0xa8   : > { %v6911_v3 = vpack.c.bf16 %v12279_v20, %v12278_v17  ;;  %6878 = vmatpush1.bf16.msra.mxu0 %v6877_v5  ;;  %6910 = vmatpush3.bf16.msra.mxu1 %v6907_v57  ;;  %v6881_v58 = vpack.c.bf16 %v12281_v18, %v12280_v15  ;;  %v12282_v22 = vld [vmem:[#allocation32_spill] sm:$0xff]  ;;  %v12284_v23 = vld [vmem:[#allocation33_spill] sm:$0xff]  ;;  %v12286_v21 = vld [vmem:[#allocation31_spill] sm:$0xff] }
  0xa9   : > { %6880 = vmatprep.subr.bf16.mxu0 %v6879_v62  ;;  %v6883_v10 = vpack.c.bf16 %v12283_v25, %v12282_v22  ;;  %v12285_v26 = vld [vmem:[#allocation36_spill] sm:$0xff]  ;;  %v12287_v24 = vld [vmem:[#allocation34_spill] sm:$0xff]  ;;  %v12289_v31 = vld [vmem:[#allocation41_spill] sm:$0xff]  ;;  %8621 = vset.pattern.permute.xlu1 %v9079_v61  ;;  %p9026_p0 = por (%p367_p10), %p9025_p13, %p9024_p12 }
  0xaa   : > { %6912 = vmatprep.subr.bf16.mxu1 %v6911_v3  ;;  %v6915_v9 = vpack.c.bf16 %v12285_v26, %v12284_v23  ;;  %v6885_v5 = vpack.c.bf16 %v12287_v24, %v12286_v21  ;;  %v12288_v28 = vld [vmem:[#allocation38_spill] sm:$0xff]  ;;  %v12290_v29 = vld [vmem:[#allocation39_spill] sm:$0xff]  ;;  %8620 = vset.pattern.permute.xlu0 %v9080_v12  ;;  %v12292_v27 = vld [vmem:[#allocation37_spill] sm:$0xff] }
  0xab   : > { %v6887_v57 = vpack.c.bf16 %v12289_v31, %v12288_v28  ;;  %v12291_v32 = vld [vmem:[#allocation42_spill] sm:$0xff]  ;;  %1281 = vperm.xlu1 %8621, %v12267_v7   ;;  %686 = vperm.xlu0 %8620, %v12267_v7   ;;  %v12293_v30 = vld [vmem:[#allocation40_spill] sm:$0xff]  ;;  %v12295_v37 = vld [vmem:[#allocation47_spill] sm:$0xff]  ;;  %p9027_p1 = pnand (%p367_p10), %p9026_p0, %p9020_p11 }
  0xac   : > { %6882 = vmatpush1.bf16.msra.mxu0 %v6881_v58  ;;  %6914 = vmatpush3.bf16.msra.mxu1 %v6911_v3  ;;  %v6919_v62 = vpack.c.bf16 %v12291_v32, %v12290_v29  ;;  %v6889_v3 = vpack.c.bf16 %v12293_v30, %v12292_v27  ;;  %v12294_v34 = vld [vmem:[#allocation44_spill] sm:$0xff]  ;;  %v12296_v35 = vld [vmem:[#allocation45_spill] sm:$0xff]  ;;  %v12298_v33 = vld [vmem:[#allocation43_spill] sm:$0xff] }
  0xad   : > { %6884 = vmatprep.subr.bf16.mxu0 %v6883_v10  ;;  %6916 = vmatprep.subr.bf16.mxu1 %v6915_v9  ;;  %v6891_v10 = vpack.c.bf16 %v12295_v37, %v12294_v34  ;;  %v12297_v38 = vld [vmem:[#allocation48_spill] sm:$0xff]  ;;  %v12299_v36 = vld [vmem:[#allocation46_spill] sm:$0xff]  ;;  %v12301_v43 = vld [vmem:[#allocation53_spill] sm:$0xff] }
  0xae   : > { %v6923_v58 = vpack.c.bf16 %v12297_v38, %v12296_v35  ;;  %v12300_v40 = vld [vmem:[#allocation50_spill] sm:$0xff]  ;;  %v12302_v41 = vld [vmem:[#allocation51_spill] sm:$0xff]  ;;  %v12304_v39 = vld [vmem:[#allocation49_spill] sm:$0xff] }
  0xaf   : > { %1285 = vperm.xlu1 %8621, %v12266_v8   ;;  %691 = vperm.xlu0 %8620, %v12266_v8   ;;  %v6895_v12 = vpack.c.bf16 %v12301_v43, %v12300_v40  ;;  %v12303_v44 = vld [vmem:[#allocation54_spill] sm:$0xff]  ;;  %v12305_v42 = vld [vmem:[#allocation52_spill] sm:$0xff]  ;;  %v12307_v49 = vld [vmem:[#allocation59_spill] sm:$0xff] }
  0xb0   : > { %6886 = vmatpush1.bf16.msra.mxu0 %v6885_v5  ;;  %6918 = vmatpush3.bf16.msra.mxu1 %v6915_v9  ;;  %v6893_v9 = vpack.c.bf16 %v12299_v36, %v12298_v33  ;;  %v6927_v5 = vpack.c.bf16 %v12303_v44, %v12302_v41  ;;  %v6897_v61 = vpack.c.bf16 %v12305_v42, %v12304_v39  ;;  %v12306_v46 = vld [vmem:[#allocation56_spill] sm:$0xff]  ;;  %v12308_v47 = vld [vmem:[#allocation57_spill] sm:$0xff]  ;;  %v12310_v45 = vld [vmem:[#allocation55_spill] sm:$0xff] }
  0xb1   : > { %6888 = vmatprep.subr.bf16.mxu0 %v6887_v57  ;;  %6920 = vmatprep.subr.bf16.mxu1 %v6919_v62  ;;  %v9081_v57 = vmov 2   ;;  %v12309_v50 = vld [vmem:[#allocation60_spill] sm:$0xff]  ;;  %v12311_v48 = vld [vmem:[#allocation58_spill] sm:$0xff]  ;;  %v12313_v55 = vld [vmem:[#allocation65_spill] sm:$0xff] }
  0xb2   : > { %v12312_v52 = vld [vmem:[#allocation62_spill] sm:$0xff]  ;;  %v12314_v53 = vld [vmem:[#allocation63_spill] sm:$0xff]  ;;  %v12316_v51 = vld [vmem:[#allocation61_spill] sm:$0xff] }
  0xb3   : > { %8623 = vset.pattern.permute.xlu1 %v9081_v57  ;;  %8622 = vset.pattern.permute.xlu0 %v9081_v57  ;;  %v12315_v56 = vld [vmem:[#allocation66_spill] sm:$0xff]  ;;  %v12317_v54 = vld [vmem:[#allocation64_spill] sm:$0xff]  ;;  %v9083_v57 = vmov 4   ;;  %v12324_v15 = vld [vmem:[#allocation119_spill] sm:$0xff] }
  0xb4   : > { %6890 = vmatpush1.bf16.msra.mxu0 %v6889_v3  ;;  %6922 = vmatpush3.bf16.msra.mxu1 %v6919_v62  ;;  %v6899_v62 = vpack.c.bf16 %v12307_v49, %v12306_v46  ;;  %v6931_v3 = vpack.c.bf16 %v12309_v50, %v12308_v47  ;;  %v12323_v14 = vld [vmem:[#allocation116_spill] sm:$0xff]  ;;  %v12331_v19 = vld [vmem:[#allocation118_spill] sm:$0xff]  ;;  %v12362_v28 = vld [vmem:[#allocation143_spill] sm:$0xff] }
  0xb5   : > { %6892 = vmatprep.subr.bf16.mxu0 %v6891_v10  ;;  %6924 = vmatprep.subr.bf16.mxu1 %v6923_v58  ;;  %v6901_v10 = vpack.c.bf16 %v12311_v48, %v12310_v45  ;;  %v9756_v16 = vpack.c.bf16 %v12324_v15, %v12323_v14  ;;  %v12329_v18 = vld [vmem:[#allocation16_spill] sm:$0xff]  ;;  %v12333_v14 = vld [vmem:[#allocation122_spill] sm:$0xff]  ;;  %v12334_v15 = vld [vmem:[#allocation125_spill] sm:$0xff] }
  0xb6   : > { %1879 = vperm.xlu1 %8623, %v12266_v8   ;;  %1875 = vperm.xlu0 %8622, %v12267_v7   ;;  %v9773_v21 = vpack.c.bf16 %v12334_v15, %v12333_v14  ;;  %v12343_v14 = vld [vmem:[#allocation128_spill] sm:$0xff]  ;;  %v12344_v15 = vld [vmem:[#allocation131_spill] sm:$0xff]  ;;  %v12365_v29 = vld [vmem:[#allocation150_spill] sm:$0xff] }
  0xb7   : > { %12325 = vst [vmem:[#allocation228_spill] sm:$0xff] %v9756_v16  ;;  %v9792_v23 = vpack.c.bf16 %v12344_v15, %v12343_v14  ;;  %v12352_v14 = vld [vmem:[#allocation134_spill] sm:$0xff]  ;;  %v12353_v15 = vld [vmem:[#allocation137_spill] sm:$0xff]  ;;  %v12361_v27 = vld [vmem:[#allocation140_spill] sm:$0xff] }
  0xb8   : > { %6894 = vmatpush1.bf16.msra.mxu0 %v6893_v9  ;;  %6926 = vmatpush3.bf16.msra.mxu1 %v6923_v58  ;;  %v6903_v58 = vpack.c.bf16 %v12313_v55, %v12312_v52  ;;  %v6935_v9 = vpack.c.bf16 %v12315_v56, %v12314_v53  ;;  %12335 = vst [vmem:[#allocation231_spill] sm:$0xff] %v9773_v21  ;;  %v12368_v30 = vld [vmem:[#allocation142_spill] sm:$0xff]  ;;  %v12371_v31 = vld [vmem:[#allocation149_spill] sm:$0xff]  ;;  %v12374_v32 = vld [vmem:[#allocation156_spill] sm:$0xff] }
  0xb9   : > { %6896 = vmatprep.subr.bf16.mxu0 %v6895_v12  ;;  %6928 = vmatprep.subr.bf16.mxu1 %v6927_v5  ;;  %v9082_v12 = vmov 3   ;;  %12345 = vst [vmem:[#allocation234_spill] sm:$0xff] %v9792_v23  ;;  %v9811_v25 = vpack.c.bf16 %v12353_v15, %v12352_v14  ;;  %v9827_v14 = vpack.c.bf16 %v12362_v28, %v12361_v27  ;;  %v12364_v15 = vld [vmem:[#allocation147_spill] sm:$0xff]  ;;  %v12373_v28 = vld [vmem:[#allocation153_spill] sm:$0xff]  ;;  %v12377_v33 = vld [vmem:[#allocation148_spill] sm:$0xff] }
  0xba   : > { %8624 = vset.pattern.permute.xlu1 %v9082_v12  ;;  %8625 = vset.pattern.permute.xlu0 %v9082_v12  ;;  %v12380_v34 = vld [vmem:[#allocation155_spill] sm:$0xff]  ;;  %v12383_v35 = vld [vmem:[#allocation162_spill] sm:$0xff]  ;;  %v12389_v37 = vld [vmem:[#allocation161_spill] sm:$0xff] }
  0xbb   : > { %2469 = vperm.xlu1 %8624, %v12267_v7   ;;  %2473 = vperm.xlu0 %8625, %v12266_v8   ;;  %12354 = vst [vmem:[#allocation237_spill] sm:$0xff] %v9811_v25  ;;  %12363 = vst [vmem:[#allocation240_spill] sm:$0xff] %v9827_v14  ;;  %v12386_v36 = vld [vmem:[#allocation154_spill] sm:$0xff]  ;;  %v12401_v39 = vld [vmem:[#allocation77_spill] sm:$0xff] }
  0xbc   : > { %6898 = vmatpush1.bf16.msra.mxu0 %v6897_v61  ;;  %6930 = vmatpush3.bf16.msra.mxu1 %v6927_v5  ;;  %v6905_v5 = vpack.c.bf16 %v12317_v54, %v12316_v51  ;;  %v9084_v61 = vmov 5   ;;  %v12400_v38 = vld [vmem:[#allocation74_spill] sm:$0xff]  ;;  %v12403_v41 = vld [vmem:[#allocation69_spill] sm:$0xff]  ;;  %v12404_v42 = vld [vmem:[#allocation72_spill] sm:$0xff] }
  0xbd   : > { %6900 = vmatprep.subr.bf16.mxu0 %v6899_v62  ;;  %6932 = vmatprep.subr.bf16.mxu1 %v6931_v3  ;;  %v9085_v62 = vmov 6   ;;  %v9904_v40 = vpack.c.bf16 %v12401_v39, %v12400_v38  ;;  %v9908_v43 = vpack.c.bf16 %v12404_v42, %v12403_v41  ;;  %v12406_v44 = vld [vmem:[#allocation73_spill] sm:$0xff]  ;;  %v12407_v45 = vld [vmem:[#allocation76_spill] sm:$0xff]  ;;  %v12412_v39 = vld [vmem:[#allocation75_spill] sm:$0xff] }
  0xbe   : > { %v12415_v42 = vld [vmem:[#allocation79_spill] sm:$0xff]  ;;  %v12416_v46 = vld [vmem:[#allocation82_spill] sm:$0xff]  ;;  %v12437_v55 = vld [vmem:[#allocation101_spill] sm:$0xff] }
  0xbf   : > { %8626 = vset.pattern.permute.xlu1 %v9083_v57  ;;  %8627 = vset.pattern.permute.xlu0 %v9084_v61  ;;  %12402 = vst [vmem:[#allocation253_spill] sm:$0xff] %v9904_v40  ;;  %12405 = vst [vmem:[#allocation254_spill] sm:$0xff] %v9908_v43  ;;  %v12436_v54 = vld [vmem:[#allocation98_spill] sm:$0xff]  ;;  %v12440_v56 = vld [vmem:[#allocation96_spill] sm:$0xff] }
  0xc0   : > { %6902 = vmatpush1.bf16.msra.mxu0 %v6901_v10  ;;  %6934 = vmatpush3.bf16.msra.mxu1 %v6931_v3  ;;  %v9086_v3 = vmov 7   ;;  %v12318_v10 = vld [vmem:[#allocation15_spill] sm:$0xff] }
  0xc1   : > { %6904 = vmatprep.subr.bf16.mxu0 %v6903_v58  ;;  %6936 = vmatprep.subr.bf16.mxu1 %v6935_v9 }
  0xc2   : > { %3063 = vperm.xlu1 %8626, %v12267_v7   ;;  %3657 = vperm.xlu0 %8627, %v12267_v7  }
  0xc4   : > { %6906 = vmatpush1.bf16.msra.mxu0 %v6905_v5  ;;  %6938 = vmatpush3.bf16.msra.mxu1 %v6935_v9 }
  0xc6   : > { %3067 = vperm.xlu1 %8626, %v12266_v8   ;;  %8630 = vset.pattern.permute.xlu0 %v9085_v62 }
  0xc7   : > { %438 = vmatmul.mubr.f32.vlgmr.msra.gmra.mrb[0].mxu0 %v9065_v1  ;;  %6026 = vmatmul.mubr.f32.vlgmr.msra.gmra.mrb[0].mxu1 %v9061_v60 }
  0xc8   : > { %443 = vmatprep.mubr.f32.mxu0 %v11809_v11  ;;  %596 = vmatprep.mubr.f32.mxu1 %v11809_v11 }
  0xc9   : > { %4255 = vperm.xlu0 %8630, %v12266_v8  }
  0xca   : > { %8628 = vset.pattern.permute.xlu1 %v9084_v61  ;;  %v12320_v61 = vld [vmem:[#allocation117_spill] sm:$0xff] }
  0xcb   : > { %444 = vmatmul.mubr.f32.gmra.mrb[2].mxu0 %v9061_v60  ;;  %3661 = vperm.xlu1 %8628, %v12266_v8  }
  0xcc   : > { %6032 = vmatprep.mubr.msk.f32.mxu0 %vm525_vm0, %v12318_v10 }
  0xcd   : > { %8632 = vset.pattern.permute.xlu0 %v9086_v3 }
  0xcf   : > { %8629 = vset.pattern.permute.xlu1 %v9085_v62  ;;  %v12321_v62 = vld [vmem:[#allocation120_spill] sm:$0xff] }
  0xd0   : > { %4251 = vperm.xlu1 %8629, %v12267_v7  }
  0xd4   : > { %8631 = vset.pattern.permute.xlu1 %v9086_v3  ;;  %v9744_v3 = vpack.c.bf16 %v12321_v62, %v12320_v61  ;;  %v12326_v61 = vld [vmem:[#allocation123_spill] sm:$0xff]  ;;  %v12327_v62 = vld [vmem:[#allocation126_spill] sm:$0xff] }
  0xd5   : > { %4845 = vperm.xlu1 %8631, %v12267_v7   ;;  %v9761_v17 = vpack.c.bf16 %v12327_v62, %v12326_v61  ;;  %v12336_v61 = vld [vmem:[#allocation129_spill] sm:$0xff] }
  0xd6   : > { %12322 = vst [vmem:[#allocation227_spill] sm:$0xff] %v9744_v3 }
  0xd7   : > { %12328 = vst [vmem:[#allocation229_spill] sm:$0xff] %v9761_v17 }
  0xd9   : > { %4849 = vperm.xlu1 %8631, %v12266_v8  }
 0x19a   : > { %v9732_v58 = vpop.f32.mrb[0].mxu0  ;;  %v9734_v9 = vpop.f32.mrb[0].mxu1 }
 0x19b   : > { %v9736_v12 = vpop.f32.mrb[1].mxu0  ;;  %v9738_v5 = vpop.f32.mrb[1].mxu1 }
 0x19c   : > { %12319 = vst [vmem:[#allocation226_spill] sm:$0xff] %v9738_v5  ;;  %v6943_v57 = vpack.c.bf16 %v9734_v9, %v9738_v5 }
 0x19e   : > { %v9746_v11 = vpop.f32.mrb[2].mxu0  ;;  %6944 = vmatprep.subr.bf16.mxu0 %v6943_v57 }
 0x19f   : > { %v9748_v7 = vpop.f32.mrb[3].mxu0  ;;  %6946 = vmatpush3.bf16.msra.mxu0 %v6943_v57  ;;  %v6941_v8 = vpack.c.bf16 %v9746_v11, %v9732_v58  ;;  %v12330_v57 = vld [vmem:[#allocation115_spill] sm:$0xff] }
 0x1a0   : > { %v6939_v13 = vpack.c.bf16 %v9748_v7, %v9736_v12  ;;  %6980 = vmatprep.subr.bf16.mxu0 %v9744_v3  ;;  %v9767_v20 = vpack.c.bf16 %v12331_v19, %v12330_v57  ;;  %v12340_v19 = vld [vmem:[#allocation121_spill] sm:$0xff]  ;;  %v12341_v57 = vld [vmem:[#allocation124_spill] sm:$0xff] }
 0x1a1   : > { %v9787_v22 = vpack.c.bf16 %v12341_v57, %v12340_v19  ;;  %v12349_v19 = vld [vmem:[#allocation127_spill] sm:$0xff]  ;;  %v12350_v57 = vld [vmem:[#allocation130_spill] sm:$0xff] }
 0x1a2   : > { %6940 = vmatprep.subr.bf16.mxu1 %v6939_v13  ;;  %6033 = vmatmul.mubr.msk.f32.vlgmr.msra.gmra.mrb[4].mxu0 %vm525_vm0, %v12329_v18  ;;  %12332 = vst [vmem:[#allocation230_spill] sm:$0xff] %v9767_v20  ;;  %v12337_v13 = vld [vmem:[#allocation132_spill] sm:$0xff]  ;;  %v9805_v24 = vpack.c.bf16 %v12350_v57, %v12349_v19  ;;  %v12358_v19 = vld [vmem:[#allocation133_spill] sm:$0xff] }
 0x1a3   : > { %6942 = vmatpush1.bf16.msra.mxu1 %v6941_v8  ;;  %6982 = vmatpush3.bf16.msra.mxu0 %v9744_v3  ;;  %v9778_v62 = vpack.c.bf16 %v12337_v13, %v12336_v61  ;;  %v12339_v8 = vmov 0.0   ;;  %12342 = vst [vmem:[#allocation233_spill] sm:$0xff] %v9787_v22  ;;  %v12346_v61 = vld [vmem:[#allocation135_spill] sm:$0xff]  ;;  %v12347_v13 = vld [vmem:[#allocation138_spill] sm:$0xff]  ;;  %v12359_v57 = vld [vmem:[#allocation136_spill] sm:$0xff] }
 0x1a4   : > { %6948 = vmatprep.subr.bf16.mxu1 %v9756_v16  ;;  %6984 = vmatprep.subr.bf16.mxu0 %v9761_v17  ;;  %12351 = vst [vmem:[#allocation236_spill] sm:$0xff] %v9805_v24  ;;  %v9822_v26 = vpack.c.bf16 %v12359_v57, %v12358_v19  ;;  %v12370_v57 = vld [vmem:[#allocation146_spill] sm:$0xff] }
 0x1a5   : > { %12338 = vst [vmem:[#allocation232_spill] sm:$0xff] %v9778_v62  ;;  %6067 = vmatprep.mubr.f32.mxu0 %v9065_v1  ;;  %v9843_v27 = vpack.c.bf16 %v12371_v31, %v12370_v57  ;;  %v12382_v57 = vld [vmem:[#allocation159_spill] sm:$0xff] }
 0x1a6   : > { %5471 = vmatmul.mubr.msk.f32.vlgmr.msra.gmra.mrb[2].mxu1 %vm525_vm0, %v12318_v10  ;;  %v9798_v10 = vpack.c.bf16 %v12347_v13, %v12346_v61  ;;  %v12355_v61 = vld [vmem:[#allocation141_spill] sm:$0xff]  ;;  %v12356_v13 = vld [vmem:[#allocation144_spill] sm:$0xff]  ;;  %12360 = vst [vmem:[#allocation239_spill] sm:$0xff] %v9822_v26 }
 0x1a7   : > { %6950 = vmatpush1.bf16.msra.mxu1 %v9767_v20  ;;  %602 = vmatprep.mubr.f32.mxu1 %v12339_v8  ;;  %12372 = vst [vmem:[#allocation243_spill] sm:$0xff] %v9843_v27 }
 0x1a8   : > { %6952 = vmatprep.subr.bf16.mxu1 %v9773_v21  ;;  %6986 = vmatpush3.bf16.msra.mxu0 %v9761_v17  ;;  %12348 = vst [vmem:[#allocation235_spill] sm:$0xff] %v9798_v10 }
 0x1a9   : > { %6988 = vmatprep.subr.bf16.mxu0 %v9778_v62 }
 0x1aa   : > { %5472 = vmatmul.mubr.msk.f32.gmra.mrb[4].mxu1 %vm525_vm0, %v12329_v18  ;;  %v9817_v18 = vpack.c.bf16 %v12356_v13, %v12355_v61  ;;  %v9833_v61 = vpack.c.bf16 %v12365_v29, %v12364_v15  ;;  %v12367_v13 = vld [vmem:[#allocation139_spill] sm:$0xff]  ;;  %v9849_v29 = vpack.c.bf16 %v12374_v32, %v12373_v28  ;;  %v12376_v15 = vld [vmem:[#allocation145_spill] sm:$0xff]  ;;  %v9865_v32 = vpack.c.bf16 %v12383_v35, %v12382_v57 }
 0x1ab   : > { %6954 = vmatpush1.bf16.msra.mxu1 %v9787_v22  ;;  %796 = vmatprep.mubr.f32.mxu1 %v12339_v8  ;;  %v9838_v19 = vpack.c.bf16 %v12368_v30, %v12367_v13  ;;  %v9854_v30 = vpack.c.bf16 %v12377_v33, %v12376_v15  ;;  %v12379_v13 = vld [vmem:[#allocation152_spill] sm:$0xff]  ;;  %v12385_v28 = vld [vmem:[#allocation151_spill] sm:$0xff]  ;;  %v12388_v15 = vld [vmem:[#allocation158_spill] sm:$0xff] }
 0x1ac   : > { %6956 = vmatprep.subr.bf16.mxu1 %v9792_v23  ;;  %6990 = vmatpush3.bf16.msra.mxu0 %v9778_v62  ;;  %12357 = vst [vmem:[#allocation238_spill] sm:$0xff] %v9817_v18  ;;  %12366 = vst [vmem:[#allocation241_spill] sm:$0xff] %v9833_v61  ;;  %v9859_v31 = vpack.c.bf16 %v12380_v34, %v12379_v13  ;;  %v9870_v33 = vpack.c.bf16 %v12386_v36, %v12385_v28  ;;  %v12391_v35 = vld [vmem:[#allocation157_spill] sm:$0xff]  ;;  %v12392_v13 = vld [vmem:[#allocation160_spill] sm:$0xff] }
 0x1ad   : > { %6992 = vmatprep.subr.bf16.mxu0 %v9798_v10  ;;  %12369 = vst [vmem:[#allocation242_spill] sm:$0xff] %v9838_v19  ;;  %12375 = vst [vmem:[#allocation244_spill] sm:$0xff] %v9849_v29  ;;  %v9875_v34 = vpack.c.bf16 %v12389_v37, %v12388_v15  ;;  %v9882_v57 = vpack.c.bf16 %v12392_v13, %v12391_v35  ;;  %v12394_v36 = vld [vmem:[#allocation68_spill] sm:$0xff]  ;;  %v12395_v37 = vld [vmem:[#allocation71_spill] sm:$0xff] }
 0x1ae   : > { %12378 = vst [vmem:[#allocation245_spill] sm:$0xff] %v9854_v30  ;;  %12381 = vst [vmem:[#allocation246_spill] sm:$0xff] %v9859_v31  ;;  %v9894_v28 = vpack.c.bf16 %v12395_v37, %v12394_v36  ;;  %v12397_v15 = vld [vmem:[#allocation67_spill] sm:$0xff]  ;;  %v12398_v35 = vld [vmem:[#allocation70_spill] sm:$0xff]  ;;  %v9912_v36 = vpack.c.bf16 %v12407_v45, %v12406_v44  ;;  %v9928_v44 = vpack.c.bf16 %v12416_v46, %v12415_v42  ;;  %v9930_v45 = vpop.permute.xlu1 %1281 }
 0x1af   : > { %6958 = vmatpush1.bf16.msra.mxu1 %v9805_v24  ;;  %12384 = vst [vmem:[#allocation247_spill] sm:$0xff] %v9865_v32  ;;  %12387 = vst [vmem:[#allocation248_spill] sm:$0xff] %v9870_v33  ;;  %v9898_v13 = vpack.c.bf16 %v12398_v35, %v12397_v15  ;;  %v12409_v37 = vld [vmem:[#allocation80_spill] sm:$0xff]  ;;  %v12410_v15 = vld [vmem:[#allocation83_spill] sm:$0xff] }
 0x1b0   : > { %6960 = vmatprep.subr.bf16.mxu1 %v9811_v25  ;;  %6994 = vmatpush3.bf16.msra.mxu0 %v9798_v10  ;;  %12390 = vst [vmem:[#allocation249_spill] sm:$0xff] %v9875_v34  ;;  %12393 = vst [vmem:[#allocation250_spill] sm:$0xff] %v9882_v57  ;;  %v9920_v38 = vpack.c.bf16 %v12410_v15, %v12409_v37  ;;  %v12413_v35 = vld [vmem:[#allocation78_spill] sm:$0xff]  ;;  %v12419_v15 = vld [vmem:[#allocation89_spill] sm:$0xff] }
 0x1b1   : > { %6996 = vmatprep.subr.bf16.mxu0 %v9817_v18  ;;  %12396 = vst [vmem:[#allocation251_spill] sm:$0xff] %v9894_v28  ;;  %12399 = vst [vmem:[#allocation252_spill] sm:$0xff] %v9898_v13  ;;  %v9924_v41 = vpack.c.bf16 %v12413_v35, %v12412_v39  ;;  %v12418_v37 = vld [vmem:[#allocation86_spill] sm:$0xff]  ;;  %v12421_v39 = vld [vmem:[#allocation81_spill] sm:$0xff] }
 0x1b2   : > { %12408 = vst [vmem:[#allocation255_spill] sm:$0xff] %v9912_v36  ;;  %12411 = vst [vmem:[#allocation256_spill] sm:$0xff] %v9920_v38  ;;  %v9938_v47 = vpack.c.bf16 %v12419_v15, %v12418_v37  ;;  %v12422_v35 = vld [vmem:[#allocation84_spill] sm:$0xff]  ;;  %v12424_v46 = vld [vmem:[#allocation85_spill] sm:$0xff]  ;;  %v9952_v50 = vpop.permute.xlu1 %1285 }
 0x1b3   : > { %6962 = vmatpush1.bf16.msra.mxu1 %v9822_v26  ;;  %12414 = vst [vmem:[#allocation257_spill] sm:$0xff] %v9924_v41  ;;  %12417 = vst [vmem:[#allocation258_spill] sm:$0xff] %v9928_v44  ;;  %v9942_v48 = vpack.c.bf16 %v12422_v35, %v12421_v39  ;;  %v12425_v42 = vld [vmem:[#allocation88_spill] sm:$0xff]  ;;  %v12428_v15 = vld [vmem:[#allocation95_spill] sm:$0xff] }
 0x1b4   : > { %6964 = vmatprep.subr.bf16.mxu1 %v9827_v14  ;;  %6998 = vmatpush3.bf16.msra.mxu0 %v9817_v18  ;;  %12420 = vst [vmem:[#allocation259_spill] sm:$0xff] %v9938_v47  ;;  %v9946_v49 = vpack.c.bf16 %v12425_v42, %v12424_v46  ;;  %v12427_v37 = vld [vmem:[#allocation92_spill] sm:$0xff]  ;;  %v12430_v39 = vld [vmem:[#allocation87_spill] sm:$0xff]  ;;  %v12431_v35 = vld [vmem:[#allocation90_spill] sm:$0xff] }
 0x1b5   : > { %7000 = vmatprep.subr.bf16.mxu0 %v9833_v61  ;;  %12423 = vst [vmem:[#allocation260_spill] sm:$0xff] %v9942_v48  ;;  %v9956_v51 = vpack.c.bf16 %v12428_v15, %v12427_v37  ;;  %v9960_v52 = vpack.c.bf16 %v12431_v35, %v12430_v39  ;;  %v12433_v46 = vld [vmem:[#allocation91_spill] sm:$0xff]  ;;  %v12434_v42 = vld [vmem:[#allocation94_spill] sm:$0xff]  ;;  %v9972_v37 = vpack.c.bf16 %v12437_v55, %v12436_v54  ;;  %v12439_v15 = vld [vmem:[#allocation93_spill] sm:$0xff] }
 0x1b6   : > { %12426 = vst [vmem:[#allocation261_spill] sm:$0xff] %v9946_v49  ;;  %v9964_v53 = vpack.c.bf16 %v12434_v42, %v12433_v46  ;;  %v9976_v39 = vpack.c.bf16 %v12440_v56, %v12439_v15  ;;  %v12442_v35 = vld [vmem:[#allocation97_spill] sm:$0xff]  ;;  %v1880_v42 = vpop.permute.xlu1 %1879  ;;  %v12446_v54 = vld [vmem:[#allocation107_spill] sm:$0xff]  ;;  %v12449_v56 = vld [vmem:[#allocation102_spill] sm:$0xff] }
 0x1b7   : > { %6966 = vmatpush1.bf16.msra.mxu1 %v9838_v19  ;;  %12429 = vst [vmem:[#allocation262_spill] sm:$0xff] %v9956_v51  ;;  %12432 = vst [vmem:[#allocation263_spill] sm:$0xff] %v9960_v52 }
 0x1b8   : > { %6968 = vmatprep.subr.bf16.mxu1 %v9843_v27  ;;  %7002 = vmatpush3.bf16.msra.mxu0 %v9833_v61  ;;  %12435 = vst [vmem:[#allocation264_spill] sm:$0xff] %v9964_v53  ;;  %12438 = vst [vmem:[#allocation265_spill] sm:$0xff] %v9972_v37  ;;  %v10094_v27 = vmul.f32 %v9952_v50, %v9748_v7 }
 0x1b9   : > { %7004 = vmatprep.subr.bf16.mxu0 %v9849_v29  ;;  %12441 = vst [vmem:[#allocation266_spill] sm:$0xff] %v9976_v39 }
 0x1bb   : > { %6970 = vmatpush1.bf16.msra.mxu1 %v9854_v30 }
 0x1bc   : > { %6972 = vmatprep.subr.bf16.mxu1 %v9859_v31  ;;  %7006 = vmatpush3.bf16.msra.mxu0 %v9849_v29  ;;  %v10081_v31 = vmul.f32 %v9952_v50, %v9746_v11 }
 0x1bd   : > { %7008 = vmatprep.subr.bf16.mxu0 %v9865_v32 }
 0x1bf   : > { %6974 = vmatpush1.bf16.msra.mxu1 %v9870_v33 }
 0x1c0   : > { %6976 = vmatprep.subr.bf16.mxu1 %v9875_v34  ;;  %7010 = vmatpush3.bf16.msra.mxu0 %v9865_v32  ;;  %v1293_v32 = vmul.f32 %v9734_v9, %v9952_v50  ;;  %v1887_v34 = vmul.f32 %v9734_v9, %v1880_v42 }
 0x1c1   : > { %7044 = vmatprep.subr.bf16.mxu0 %v9908_v43 }
 0x1c3   : > { %6978 = vmatpush1.bf16.msra.mxu1 %v9882_v57  ;;  %6068 = vmatmul.mubr.f32.vlgmr.msra.gmra.mrb[6].mxu0 %v9061_v60  ;;  %v10066_v57 = vmul.f32 %v9930_v45, %v9738_v5 }
 0x1c4   : > { %7012 = vmatprep.subr.bf16.mxu1 %v9894_v28  ;;  %7046 = vmatpush3.bf16.msra.mxu0 %v9908_v43  ;;  %v10060_v28 = vmul.f32 %v9930_v45, %v9736_v12 }
 0x1c5   : > { %7048 = vmatprep.subr.bf16.mxu0 %v9924_v41 }
 0x1c6   : > { %797 = vmatmul.mubr.f32.vlgmr.msra.gmra.mrb[6].mxu1 %v9065_v1  ;;  %v12485_v1 = vld [vmem:[#allocation217_spill] sm:$0xff] }
 0x1c7   : > { %802 = vmatprep.mubr.f32.mxu1 %v12339_v8  ;;  %7014 = vmatpush1.bf16.msra.mxu1 %v9898_v13  ;;  %v10056_v13 = vmul.f32 %v9930_v45, %v9732_v58  ;;  %v10084_v45 = vmul.f32 %v1880_v42, %v9746_v11  ;;  %v12486_v63 = vmov %v12485_v1 }
 0x1c8   : > { %7016 = vmatprep.subr.bf16.mxu1 %v9904_v40  ;;  %7050 = vmatpush3.bf16.msra.mxu0 %v9924_v41 }
 0x1c9   : > { %7052 = vmatprep.subr.bf16.mxu0 %v9942_v48 }
 0x1ca   : > { %803 = vmatmul.mubr.f32.gmra.mrb[8].mxu1 %v9061_v60 }
 0x1cb   : > { %996 = vmatprep.mubr.f32.mxu1 %v12339_v8  ;;  %7018 = vmatpush1.bf16.msra.mxu1 %v9912_v36 }
 0x1cc   : > { %7020 = vmatprep.subr.bf16.mxu1 %v9920_v38  ;;  %7054 = vmatpush3.bf16.msra.mxu0 %v9942_v48 }
 0x1cd   : > { %7056 = vmatprep.subr.bf16.mxu0 %v9960_v52 }
 0x1cf   : > { %7022 = vmatpush1.bf16.msra.mxu1 %v9928_v44  ;;  %v12457_v44 = vld [vmem:[#allocation105_spill] sm:$0xff] }
 0x1d0   : > { %7024 = vmatprep.subr.bf16.mxu1 %v9938_v47  ;;  %7058 = vmatpush3.bf16.msra.mxu0 %v9960_v52  ;;  %v12451_v52 = vld [vmem:[#allocation103_spill] sm:$0xff]  ;;  %v12454_v47 = vld [vmem:[#allocation110_spill] sm:$0xff] }
 0x1d1   : > { %7060 = vmatprep.subr.bf16.mxu0 %v9976_v39 }
 0x1d3   : > { %7026 = vmatpush1.bf16.msra.mxu1 %v9946_v49  ;;  %v12443_v49 = vld [vmem:[#allocation100_spill] sm:$0xff] }
 0x1d4   : > { %7028 = vmatprep.subr.bf16.mxu1 %v9956_v51  ;;  %v9980_v46 = vpack.c.bf16 %v12443_v49, %v12442_v35  ;;  %7062 = vmatpush3.bf16.msra.mxu0 %v9976_v39  ;;  %v12448_v51 = vld [vmem:[#allocation99_spill] sm:$0xff]  ;;  %v12452_v49 = vld [vmem:[#allocation106_spill] sm:$0xff] }
 0x1d5   : > { %v9992_v15 = vpack.c.bf16 %v12449_v56, %v12448_v51  ;;  %v9996_v35 = vpack.c.bf16 %v12452_v49, %v12451_v52  ;;  %v12460_v51 = vld [vmem:[#allocation109_spill] sm:$0xff]  ;;  %v12467_v56 = vld [vmem:[#allocation167_spill] sm:$0xff] }
 0x1d6   : > { %12444 = vst [vmem:[#allocation267_spill] sm:$0xff] %v9980_v46 }
 0x1d7   : > { %7030 = vmatpush1.bf16.msra.mxu1 %v9964_v53  ;;  %v12445_v53 = vld [vmem:[#allocation104_spill] sm:$0xff]  ;;  %12450 = vst [vmem:[#allocation269_spill] sm:$0xff] %v9992_v15  ;;  %12453 = vst [vmem:[#allocation270_spill] sm:$0xff] %v9996_v35  ;;  %7064 = vmatprep.subr.bf16.mxu0 %v9992_v15 }
 0x1d8   : > { %7032 = vmatprep.subr.bf16.mxu1 %v9972_v37  ;;  %v9988_v55 = vpack.c.bf16 %v12446_v54, %v12445_v53  ;;  %v12455_v37 = vld [vmem:[#allocation113_spill] sm:$0xff]  ;;  %7066 = vmatpush3.bf16.msra.mxu0 %v9992_v15  ;;  %v12461_v53 = vld [vmem:[#allocation112_spill] sm:$0xff]  ;;  %v2470_v54 = vpop.permute.xlu1 %2469 }
 0x1d9   : > { %v10000_v48 = vpack.c.bf16 %v12455_v37, %v12454_v47  ;;  %v10012_v52 = vpack.c.bf16 %v12461_v53, %v12460_v51  ;;  %v12463_v47 = vld [vmem:[#allocation111_spill] sm:$0xff]  ;;  %v687_v53 = vpop.permute.xlu0 %686  ;;  %v10087_v30 = vmul.f32 %v2470_v54, %v9732_v58  ;;  %v10100_v19 = vmul.f32 %v2470_v54, %v9736_v12 }
 0x1da   : > { %12447 = vst [vmem:[#allocation268_spill] sm:$0xff] %v9988_v55  ;;  %v10052_v43 = vmul.f32 %v687_v53, %v9738_v5 }
 0x1db   : > { %7034 = vmatpush1.bf16.msra.mxu1 %v9980_v46  ;;  %12456 = vst [vmem:[#allocation271_spill] sm:$0xff] %v10000_v48  ;;  %v12458_v46 = vld [vmem:[#allocation108_spill] sm:$0xff]  ;;  %12462 = vst [vmem:[#allocation273_spill] sm:$0xff] %v10012_v52 }
 0x1dc   : > { %v10004_v38 = vpack.c.bf16 %v12458_v46, %v12457_v44  ;;  %7036 = vmatprep.subr.bf16.mxu1 %v9988_v55  ;;  %v12464_v44 = vld [vmem:[#allocation114_spill] sm:$0xff]  ;;  %v12466_v46 = vld [vmem:[#allocation164_spill] sm:$0xff]  ;;  %v3064_v51 = vpop.permute.xlu1 %3063 }
 0x1dd   : > { %v10018_v37 = vpack.c.bf16 %v12464_v44, %v12463_v47  ;;  %v10022_v49 = vpack.c.bf16 %v12467_v56, %v12466_v46  ;;  %v692_v46 = vpop.permute.xlu0 %691  ;;  %v10115_v50 = vmul.f32 %v3064_v51, %v9732_v58 }
 0x1de   : > { %12459 = vst [vmem:[#allocation272_spill] sm:$0xff] %v10004_v38  ;;  %7068 = vmatprep.subr.bf16.mxu0 %v10004_v38  ;;  %v10049_v40 = vmul.f32 %v9734_v9, %v692_v46  ;;  %v10077_v61 = vmul.f32 %v692_v46, %v9746_v11  ;;  %v10090_v18 = vmul.f32 %v692_v46, %v9748_v7 }
 0x1df   : > { %7038 = vmatpush1.bf16.msra.mxu1 %v9996_v35  ;;  %12465 = vst [vmem:[#allocation274_spill] sm:$0xff] %v10018_v37  ;;  %12468 = vst [vmem:[#allocation275_spill] sm:$0xff] %v10022_v49  ;;  %7070 = vmatpush3.bf16.msra.mxu0 %v10004_v38  ;;  %v12470_v35 = vld [vmem:[#allocation168_spill] sm:$0xff]  ;;  %v10112_v46 = vmul.f32 %v2470_v54, %v9738_v5 }
 0x1e0   : > { %7040 = vmatprep.subr.bf16.mxu1 %v10000_v48  ;;  %7072 = vmatprep.subr.bf16.mxu0 %v10018_v37  ;;  %v12469_v48 = vld [vmem:[#allocation165_spill] sm:$0xff]  ;;  %v3068_v44 = vpop.permute.xlu1 %3067 }
 0x1e1   : > { %v10031_v47 = vpack.c.bf16 %v12470_v35, %v12469_v48  ;;  %v10043_v48 = vmul.f32 %v687_v53, %v9732_v58  ;;  %v10046_v35 = vmul.f32 %v687_v53, %v9736_v12  ;;  %v10121_v62 = vmul.f32 %v3068_v44, %v9746_v11 }
 0x1e2   : > { %v10124_v25 = vmul.f32 %v9734_v9, %v3068_v44  ;;  %v10127_v24 = vmul.f32 %v3068_v44, %v9748_v7 }
 0x1e3   : > { %7042 = vmatpush1.bf16.msra.mxu1 %v10012_v52  ;;  %7074 = vmatpush3.bf16.msra.mxu0 %v10018_v37  ;;  %12471 = vst [vmem:[#allocation276_spill] sm:$0xff] %v10031_v47  ;;  %v1876_v52 = vpop.permute.xlu0 %1875 }
 0x1e4   : > { %7076 = vmatprep.subr.bf16.mxu1 %v10022_v49  ;;  %7108 = vmatprep.subr.bf16.mxu0 %v10031_v47  ;;  %v3662_v56 = vpop.permute.xlu1 %3661  ;;  %v10069_v29 = vmul.f32 %v1876_v52, %v9732_v58  ;;  %v10072_v53 = vmul.f32 %v1876_v52, %v9736_v12  ;;  %v1884_v33 = vmul.f32 %v1876_v52, %v9738_v5 }
 0x1e5   : > { %v10097_v52 = vmul.f32 %v1880_v42, %v9748_v7  ;;  %v10118_v42 = vmul.f32 %v3064_v51, %v9736_v12  ;;  %v10139_v23 = vmul.f32 %v3662_v56, %v9746_v11  ;;  %v10142_v22 = vmul.f32 %v9734_v9, %v3662_v56 }
 0x1e6   : > { %v10145_v3 = vmul.f32 %v3662_v56, %v9748_v7 }
 0x1e7   : > { %v2474_v38 = vpop.permute.xlu0 %2473 }
 0x1e8   : > { %v4252_v55 = vpop.permute.xlu1 %4251  ;;  %v10103_v10 = vmul.f32 %v2474_v38, %v9746_v11  ;;  %v10106_v14 = vmul.f32 %v9734_v9, %v2474_v38  ;;  %v10109_v26 = vmul.f32 %v2474_v38, %v9748_v7  ;;  %v10130_v38 = vmul.f32 %v3064_v51, %v9738_v5  ;;  %12475 = vst [vmem:[#allocation280_spill] sm:$0xff] %v10145_v3  ;;  %v12477_v51 = vld [vmem:[#allocation12_spill] sm:$0xff] }
 0x1e9   : > { %v10151_v21 = vsub.s32 3, %v12477_v51  ;;  %v10154_v20 = vmul.f32 %v4252_v55, %v9732_v58  ;;  %v10157_v16 = vmul.f32 %v4252_v55, %v9736_v12  ;;  %v10166_v56 = vmul.f32 %v4252_v55, %v9738_v5 }
 0x1eb   : > { %v3658_v39 = vpop.permute.xlu0 %3657  ;;  %12478 = vst [vmem:[#allocation282_spill] sm:$0xff] %v10154_v20  ;;  %12479 = vst [vmem:[#allocation283_spill] sm:$0xff] %v10157_v16 }
 0x1ec   : > { %v10034_v15 = vpop.permute.xlu1 %4845  ;;  %v10133_v54 = vmul.f32 %v3658_v39, %v9732_v58  ;;  %v10136_v17 = vmul.f32 %v3658_v39, %v9736_v12  ;;  %v10148_v44 = vmul.f32 %v3658_v39, %v9738_v5  ;;  %12482 = vst [vmem:[#allocation286_spill] sm:$0xff] %v10166_v56  ;;  %v10192_v5 = vsub.s32 5, %v12477_v51 }
 0x1ed   : > { %12472 = vst [vmem:[#allocation277_spill] sm:$0xff] %v10034_v15  ;;  %v10170_v39 = vmul.f32 %v10034_v15, %v9732_v58  ;;  %v10174_v60 = vmul.f32 %v10034_v15, %v9736_v12  ;;  %v10195_v12 = vsub.s32 6, %v12477_v51 }
 0x1ee   : > { %12476 = vst [vmem:[#allocation281_spill] sm:$0xff] %v10148_v44 }
 0x1ef   : > { %v4256_v41 = vpop.permute.xlu0 %4255  ;;  %12483 = vst [vmem:[#allocation287_spill] sm:$0xff] %v10170_v39  ;;  %12484 = vst [vmem:[#allocation288_spill] sm:$0xff] %v10174_v60 }
 0x1f0   : > { %v4850_v49 = vpop.permute.xlu1 %4849  ;;  %v10040_v37 = vmul.f32 %v9734_v9, %v4256_v41  ;;  %v10160_v47 = vmul.f32 %v4256_v41, %v9746_v11  ;;  %v10163_v8 = vmul.f32 %v4256_v41, %v9748_v7 }
 0x1f1   : > { %v10037_v36 = vmul.f32 %v9734_v9, %v4850_v49  ;;  %v10183_v41 = vmul.f32 %v4850_v49, %v9746_v11  ;;  %v10186_v55 = vmul.f32 %v4850_v49, %v9748_v7 }
 0x1f2   : > { %12474 = vst [vmem:[#allocation279_spill] sm:$0xff] %v10040_v37  ;;  %12480 = vst [vmem:[#allocation284_spill] sm:$0xff] %v10160_v47 }
 0x1f3   : > { %12473 = vst [vmem:[#allocation278_spill] sm:$0xff] %v10037_v36  ;;  %12481 = vst [vmem:[#allocation285_spill] sm:$0xff] %v10163_v8  ;;  %v10180_v36 = vsub.s32 4, %v12477_v51 }
 0x1f4   : > { %12487 = vst [vmem:[#allocation289_spill] sm:$0xff] %v10183_v41  ;;  %12488 = vst [vmem:[#allocation290_spill] sm:$0xff] %v10186_v55  ;;  %v12490_v41 = vld [vmem:[#allocation215_spill] sm:$0xff] }
 0x275   : > { %v6034_v9 = vpop.f32.mrb[4].mxu0 }
 0x276   : > { %v10177_v4 = vadd.f32 %v6034_v9, %v12485_v1  ;;  %v675_v59 = vpop.f32.mrb[5].mxu0  ;;  %v10198_v1 = vsub.s32 7, %v12477_v51 }
 0x277   : > { %v10189_v58 = vadd.f32 %v675_v59, %v12486_v63 }
 0x278   : > { %12489 = vst [vmem:[#allocation291_spill] sm:$0xff] %v10198_v1  ;;  %v723_v9 = vrot.slane %v10177_v4, %v12264_v6  ;;  %v1317_v11 = vrot.slane %v10177_v4, %v12263_v0  ;;  %v1911_v7 = vrot.slane %v10177_v4, %v12265_v2  ;;  %v2505_v59 = vrot.slane %v10177_v4, %v10151_v21  ;;  %v12492_v1 = vld [vmem:[#allocation216_spill] sm:$0xff] }
 0x279   : > { %v598_v49 = vpop.f32.mrb[2].mxu1  ;;  %v711_v63 = vrot.slane %v10189_v58, %v12264_v6  ;;  %v1305_v51 = vrot.slane %v10189_v58, %v12263_v0  ;;  %v1899_v15 = vrot.slane %v10189_v58, %v12265_v2  ;;  %v2493_v55 = vrot.slane %v10189_v58, %v10151_v21 }
 0x27a   : > { %v10217_v60 = vadd.f32 %v598_v49, %v12490_v41  ;;  %v600_v39 = vpop.f32.mrb[3].mxu1  ;;  %v10220_v56 = vsub.f32 %v723_v9, %v10049_v40  ;;  %v10222_v8 = vsub.f32 %v1317_v11, %v1293_v32  ;;  %v10224_v37 = vsub.f32 %v1911_v7, %v1887_v34 }
 0x27b   : > { %v12493_v47 = vmov %v12492_v1  ;;  %v10227_v16 = vadd.f32 %v600_v39, %v12492_v1  ;;  %v10230_v20 = vsub.f32 %v711_v63, %v10052_v43  ;;  %v10233_v44 = vsub.f32 %v1305_v51, %v10066_v57 }
 0x27c   : > { %12491 = vst [vmem:[#allocation292_spill] sm:$0xff] %v10224_v37  ;;  %v10235_v3 = vsub.f32 %v1899_v15, %v1884_v33  ;;  %v703_v49 = vrot.slane %v10217_v60, %v12264_v6  ;;  %v1297_v40 = vrot.slane %v10217_v60, %v12263_v0  ;;  %v1891_v32 = vrot.slane %v10217_v60, %v12265_v2 }
 0x27d   : > { %v2485_v34 = vrot.slane %v10217_v60, %v10151_v21  ;;  %v604_v39 = vpop.f32.mrb[4].mxu1  ;;  %v707_v43 = vrot.slane %v10227_v16, %v12264_v6  ;;  %v1301_v63 = vrot.slane %v10227_v16, %v12263_v0  ;;  %v1895_v33 = vrot.slane %v10227_v16, %v12265_v2 }
 0x27e   : > { %12494 = vst [vmem:[#allocation293_spill] sm:$0xff] %v10235_v3  ;;  %v2489_v57 = vrot.slane %v10227_v16, %v10151_v21  ;;  %v10254_v15 = vadd.f32 %v604_v39, %v12490_v41  ;;  %v606_v51 = vpop.f32.mrb[5].mxu1  ;;  %v10257_v1 = vsub.f32 %v703_v49, %v10043_v48  ;;  %v10260_v9 = vsub.f32 %v1297_v40, %v10056_v13  ;;  %v12542_v41 = vld [vmem:[#allocation226_spill] sm:$0xff] }
 0x27f   : > { %v10263_v11 = vsub.f32 %v1891_v32, %v10069_v29  ;;  %v10266_v7 = vadd.f32 %v606_v51, %v12493_v47  ;;  %v10269_v37 = vsub.f32 %v707_v43, %v10046_v35  ;;  %v10272_v3 = vsub.f32 %v1301_v63, %v10060_v28 }
 0x280   : > { %v10275_v39 = vsub.f32 %v1895_v33, %v10072_v53  ;;  %v715_v48 = vrot.slane %v10254_v15, %v12264_v6  ;;  %v1309_v13 = vrot.slane %v10254_v15, %v12263_v0  ;;  %v1903_v29 = vrot.slane %v10254_v15, %v12265_v2 }
 0x281   : > { %12495 = vst [vmem:[#allocation294_spill] sm:$0xff] %v10263_v11  ;;  %v10284_v49 = vsub.f32 %v2485_v34, %v10087_v30  ;;  %v719_v35 = vrot.slane %v10266_v7, %v12264_v6  ;;  %v1313_v28 = vrot.slane %v10266_v7, %v12263_v0  ;;  %v1907_v53 = vrot.slane %v10266_v7, %v12265_v2  ;;  %v12540_v2 = vld [vmem:[#allocation290_spill] sm:$0xff] }
 0x282   : > { %12496 = vst [vmem:[#allocation295_spill] sm:$0xff] %v10275_v39  ;;  %v10293_v40 = vsub.f32 %v2489_v57, %v10100_v19  ;;  %v10296_v32 = vsub.f32 %v715_v48, %v10077_v61  ;;  %v10299_v43 = vsub.f32 %v1309_v13, %v10081_v31  ;;  %v10302_v30 = vsub.f32 %v1903_v29, %v10084_v45  ;;  %v12619_v39 = vld [vmem:[#allocation244_spill] sm:$0xff]  ;;  %v12620_v11 = vld [vmem:[#allocation250_spill] sm:$0xff] }
 0x283   : > { %12497 = vst [vmem:[#allocation296_spill] sm:$0xff] %v10284_v49  ;;  %v2497_v34 = vrot.slane %v10254_v15, %v10151_v21  ;;  %v10307_v63 = vsub.f32 %v719_v35, %v10090_v18  ;;  %v10310_v33 = vsub.f32 %v1313_v28, %v10094_v27  ;;  %v10313_v19 = vsub.f32 %v1907_v53, %v10097_v52  ;;  %v12616_v49 = vld [vmem:[#allocation241_spill] sm:$0xff] }
 0x284   : > { %12498 = vst [vmem:[#allocation297_spill] sm:$0xff] %v10293_v40  ;;  %12499 = vst [vmem:[#allocation298_spill] sm:$0xff] %v10302_v30  ;;  %v10316_v61 = vsub.f32 %v2505_v59, %v10106_v14  ;;  %v2501_v45 = vrot.slane %v10266_v7, %v10151_v21  ;;  %v10324_v57 = vsub.f32 %v2493_v55, %v10112_v46  ;;  %v12615_v40 = vld [vmem:[#allocation246_spill] sm:$0xff]  ;;  %v12618_v30 = vld [vmem:[#allocation249_spill] sm:$0xff] }
 0x285   : > { %12500 = vst [vmem:[#allocation299_spill] sm:$0xff] %v10313_v19  ;;  %v10319_v31 = vsub.f32 %v2497_v34, %v10103_v10  ;;  %v3079_v18 = vrot.slane %v10217_v60, %v10180_v36  ;;  %v3083_v27 = vrot.slane %v10227_v16, %v10180_v36  ;;  %v3091_v52 = vrot.slane %v10254_v15, %v10180_v36  ;;  %v12617_v19 = vld [vmem:[#allocation248_spill] sm:$0xff] }
 0x286   : > { %12501 = vst [vmem:[#allocation300_spill] sm:$0xff] %v10316_v61  ;;  %12503 = vst [vmem:[#allocation302_spill] sm:$0xff] %v10324_v57  ;;  %v3099_v14 = vrot.slane %v10177_v4, %v10180_v36  ;;  %v3095_v10 = vrot.slane %v10266_v7, %v10180_v36  ;;  %v10337_v21 = vsub.f32 %v2501_v45, %v10109_v26  ;;  %v12515_v45 = vld [vmem:[#allocation280_spill] sm:$0xff]  ;;  %v12611_v61 = vld [vmem:[#allocation242_spill] sm:$0xff] }
 0x287   : > { %12502 = vst [vmem:[#allocation301_spill] sm:$0xff] %v10319_v31  ;;  %v10340_v46 = vsub.f32 %v3079_v18, %v10115_v50  ;;  %v3087_v55 = vrot.slane %v10189_v58, %v10180_v36  ;;  %v3673_v59 = vrot.slane %v10217_v60, %v10192_v5  ;;  %v10347_v51 = vsub.f32 %v3083_v27, %v10118_v42  ;;  %v12517_v18 = vld [vmem:[#allocation281_spill] sm:$0xff]  ;;  %v12612_v57 = vld [vmem:[#allocation243_spill] sm:$0xff] }
 0x288   : > { %12504 = vst [vmem:[#allocation303_spill] sm:$0xff] %v10337_v21  ;;  %v10350_v48 = vsub.f32 %v3091_v52, %v10121_v62  ;;  %v10353_v13 = vsub.f32 %v3099_v14, %v10124_v25  ;;  %v10356_v26 = vsub.f32 %v3095_v10, %v10127_v24  ;;  %v3677_v29 = vrot.slane %v10227_v16, %v10192_v5  ;;  %v12523_v10 = vld [vmem:[#allocation284_spill] sm:$0xff]  ;;  %v12613_v21 = vld [vmem:[#allocation238_spill] sm:$0xff]  ;;  %v12614_v31 = vld [vmem:[#allocation245_spill] sm:$0xff] }
 0x289   : > { %12505 = vst [vmem:[#allocation304_spill] sm:$0xff] %v10340_v46  ;;  %12506 = vst [vmem:[#allocation305_spill] sm:$0xff] %v10347_v51  ;;  %v10359_v50 = vsub.f32 %v3087_v55, %v10130_v38  ;;  %v10362_v36 = vsub.f32 %v3673_v59, %v10133_v54  ;;  %v3685_v42 = vrot.slane %v10254_v15, %v10192_v5  ;;  %v12609_v51 = vld [vmem:[#allocation240_spill] sm:$0xff]  ;;  %v12610_v46 = vld [vmem:[#allocation235_spill] sm:$0xff] }
 0x28a   : > { %12507 = vst [vmem:[#allocation306_spill] sm:$0xff] %v10350_v48  ;;  %12508 = vst [vmem:[#allocation307_spill] sm:$0xff] %v10353_v13  ;;  %v3693_v62 = vrot.slane %v10177_v4, %v10192_v5  ;;  %v3689_v25 = vrot.slane %v10266_v7, %v10192_v5  ;;  %v3681_v24 = vrot.slane %v10189_v58, %v10192_v5  ;;  %v12605_v13 = vld [vmem:[#allocation236_spill] sm:$0xff]  ;;  %v12608_v48 = vld [vmem:[#allocation239_spill] sm:$0xff] }
 0x28b   : > { %12509 = vst [vmem:[#allocation308_spill] sm:$0xff] %v10356_v26  ;;  %12510 = vst [vmem:[#allocation309_spill] sm:$0xff] %v10359_v50  ;;  %v4267_v38 = vrot.slane %v10217_v60, %v10195_v12  ;;  %v10377_v54 = vsub.f32 %v3677_v29, %v10136_v17  ;;  %v10380_v35 = vsub.f32 %v3685_v42, %v10139_v23  ;;  %v12519_v17 = vld [vmem:[#allocation282_spill] sm:$0xff]  ;;  %v12521_v23 = vld [vmem:[#allocation283_spill] sm:$0xff] }
 0x28c   : > { %12511 = vst [vmem:[#allocation310_spill] sm:$0xff] %v10362_v36  ;;  %v4271_v28 = vrot.slane %v10227_v16, %v10195_v12  ;;  %v4279_v53 = vrot.slane %v10254_v15, %v10195_v12  ;;  %v10387_v34 = vsub.f32 %v3693_v62, %v10142_v22  ;;  %v10390_v5 = vsub.f32 %v3689_v25, %v12515_v45  ;;  %v12525_v42 = vld [vmem:[#allocation291_spill] sm:$0xff]  ;;  %v12597_v36 = vld [vmem:[#allocation213_spill] sm:$0xff]  ;;  %v12607_v26 = vld [vmem:[#allocation232_spill] sm:$0xff] }
 0x28d   : > { %12512 = vst [vmem:[#allocation311_spill] sm:$0xff] %v10377_v54  ;;  %12513 = vst [vmem:[#allocation312_spill] sm:$0xff] %v10380_v35  ;;  %v10393_v27 = vsub.f32 %v3681_v24, %v12517_v18  ;;  %v10396_v52 = vsub.f32 %v4267_v38, %v12519_v17  ;;  %v4287_v59 = vrot.slane %v10177_v4, %v10195_v12  ;;  %v12526_v38 = vld [vmem:[#allocation279_spill] sm:$0xff]  ;;  %v12530_v17 = vld [vmem:[#allocation286_spill] sm:$0xff] }
 0x28e   : > { %12514 = vst [vmem:[#allocation313_spill] sm:$0xff] %v10387_v34  ;;  %12516 = vst [vmem:[#allocation280_spill] sm:$0xff] %v10390_v5  ;;  %v10399_v14 = vsub.f32 %v4271_v28, %v12521_v23  ;;  %v10402_v55 = vsub.f32 %v4279_v53, %v12523_v10  ;;  %v4283_v22 = vrot.slane %v10266_v7, %v10195_v12  ;;  %v12528_v53 = vld [vmem:[#allocation285_spill] sm:$0xff]  ;;  %v12532_v23 = vld [vmem:[#allocation287_spill] sm:$0xff] }
 0x28f   : > { %12518 = vst [vmem:[#allocation281_spill] sm:$0xff] %v10393_v27  ;;  %12520 = vst [vmem:[#allocation282_spill] sm:$0xff] %v10396_v52  ;;  %v4275_v29 = vrot.slane %v10189_v58, %v10195_v12  ;;  %v4861_v62 = vrot.slane %v10217_v60, %v12525_v42  ;;  %v4865_v25 = vrot.slane %v10227_v16, %v12525_v42  ;;  %v12534_v10 = vld [vmem:[#allocation288_spill] sm:$0xff]  ;;  %v12585_v52 = vld [vmem:[#allocation203_spill] sm:$0xff] }
 0x290   : > { %12522 = vst [vmem:[#allocation283_spill] sm:$0xff] %v10399_v14  ;;  %12524 = vst [vmem:[#allocation284_spill] sm:$0xff] %v10402_v55  ;;  %v4873_v24 = vrot.slane %v10254_v15, %v12525_v42  ;;  %v10417_v28 = vsub.f32 %v4287_v59, %v12526_v38  ;;  %v10420_v45 = vsub.f32 %v4283_v22, %v12528_v53  ;;  %v12536_v59 = vld [vmem:[#allocation289_spill] sm:$0xff]  ;;  %v12538_v22 = vld [vmem:[#allocation278_spill] sm:$0xff] }
 0x291   : > { %v4881_v18 = vrot.slane %v10177_v4, %v12525_v42  ;;  %v4877_v12 = vrot.slane %v10266_v7, %v12525_v42  ;;  %v10427_v60 = vsub.f32 %v4275_v29, %v12530_v17  ;;  %v10430_v16 = vsub.f32 %v4861_v62, %v12532_v23  ;;  %v12543_v7 = vld [vmem:[#allocation277_spill] sm:$0xff]  ;;  %v12581_v55 = vld [vmem:[#allocation192_spill] sm:$0xff]  ;;  %v12587_v34 = vld [vmem:[#allocation198_spill] sm:$0xff] }
 0x292   : > { %12527 = vst [vmem:[#allocation291_spill] sm:$0xff] %v10417_v28  ;;  %12529 = vst [vmem:[#allocation279_spill] sm:$0xff] %v10420_v45  ;;  %v10433_v15 = vsub.f32 %v4865_v25, %v12534_v10  ;;  %v10436_v38 = vsub.f32 %v4873_v24, %v12536_v59  ;;  %v4854_v47 = vmul.f32 %v12543_v7, %v12542_v41  ;;  %v12545_v10 = vld [vmem:[#allocation220_spill] sm:$0xff]  ;;  %v12576_v28 = vld [vmem:[#allocation187_spill] sm:$0xff] }
 0x293   : > { %12531 = vst [vmem:[#allocation285_spill] sm:$0xff] %v10427_v60  ;;  %12533 = vst [vmem:[#allocation286_spill] sm:$0xff] %v10430_v16  ;;  %v10439_v53 = vsub.f32 %v4881_v18, %v12538_v22  ;;  %v10442_v4 = vsub.f32 %v4877_v12, %v12540_v2  ;;  %v4869_v29 = vrot.slane %v10189_v58, %v12525_v42  ;;  %v12577_v60 = vld [vmem:[#allocation190_spill] sm:$0xff]  ;;  %v12579_v45 = vld [vmem:[#allocation197_spill] sm:$0xff] }
 0x294   : > { %12535 = vst [vmem:[#allocation287_spill] sm:$0xff] %v10433_v15  ;;  %12537 = vst [vmem:[#allocation288_spill] sm:$0xff] %v10436_v38  ;;  %v12546_v38 = vld [vmem:[#allocation221_spill] sm:$0xff]  ;;  %v12575_v15 = vld [vmem:[#allocation186_spill] sm:$0xff] }
 0x295   : > { %12539 = vst [vmem:[#allocation289_spill] sm:$0xff] %v10439_v53  ;;  %12541 = vst [vmem:[#allocation278_spill] sm:$0xff] %v10442_v4  ;;  %v10448_v62 = vsub.f32 %v4869_v29, %v4854_v47  ;;  %v12583_v14 = vld [vmem:[#allocation196_spill] sm:$0xff]  ;;  %v12589_v27 = vld [vmem:[#allocation202_spill] sm:$0xff] }
 0x296   : > { %v6069_v17 = vpop.f32.mrb[6].mxu0  ;;  %v12591_v5 = vld [vmem:[#allocation212_spill] sm:$0xff]  ;;  %v12593_v35 = vld [vmem:[#allocation207_spill] sm:$0xff]  ;;  %v12606_v50 = vld [vmem:[#allocation237_spill] sm:$0xff] }
 0x297   : > { %12544 = vst [vmem:[#allocation290_spill] sm:$0xff] %v10448_v62  ;;  %v875_v25 = vpop.f32.mrb[7].mxu0  ;;  %v12595_v54 = vld [vmem:[#allocation211_spill] sm:$0xff] }
 0x299   : > { %v798_v23 = vpop.f32.mrb[6].mxu1 }
 0x29a   : > { %v799_v24 = vadd.f32 %v798_v23, %v12545_v10  ;;  %v800_v59 = vpop.f32.mrb[7].mxu1 }
 0x29b   : > { %v801_v18 = vadd.f32 %v800_v59, %v12546_v38 }
 0x29c   : > { %v884_v22 = vadd.f32 %v799_v24, %v10257_v1 }
 0x29d   : > { %v885_v2 = vadd.f32 %v801_v18, %v10269_v37  ;;  %v804_v12 = vpop.f32.mrb[8].mxu1 }
 0x29e   : > { %v5475_v53 = vmul.f32 -1.442695, %v884_v22  ;;  %v805_v41 = vadd.f32 %v804_v12, %v12545_v10  ;;  %v806_v7 = vpop.f32.mrb[9].mxu1 }
 0x29f   : > { %v807_v47 = vadd.f32 %v806_v7, %v12546_v38  ;;  %v5476_v23 = vmul.f32 -1.442695, %v885_v2 }
 0x2a0   : > { %8633 = vpow2.f32 %v5475_v53  ;;  %v886_v58 = vadd.f32 %v805_v41, %v10296_v32  ;;  %v12547_v53 = vld [vmem:[#allocation222_spill] sm:$0xff] }
 0x2a1   : > { %v887_v42 = vadd.f32 %v807_v47, %v10307_v63  ;;  %v876_v62 = vadd.f32 %v875_v25, %v12547_v53  ;;  %v881_v2 = vadd.f32 %v6069_v17, %v12547_v53  ;;  %v12550_v17 = vld [vmem:[#allocation163_spill] sm:$0xff] }
 0x2a2   : > { %v5477_v29 = vmul.f32 -1.442695, %v886_v58 }
 0x2a3   : > { %v5478_v59 = vmul.f32 -1.442695, %v887_v42 }
 0x2a4   : > { %8635 = vpow2.f32 %v5477_v29 }
 0x2a5   : > { %8637 = vpow2.f32 %v5476_v23 }
 0x2a6   : > { %8639 = vpow2.f32 %v5478_v59 }
 0x2aa   : > { %v8634_v1 = vpop.eup %8633 }
 0x2ab   : > { %v900_v37 = vadd.f32 1.0, %v8634_v1 }
 0x2ad   : > { %8641 = vrcp.f32 %v900_v37 }
 0x2ae   : > { %v8636_v24 = vpop.eup %8635 }
 0x2af   : > { %v902_v18 = vadd.f32 1.0, %v8636_v24  ;;  %v8638_v22 = vpop.eup %8637  ;;  %v12548_v24 = vld [vmem:[#allocation225_spill] sm:$0xff] }
 0x2b0   : > { %v8640_v12 = vpop.eup %8639  ;;  %v901_v7 = vadd.f32 1.0, %v8638_v22  ;;  %v12549_v22 = vld [vmem:[#allocation13_spill] sm:$0xff] }
 0x2b1   : > { %8643 = vrcp.f32 %v902_v18  ;;  %v903_v41 = vadd.f32 1.0, %v8640_v12  ;;  %vm730_vm1 = vcmp.eq.s32.totalorder %v12549_v22, 0  ;;  %v12551_v12 = vld [vmem:[#allocation166_spill] sm:$0xff]  ;;  %vm1324_vm3 = vcmp.eq.s32.totalorder %v12549_v22, 1 }
 0x2b2   : > { %8645 = vrcp.f32 %v901_v7  ;;  %vm1918_vm5 = vcmp.eq.s32.totalorder %v12549_v22, 2  ;;  %vm2512_vm7 = vcmp.eq.s32.totalorder %v12549_v22, 3  ;;  %vm3106_vm9 = vcmp.eq.s32.totalorder %v12549_v22, 4 }
 0x2b3   : > { %8647 = vrcp.f32 %v903_v41  ;;  %v12552_v41 = vld [vmem:[#allocation170_spill] sm:$0xff]  ;;  %vm3700_vm11 = vcmp.eq.s32.totalorder %v12549_v22, 5  ;;  %vm4294_vm13 = vcmp.eq.s32.totalorder %v12549_v22, 6  ;;  %vm4888_vm15 = vcmp.eq.s32.totalorder %v12549_v22, 7 }
 0x2b7   : > { %v8642_v32 = vpop.eup %8641 }
 0x2b8   : > { %v912_v63 = vmul.f32 %v8642_v32, %v876_v62 }
 0x2ba   : > { %v914_v47 = vadd.f32 %v912_v63, %v10230_v20  ;;  %v10466_v20 = vpack.c.bf16 %v12551_v12, %v12550_v17  ;;  %v12553_v63 = vld [vmem:[#allocation173_spill] sm:$0xff]  ;;  %v12560_v17 = vld [vmem:[#allocation179_spill] sm:$0xff] }
 0x2bb   : > { %v8644_v58 = vpop.eup %8643  ;;  %v12561_v12 = vld [vmem:[#allocation171_spill] sm:$0xff] }
 0x2bc   : > { %v913_v42 = vmul.f32 %v8644_v58, %v881_v2  ;;  %8649 = vtanh.f32 %v914_v47  ;;  %v8646_v23 = vpop.eup %8645  ;;  %v12554_v58 = vld [vmem:[#allocation224_spill] sm:$0xff] }
 0x2bd   : > { %v8648_v59 = vpop.eup %8647  ;;  %v918_v1 = vsub.f32 1.0, %v8646_v23  ;;  %v922_v18 = vmul.f32 %v12548_v24, %v8646_v23  ;;  %v12556_v23 = vmov 0.0  }
 0x2be   : > { %v915_v29 = vadd.f32 %v913_v42, %v10220_v56  ;;  %v919_v7 = vsub.f32 1.0, %v8648_v59  ;;  %v10470_v56 = vpack.c.bf16 %v12553_v63, %v12552_v41  ;;  %v923_v42 = vmul.f32 %v12554_v58, %v8648_v59  ;;  %v12563_v63 = vld [vmem:[#allocation276_spill] sm:$0xff] }
 0x2c0   : > { %8651 = vtanh.f32 %v915_v29  ;;  %v12555_v29 = vld [vmem:[#allocation14_spill] sm:$0xff] }
 0x2c1   : > { %vm731_vm2 = vcmp.eq.s32.totalorder %v12555_v29, 0  ;;  %vm1325_vm4 = vcmp.eq.s32.totalorder %v12555_v29, 1  ;;  %vm1919_vm6 = vcmp.eq.s32.totalorder %v12555_v29, 2  ;;  %vm2513_vm8 = vcmp.eq.s32.totalorder %v12555_v29, 3 }
 0x2c2   : > { %vm3107_vm10 = vcmp.eq.s32.totalorder %v12555_v29, 4  ;;  %vm3701_vm12 = vcmp.eq.s32.totalorder %v12555_v29, 5  ;;  %vm4295_vm14 = vcmp.eq.s32.totalorder %v12555_v29, 6  ;;  %vm4889_vm0 = vcmp.eq.s32.totalorder %v12555_v29, 7 }
 0x2c6   : > { %v8650_v37 = vpop.eup %8649 }
 0x2c7   : > { %v920_v25 = vmul.f32 %v8650_v37, %v918_v1  ;;  %v12557_v37 = vld [vmem:[#allocation169_spill] sm:$0xff] }
 0x2c9   : > { %v924_v62 = vadd.f32 %v922_v18, %v920_v25  ;;  %v12558_v25 = vld [vmem:[#allocation172_spill] sm:$0xff] }
 0x2ca   : > { %v8652_v32 = vpop.eup %8651  ;;  %v10485_v18 = vpack.c.bf16 %v12558_v25, %v12557_v37  ;;  %v12566_v25 = vld [vmem:[#allocation182_spill] sm:$0xff] }
 0x2cb   : > { %v10475_v2 = vsel %vm730_vm1, %v12548_v24, %v924_v62  ;;  %v921_v47 = vmul.f32 %v8652_v32, %v919_v7  ;;  %v12559_v62 = vld [vmem:[#allocation176_spill] sm:$0xff]  ;;  %v12562_v7 = vld [vmem:[#allocation174_spill] sm:$0xff] }
 0x2cc   : > { %997 = vmatmul.mubr.f32.vlgmr.msra.gmra.mrb[10].mxu1 %v10475_v2  ;;  %6102 = vmatprep.mubr.f32.mxu0 %v10475_v2  ;;  %v10490_v59 = vpack.c.bf16 %v12560_v17, %v12559_v62  ;;  %v10494_v32 = vpack.c.bf16 %v12562_v7, %v12561_v12  ;;  %v12567_v62 = vld [vmem:[#allocation185_spill] sm:$0xff]  ;;  %v12569_v12 = vld [vmem:[#allocation180_spill] sm:$0xff] }
 0x2cd   : > { %7078 = vmatpush1.bf16.msra.mxu1 %v10466_v20  ;;  %1002 = vmatprep.mubr.f32.mxu1 %v12556_v23  ;;  %v925_v1 = vadd.f32 %v923_v42, %v921_v47  ;;  %v12564_v47 = vld [vmem:[#allocation175_spill] sm:$0xff]  ;;  %v12565_v42 = vld [vmem:[#allocation178_spill] sm:$0xff]  ;;  %v12568_v17 = vld [vmem:[#allocation177_spill] sm:$0xff] }
 0x2ce   : > { %7080 = vmatprep.subr.bf16.mxu1 %v10470_v56  ;;  %v10507_v37 = vpack.c.bf16 %v12565_v42, %v12564_v47  ;;  %v10517_v7 = vpack.c.bf16 %v12569_v12, %v12568_v17  ;;  %v12570_v47 = vld [vmem:[#allocation181_spill] sm:$0xff]  ;;  %v12571_v42 = vld [vmem:[#allocation184_spill] sm:$0xff]  ;;  %v12574_v12 = vld [vmem:[#allocation183_spill] sm:$0xff] }
 0x2cf   : > { %v10499_v41 = vsel %vm731_vm2, %v12554_v58, %v925_v1  ;;  %v10513_v1 = vpack.c.bf16 %v12567_v62, %v12566_v25  ;;  %v10525_v4 = vpack.c.bf16 %v12571_v42, %v12570_v47  ;;  %v12572_v25 = vld [vmem:[#allocation188_spill] sm:$0xff]  ;;  %v12573_v62 = vld [vmem:[#allocation191_spill] sm:$0xff]  ;;  %v10535_v16 = vpack.c.bf16 %v12575_v15, %v12574_v12  ;;  %v12578_v42 = vld [vmem:[#allocation194_spill] sm:$0xff] }
 0x2d0   : > { %1003 = vmatmul.mubr.f32.gmra.mrb[12].mxu1 %v10499_v41  ;;  %6103 = vmatmul.mubr.f32.vlgmr.msra.gmra.mrb[8].mxu0 %v10499_v41  ;;  %v10531_v17 = vpack.c.bf16 %v12573_v62, %v12572_v25  ;;  %v10541_v47 = vpack.c.bf16 %v12577_v60, %v12576_v28  ;;  %v10547_v25 = vpack.c.bf16 %v12579_v45, %v12578_v42  ;;  %v12580_v62 = vld [vmem:[#allocation189_spill] sm:$0xff]  ;;  %v12584_v60 = vld [vmem:[#allocation200_spill] sm:$0xff]  ;;  %v12586_v42 = vld [vmem:[#allocation195_spill] sm:$0xff] }
 0x2d1   : > { %7082 = vmatpush1.bf16.msra.mxu1 %v10485_v18  ;;  %7110 = vmatpush3.bf16.msra.mxu0 %v12563_v63  ;;  %v10551_v15 = vpack.c.bf16 %v12581_v55, %v12580_v62  ;;  %v12582_v12 = vld [vmem:[#allocation193_spill] sm:$0xff]  ;;  %v10563_v45 = vpack.c.bf16 %v12585_v52, %v12584_v60  ;;  %v10567_v55 = vpack.c.bf16 %v12587_v34, %v12586_v42  ;;  %v12588_v62 = vld [vmem:[#allocation199_spill] sm:$0xff]  ;;  %v12594_v42 = vld [vmem:[#allocation208_spill] sm:$0xff] }
 0x2d2   : > { %7084 = vmatprep.subr.bf16.mxu1 %v10490_v59  ;;  %7112 = vmatprep.subr.bf16.mxu0 %v10494_v32  ;;  %v10557_v28 = vpack.c.bf16 %v12583_v14, %v12582_v12  ;;  %v10573_v14 = vpack.c.bf16 %v12589_v27, %v12588_v62  ;;  %v12590_v12 = vld [vmem:[#allocation209_spill] sm:$0xff]  ;;  %v10589_v27 = vpack.c.bf16 %v12595_v54, %v12594_v42  ;;  %v12596_v62 = vld [vmem:[#allocation210_spill] sm:$0xff] }
 0x2d3   : > { %1148 = vmatprep.mubr.f32.mxu1 %v12556_v23  ;;  %6137 = vmatprep.mubr.f32.mxu0 %v12548_v24  ;;  %v10579_v52 = vpack.c.bf16 %v12591_v5, %v12590_v12  ;;  %v12592_v60 = vld [vmem:[#allocation201_spill] sm:$0xff]  ;;  %v10595_v5 = vpack.c.bf16 %v12597_v36, %v12596_v62  ;;  %v12599_v54 = vld [vmem:[#allocation230_spill] sm:$0xff]  ;;  %v12600_v12 = vld [vmem:[#allocation231_spill] sm:$0xff] }
 0x2d4   : > { %v10583_v34 = vpack.c.bf16 %v12593_v35, %v12592_v60  ;;  %v12598_v35 = vld [vmem:[#allocation228_spill] sm:$0xff]  ;;  %v12601_v36 = vld [vmem:[#allocation227_spill] sm:$0xff]  ;;  %v12602_v60 = vld [vmem:[#allocation233_spill] sm:$0xff] }
 0x2d5   : > { %7086 = vmatpush1.bf16.msra.mxu1 %v10507_v37  ;;  %7114 = vmatpush3.bf16.msra.mxu0 %v10494_v32  ;;  %v12603_v42 = vld [vmem:[#allocation234_spill] sm:$0xff]  ;;  %v12604_v62 = vld [vmem:[#allocation229_spill] sm:$0xff] }
 0x2d6   : > { %7088 = vmatprep.subr.bf16.mxu1 %v10513_v1  ;;  %7116 = vmatprep.subr.bf16.mxu0 %v10517_v7 }
 0x2d9   : > { %7090 = vmatpush1.bf16.msra.mxu1 %v10525_v4  ;;  %7118 = vmatpush3.bf16.msra.mxu0 %v10517_v7 }
 0x2da   : > { %7092 = vmatprep.subr.bf16.mxu1 %v10531_v17  ;;  %7120 = vmatprep.subr.bf16.mxu0 %v10535_v16 }
 0x2dd   : > { %7094 = vmatpush1.bf16.msra.mxu1 %v10541_v47  ;;  %7122 = vmatpush3.bf16.msra.mxu0 %v10535_v16 }
 0x2de   : > { %7096 = vmatprep.subr.bf16.mxu1 %v10547_v25  ;;  %7124 = vmatprep.subr.bf16.mxu0 %v10551_v15 }
 0x2e1   : > { %7098 = vmatpush1.bf16.msra.mxu1 %v10557_v28  ;;  %7126 = vmatpush3.bf16.msra.mxu0 %v10551_v15 }
 0x2e2   : > { %7100 = vmatprep.subr.bf16.mxu1 %v10563_v45  ;;  %7128 = vmatprep.subr.bf16.mxu0 %v10567_v55 }
 0x2e5   : > { %7102 = vmatpush1.bf16.msra.mxu1 %v10573_v14  ;;  %7130 = vmatpush3.bf16.msra.mxu0 %v10567_v55 }
 0x2e6   : > { %7104 = vmatprep.subr.bf16.mxu1 %v10579_v52  ;;  %7132 = vmatprep.subr.bf16.mxu0 %v10583_v34 }
 0x2e9   : > { %7106 = vmatpush1.bf16.msra.mxu1 %v10589_v27  ;;  %7134 = vmatpush3.bf16.msra.mxu0 %v10583_v34 }
 0x2ea   : > { %7136 = vmatprep.subr.bf16.mxu0 %v10595_v5  ;;  %7140 = vmatprep.subr.bf16.mxu1 %v12598_v35 }
 0x2ec   : > { %1149 = vmatmul.mubr.f32.vlgmr.msra.gmra.mrb[10].mxu1 %v12548_v24 }
 0x2ed   : > { %7138 = vmatpush3.bf16.msra.mxu0 %v10595_v5  ;;  %7142 = vmatpush1.bf16.msra.mxu1 %v12599_v54 }
 0x2ee   : > { %1154 = vmatprep.mubr.f32.mxu1 %v12556_v23  ;;  %7144 = vmatprep.subr.bf16.mxu1 %v12600_v12  ;;  %v12656_v12 = vld [vmem:[#allocation219_spill] sm:$0xff] }
 0x2ef   : > { %7172 = vmatprep.subr.bf16.mxu0 %v12601_v36 }
 0x2f0   : > { %1155 = vmatmul.mubr.f32.gmra.mrb[12].mxu1 %v12554_v58  ;;  %6138 = vmatmul.mubr.f32.vlgmr.msra.gmra.mrb[10].mxu0 %v12554_v58 }
 0x2f1   : > { %7146 = vmatpush1.bf16.msra.mxu1 %v12602_v60  ;;  %7174 = vmatpush3.bf16.msra.mxu0 %v12601_v36 }
 0x2f2   : > { %6172 = vmatprep.mubr.f32.mxu0 %v10475_v2  ;;  %7148 = vmatprep.subr.bf16.mxu1 %v12603_v42 }
 0x2f3   : > { %7176 = vmatprep.subr.bf16.mxu0 %v12604_v62  ;;  %1390 = vmatprep.mubr.f32.mxu1 %v12556_v23 }
 0x2f5   : > { %7150 = vmatpush1.bf16.msra.mxu1 %v12605_v13  ;;  %7178 = vmatpush3.bf16.msra.mxu0 %v12604_v62 }
 0x2f6   : > { %7152 = vmatprep.subr.bf16.mxu1 %v12606_v50  ;;  %7180 = vmatprep.subr.bf16.mxu0 %v12607_v26 }
 0x2f9   : > { %7154 = vmatpush1.bf16.msra.mxu1 %v12608_v48  ;;  %7182 = vmatpush3.bf16.msra.mxu0 %v12607_v26 }
 0x2fa   : > { %7156 = vmatprep.subr.bf16.mxu1 %v12609_v51  ;;  %7184 = vmatprep.subr.bf16.mxu0 %v12610_v46 }
 0x2fd   : > { %7158 = vmatpush1.bf16.msra.mxu1 %v12611_v61  ;;  %7186 = vmatpush3.bf16.msra.mxu0 %v12610_v46  ;;  %v12649_v61 = vld [vmem:[#allocation218_spill] sm:$0xff] }
 0x2fe   : > { %7160 = vmatprep.subr.bf16.mxu1 %v12612_v57  ;;  %7188 = vmatprep.subr.bf16.mxu0 %v12613_v21  ;;  %v12621_v57 = vld [vmem:[#allocation247_spill] sm:$0xff] }
 0x301   : > { %7162 = vmatpush1.bf16.msra.mxu1 %v12614_v31  ;;  %7190 = vmatpush3.bf16.msra.mxu0 %v12613_v21  ;;  %v12622_v31 = vld [vmem:[#allocation251_spill] sm:$0xff]  ;;  %v12634_v21 = vld [vmem:[#allocation262_spill] sm:$0xff] }
 0x302   : > { %7164 = vmatprep.subr.bf16.mxu1 %v12615_v40  ;;  %7192 = vmatprep.subr.bf16.mxu0 %v12616_v49  ;;  %v12632_v40 = vld [vmem:[#allocation261_spill] sm:$0xff] }
 0x305   : > { %7166 = vmatpush1.bf16.msra.mxu1 %v12617_v19  ;;  %7194 = vmatpush3.bf16.msra.mxu0 %v12616_v49  ;;  %v12623_v19 = vld [vmem:[#allocation252_spill] sm:$0xff]  ;;  %v12624_v49 = vld [vmem:[#allocation254_spill] sm:$0xff] }
 0x306   : > { %7168 = vmatprep.subr.bf16.mxu1 %v12618_v30  ;;  %7196 = vmatprep.subr.bf16.mxu0 %v12619_v39  ;;  %v12625_v30 = vld [vmem:[#allocation253_spill] sm:$0xff] }
 0x309   : > { %7170 = vmatpush1.bf16.msra.mxu1 %v12620_v11  ;;  %7198 = vmatpush3.bf16.msra.mxu0 %v12619_v39  ;;  %v12627_v11 = vld [vmem:[#allocation257_spill] sm:$0xff]  ;;  %v12630_v39 = vld [vmem:[#allocation260_spill] sm:$0xff] }
 0x30a   : > { %7200 = vmatprep.subr.bf16.mxu0 %v12621_v57  ;;  %7204 = vmatprep.subr.bf16.mxu1 %v12622_v31  ;;  %v12626_v31 = vld [vmem:[#allocation255_spill] sm:$0xff] }
 0x30c   : > { %1391 = vmatmul.mubr.f32.vlgmr.msra.gmra.mrb[14].mxu1 %v10475_v2 }
 0x30d   : > { %7202 = vmatpush3.bf16.msra.mxu0 %v12621_v57  ;;  %1396 = vmatprep.mubr.f32.mxu1 %v12556_v23  ;;  %v12628_v57 = vld [vmem:[#allocation256_spill] sm:$0xff] }
 0x30e   : > { %7206 = vmatpush1.bf16.msra.mxu1 %v12623_v19  ;;  %7236 = vmatprep.subr.bf16.mxu0 %v12624_v49  ;;  %v12629_v19 = vld [vmem:[#allocation258_spill] sm:$0xff] }
 0x30f   : > { %7208 = vmatprep.subr.bf16.mxu1 %v12625_v30  ;;  %v12631_v30 = vld [vmem:[#allocation259_spill] sm:$0xff] }
 0x310   : > { %1397 = vmatmul.mubr.f32.gmra.mrb[16].mxu1 %v10499_v41  ;;  %6173 = vmatmul.mubr.f32.vlgmr.msra.gmra.mrb[12].mxu0 %v10499_v41 }
 0x311   : > { %7238 = vmatpush3.bf16.msra.mxu0 %v12624_v49  ;;  %1590 = vmatprep.mubr.f32.mxu1 %v12556_v23  ;;  %v12633_v49 = vld [vmem:[#allocation263_spill] sm:$0xff] }
 0x312   : > { %7210 = vmatpush1.bf16.msra.mxu1 %v12626_v31  ;;  %7240 = vmatprep.subr.bf16.mxu0 %v12627_v11  ;;  %v12635_v31 = vld [vmem:[#allocation264_spill] sm:$0xff] }
 0x313   : > { %7212 = vmatprep.subr.bf16.mxu1 %v12628_v57  ;;  %v12636_v57 = vld [vmem:[#allocation266_spill] sm:$0xff] }
 0x315   : > { %7242 = vmatpush3.bf16.msra.mxu0 %v12627_v11  ;;  %v12637_v11 = vld [vmem:[#allocation265_spill] sm:$0xff] }
 0x316   : > { %7214 = vmatpush1.bf16.msra.mxu1 %v12629_v19  ;;  %7244 = vmatprep.subr.bf16.mxu0 %v12630_v39  ;;  %v12638_v19 = vld [vmem:[#allocation267_spill] sm:$0xff] }
 0x317   : > { %7216 = vmatprep.subr.bf16.mxu1 %v12631_v30  ;;  %v12639_v30 = vld [vmem:[#allocation269_spill] sm:$0xff] }
 0x319   : > { %7246 = vmatpush3.bf16.msra.mxu0 %v12630_v39  ;;  %v12640_v39 = vld [vmem:[#allocation268_spill] sm:$0xff] }
 0x31a   : > { %7218 = vmatpush1.bf16.msra.mxu1 %v12632_v40  ;;  %7248 = vmatprep.subr.bf16.mxu0 %v12633_v49  ;;  %v12641_v40 = vld [vmem:[#allocation270_spill] sm:$0xff] }
 0x31b   : > { %7220 = vmatprep.subr.bf16.mxu1 %v12634_v21  ;;  %v12642_v21 = vld [vmem:[#allocation272_spill] sm:$0xff] }
 0x31d   : > { %7250 = vmatpush3.bf16.msra.mxu0 %v12633_v49  ;;  %v12643_v49 = vld [vmem:[#allocation271_spill] sm:$0xff] }
 0x31e   : > { %7222 = vmatpush1.bf16.msra.mxu1 %v12635_v31  ;;  %7252 = vmatprep.subr.bf16.mxu0 %v12636_v57  ;;  %v12644_v31 = vld [vmem:[#allocation273_spill] sm:$0xff] }
 0x31f   : > { %7224 = vmatprep.subr.bf16.mxu1 %v12637_v11  ;;  %v12645_v11 = vld [vmem:[#allocation274_spill] sm:$0xff] }
 0x321   : > { %7254 = vmatpush3.bf16.msra.mxu0 %v12636_v57  ;;  %v12646_v57 = vld [vmem:[#allocation275_spill] sm:$0xff] }
 0x322   : > { %7226 = vmatpush1.bf16.msra.mxu1 %v12638_v19  ;;  %7256 = vmatprep.subr.bf16.mxu0 %v12639_v30  ;;  %v12647_v19 = vld [vmem:[#allocation214_spill] sm:$0xff] }
 0x323   : > { %7228 = vmatprep.subr.bf16.mxu1 %v12640_v39 }
 0x325   : > { %7258 = vmatpush3.bf16.msra.mxu0 %v12639_v30 }
 0x326   : > { %7230 = vmatpush1.bf16.msra.mxu1 %v12641_v40  ;;  %7260 = vmatprep.subr.bf16.mxu0 %v12642_v21  ;;  %v12648_v40 = vrot.slane %v12647_v19, %v12264_v6 }
 0x327   : > { %7232 = vmatprep.subr.bf16.mxu1 %v12643_v49  ;;  %v12650_v49 = vrot.slane %v12649_v61, %v12264_v6 }
 0x329   : > { %7262 = vmatpush3.bf16.msra.mxu0 %v12642_v21  ;;  %v10684_v46 = vadd.f32 %v12650_v49, %v12648_v40 }
 0x32a   : > { %7234 = vmatpush1.bf16.msra.mxu1 %v12644_v31  ;;  %7264 = vmatprep.subr.bf16.mxu0 %v12645_v11  ;;  %v12652_v31 = vrot.slane %v12647_v19, %v12263_v0 }
 0x32b   : > { %7268 = vmatprep.subr.bf16.mxu1 %v12646_v57  ;;  %12651 = vst [vmem:[#allocation226_spill] sm:$0xff] %v10684_v46  ;;  %v12653_v57 = vrot.slane %v12649_v61, %v12263_v0 }
 0x32d   : > { %7266 = vmatpush3.bf16.msra.mxu0 %v12645_v11  ;;  %v10692_v11 = vadd.f32 %v12653_v57, %v12652_v31 }
 0x32e   : > { %7300 = vmatprep.subr.bf16.mxu0 %v12563_v63 }
 0x32f   : > { %12654 = vst [vmem:[#allocation277_spill] sm:$0xff] %v10692_v11 }
 0x3a3   : > { %v6104_v39 = vpop.f32.mrb[8].mxu0 }
 0x3a4   : > { %v1075_v30 = vpop.f32.mrb[9].mxu0 }
 0x3bf   : > { %v1150_v21 = vpop.f32.mrb[10].mxu1 }
 0x3c0   : > { %v8484_v51 = vadd.f32 %v10684_v46, %v1150_v21  ;;  %v1152_v48 = vpop.f32.mrb[11].mxu1 }
 0x3c1   : > { %v8486_v50 = vadd.f32 %v10692_v11, %v1152_v48 }
 0x3c2   : > { %v5479_v26 = vmul.f32 -1.442695, %v8484_v51 }
 0x3c3   : > { %v1156_v13 = vpop.f32.mrb[12].mxu1  ;;  %v6139_v62 = vpop.f32.mrb[10].mxu0  ;;  %v5480_v60 = vmul.f32 -1.442695, %v8486_v50 }
 0x3c4   : > { %8653 = vpow2.f32 %v5479_v26  ;;  %v8488_v49 = vadd.f32 %v10684_v46, %v1156_v13  ;;  %v1158_v40 = vpop.f32.mrb[13].mxu1  ;;  %v1227_v6 = vpop.f32.mrb[11].mxu0  ;;  %v12655_v13 = vld [vmem:[#allocation223_spill] sm:$0xff] }
 0x3c5   : > { %v8490_v19 = vadd.f32 %v10692_v11, %v1158_v40  ;;  %v1228_v46 = vadd.f32 %v1227_v6, %v12655_v13  ;;  %v1076_v40 = vadd.f32 %v1075_v30, %v12656_v12 }
 0x3c6   : > { %v5481_v42 = vmul.f32 -1.442695, %v8488_v49 }
 0x3c7   : > { %v5482_v31 = vmul.f32 -1.442695, %v8490_v19  ;;  %v1233_v19 = vadd.f32 %v6139_v62, %v12655_v13 }
 0x3c8   : > { %8655 = vpow2.f32 %v5481_v42 }
 0x3c9   : > { %8657 = vpow2.f32 %v5480_v60 }
 0x3ca   : > { %8659 = vpow2.f32 %v5482_v31 }
 0x3ce   : > { %v8654_v57 = vpop.eup %8653 }
 0x3cf   : > { %v1252_v21 = vadd.f32 1.0, %v8654_v57  ;;  %v1081_v57 = vadd.f32 %v6104_v39, %v12656_v12 }
 0x3d1   : > { %8661 = vrcp.f32 %v1252_v21 }
 0x3d2   : > { %v8656_v51 = vpop.eup %8655 }
 0x3d3   : > { %v1254_v48 = vadd.f32 1.0, %v8656_v51  ;;  %v8658_v0 = vpop.eup %8657 }
 0x3d4   : > { %v8660_v26 = vpop.eup %8659  ;;  %v1253_v61 = vadd.f32 1.0, %v8658_v0 }
 0x3d5   : > { %8663 = vrcp.f32 %v1254_v48  ;;  %v1255_v49 = vadd.f32 1.0, %v8660_v26 }
 0x3d6   : > { %8665 = vrcp.f32 %v1253_v61 }
 0x3d7   : > { %8667 = vrcp.f32 %v1255_v49 }
 0x3db   : > { %v8662_v36 = vpop.eup %8661 }
 0x3dc   : > { %v1264_v50 = vmul.f32 %v8662_v36, %v1228_v46 }
 0x3de   : > { %v1266_v60 = vadd.f32 %v1264_v50, %v1076_v40 }
 0x3df   : > { %v8664_v42 = vpop.eup %8663  ;;  %v1392_v31 = vpop.f32.mrb[14].mxu1 }
 0x3e0   : > { %v1265_v21 = vmul.f32 %v8664_v42, %v1233_v19  ;;  %8669 = vtanh.f32 %v1266_v60  ;;  %v1393_v0 = vadd.f32 %v1392_v31, %v12545_v10  ;;  %v1394_v51 = vpop.f32.mrb[15].mxu1  ;;  %v8666_v50 = vpop.eup %8665 }
 0x3e1   : > { %v1395_v6 = vadd.f32 %v1394_v51, %v12546_v38 }
 0x3e2   : > { %v1267_v48 = vadd.f32 %v1265_v21, %v1081_v57  ;;  %v1478_v30 = vadd.f32 %v1393_v0, %v10260_v9  ;;  %v8668_v9 = vpop.eup %8667  ;;  %v1274_v0 = vmul.f32 %v12548_v24, %v8666_v50 }
 0x3e3   : > { %v1479_v61 = vadd.f32 %v1395_v6, %v10272_v3  ;;  %v1398_v46 = vpop.f32.mrb[16].mxu1  ;;  %v6174_v36 = vpop.f32.mrb[12].mxu0  ;;  %v1270_v3 = vsub.f32 1.0, %v8666_v50 }
 0x3e4   : > { %8671 = vtanh.f32 %v1267_v48  ;;  %v5483_v62 = vmul.f32 -1.442695, %v1478_v30  ;;  %v1399_v26 = vadd.f32 %v1398_v46, %v12545_v10  ;;  %v1400_v49 = vpop.f32.mrb[17].mxu1  ;;  %v1469_v39 = vpop.f32.mrb[13].mxu0  ;;  %v1271_v48 = vsub.f32 1.0, %v8668_v9 }
 0x3e5   : > { %v1401_v40 = vadd.f32 %v1400_v49, %v12546_v38  ;;  %v5484_v31 = vmul.f32 -1.442695, %v1479_v61 }
 0x3e6   : > { %8673 = vpow2.f32 %v5483_v62  ;;  %v1480_v19 = vadd.f32 %v1399_v26, %v10299_v43  ;;  %v1275_v62 = vmul.f32 %v12554_v58, %v8668_v9  ;;  %v1475_v9 = vadd.f32 %v6174_v36, %v12547_v53 }
 0x3e7   : > { %v1481_v60 = vadd.f32 %v1401_v40, %v10310_v33 }
 0x3e8   : > { %v5485_v42 = vmul.f32 -1.442695, %v1480_v19 }
 0x3e9   : > { %v5486_v51 = vmul.f32 -1.442695, %v1481_v60  ;;  %v1470_v60 = vadd.f32 %v1469_v39, %v12547_v53 }
 0x3ea   : > { %v8670_v57 = vpop.eup %8669  ;;  %8675 = vpow2.f32 %v5485_v42 }
 0x3eb   : > { %v1272_v21 = vmul.f32 %v8670_v57, %v1270_v3  ;;  %8677 = vpow2.f32 %v5484_v31 }
 0x3ec   : > { %8679 = vpow2.f32 %v5486_v51 }
 0x3ed   : > { %v1276_v6 = vadd.f32 %v1274_v0, %v1272_v21 }
 0x3ee   : > { %v8672_v30 = vpop.eup %8671 }
 0x3ef   : > { %v1273_v46 = vmul.f32 %v8672_v30, %v1271_v48 }
 0x3f0   : > { %v8674_v43 = vpop.eup %8673 }
 0x3f1   : > { %v1494_v33 = vadd.f32 1.0, %v8674_v43  ;;  %v10712_v26 = vadd.f32 %v1275_v62, %v1273_v46 }
 0x3f3   : > { %8681 = vrcp.f32 %v1494_v33 }
 0x3f4   : > { %v8676_v61 = vpop.eup %8675 }
 0x3f5   : > { %v1496_v49 = vadd.f32 1.0, %v8676_v61  ;;  %v8678_v40 = vpop.eup %8677 }
 0x3f6   : > { %v8680_v19 = vpop.eup %8679  ;;  %v1495_v50 = vadd.f32 1.0, %v8678_v40 }
 0x3f7   : > { %8683 = vrcp.f32 %v1496_v49  ;;  %v1497_v31 = vadd.f32 1.0, %v8680_v19  ;;  %v10744_v19 = vsel %vm730_vm1, %v12548_v24, %v1276_v6  ;;  %v12657_v24 = vld [vmem:[#allocation231_spill] sm:$0xff] }
 0x3f8   : > { %8685 = vrcp.f32 %v1495_v50  ;;  %v12658_v6 = vld [vmem:[#allocation227_spill] sm:$0xff]  ;;  %v12659_v50 = vld [vmem:[#allocation233_spill] sm:$0xff] }
 0x3f9   : > { %8687 = vrcp.f32 %v1497_v31  ;;  %v12664_v31 = vld [vmem:[#allocation232_spill] sm:$0xff] }
 0x3fd   : > { %v8682_v42 = vpop.eup %8681 }
 0x3fe   : > { %v1506_v3 = vmul.f32 %v8682_v42, %v1470_v60  ;;  %v12660_v60 = vld [vmem:[#allocation234_spill] sm:$0xff]  ;;  %v12661_v42 = vld [vmem:[#allocation229_spill] sm:$0xff] }
 0x400   : > { %v1508_v57 = vadd.f32 %v1506_v3, %v10233_v44  ;;  %v12665_v3 = vld [vmem:[#allocation239_spill] sm:$0xff] }
 0x401   : > { %v8684_v21 = vpop.eup %8683 }
 0x402   : > { %v1507_v0 = vmul.f32 %v8684_v21, %v1475_v9  ;;  %8689 = vtanh.f32 %v1508_v57  ;;  %v8686_v48 = vpop.eup %8685  ;;  %v12666_v9 = vld [vmem:[#allocation240_spill] sm:$0xff]  ;;  %v12667_v57 = vld [vmem:[#allocation235_spill] sm:$0xff]  ;;  %v12668_v21 = vld [vmem:[#allocation242_spill] sm:$0xff] }
 0x403   : > { %v8688_v30 = vpop.eup %8687  ;;  %v1512_v46 = vsub.f32 1.0, %v8686_v48  ;;  %v1516_v43 = vmul.f32 %v8686_v48, %v10475_v2  ;;  %v12671_v48 = vld [vmem:[#allocation245_spill] sm:$0xff] }
 0x404   : > { %v1509_v51 = vadd.f32 %v1507_v0, %v10222_v8  ;;  %v1513_v36 = vsub.f32 1.0, %v8688_v30  ;;  %v1517_v8 = vmul.f32 %v8688_v30, %v10499_v41  ;;  %v12669_v0 = vld [vmem:[#allocation243_spill] sm:$0xff]  ;;  %v12672_v30 = vld [vmem:[#allocation246_spill] sm:$0xff] }
 0x406   : > { %8691 = vtanh.f32 %v1509_v51  ;;  %v12670_v51 = vld [vmem:[#allocation238_spill] sm:$0xff] }
 0x40c   : > { %v8690_v62 = vpop.eup %8689 }
 0x40d   : > { %v1514_v39 = vmul.f32 %v8690_v62, %v1512_v46  ;;  %v12673_v46 = vld [vmem:[#allocation241_spill] sm:$0xff]  ;;  %v12674_v62 = vld [vmem:[#allocation248_spill] sm:$0xff] }
 0x40f   : > { %v1518_v33 = vadd.f32 %v1516_v43, %v1514_v39  ;;  %v12675_v39 = vld [vmem:[#allocation249_spill] sm:$0xff]  ;;  %v12676_v43 = vld [vmem:[#allocation244_spill] sm:$0xff] }
 0x410   : > { %v8692_v61 = vpop.eup %8691 }
 0x411   : > { %v10723_v44 = vsel %vm1324_vm3, %v10475_v2, %v1518_v33  ;;  %v1515_v49 = vmul.f32 %v8692_v61, %v1513_v36  ;;  %v12677_v33 = vld [vmem:[#allocation250_spill] sm:$0xff]  ;;  %v12678_v36 = vld [vmem:[#allocation247_spill] sm:$0xff] }
 0x412   : > { %1591 = vmatmul.mubr.f32.vlgmr.msra.gmra.mrb[18].mxu1 %v10723_v44  ;;  %6207 = vmatprep.mubr.f32.mxu0 %v10723_v44  ;;  %v12679_v61 = vld [vmem:[#allocation251_spill] sm:$0xff] }
 0x413   : > { %7270 = vmatpush1.bf16.msra.mxu1 %v10466_v20  ;;  %1596 = vmatprep.mubr.f32.mxu1 %v12556_v23  ;;  %v1519_v40 = vadd.f32 %v1517_v8, %v1515_v49  ;;  %v12680_v49 = vld [vmem:[#allocation252_spill] sm:$0xff]  ;;  %v12681_v8 = vld [vmem:[#allocation254_spill] sm:$0xff] }
 0x414   : > { %7272 = vmatprep.subr.bf16.mxu1 %v10470_v56 }
 0x415   : > { %v10735_v2 = vsel %vm1325_vm4, %v10499_v41, %v1519_v40  ;;  %v10783_v41 = vsel %vm731_vm2, %v12554_v58, %v10712_v26  ;;  %v12662_v58 = vld [vmem:[#allocation236_spill] sm:$0xff]  ;;  %v12663_v26 = vld [vmem:[#allocation237_spill] sm:$0xff] }
 0x416   : > { %1597 = vmatmul.mubr.f32.gmra.mrb[20].mxu1 %v10735_v2  ;;  %6208 = vmatmul.mubr.f32.vlgmr.msra.gmra.mrb[14].mxu0 %v10735_v2  ;;  %v12682_v40 = vld [vmem:[#allocation253_spill] sm:$0xff] }
 0x417   : > { %7274 = vmatpush1.bf16.msra.mxu1 %v10485_v18  ;;  %7302 = vmatpush3.bf16.msra.mxu0 %v12563_v63 }
 0x418   : > { %6242 = vmatprep.mubr.f32.mxu0 %v10744_v19  ;;  %7276 = vmatprep.subr.bf16.mxu1 %v10490_v59 }
 0x419   : > { %7304 = vmatprep.subr.bf16.mxu0 %v10494_v32  ;;  %1742 = vmatprep.mubr.f32.mxu1 %v12556_v23 }
 0x41b   : > { %7278 = vmatpush1.bf16.msra.mxu1 %v10507_v37  ;;  %7306 = vmatpush3.bf16.msra.mxu0 %v10494_v32 }
 0x41c   : > { %7280 = vmatprep.subr.bf16.mxu1 %v10513_v1  ;;  %7308 = vmatprep.subr.bf16.mxu0 %v10517_v7 }
 0x41f   : > { %7282 = vmatpush1.bf16.msra.mxu1 %v10525_v4  ;;  %7310 = vmatpush3.bf16.msra.mxu0 %v10517_v7 }
 0x420   : > { %7284 = vmatprep.subr.bf16.mxu1 %v10531_v17  ;;  %7312 = vmatprep.subr.bf16.mxu0 %v10535_v16 }
 0x423   : > { %7286 = vmatpush1.bf16.msra.mxu1 %v10541_v47  ;;  %7314 = vmatpush3.bf16.msra.mxu0 %v10535_v16 }
 0x424   : > { %7288 = vmatprep.subr.bf16.mxu1 %v10547_v25  ;;  %7316 = vmatprep.subr.bf16.mxu0 %v10551_v15 }
 0x427   : > { %7290 = vmatpush1.bf16.msra.mxu1 %v10557_v28  ;;  %7318 = vmatpush3.bf16.msra.mxu0 %v10551_v15 }
 0x428   : > { %7292 = vmatprep.subr.bf16.mxu1 %v10563_v45  ;;  %7320 = vmatprep.subr.bf16.mxu0 %v10567_v55 }
 0x42b   : > { %7294 = vmatpush1.bf16.msra.mxu1 %v10573_v14  ;;  %7322 = vmatpush3.bf16.msra.mxu0 %v10567_v55 }
 0x42c   : > { %7296 = vmatprep.subr.bf16.mxu1 %v10579_v52  ;;  %7324 = vmatprep.subr.bf16.mxu0 %v10583_v34 }
 0x42f   : > { %7298 = vmatpush1.bf16.msra.mxu1 %v10589_v27  ;;  %7326 = vmatpush3.bf16.msra.mxu0 %v10583_v34 }
 0x430   : > { %7328 = vmatprep.subr.bf16.mxu0 %v10595_v5  ;;  %7332 = vmatprep.subr.bf16.mxu1 %v12598_v35 }
 0x432   : > { %1743 = vmatmul.mubr.f32.vlgmr.msra.gmra.mrb[18].mxu1 %v10744_v19 }
 0x433   : > { %7330 = vmatpush3.bf16.msra.mxu0 %v10595_v5  ;;  %7334 = vmatpush1.bf16.msra.mxu1 %v12599_v54 }
 0x434   : > { %1748 = vmatprep.mubr.f32.mxu1 %v12556_v23  ;;  %7336 = vmatprep.subr.bf16.mxu1 %v12657_v24 }
 0x435   : > { %7364 = vmatprep.subr.bf16.mxu0 %v12658_v6 }
 0x436   : > { %1749 = vmatmul.mubr.f32.gmra.mrb[20].mxu1 %v10783_v41  ;;  %6243 = vmatmul.mubr.f32.vlgmr.msra.gmra.mrb[16].mxu0 %v10783_v41 }
 0x437   : > { %7338 = vmatpush1.bf16.msra.mxu1 %v12659_v50  ;;  %7366 = vmatpush3.bf16.msra.mxu0 %v12658_v6 }
 0x438   : > { %6277 = vmatprep.mubr.f32.mxu0 %v10723_v44  ;;  %7340 = vmatprep.subr.bf16.mxu1 %v12660_v60 }
 0x439   : > { %7368 = vmatprep.subr.bf16.mxu0 %v12661_v42  ;;  %1984 = vmatprep.mubr.f32.mxu1 %v12556_v23 }
 0x43b   : > { %7342 = vmatpush1.bf16.msra.mxu1 %v12662_v58  ;;  %7370 = vmatpush3.bf16.msra.mxu0 %v12661_v42 }
 0x43c   : > { %7344 = vmatprep.subr.bf16.mxu1 %v12663_v26  ;;  %7372 = vmatprep.subr.bf16.mxu0 %v12664_v31 }
 0x43f   : > { %7346 = vmatpush1.bf16.msra.mxu1 %v12665_v3  ;;  %7374 = vmatpush3.bf16.msra.mxu0 %v12664_v31 }
 0x440   : > { %7348 = vmatprep.subr.bf16.mxu1 %v12666_v9  ;;  %7376 = vmatprep.subr.bf16.mxu0 %v12667_v57 }
 0x443   : > { %7350 = vmatpush1.bf16.msra.mxu1 %v12668_v21  ;;  %7378 = vmatpush3.bf16.msra.mxu0 %v12667_v57 }
 0x444   : > { %7352 = vmatprep.subr.bf16.mxu1 %v12669_v0  ;;  %7380 = vmatprep.subr.bf16.mxu0 %v12670_v51 }
 0x447   : > { %7354 = vmatpush1.bf16.msra.mxu1 %v12671_v48  ;;  %7382 = vmatpush3.bf16.msra.mxu0 %v12670_v51 }
 0x448   : > { %7356 = vmatprep.subr.bf16.mxu1 %v12672_v30  ;;  %7384 = vmatprep.subr.bf16.mxu0 %v12673_v46 }
 0x44b   : > { %7358 = vmatpush1.bf16.msra.mxu1 %v12674_v62  ;;  %7386 = vmatpush3.bf16.msra.mxu0 %v12673_v46  ;;  %v12691_v62 = vld [vmem:[#allocation262_spill] sm:$0xff] }
 0x44c   : > { %7360 = vmatprep.subr.bf16.mxu1 %v12675_v39  ;;  %7388 = vmatprep.subr.bf16.mxu0 %v12676_v43  ;;  %v12689_v39 = vld [vmem:[#allocation261_spill] sm:$0xff] }
 0x44f   : > { %7362 = vmatpush1.bf16.msra.mxu1 %v12677_v33  ;;  %7390 = vmatpush3.bf16.msra.mxu0 %v12676_v43  ;;  %v12684_v33 = vld [vmem:[#allocation257_spill] sm:$0xff]  ;;  %v12687_v43 = vld [vmem:[#allocation260_spill] sm:$0xff] }
 0x450   : > { %7392 = vmatprep.subr.bf16.mxu0 %v12678_v36  ;;  %7396 = vmatprep.subr.bf16.mxu1 %v12679_v61  ;;  %v12683_v61 = vld [vmem:[#allocation255_spill] sm:$0xff] }
 0x452   : > { %1985 = vmatmul.mubr.f32.vlgmr.msra.gmra.mrb[22].mxu1 %v10723_v44 }
 0x453   : > { %7394 = vmatpush3.bf16.msra.mxu0 %v12678_v36  ;;  %1990 = vmatprep.mubr.f32.mxu1 %v12556_v23  ;;  %v12685_v36 = vld [vmem:[#allocation256_spill] sm:$0xff] }
 0x454   : > { %7398 = vmatpush1.bf16.msra.mxu1 %v12680_v49  ;;  %7428 = vmatprep.subr.bf16.mxu0 %v12681_v8  ;;  %v12686_v49 = vld [vmem:[#allocation258_spill] sm:$0xff] }
 0x455   : > { %7400 = vmatprep.subr.bf16.mxu1 %v12682_v40  ;;  %v12688_v40 = vld [vmem:[#allocation259_spill] sm:$0xff] }
 0x456   : > { %1991 = vmatmul.mubr.f32.gmra.mrb[24].mxu1 %v10735_v2  ;;  %6278 = vmatmul.mubr.f32.vlgmr.msra.gmra.mrb[18].mxu0 %v10735_v2 }
 0x457   : > { %7430 = vmatpush3.bf16.msra.mxu0 %v12681_v8  ;;  %2184 = vmatprep.mubr.f32.mxu1 %v12556_v23  ;;  %v12690_v8 = vld [vmem:[#allocation263_spill] sm:$0xff] }
 0x458   : > { %7402 = vmatpush1.bf16.msra.mxu1 %v12683_v61  ;;  %7432 = vmatprep.subr.bf16.mxu0 %v12684_v33  ;;  %v12692_v61 = vld [vmem:[#allocation264_spill] sm:$0xff] }
 0x459   : > { %7404 = vmatprep.subr.bf16.mxu1 %v12685_v36  ;;  %v12693_v36 = vld [vmem:[#allocation266_spill] sm:$0xff] }
 0x45b   : > { %7434 = vmatpush3.bf16.msra.mxu0 %v12684_v33  ;;  %v12694_v33 = vld [vmem:[#allocation265_spill] sm:$0xff] }
 0x45c   : > { %7406 = vmatpush1.bf16.msra.mxu1 %v12686_v49  ;;  %7436 = vmatprep.subr.bf16.mxu0 %v12687_v43  ;;  %v12695_v49 = vld [vmem:[#allocation267_spill] sm:$0xff] }
 0x45d   : > { %7408 = vmatprep.subr.bf16.mxu1 %v12688_v40  ;;  %v12696_v40 = vld [vmem:[#allocation269_spill] sm:$0xff] }
 0x45f   : > { %7438 = vmatpush3.bf16.msra.mxu0 %v12687_v43  ;;  %v12697_v43 = vld [vmem:[#allocation268_spill] sm:$0xff] }
 0x460   : > { %7410 = vmatpush1.bf16.msra.mxu1 %v12689_v39  ;;  %7440 = vmatprep.subr.bf16.mxu0 %v12690_v8  ;;  %v12698_v39 = vld [vmem:[#allocation270_spill] sm:$0xff] }
 0x461   : > { %7412 = vmatprep.subr.bf16.mxu1 %v12691_v62  ;;  %v12699_v62 = vld [vmem:[#allocation272_spill] sm:$0xff] }
 0x463   : > { %7442 = vmatpush3.bf16.msra.mxu0 %v12690_v8  ;;  %v12700_v8 = vld [vmem:[#allocation271_spill] sm:$0xff] }
 0x464   : > { %7414 = vmatpush1.bf16.msra.mxu1 %v12692_v61  ;;  %7444 = vmatprep.subr.bf16.mxu0 %v12693_v36  ;;  %v12701_v61 = vld [vmem:[#allocation273_spill] sm:$0xff] }
 0x465   : > { %7416 = vmatprep.subr.bf16.mxu1 %v12694_v33  ;;  %v12702_v33 = vld [vmem:[#allocation274_spill] sm:$0xff] }
 0x467   : > { %7446 = vmatpush3.bf16.msra.mxu0 %v12693_v36  ;;  %v12703_v36 = vld [vmem:[#allocation275_spill] sm:$0xff] }
 0x468   : > { %7418 = vmatpush1.bf16.msra.mxu1 %v12695_v49  ;;  %7448 = vmatprep.subr.bf16.mxu0 %v12696_v40 }
 0x469   : > { %7420 = vmatprep.subr.bf16.mxu1 %v12697_v43 }
 0x46b   : > { %7450 = vmatpush3.bf16.msra.mxu0 %v12696_v40 }
 0x46c   : > { %7422 = vmatpush1.bf16.msra.mxu1 %v12698_v39  ;;  %7452 = vmatprep.subr.bf16.mxu0 %v12699_v62  ;;  %v12704_v39 = vld [vmem:[#allocation226_spill] sm:$0xff] }
 0x46d   : > { %7424 = vmatprep.subr.bf16.mxu1 %v12700_v8 }
 0x46f   : > { %7454 = vmatpush3.bf16.msra.mxu0 %v12699_v62 }
 0x470   : > { %7426 = vmatpush1.bf16.msra.mxu1 %v12701_v61  ;;  %7456 = vmatprep.subr.bf16.mxu0 %v12702_v33 }
 0x471   : > { %7460 = vmatprep.subr.bf16.mxu1 %v12703_v36 }
 0x473   : > { %7458 = vmatpush3.bf16.msra.mxu0 %v12702_v33 }
 0x474   : > { %7492 = vmatprep.subr.bf16.mxu0 %v12563_v63 }
 0x4e9   : > { %v6209_v43 = vpop.f32.mrb[14].mxu0 }
 0x4ea   : > { %v1669_v40 = vpop.f32.mrb[15].mxu0 }
 0x505   : > { %v1744_v49 = vpop.f32.mrb[18].mxu1 }
 0x506   : > { %v8492_v46 = vadd.f32 %v12704_v39, %v1744_v49  ;;  %v1746_v30 = vpop.f32.mrb[19].mxu1 }
 0x507   : > { %v8494_v8 = vadd.f32 %v10692_v11, %v1746_v30 }
 0x508   : > { %v5487_v48 = vmul.f32 -1.442695, %v8492_v46 }
 0x509   : > { %v1750_v62 = vpop.f32.mrb[20].mxu1  ;;  %v6244_v51 = vpop.f32.mrb[16].mxu0  ;;  %v5488_v57 = vmul.f32 -1.442695, %v8494_v8  ;;  %v1675_v8 = vadd.f32 %v6209_v43, %v12656_v12 }
 0x50a   : > { %8693 = vpow2.f32 %v5487_v48  ;;  %v8496_v61 = vadd.f32 %v12704_v39, %v1750_v62  ;;  %v1752_v0 = vpop.f32.mrb[21].mxu1  ;;  %v1821_v36 = vpop.f32.mrb[17].mxu0 }
 0x50b   : > { %v8498_v33 = vadd.f32 %v10692_v11, %v1752_v0  ;;  %v1822_v62 = vadd.f32 %v1821_v36, %v12655_v13  ;;  %v1670_v0 = vadd.f32 %v1669_v40, %v12656_v12 }
 0x50c   : > { %v5489_v21 = vmul.f32 -1.442695, %v8496_v61 }
 0x50d   : > { %v5490_v9 = vmul.f32 -1.442695, %v8498_v33 }
 0x50e   : > { %8695 = vpow2.f32 %v5489_v21 }
 0x50f   : > { %8697 = vpow2.f32 %v5488_v57  ;;  %v1827_v57 = vadd.f32 %v6244_v51, %v12655_v13 }
 0x510   : > { %8699 = vpow2.f32 %v5490_v9 }
 0x514   : > { %v8694_v3 = vpop.eup %8693 }
 0x515   : > { %v1846_v49 = vadd.f32 1.0, %v8694_v3 }
 0x517   : > { %8701 = vrcp.f32 %v1846_v49 }
 0x518   : > { %v8696_v46 = vpop.eup %8695 }
 0x519   : > { %v1848_v30 = vadd.f32 1.0, %v8696_v46  ;;  %v8698_v31 = vpop.eup %8697 }
 0x51a   : > { %v8700_v48 = vpop.eup %8699  ;;  %v1847_v26 = vadd.f32 1.0, %v8698_v31 }
 0x51b   : > { %8703 = vrcp.f32 %v1848_v30  ;;  %v1849_v61 = vadd.f32 1.0, %v8700_v48  ;;  %v12705_v48 = vld [vmem:[#allocation294_spill] sm:$0xff] }
 0x51c   : > { %8705 = vrcp.f32 %v1847_v26  ;;  %v12706_v26 = vld [vmem:[#allocation295_spill] sm:$0xff] }
 0x51d   : > { %8707 = vrcp.f32 %v1849_v61 }
 0x521   : > { %v8702_v39 = vpop.eup %8701 }
 0x522   : > { %v1858_v21 = vmul.f32 %v8702_v39, %v1822_v62 }
 0x524   : > { %v1860_v33 = vadd.f32 %v1858_v21, %v1670_v0 }
 0x525   : > { %v8704_v9 = vpop.eup %8703  ;;  %v1986_v3 = vpop.f32.mrb[22].mxu1 }
 0x526   : > { %v1859_v49 = vmul.f32 %v8704_v9, %v1827_v57  ;;  %8709 = vtanh.f32 %v1860_v33  ;;  %v1987_v31 = vadd.f32 %v1986_v3, %v12545_v10  ;;  %v1988_v46 = vpop.f32.mrb[23].mxu1  ;;  %v8706_v33 = vpop.eup %8705  ;;  %v12707_v9 = vld [vmem:[#allocation298_spill] sm:$0xff] }
 0x527   : > { %v1989_v36 = vadd.f32 %v1988_v46, %v12546_v38  ;;  %v12708_v46 = vld [vmem:[#allocation299_spill] sm:$0xff] }
 0x528   : > { %v1861_v30 = vadd.f32 %v1859_v49, %v1675_v8  ;;  %v2072_v40 = vadd.f32 %v1987_v31, %v12705_v48  ;;  %v8708_v31 = vpop.eup %8707 }
 0x529   : > { %v2073_v39 = vadd.f32 %v1989_v36, %v12706_v26  ;;  %v1992_v62 = vpop.f32.mrb[24].mxu1  ;;  %v6279_v51 = vpop.f32.mrb[18].mxu0  ;;  %v1864_v36 = vsub.f32 1.0, %v8706_v33  ;;  %v1865_v12 = vsub.f32 1.0, %v8708_v31 }
 0x52a   : > { %8711 = vtanh.f32 %v1861_v30  ;;  %v5491_v0 = vmul.f32 -1.442695, %v2072_v40  ;;  %v1993_v61 = vadd.f32 %v1992_v62, %v12545_v10  ;;  %v1994_v21 = vpop.f32.mrb[25].mxu1  ;;  %v2063_v43 = vpop.f32.mrb[19].mxu0  ;;  %v1868_v40 = vmul.f32 %v8706_v33, %v10744_v19 }
 0x52b   : > { %v1995_v57 = vadd.f32 %v1994_v21, %v12546_v38  ;;  %v5492_v48 = vmul.f32 -1.442695, %v2073_v39 }
 0x52c   : > { %8713 = vpow2.f32 %v5491_v0  ;;  %v2074_v3 = vadd.f32 %v1993_v61, %v12707_v9  ;;  %v1869_v0 = vmul.f32 %v8708_v31, %v10783_v41  ;;  %v2069_v31 = vadd.f32 %v6279_v51, %v12547_v53 }
 0x52d   : > { %v2075_v8 = vadd.f32 %v1995_v57, %v12708_v46 }
 0x52e   : > { %v5493_v49 = vmul.f32 -1.442695, %v2074_v3 }
 0x52f   : > { %v5494_v62 = vmul.f32 -1.442695, %v2075_v8  ;;  %v2064_v8 = vadd.f32 %v2063_v43, %v12547_v53 }
 0x530   : > { %v8710_v26 = vpop.eup %8709  ;;  %8715 = vpow2.f32 %v5493_v49 }
 0x531   : > { %v1866_v30 = vmul.f32 %v8710_v26, %v1864_v36  ;;  %8717 = vpow2.f32 %v5492_v48  ;;  %v12709_v26 = vld [vmem:[#allocation293_spill] sm:$0xff] }
 0x532   : > { %8719 = vpow2.f32 %v5494_v62  ;;  %v12710_v62 = vld [vmem:[#allocation292_spill] sm:$0xff] }
 0x533   : > { %v1870_v10 = vadd.f32 %v1868_v40, %v1866_v30 }
 0x534   : > { %v8712_v21 = vpop.eup %8711 }
 0x535   : > { %v1867_v38 = vmul.f32 %v8712_v21, %v1865_v12 }
 0x536   : > { %v8714_v61 = vpop.eup %8713 }
 0x537   : > { %v2088_v57 = vadd.f32 1.0, %v8714_v61  ;;  %v10875_v9 = vadd.f32 %v1869_v0, %v1867_v38 }
 0x539   : > { %8721 = vrcp.f32 %v2088_v57 }
 0x53a   : > { %v8716_v39 = vpop.eup %8715 }
 0x53b   : > { %v2090_v3 = vadd.f32 1.0, %v8716_v39  ;;  %v8718_v46 = vpop.eup %8717 }
 0x53c   : > { %v8720_v49 = vpop.eup %8719  ;;  %v2089_v33 = vadd.f32 1.0, %v8718_v46 }
 0x53d   : > { %8723 = vrcp.f32 %v2090_v3  ;;  %v2091_v36 = vadd.f32 1.0, %v8720_v49 }
 0x53e   : > { %8725 = vrcp.f32 %v2089_v33 }
 0x53f   : > { %8727 = vrcp.f32 %v2091_v36 }
 0x543   : > { %v8722_v48 = vpop.eup %8721 }
 0x544   : > { %v2100_v12 = vmul.f32 %v8722_v48, %v2064_v8 }
 0x546   : > { %v2102_v30 = vadd.f32 %v2100_v12, %v12709_v26  ;;  %v10907_v12 = vsel %vm1324_vm3, %v10744_v19, %v1870_v10  ;;  %v10946_v10 = vsel %vm1325_vm4, %v10783_v41, %v10875_v9  ;;  %v12712_v19 = vld [vmem:[#allocation232_spill] sm:$0xff]  ;;  %v12713_v41 = vld [vmem:[#allocation239_spill] sm:$0xff]  ;;  %v12716_v26 = vld [vmem:[#allocation242_spill] sm:$0xff] }
 0x547   : > { %v8724_v40 = vpop.eup %8723  ;;  %v12714_v9 = vld [vmem:[#allocation240_spill] sm:$0xff] }
 0x548   : > { %v2101_v38 = vmul.f32 %v8724_v40, %v2069_v31  ;;  %8729 = vtanh.f32 %v2102_v30  ;;  %v8726_v0 = vpop.eup %8725  ;;  %v12715_v31 = vld [vmem:[#allocation235_spill] sm:$0xff]  ;;  %v12718_v40 = vld [vmem:[#allocation238_spill] sm:$0xff] }
 0x549   : > { %v8728_v61 = vpop.eup %8727  ;;  %v2106_v57 = vsub.f32 1.0, %v8726_v0  ;;  %v2110_v3 = vmul.f32 %v8726_v0, %v10723_v44  ;;  %v12717_v30 = vld [vmem:[#allocation243_spill] sm:$0xff]  ;;  %v12722_v0 = vld [vmem:[#allocation248_spill] sm:$0xff] }
 0x54a   : > { %v2103_v21 = vadd.f32 %v2101_v38, %v12710_v62  ;;  %v2107_v51 = vsub.f32 1.0, %v8728_v61  ;;  %v2111_v48 = vmul.f32 %v8728_v61, %v10735_v2  ;;  %v12719_v38 = vld [vmem:[#allocation245_spill] sm:$0xff]  ;;  %v12720_v62 = vld [vmem:[#allocation246_spill] sm:$0xff] }
 0x54b   : > { %v12723_v61 = vld [vmem:[#allocation249_spill] sm:$0xff] }
 0x54c   : > { %8731 = vtanh.f32 %v2103_v21  ;;  %v12721_v21 = vld [vmem:[#allocation241_spill] sm:$0xff] }
 0x552   : > { %v8730_v39 = vpop.eup %8729 }
 0x553   : > { %v2108_v43 = vmul.f32 %v8730_v39, %v2106_v57  ;;  %v12724_v57 = vld [vmem:[#allocation244_spill] sm:$0xff]  ;;  %v12725_v39 = vld [vmem:[#allocation250_spill] sm:$0xff] }
 0x555   : > { %v2112_v46 = vadd.f32 %v2110_v3, %v2108_v43  ;;  %v12726_v43 = vld [vmem:[#allocation247_spill] sm:$0xff] }
 0x556   : > { %v8732_v49 = vpop.eup %8731  ;;  %v12727_v3 = vld [vmem:[#allocation251_spill] sm:$0xff] }
 0x557   : > { %v10886_v33 = vsel %vm1918_vm5, %v10723_v44, %v2112_v46  ;;  %v2109_v8 = vmul.f32 %v8732_v49, %v2107_v51  ;;  %v12728_v46 = vld [vmem:[#allocation252_spill] sm:$0xff]  ;;  %v12729_v51 = vld [vmem:[#allocation254_spill] sm:$0xff]  ;;  %v12730_v49 = vld [vmem:[#allocation253_spill] sm:$0xff] }
 0x558   : > { %2185 = vmatmul.mubr.f32.vlgmr.msra.gmra.mrb[26].mxu1 %v10886_v33  ;;  %6312 = vmatprep.mubr.f32.mxu0 %v10886_v33 }
 0x559   : > { %7462 = vmatpush1.bf16.msra.mxu1 %v10466_v20  ;;  %2190 = vmatprep.mubr.f32.mxu1 %v12556_v23  ;;  %v2113_v36 = vadd.f32 %v2111_v48, %v2109_v8  ;;  %v12731_v8 = vld [vmem:[#allocation255_spill] sm:$0xff]  ;;  %v12732_v48 = vld [vmem:[#allocation257_spill] sm:$0xff] }
 0x55a   : > { %7464 = vmatprep.subr.bf16.mxu1 %v10470_v56 }
 0x55b   : > { %v10898_v44 = vsel %vm1919_vm6, %v10735_v2, %v2113_v36  ;;  %v12711_v2 = vld [vmem:[#allocation237_spill] sm:$0xff]  ;;  %v12733_v36 = vld [vmem:[#allocation256_spill] sm:$0xff] }
 0x55c   : > { %2191 = vmatmul.mubr.f32.gmra.mrb[28].mxu1 %v10898_v44  ;;  %6313 = vmatmul.mubr.f32.vlgmr.msra.gmra.mrb[20].mxu0 %v10898_v44 }
 0x55d   : > { %7466 = vmatpush1.bf16.msra.mxu1 %v10485_v18  ;;  %7494 = vmatpush3.bf16.msra.mxu0 %v12563_v63 }
 0x55e   : > { %6347 = vmatprep.mubr.f32.mxu0 %v10907_v12  ;;  %7468 = vmatprep.subr.bf16.mxu1 %v10490_v59 }
 0x55f   : > { %7496 = vmatprep.subr.bf16.mxu0 %v10494_v32  ;;  %2336 = vmatprep.mubr.f32.mxu1 %v12556_v23 }
 0x561   : > { %7470 = vmatpush1.bf16.msra.mxu1 %v10507_v37  ;;  %7498 = vmatpush3.bf16.msra.mxu0 %v10494_v32 }
 0x562   : > { %7472 = vmatprep.subr.bf16.mxu1 %v10513_v1  ;;  %7500 = vmatprep.subr.bf16.mxu0 %v10517_v7 }
 0x565   : > { %7474 = vmatpush1.bf16.msra.mxu1 %v10525_v4  ;;  %7502 = vmatpush3.bf16.msra.mxu0 %v10517_v7 }
 0x566   : > { %7476 = vmatprep.subr.bf16.mxu1 %v10531_v17  ;;  %7504 = vmatprep.subr.bf16.mxu0 %v10535_v16 }
 0x569   : > { %7478 = vmatpush1.bf16.msra.mxu1 %v10541_v47  ;;  %7506 = vmatpush3.bf16.msra.mxu0 %v10535_v16 }
 0x56a   : > { %7480 = vmatprep.subr.bf16.mxu1 %v10547_v25  ;;  %7508 = vmatprep.subr.bf16.mxu0 %v10551_v15 }
 0x56d   : > { %7482 = vmatpush1.bf16.msra.mxu1 %v10557_v28  ;;  %7510 = vmatpush3.bf16.msra.mxu0 %v10551_v15 }
 0x56e   : > { %7484 = vmatprep.subr.bf16.mxu1 %v10563_v45  ;;  %7512 = vmatprep.subr.bf16.mxu0 %v10567_v55 }
 0x571   : > { %7486 = vmatpush1.bf16.msra.mxu1 %v10573_v14  ;;  %7514 = vmatpush3.bf16.msra.mxu0 %v10567_v55 }
 0x572   : > { %7488 = vmatprep.subr.bf16.mxu1 %v10579_v52  ;;  %7516 = vmatprep.subr.bf16.mxu0 %v10583_v34 }
 0x575   : > { %7490 = vmatpush1.bf16.msra.mxu1 %v10589_v27  ;;  %7518 = vmatpush3.bf16.msra.mxu0 %v10583_v34 }
 0x576   : > { %7520 = vmatprep.subr.bf16.mxu0 %v10595_v5  ;;  %7524 = vmatprep.subr.bf16.mxu1 %v12598_v35 }
 0x578   : > { %2337 = vmatmul.mubr.f32.vlgmr.msra.gmra.mrb[26].mxu1 %v10907_v12 }
 0x579   : > { %7522 = vmatpush3.bf16.msra.mxu0 %v10595_v5  ;;  %7526 = vmatpush1.bf16.msra.mxu1 %v12599_v54 }
 0x57a   : > { %2342 = vmatprep.mubr.f32.mxu1 %v12556_v23  ;;  %7528 = vmatprep.subr.bf16.mxu1 %v12657_v24 }
 0x57b   : > { %7556 = vmatprep.subr.bf16.mxu0 %v12658_v6 }
 0x57c   : > { %2343 = vmatmul.mubr.f32.gmra.mrb[28].mxu1 %v10946_v10  ;;  %6348 = vmatmul.mubr.f32.vlgmr.msra.gmra.mrb[22].mxu0 %v10946_v10 }
 0x57d   : > { %7530 = vmatpush1.bf16.msra.mxu1 %v12659_v50  ;;  %7558 = vmatpush3.bf16.msra.mxu0 %v12658_v6 }
 0x57e   : > { %6382 = vmatprep.mubr.f32.mxu0 %v10886_v33  ;;  %7532 = vmatprep.subr.bf16.mxu1 %v12660_v60 }
 0x57f   : > { %7560 = vmatprep.subr.bf16.mxu0 %v12661_v42  ;;  %2578 = vmatprep.mubr.f32.mxu1 %v12556_v23 }
 0x581   : > { %7534 = vmatpush1.bf16.msra.mxu1 %v12662_v58  ;;  %7562 = vmatpush3.bf16.msra.mxu0 %v12661_v42 }
 0x582   : > { %7536 = vmatprep.subr.bf16.mxu1 %v12711_v2  ;;  %7564 = vmatprep.subr.bf16.mxu0 %v12712_v19 }
 0x585   : > { %7538 = vmatpush1.bf16.msra.mxu1 %v12713_v41  ;;  %7566 = vmatpush3.bf16.msra.mxu0 %v12712_v19  ;;  %v12753_v41 = vld [vmem:[#allocation219_spill] sm:$0xff]  ;;  %v12756_v19 = vld [vmem:[#allocation296_spill] sm:$0xff] }
 0x586   : > { %7540 = vmatprep.subr.bf16.mxu1 %v12714_v9  ;;  %7568 = vmatprep.subr.bf16.mxu0 %v12715_v31 }
 0x589   : > { %7542 = vmatpush1.bf16.msra.mxu1 %v12716_v26  ;;  %7570 = vmatpush3.bf16.msra.mxu0 %v12715_v31 }
 0x58a   : > { %7544 = vmatprep.subr.bf16.mxu1 %v12717_v30  ;;  %7572 = vmatprep.subr.bf16.mxu0 %v12718_v40 }
 0x58d   : > { %7546 = vmatpush1.bf16.msra.mxu1 %v12719_v38  ;;  %7574 = vmatpush3.bf16.msra.mxu0 %v12718_v40 }
 0x58e   : > { %7548 = vmatprep.subr.bf16.mxu1 %v12720_v62  ;;  %7576 = vmatprep.subr.bf16.mxu0 %v12721_v21 }
 0x591   : > { %7550 = vmatpush1.bf16.msra.mxu1 %v12722_v0  ;;  %7578 = vmatpush3.bf16.msra.mxu0 %v12721_v21 }
 0x592   : > { %7552 = vmatprep.subr.bf16.mxu1 %v12723_v61  ;;  %7580 = vmatprep.subr.bf16.mxu0 %v12724_v57 }
 0x595   : > { %7554 = vmatpush1.bf16.msra.mxu1 %v12725_v39  ;;  %7582 = vmatpush3.bf16.msra.mxu0 %v12724_v57  ;;  %v12739_v39 = vld [vmem:[#allocation262_spill] sm:$0xff] }
 0x596   : > { %7584 = vmatprep.subr.bf16.mxu0 %v12726_v43  ;;  %7588 = vmatprep.subr.bf16.mxu1 %v12727_v3  ;;  %v12735_v3 = vld [vmem:[#allocation260_spill] sm:$0xff] }
 0x598   : > { %2579 = vmatmul.mubr.f32.vlgmr.msra.gmra.mrb[30].mxu1 %v10886_v33 }
 0x599   : > { %7586 = vmatpush3.bf16.msra.mxu0 %v12726_v43  ;;  %2584 = vmatprep.mubr.f32.mxu1 %v12556_v23  ;;  %v12737_v43 = vld [vmem:[#allocation261_spill] sm:$0xff] }
 0x59a   : > { %7590 = vmatpush1.bf16.msra.mxu1 %v12728_v46  ;;  %7620 = vmatprep.subr.bf16.mxu0 %v12729_v51  ;;  %v12734_v46 = vld [vmem:[#allocation258_spill] sm:$0xff] }
 0x59b   : > { %7592 = vmatprep.subr.bf16.mxu1 %v12730_v49  ;;  %v12736_v49 = vld [vmem:[#allocation259_spill] sm:$0xff] }
 0x59c   : > { %2585 = vmatmul.mubr.f32.gmra.mrb[32].mxu1 %v10898_v44  ;;  %6383 = vmatmul.mubr.f32.vlgmr.msra.gmra.mrb[24].mxu0 %v10898_v44 }
 0x59d   : > { %7622 = vmatpush3.bf16.msra.mxu0 %v12729_v51  ;;  %2778 = vmatprep.mubr.f32.mxu1 %v12556_v23  ;;  %v12738_v51 = vld [vmem:[#allocation263_spill] sm:$0xff] }
 0x59e   : > { %7594 = vmatpush1.bf16.msra.mxu1 %v12731_v8  ;;  %7624 = vmatprep.subr.bf16.mxu0 %v12732_v48  ;;  %v12740_v8 = vld [vmem:[#allocation264_spill] sm:$0xff] }
 0x59f   : > { %7596 = vmatprep.subr.bf16.mxu1 %v12733_v36  ;;  %v12741_v36 = vld [vmem:[#allocation266_spill] sm:$0xff] }
 0x5a1   : > { %7626 = vmatpush3.bf16.msra.mxu0 %v12732_v48  ;;  %v12742_v48 = vld [vmem:[#allocation265_spill] sm:$0xff] }
 0x5a2   : > { %7598 = vmatpush1.bf16.msra.mxu1 %v12734_v46  ;;  %7628 = vmatprep.subr.bf16.mxu0 %v12735_v3  ;;  %v12743_v46 = vld [vmem:[#allocation267_spill] sm:$0xff] }
 0x5a3   : > { %7600 = vmatprep.subr.bf16.mxu1 %v12736_v49  ;;  %v12744_v49 = vld [vmem:[#allocation269_spill] sm:$0xff] }
 0x5a5   : > { %7630 = vmatpush3.bf16.msra.mxu0 %v12735_v3  ;;  %v12745_v3 = vld [vmem:[#allocation268_spill] sm:$0xff] }
 0x5a6   : > { %7602 = vmatpush1.bf16.msra.mxu1 %v12737_v43  ;;  %7632 = vmatprep.subr.bf16.mxu0 %v12738_v51  ;;  %v12746_v43 = vld [vmem:[#allocation270_spill] sm:$0xff] }
 0x5a7   : > { %7604 = vmatprep.subr.bf16.mxu1 %v12739_v39  ;;  %v12747_v39 = vld [vmem:[#allocation272_spill] sm:$0xff] }
 0x5a9   : > { %7634 = vmatpush3.bf16.msra.mxu0 %v12738_v51  ;;  %v12748_v51 = vld [vmem:[#allocation271_spill] sm:$0xff] }
 0x5aa   : > { %7606 = vmatpush1.bf16.msra.mxu1 %v12740_v8  ;;  %7636 = vmatprep.subr.bf16.mxu0 %v12741_v36  ;;  %v12749_v8 = vld [vmem:[#allocation273_spill] sm:$0xff] }
 0x5ab   : > { %7608 = vmatprep.subr.bf16.mxu1 %v12742_v48  ;;  %v12750_v48 = vld [vmem:[#allocation274_spill] sm:$0xff] }
 0x5ad   : > { %7638 = vmatpush3.bf16.msra.mxu0 %v12741_v36  ;;  %v12751_v36 = vld [vmem:[#allocation275_spill] sm:$0xff] }
 0x5ae   : > { %7610 = vmatpush1.bf16.msra.mxu1 %v12743_v46  ;;  %7640 = vmatprep.subr.bf16.mxu0 %v12744_v49 }
 0x5af   : > { %7612 = vmatprep.subr.bf16.mxu1 %v12745_v3 }
 0x5b1   : > { %7642 = vmatpush3.bf16.msra.mxu0 %v12744_v49 }
 0x5b2   : > { %7614 = vmatpush1.bf16.msra.mxu1 %v12746_v43  ;;  %7644 = vmatprep.subr.bf16.mxu0 %v12747_v39  ;;  %v12752_v43 = vld [vmem:[#allocation226_spill] sm:$0xff] }
 0x5b3   : > { %7616 = vmatprep.subr.bf16.mxu1 %v12748_v51 }
 0x5b5   : > { %7646 = vmatpush3.bf16.msra.mxu0 %v12747_v39 }
 0x5b6   : > { %7618 = vmatpush1.bf16.msra.mxu1 %v12749_v8  ;;  %7648 = vmatprep.subr.bf16.mxu0 %v12750_v48 }
 0x5b7   : > { %7652 = vmatprep.subr.bf16.mxu1 %v12751_v36 }
 0x5b9   : > { %7650 = vmatpush3.bf16.msra.mxu0 %v12750_v48 }
 0x5ba   : > { %7684 = vmatprep.subr.bf16.mxu0 %v12563_v63 }
 0x62f   : > { %v6314_v3 = vpop.f32.mrb[20].mxu0 }
 0x630   : > { %v2263_v49 = vpop.f32.mrb[21].mxu0 }
 0x64b   : > { %v2338_v46 = vpop.f32.mrb[26].mxu1 }
 0x64c   : > { %v8500_v57 = vadd.f32 %v12752_v43, %v2338_v46  ;;  %v2340_v61 = vpop.f32.mrb[27].mxu1 }
 0x64d   : > { %v8502_v51 = vadd.f32 %v10692_v11, %v2340_v61 }
 0x64e   : > { %v5495_v0 = vmul.f32 -1.442695, %v8500_v57 }
 0x64f   : > { %v2344_v39 = vpop.f32.mrb[28].mxu1  ;;  %v6349_v21 = vpop.f32.mrb[22].mxu0  ;;  %v5496_v40 = vmul.f32 -1.442695, %v8502_v51 }
 0x650   : > { %8733 = vpow2.f32 %v5495_v0  ;;  %v8504_v8 = vadd.f32 %v12752_v43, %v2344_v39  ;;  %v2346_v62 = vpop.f32.mrb[29].mxu1  ;;  %v2415_v36 = vpop.f32.mrb[23].mxu0 }
 0x651   : > { %v8506_v48 = vadd.f32 %v10692_v11, %v2346_v62  ;;  %v2416_v39 = vadd.f32 %v2415_v36, %v12655_v13  ;;  %v2264_v62 = vadd.f32 %v2263_v49, %v12753_v41  ;;  %v12755_v36 = vld [vmem:[#allocation221_spill] sm:$0xff] }
 0x652   : > { %v5497_v38 = vmul.f32 -1.442695, %v8504_v8 }
 0x653   : > { %v5498_v30 = vmul.f32 -1.442695, %v8506_v48  ;;  %v2269_v48 = vadd.f32 %v6314_v3, %v12753_v41 }
 0x654   : > { %8735 = vpow2.f32 %v5497_v38 }
 0x655   : > { %8737 = vpow2.f32 %v5496_v40  ;;  %v2421_v40 = vadd.f32 %v6349_v21, %v12655_v13 }
 0x656   : > { %8739 = vpow2.f32 %v5498_v30 }
 0x65a   : > { %v8734_v26 = vpop.eup %8733 }
 0x65b   : > { %v2440_v46 = vadd.f32 1.0, %v8734_v26 }
 0x65d   : > { %8741 = vrcp.f32 %v2440_v46 }
 0x65e   : > { %v8736_v57 = vpop.eup %8735 }
 0x65f   : > { %v2442_v61 = vadd.f32 1.0, %v8736_v57  ;;  %v8738_v31 = vpop.eup %8737  ;;  %v12754_v57 = vld [vmem:[#allocation220_spill] sm:$0xff] }
 0x660   : > { %v8740_v0 = vpop.eup %8739  ;;  %v2441_v9 = vadd.f32 1.0, %v8738_v31 }
 0x661   : > { %8743 = vrcp.f32 %v2442_v61  ;;  %v2443_v8 = vadd.f32 1.0, %v8740_v0 }
 0x662   : > { %8745 = vrcp.f32 %v2441_v9  ;;  %v12757_v9 = vld [vmem:[#allocation297_spill] sm:$0xff] }
 0x663   : > { %8747 = vrcp.f32 %v2443_v8 }
 0x667   : > { %v8742_v43 = vpop.eup %8741 }
 0x668   : > { %v2452_v38 = vmul.f32 %v8742_v43, %v2416_v39 }
 0x66a   : > { %v2454_v51 = vadd.f32 %v2452_v38, %v2264_v62 }
 0x66b   : > { %v8744_v30 = vpop.eup %8743  ;;  %v2580_v26 = vpop.f32.mrb[30].mxu1 }
 0x66c   : > { %v2453_v46 = vmul.f32 %v8744_v30, %v2421_v40  ;;  %8749 = vtanh.f32 %v2454_v51  ;;  %v2581_v31 = vadd.f32 %v2580_v26, %v12754_v57  ;;  %v2582_v61 = vpop.f32.mrb[31].mxu1  ;;  %v8746_v51 = vpop.eup %8745  ;;  %v12758_v30 = vld [vmem:[#allocation301_spill] sm:$0xff] }
 0x66d   : > { %v2583_v11 = vadd.f32 %v2582_v61, %v12755_v36  ;;  %v12759_v61 = vld [vmem:[#allocation303_spill] sm:$0xff] }
 0x66e   : > { %v2455_v0 = vadd.f32 %v2453_v46, %v2269_v48  ;;  %v2666_v49 = vadd.f32 %v2581_v31, %v12756_v19  ;;  %v8748_v19 = vpop.eup %8747 }
 0x66f   : > { %v2667_v43 = vadd.f32 %v2583_v11, %v12757_v9  ;;  %v2586_v39 = vpop.f32.mrb[32].mxu1  ;;  %v6384_v21 = vpop.f32.mrb[24].mxu0  ;;  %v2458_v11 = vsub.f32 1.0, %v8746_v51  ;;  %v2459_v41 = vsub.f32 1.0, %v8748_v19 }
 0x670   : > { %8751 = vtanh.f32 %v2455_v0  ;;  %v5499_v62 = vmul.f32 -1.442695, %v2666_v49  ;;  %v2587_v8 = vadd.f32 %v2586_v39, %v12754_v57  ;;  %v2588_v38 = vpop.f32.mrb[33].mxu1  ;;  %v2657_v3 = vpop.f32.mrb[25].mxu0  ;;  %v2462_v49 = vmul.f32 %v8746_v51, %v10907_v12 }
 0x671   : > { %v2589_v40 = vadd.f32 %v2588_v38, %v12755_v36  ;;  %v5500_v31 = vmul.f32 -1.442695, %v2667_v43 }
 0x672   : > { %8753 = vpow2.f32 %v5499_v62  ;;  %v2668_v26 = vadd.f32 %v2587_v8, %v12758_v30  ;;  %v2463_v62 = vmul.f32 %v8748_v19, %v10946_v10  ;;  %v2663_v19 = vadd.f32 %v6384_v21, %v12547_v53 }
 0x673   : > { %v2669_v48 = vadd.f32 %v2589_v40, %v12759_v61 }
 0x674   : > { %v5501_v46 = vmul.f32 -1.442695, %v2668_v26 }
 0x675   : > { %v5502_v39 = vmul.f32 -1.442695, %v2669_v48  ;;  %v2658_v48 = vadd.f32 %v2657_v3, %v12547_v53 }
 0x676   : > { %v8750_v9 = vpop.eup %8749  ;;  %8755 = vpow2.f32 %v5501_v46 }
 0x677   : > { %v2460_v0 = vmul.f32 %v8750_v9, %v2458_v11  ;;  %8757 = vpow2.f32 %v5500_v31  ;;  %v12760_v9 = vld [vmem:[#allocation302_spill] sm:$0xff] }
 0x678   : > { %8759 = vpow2.f32 %v5502_v39  ;;  %v12761_v39 = vld [vmem:[#allocation300_spill] sm:$0xff] }
 0x679   : > { %v2464_v57 = vadd.f32 %v2462_v49, %v2460_v0 }
 0x67a   : > { %v8752_v38 = vpop.eup %8751 }
 0x67b   : > { %v2461_v36 = vmul.f32 %v8752_v38, %v2459_v41 }
 0x67c   : > { %v8754_v8 = vpop.eup %8753 }
 0x67d   : > { %v2682_v40 = vadd.f32 1.0, %v8754_v8  ;;  %v11038_v30 = vadd.f32 %v2463_v62, %v2461_v36 }
 0x67f   : > { %8761 = vrcp.f32 %v2682_v40 }
 0x680   : > { %v8756_v43 = vpop.eup %8755 }
 0x681   : > { %v2684_v26 = vadd.f32 1.0, %v8756_v43  ;;  %v8758_v61 = vpop.eup %8757 }
 0x682   : > { %v8760_v46 = vpop.eup %8759  ;;  %v2683_v51 = vadd.f32 1.0, %v8758_v61 }
 0x683   : > { %8763 = vrcp.f32 %v2684_v26  ;;  %v2685_v11 = vadd.f32 1.0, %v8760_v46 }
 0x684   : > { %8765 = vrcp.f32 %v2683_v51 }
 0x685   : > { %8767 = vrcp.f32 %v2685_v11 }
 0x689   : > { %v8762_v31 = vpop.eup %8761 }
 0x68a   : > { %v2694_v41 = vmul.f32 %v8762_v31, %v2658_v48 }
 0x68c   : > { %v2696_v0 = vadd.f32 %v2694_v41, %v12760_v9  ;;  %v11070_v41 = vsel %vm1918_vm5, %v10907_v12, %v2464_v57  ;;  %v12762_v12 = vld [vmem:[#allocation232_spill] sm:$0xff]  ;;  %v12767_v9 = vld [vmem:[#allocation243_spill] sm:$0xff] }
 0x68d   : > { %v8764_v49 = vpop.eup %8763  ;;  %v12764_v57 = vld [vmem:[#allocation240_spill] sm:$0xff] }
 0x68e   : > { %v2695_v36 = vmul.f32 %v8764_v49, %v2663_v19  ;;  %8769 = vtanh.f32 %v2696_v0  ;;  %v8766_v62 = vpop.eup %8765  ;;  %v12766_v19 = vld [vmem:[#allocation242_spill] sm:$0xff]  ;;  %v12769_v49 = vld [vmem:[#allocation245_spill] sm:$0xff] }
 0x68f   : > { %v8768_v8 = vpop.eup %8767  ;;  %v2700_v40 = vsub.f32 1.0, %v8766_v62  ;;  %v2704_v26 = vmul.f32 %v8766_v62, %v10886_v33  ;;  %v12768_v0 = vld [vmem:[#allocation238_spill] sm:$0xff]  ;;  %v12773_v62 = vld [vmem:[#allocation249_spill] sm:$0xff] }
 0x690   : > { %v2697_v38 = vadd.f32 %v2695_v36, %v12761_v39  ;;  %v2701_v21 = vsub.f32 1.0, %v8768_v8  ;;  %v2705_v31 = vmul.f32 %v8768_v8, %v10898_v44  ;;  %v12770_v36 = vld [vmem:[#allocation246_spill] sm:$0xff]  ;;  %v12771_v39 = vld [vmem:[#allocation241_spill] sm:$0xff]  ;;  %v12774_v8 = vld [vmem:[#allocation244_spill] sm:$0xff] }
 0x692   : > { %8771 = vtanh.f32 %v2697_v38  ;;  %v12772_v38 = vld [vmem:[#allocation248_spill] sm:$0xff] }
 0x698   : > { %v8770_v43 = vpop.eup %8769 }
 0x699   : > { %v2702_v3 = vmul.f32 %v8770_v43, %v2700_v40  ;;  %v12775_v40 = vld [vmem:[#allocation250_spill] sm:$0xff]  ;;  %v12776_v43 = vld [vmem:[#allocation247_spill] sm:$0xff] }
 0x69b   : > { %v2706_v61 = vadd.f32 %v2704_v26, %v2702_v3  ;;  %v12777_v3 = vld [vmem:[#allocation251_spill] sm:$0xff]  ;;  %v12778_v26 = vld [vmem:[#allocation252_spill] sm:$0xff] }
 0x69c   : > { %v8772_v46 = vpop.eup %8771 }
 0x69d   : > { %v11049_v51 = vsel %vm2512_vm7, %v10886_v33, %v2706_v61  ;;  %v2703_v48 = vmul.f32 %v8772_v46, %v2701_v21  ;;  %v12779_v61 = vld [vmem:[#allocation254_spill] sm:$0xff]  ;;  %v12780_v21 = vld [vmem:[#allocation253_spill] sm:$0xff]  ;;  %v12781_v46 = vld [vmem:[#allocation255_spill] sm:$0xff] }
 0x69e   : > { %2779 = vmatmul.mubr.f32.vlgmr.msra.gmra.mrb[34].mxu1 %v11049_v51  ;;  %6417 = vmatprep.mubr.f32.mxu0 %v11049_v51 }
 0x69f   : > { %7654 = vmatpush1.bf16.msra.mxu1 %v10466_v20  ;;  %2784 = vmatprep.mubr.f32.mxu1 %v12556_v23  ;;  %v2707_v11 = vadd.f32 %v2705_v31, %v2703_v48  ;;  %v12782_v48 = vld [vmem:[#allocation257_spill] sm:$0xff]  ;;  %v12783_v31 = vld [vmem:[#allocation256_spill] sm:$0xff] }
 0x6a0   : > { %7656 = vmatprep.subr.bf16.mxu1 %v10470_v56 }
 0x6a1   : > { %v11061_v33 = vsel %vm2513_vm8, %v10898_v44, %v2707_v11  ;;  %v11109_v44 = vsel %vm1919_vm6, %v10946_v10, %v11038_v30  ;;  %v12763_v10 = vld [vmem:[#allocation239_spill] sm:$0xff]  ;;  %v12784_v11 = vld [vmem:[#allocation258_spill] sm:$0xff] }
 0x6a2   : > { %2785 = vmatmul.mubr.f32.gmra.mrb[36].mxu1 %v11061_v33  ;;  %6418 = vmatmul.mubr.f32.vlgmr.msra.gmra.mrb[26].mxu0 %v11061_v33  ;;  %v12765_v30 = vld [vmem:[#allocation235_spill] sm:$0xff] }
 0x6a3   : > { %7658 = vmatpush1.bf16.msra.mxu1 %v10485_v18  ;;  %7686 = vmatpush3.bf16.msra.mxu0 %v12563_v63 }
 0x6a4   : > { %6452 = vmatprep.mubr.f32.mxu0 %v11070_v41  ;;  %7660 = vmatprep.subr.bf16.mxu1 %v10490_v59 }
 0x6a5   : > { %7688 = vmatprep.subr.bf16.mxu0 %v10494_v32  ;;  %2930 = vmatprep.mubr.f32.mxu1 %v12556_v23 }
 0x6a7   : > { %7662 = vmatpush1.bf16.msra.mxu1 %v10507_v37  ;;  %7690 = vmatpush3.bf16.msra.mxu0 %v10494_v32 }
 0x6a8   : > { %7664 = vmatprep.subr.bf16.mxu1 %v10513_v1  ;;  %7692 = vmatprep.subr.bf16.mxu0 %v10517_v7 }
 0x6ab   : > { %7666 = vmatpush1.bf16.msra.mxu1 %v10525_v4  ;;  %7694 = vmatpush3.bf16.msra.mxu0 %v10517_v7 }
 0x6ac   : > { %7668 = vmatprep.subr.bf16.mxu1 %v10531_v17  ;;  %7696 = vmatprep.subr.bf16.mxu0 %v10535_v16 }
 0x6af   : > { %7670 = vmatpush1.bf16.msra.mxu1 %v10541_v47  ;;  %7698 = vmatpush3.bf16.msra.mxu0 %v10535_v16 }
 0x6b0   : > { %7672 = vmatprep.subr.bf16.mxu1 %v10547_v25  ;;  %7700 = vmatprep.subr.bf16.mxu0 %v10551_v15 }
 0x6b3   : > { %7674 = vmatpush1.bf16.msra.mxu1 %v10557_v28  ;;  %7702 = vmatpush3.bf16.msra.mxu0 %v10551_v15 }
 0x6b4   : > { %7676 = vmatprep.subr.bf16.mxu1 %v10563_v45  ;;  %7704 = vmatprep.subr.bf16.mxu0 %v10567_v55 }
 0x6b7   : > { %7678 = vmatpush1.bf16.msra.mxu1 %v10573_v14  ;;  %7706 = vmatpush3.bf16.msra.mxu0 %v10567_v55 }
 0x6b8   : > { %7680 = vmatprep.subr.bf16.mxu1 %v10579_v52  ;;  %7708 = vmatprep.subr.bf16.mxu0 %v10583_v34 }
 0x6bb   : > { %7682 = vmatpush1.bf16.msra.mxu1 %v10589_v27  ;;  %7710 = vmatpush3.bf16.msra.mxu0 %v10583_v34 }
 0x6bc   : > { %7712 = vmatprep.subr.bf16.mxu0 %v10595_v5  ;;  %7716 = vmatprep.subr.bf16.mxu1 %v12598_v35 }
 0x6be   : > { %2931 = vmatmul.mubr.f32.vlgmr.msra.gmra.mrb[34].mxu1 %v11070_v41 }
 0x6bf   : > { %7714 = vmatpush3.bf16.msra.mxu0 %v10595_v5  ;;  %7718 = vmatpush1.bf16.msra.mxu1 %v12599_v54 }
 0x6c0   : > { %2936 = vmatprep.mubr.f32.mxu1 %v12556_v23  ;;  %7720 = vmatprep.subr.bf16.mxu1 %v12657_v24 }
 0x6c1   : > { %7748 = vmatprep.subr.bf16.mxu0 %v12658_v6 }
 0x6c2   : > { %2937 = vmatmul.mubr.f32.gmra.mrb[36].mxu1 %v11109_v44  ;;  %6453 = vmatmul.mubr.f32.vlgmr.msra.gmra.mrb[28].mxu0 %v11109_v44 }
 0x6c3   : > { %7722 = vmatpush1.bf16.msra.mxu1 %v12659_v50  ;;  %7750 = vmatpush3.bf16.msra.mxu0 %v12658_v6 }
 0x6c4   : > { %6487 = vmatprep.mubr.f32.mxu0 %v11049_v51  ;;  %7724 = vmatprep.subr.bf16.mxu1 %v12660_v60 }
 0x6c5   : > { %7752 = vmatprep.subr.bf16.mxu0 %v12661_v42  ;;  %3172 = vmatprep.mubr.f32.mxu1 %v12556_v23 }
 0x6c7   : > { %7726 = vmatpush1.bf16.msra.mxu1 %v12662_v58  ;;  %7754 = vmatpush3.bf16.msra.mxu0 %v12661_v42 }
 0x6c8   : > { %7728 = vmatprep.subr.bf16.mxu1 %v12711_v2  ;;  %7756 = vmatprep.subr.bf16.mxu0 %v12762_v12 }
 0x6cb   : > { %7730 = vmatpush1.bf16.msra.mxu1 %v12763_v10  ;;  %7758 = vmatpush3.bf16.msra.mxu0 %v12762_v12  ;;  %v12804_v10 = vld [vmem:[#allocation219_spill] sm:$0xff]  ;;  %v12807_v12 = vld [vmem:[#allocation304_spill] sm:$0xff] }
 0x6cc   : > { %7732 = vmatprep.subr.bf16.mxu1 %v12764_v57  ;;  %7760 = vmatprep.subr.bf16.mxu0 %v12765_v30 }
 0x6cf   : > { %7734 = vmatpush1.bf16.msra.mxu1 %v12766_v19  ;;  %7762 = vmatpush3.bf16.msra.mxu0 %v12765_v30 }
 0x6d0   : > { %7736 = vmatprep.subr.bf16.mxu1 %v12767_v9  ;;  %7764 = vmatprep.subr.bf16.mxu0 %v12768_v0 }
 0x6d3   : > { %7738 = vmatpush1.bf16.msra.mxu1 %v12769_v49  ;;  %7766 = vmatpush3.bf16.msra.mxu0 %v12768_v0 }
 0x6d4   : > { %7740 = vmatprep.subr.bf16.mxu1 %v12770_v36  ;;  %7768 = vmatprep.subr.bf16.mxu0 %v12771_v39 }
 0x6d7   : > { %7742 = vmatpush1.bf16.msra.mxu1 %v12772_v38  ;;  %7770 = vmatpush3.bf16.msra.mxu0 %v12771_v39 }
 0x6d8   : > { %7744 = vmatprep.subr.bf16.mxu1 %v12773_v62  ;;  %7772 = vmatprep.subr.bf16.mxu0 %v12774_v8 }
 0x6db   : > { %7746 = vmatpush1.bf16.msra.mxu1 %v12775_v40  ;;  %7774 = vmatpush3.bf16.msra.mxu0 %v12774_v8 }
 0x6dc   : > { %7776 = vmatprep.subr.bf16.mxu0 %v12776_v43  ;;  %7780 = vmatprep.subr.bf16.mxu1 %v12777_v3  ;;  %v12787_v3 = vld [vmem:[#allocation261_spill] sm:$0xff] }
 0x6de   : > { %3173 = vmatmul.mubr.f32.vlgmr.msra.gmra.mrb[38].mxu1 %v11049_v51 }
 0x6df   : > { %7778 = vmatpush3.bf16.msra.mxu0 %v12776_v43  ;;  %3178 = vmatprep.mubr.f32.mxu1 %v12556_v23  ;;  %v12789_v43 = vld [vmem:[#allocation262_spill] sm:$0xff] }
 0x6e0   : > { %7782 = vmatpush1.bf16.msra.mxu1 %v12778_v26  ;;  %7812 = vmatprep.subr.bf16.mxu0 %v12779_v61  ;;  %v12785_v26 = vld [vmem:[#allocation260_spill] sm:$0xff] }
 0x6e1   : > { %7784 = vmatprep.subr.bf16.mxu1 %v12780_v21  ;;  %v12786_v21 = vld [vmem:[#allocation259_spill] sm:$0xff] }
 0x6e2   : > { %3179 = vmatmul.mubr.f32.gmra.mrb[40].mxu1 %v11061_v33  ;;  %6488 = vmatmul.mubr.f32.vlgmr.msra.gmra.mrb[30].mxu0 %v11061_v33 }
 0x6e3   : > { %7814 = vmatpush3.bf16.msra.mxu0 %v12779_v61  ;;  %3372 = vmatprep.mubr.f32.mxu1 %v12556_v23  ;;  %v12788_v61 = vld [vmem:[#allocation263_spill] sm:$0xff] }
 0x6e4   : > { %7786 = vmatpush1.bf16.msra.mxu1 %v12781_v46  ;;  %7816 = vmatprep.subr.bf16.mxu0 %v12782_v48  ;;  %v12790_v46 = vld [vmem:[#allocation264_spill] sm:$0xff] }
 0x6e5   : > { %7788 = vmatprep.subr.bf16.mxu1 %v12783_v31  ;;  %v12791_v31 = vld [vmem:[#allocation266_spill] sm:$0xff] }
 0x6e7   : > { %7818 = vmatpush3.bf16.msra.mxu0 %v12782_v48  ;;  %v12792_v48 = vld [vmem:[#allocation265_spill] sm:$0xff] }
 0x6e8   : > { %7790 = vmatpush1.bf16.msra.mxu1 %v12784_v11  ;;  %7820 = vmatprep.subr.bf16.mxu0 %v12785_v26  ;;  %v12793_v11 = vld [vmem:[#allocation267_spill] sm:$0xff] }
 0x6e9   : > { %7792 = vmatprep.subr.bf16.mxu1 %v12786_v21  ;;  %v12794_v21 = vld [vmem:[#allocation269_spill] sm:$0xff] }
 0x6eb   : > { %7822 = vmatpush3.bf16.msra.mxu0 %v12785_v26  ;;  %v12795_v26 = vld [vmem:[#allocation268_spill] sm:$0xff] }
 0x6ec   : > { %7794 = vmatpush1.bf16.msra.mxu1 %v12787_v3  ;;  %7824 = vmatprep.subr.bf16.mxu0 %v12788_v61  ;;  %v12796_v3 = vld [vmem:[#allocation270_spill] sm:$0xff] }
 0x6ed   : > { %7796 = vmatprep.subr.bf16.mxu1 %v12789_v43  ;;  %v12797_v43 = vld [vmem:[#allocation272_spill] sm:$0xff] }
 0x6ef   : > { %7826 = vmatpush3.bf16.msra.mxu0 %v12788_v61  ;;  %v12798_v61 = vld [vmem:[#allocation271_spill] sm:$0xff] }
 0x6f0   : > { %7798 = vmatpush1.bf16.msra.mxu1 %v12790_v46  ;;  %7828 = vmatprep.subr.bf16.mxu0 %v12791_v31  ;;  %v12799_v46 = vld [vmem:[#allocation273_spill] sm:$0xff] }
 0x6f1   : > { %7800 = vmatprep.subr.bf16.mxu1 %v12792_v48  ;;  %v12800_v48 = vld [vmem:[#allocation274_spill] sm:$0xff] }
 0x6f3   : > { %7830 = vmatpush3.bf16.msra.mxu0 %v12791_v31  ;;  %v12801_v31 = vld [vmem:[#allocation275_spill] sm:$0xff] }
 0x6f4   : > { %7802 = vmatpush1.bf16.msra.mxu1 %v12793_v11  ;;  %7832 = vmatprep.subr.bf16.mxu0 %v12794_v21 }
 0x6f5   : > { %7804 = vmatprep.subr.bf16.mxu1 %v12795_v26 }
 0x6f7   : > { %7834 = vmatpush3.bf16.msra.mxu0 %v12794_v21 }
 0x6f8   : > { %7806 = vmatpush1.bf16.msra.mxu1 %v12796_v3  ;;  %7836 = vmatprep.subr.bf16.mxu0 %v12797_v43  ;;  %v12802_v3 = vld [vmem:[#allocation226_spill] sm:$0xff] }
 0x6f9   : > { %7808 = vmatprep.subr.bf16.mxu1 %v12798_v61  ;;  %v12803_v61 = vld [vmem:[#allocation277_spill] sm:$0xff] }
 0x6fb   : > { %7838 = vmatpush3.bf16.msra.mxu0 %v12797_v43 }
 0x6fc   : > { %7810 = vmatpush1.bf16.msra.mxu1 %v12799_v46  ;;  %7840 = vmatprep.subr.bf16.mxu0 %v12800_v48 }
 0x6fd   : > { %7844 = vmatprep.subr.bf16.mxu1 %v12801_v31 }
 0x6ff   : > { %7842 = vmatpush3.bf16.msra.mxu0 %v12800_v48 }
 0x700   : > { %7876 = vmatprep.subr.bf16.mxu0 %v12563_v63 }
 0x775   : > { %v6419_v26 = vpop.f32.mrb[26].mxu0 }
 0x776   : > { %v2857_v21 = vpop.f32.mrb[27].mxu0 }
 0x791   : > { %v2932_v11 = vpop.f32.mrb[34].mxu1 }
 0x792   : > { %v8508_v40 = vadd.f32 %v12802_v3, %v2932_v11  ;;  %v2934_v8 = vpop.f32.mrb[35].mxu1 }
 0x793   : > { %v8510_v38 = vadd.f32 %v12803_v61, %v2934_v8 }
 0x794   : > { %v5503_v62 = vmul.f32 -1.442695, %v8508_v40 }
 0x795   : > { %v2938_v43 = vpop.f32.mrb[36].mxu1  ;;  %v6454_v39 = vpop.f32.mrb[28].mxu0  ;;  %v5504_v0 = vmul.f32 -1.442695, %v8510_v38 }
 0x796   : > { %8773 = vpow2.f32 %v5503_v62  ;;  %v8512_v46 = vadd.f32 %v12802_v3, %v2938_v43  ;;  %v2940_v36 = vpop.f32.mrb[37].mxu1  ;;  %v3009_v31 = vpop.f32.mrb[29].mxu0 }
 0x797   : > { %v8514_v48 = vadd.f32 %v12803_v61, %v2940_v36  ;;  %v3010_v43 = vadd.f32 %v3009_v31, %v12655_v13  ;;  %v2858_v36 = vadd.f32 %v2857_v21, %v12804_v10  ;;  %v12806_v31 = vld [vmem:[#allocation221_spill] sm:$0xff] }
 0x798   : > { %v5505_v49 = vmul.f32 -1.442695, %v8512_v46 }
 0x799   : > { %v5506_v9 = vmul.f32 -1.442695, %v8514_v48  ;;  %v2863_v48 = vadd.f32 %v6419_v26, %v12804_v10 }
 0x79a   : > { %8775 = vpow2.f32 %v5505_v49 }
 0x79b   : > { %8777 = vpow2.f32 %v5504_v0  ;;  %v3015_v0 = vadd.f32 %v6454_v39, %v12655_v13 }
 0x79c   : > { %8779 = vpow2.f32 %v5506_v9 }
 0x7a0   : > { %v8774_v19 = vpop.eup %8773 }
 0x7a1   : > { %v3034_v11 = vadd.f32 1.0, %v8774_v19 }
 0x7a3   : > { %8781 = vrcp.f32 %v3034_v11 }
 0x7a4   : > { %v8776_v40 = vpop.eup %8775 }
 0x7a5   : > { %v3036_v8 = vadd.f32 1.0, %v8776_v40  ;;  %v8778_v30 = vpop.eup %8777  ;;  %v12805_v40 = vld [vmem:[#allocation220_spill] sm:$0xff] }
 0x7a6   : > { %v8780_v62 = vpop.eup %8779  ;;  %v3035_v57 = vadd.f32 1.0, %v8778_v30 }
 0x7a7   : > { %8783 = vrcp.f32 %v3036_v8  ;;  %v3037_v46 = vadd.f32 1.0, %v8780_v62 }
 0x7a8   : > { %8785 = vrcp.f32 %v3035_v57  ;;  %v12808_v57 = vld [vmem:[#allocation305_spill] sm:$0xff] }
 0x7a9   : > { %8787 = vrcp.f32 %v3037_v46 }
 0x7ad   : > { %v8782_v3 = vpop.eup %8781 }
 0x7ae   : > { %v3046_v49 = vmul.f32 %v8782_v3, %v3010_v43 }
 0x7b0   : > { %v3048_v38 = vadd.f32 %v3046_v49, %v2858_v36 }
 0x7b1   : > { %v8784_v9 = vpop.eup %8783  ;;  %v3174_v19 = vpop.f32.mrb[38].mxu1 }
 0x7b2   : > { %v3047_v11 = vmul.f32 %v8784_v9, %v3015_v0  ;;  %8789 = vtanh.f32 %v3048_v38  ;;  %v3175_v30 = vadd.f32 %v3174_v19, %v12805_v40  ;;  %v3176_v8 = vpop.f32.mrb[39].mxu1  ;;  %v8786_v38 = vpop.eup %8785  ;;  %v12809_v9 = vld [vmem:[#allocation306_spill] sm:$0xff] }
 0x7b3   : > { %v3177_v61 = vadd.f32 %v3176_v8, %v12806_v31  ;;  %v12810_v8 = vld [vmem:[#allocation308_spill] sm:$0xff] }
 0x7b4   : > { %v3049_v62 = vadd.f32 %v3047_v11, %v2863_v48  ;;  %v3260_v21 = vadd.f32 %v3175_v30, %v12807_v12  ;;  %v8788_v12 = vpop.eup %8787 }
 0x7b5   : > { %v3261_v3 = vadd.f32 %v3177_v61, %v12808_v57  ;;  %v3180_v43 = vpop.f32.mrb[40].mxu1  ;;  %v6489_v39 = vpop.f32.mrb[30].mxu0  ;;  %v3052_v61 = vsub.f32 1.0, %v8786_v38  ;;  %v3053_v10 = vsub.f32 1.0, %v8788_v12 }
 0x7b6   : > { %8791 = vtanh.f32 %v3049_v62  ;;  %v5507_v36 = vmul.f32 -1.442695, %v3260_v21  ;;  %v3181_v46 = vadd.f32 %v3180_v43, %v12805_v40  ;;  %v3182_v49 = vpop.f32.mrb[41].mxu1  ;;  %v3251_v26 = vpop.f32.mrb[31].mxu0  ;;  %v3056_v21 = vmul.f32 %v8786_v38, %v11070_v41 }
 0x7b7   : > { %v3183_v0 = vadd.f32 %v3182_v49, %v12806_v31  ;;  %v5508_v30 = vmul.f32 -1.442695, %v3261_v3 }
 0x7b8   : > { %8793 = vpow2.f32 %v5507_v36  ;;  %v3262_v19 = vadd.f32 %v3181_v46, %v12809_v9  ;;  %v3057_v36 = vmul.f32 %v8788_v12, %v11109_v44  ;;  %v3257_v12 = vadd.f32 %v6489_v39, %v12547_v53 }
 0x7b9   : > { %v3263_v48 = vadd.f32 %v3183_v0, %v12810_v8 }
 0x7ba   : > { %v5509_v11 = vmul.f32 -1.442695, %v3262_v19 }
 0x7bb   : > { %v5510_v43 = vmul.f32 -1.442695, %v3263_v48  ;;  %v3252_v48 = vadd.f32 %v3251_v26, %v12547_v53 }
 0x7bc   : > { %v8790_v57 = vpop.eup %8789  ;;  %8795 = vpow2.f32 %v5509_v11 }
 0x7bd   : > { %v3054_v62 = vmul.f32 %v8790_v57, %v3052_v61  ;;  %8797 = vpow2.f32 %v5508_v30  ;;  %v12811_v57 = vld [vmem:[#allocation309_spill] sm:$0xff] }
 0x7be   : > { %8799 = vpow2.f32 %v5510_v43  ;;  %v12812_v43 = vld [vmem:[#allocation307_spill] sm:$0xff] }
 0x7bf   : > { %v3058_v40 = vadd.f32 %v3056_v21, %v3054_v62 }
 0x7c0   : > { %v8792_v49 = vpop.eup %8791 }
 0x7c1   : > { %v3055_v31 = vmul.f32 %v8792_v49, %v3053_v10 }
 0x7c2   : > { %v8794_v46 = vpop.eup %8793 }
 0x7c3   : > { %v3276_v0 = vadd.f32 1.0, %v8794_v46  ;;  %v11201_v9 = vadd.f32 %v3057_v36, %v3055_v31 }
 0x7c5   : > { %8801 = vrcp.f32 %v3276_v0 }
 0x7c6   : > { %v8796_v3 = vpop.eup %8795 }
 0x7c7   : > { %v3278_v19 = vadd.f32 1.0, %v8796_v3  ;;  %v8798_v8 = vpop.eup %8797 }
 0x7c8   : > { %v8800_v11 = vpop.eup %8799  ;;  %v3277_v38 = vadd.f32 1.0, %v8798_v8 }
 0x7c9   : > { %8803 = vrcp.f32 %v3278_v19  ;;  %v3279_v61 = vadd.f32 1.0, %v8800_v11 }
 0x7ca   : > { %8805 = vrcp.f32 %v3277_v38 }
 0x7cb   : > { %8807 = vrcp.f32 %v3279_v61 }
 0x7cf   : > { %v8802_v30 = vpop.eup %8801 }
 0x7d0   : > { %v3288_v10 = vmul.f32 %v8802_v30, %v3252_v48 }
 0x7d2   : > { %v3290_v62 = vadd.f32 %v3288_v10, %v12811_v57  ;;  %v11233_v10 = vsel %vm2512_vm7, %v11070_v41, %v3058_v40  ;;  %v12813_v41 = vld [vmem:[#allocation232_spill] sm:$0xff]  ;;  %v12818_v57 = vld [vmem:[#allocation243_spill] sm:$0xff] }
 0x7d3   : > { %v8804_v21 = vpop.eup %8803  ;;  %v12815_v40 = vld [vmem:[#allocation240_spill] sm:$0xff] }
 0x7d4   : > { %v3289_v31 = vmul.f32 %v8804_v21, %v3257_v12  ;;  %8809 = vtanh.f32 %v3290_v62  ;;  %v8806_v36 = vpop.eup %8805  ;;  %v12817_v12 = vld [vmem:[#allocation242_spill] sm:$0xff]  ;;  %v12820_v21 = vld [vmem:[#allocation245_spill] sm:$0xff] }
 0x7d5   : > { %v8808_v46 = vpop.eup %8807  ;;  %v3294_v0 = vsub.f32 1.0, %v8806_v36  ;;  %v3298_v19 = vmul.f32 %v8806_v36, %v11049_v51  ;;  %v12819_v62 = vld [vmem:[#allocation238_spill] sm:$0xff]  ;;  %v12824_v36 = vld [vmem:[#allocation249_spill] sm:$0xff] }
 0x7d6   : > { %v3291_v49 = vadd.f32 %v3289_v31, %v12812_v43  ;;  %v3295_v39 = vsub.f32 1.0, %v8808_v46  ;;  %v3299_v30 = vmul.f32 %v8808_v46, %v11061_v33  ;;  %v12821_v31 = vld [vmem:[#allocation246_spill] sm:$0xff]  ;;  %v12822_v43 = vld [vmem:[#allocation241_spill] sm:$0xff]  ;;  %v12825_v46 = vld [vmem:[#allocation244_spill] sm:$0xff] }
 0x7d8   : > { %8811 = vtanh.f32 %v3291_v49  ;;  %v12823_v49 = vld [vmem:[#allocation248_spill] sm:$0xff] }
 0x7de   : > { %v8810_v3 = vpop.eup %8809 }
 0x7df   : > { %v3296_v26 = vmul.f32 %v8810_v3, %v3294_v0  ;;  %v12826_v0 = vld [vmem:[#allocation250_spill] sm:$0xff]  ;;  %v12827_v3 = vld [vmem:[#allocation247_spill] sm:$0xff] }
 0x7e1   : > { %v3300_v8 = vadd.f32 %v3298_v19, %v3296_v26  ;;  %v12828_v26 = vld [vmem:[#allocation251_spill] sm:$0xff]  ;;  %v12829_v19 = vld [vmem:[#allocation252_spill] sm:$0xff] }
 0x7e2   : > { %v8812_v11 = vpop.eup %8811 }
 0x7e3   : > { %v11212_v38 = vsel %vm3106_vm9, %v11049_v51, %v3300_v8  ;;  %v3297_v48 = vmul.f32 %v8812_v11, %v3295_v39  ;;  %v12830_v8 = vld [vmem:[#allocation254_spill] sm:$0xff]  ;;  %v12831_v39 = vld [vmem:[#allocation253_spill] sm:$0xff]  ;;  %v12832_v11 = vld [vmem:[#allocation255_spill] sm:$0xff] }
 0x7e4   : > { %3373 = vmatmul.mubr.f32.vlgmr.msra.gmra.mrb[42].mxu1 %v11212_v38  ;;  %6522 = vmatprep.mubr.f32.mxu0 %v11212_v38 }
 0x7e5   : > { %7846 = vmatpush1.bf16.msra.mxu1 %v10466_v20  ;;  %3378 = vmatprep.mubr.f32.mxu1 %v12556_v23  ;;  %v3301_v61 = vadd.f32 %v3299_v30, %v3297_v48  ;;  %v12833_v48 = vld [vmem:[#allocation257_spill] sm:$0xff]  ;;  %v12834_v30 = vld [vmem:[#allocation256_spill] sm:$0xff] }
 0x7e6   : > { %7848 = vmatprep.subr.bf16.mxu1 %v10470_v56 }
 0x7e7   : > { %v11224_v51 = vsel %vm3107_vm10, %v11061_v33, %v3301_v61  ;;  %v11272_v33 = vsel %vm2513_vm8, %v11109_v44, %v11201_v9  ;;  %v12814_v44 = vld [vmem:[#allocation239_spill] sm:$0xff]  ;;  %v12835_v61 = vld [vmem:[#allocation258_spill] sm:$0xff] }
 0x7e8   : > { %3379 = vmatmul.mubr.f32.gmra.mrb[44].mxu1 %v11224_v51  ;;  %6523 = vmatmul.mubr.f32.vlgmr.msra.gmra.mrb[32].mxu0 %v11224_v51  ;;  %v12816_v9 = vld [vmem:[#allocation235_spill] sm:$0xff] }
 0x7e9   : > { %7850 = vmatpush1.bf16.msra.mxu1 %v10485_v18  ;;  %7878 = vmatpush3.bf16.msra.mxu0 %v12563_v63 }
 0x7ea   : > { %6557 = vmatprep.mubr.f32.mxu0 %v11233_v10  ;;  %7852 = vmatprep.subr.bf16.mxu1 %v10490_v59 }
 0x7eb   : > { %7880 = vmatprep.subr.bf16.mxu0 %v10494_v32  ;;  %3524 = vmatprep.mubr.f32.mxu1 %v12556_v23 }
 0x7ed   : > { %7854 = vmatpush1.bf16.msra.mxu1 %v10507_v37  ;;  %7882 = vmatpush3.bf16.msra.mxu0 %v10494_v32 }
 0x7ee   : > { %7856 = vmatprep.subr.bf16.mxu1 %v10513_v1  ;;  %7884 = vmatprep.subr.bf16.mxu0 %v10517_v7 }
 0x7f1   : > { %7858 = vmatpush1.bf16.msra.mxu1 %v10525_v4  ;;  %7886 = vmatpush3.bf16.msra.mxu0 %v10517_v7 }
 0x7f2   : > { %7860 = vmatprep.subr.bf16.mxu1 %v10531_v17  ;;  %7888 = vmatprep.subr.bf16.mxu0 %v10535_v16 }
 0x7f5   : > { %7862 = vmatpush1.bf16.msra.mxu1 %v10541_v47  ;;  %7890 = vmatpush3.bf16.msra.mxu0 %v10535_v16 }
 0x7f6   : > { %7864 = vmatprep.subr.bf16.mxu1 %v10547_v25  ;;  %7892 = vmatprep.subr.bf16.mxu0 %v10551_v15 }
 0x7f9   : > { %7866 = vmatpush1.bf16.msra.mxu1 %v10557_v28  ;;  %7894 = vmatpush3.bf16.msra.mxu0 %v10551_v15 }
 0x7fa   : > { %7868 = vmatprep.subr.bf16.mxu1 %v10563_v45  ;;  %7896 = vmatprep.subr.bf16.mxu0 %v10567_v55 }
 0x7fd   : > { %7870 = vmatpush1.bf16.msra.mxu1 %v10573_v14  ;;  %7898 = vmatpush3.bf16.msra.mxu0 %v10567_v55 }
 0x7fe   : > { %7872 = vmatprep.subr.bf16.mxu1 %v10579_v52  ;;  %7900 = vmatprep.subr.bf16.mxu0 %v10583_v34 }
 0x801   : > { %7874 = vmatpush1.bf16.msra.mxu1 %v10589_v27  ;;  %7902 = vmatpush3.bf16.msra.mxu0 %v10583_v34 }
 0x802   : > { %7904 = vmatprep.subr.bf16.mxu0 %v10595_v5  ;;  %7908 = vmatprep.subr.bf16.mxu1 %v12598_v35 }
 0x804   : > { %3525 = vmatmul.mubr.f32.vlgmr.msra.gmra.mrb[42].mxu1 %v11233_v10 }
 0x805   : > { %7906 = vmatpush3.bf16.msra.mxu0 %v10595_v5  ;;  %7910 = vmatpush1.bf16.msra.mxu1 %v12599_v54 }
 0x806   : > { %3530 = vmatprep.mubr.f32.mxu1 %v12556_v23  ;;  %7912 = vmatprep.subr.bf16.mxu1 %v12657_v24 }
 0x807   : > { %7940 = vmatprep.subr.bf16.mxu0 %v12658_v6 }
 0x808   : > { %3531 = vmatmul.mubr.f32.gmra.mrb[44].mxu1 %v11272_v33  ;;  %6558 = vmatmul.mubr.f32.vlgmr.msra.gmra.mrb[34].mxu0 %v11272_v33 }
 0x809   : > { %7914 = vmatpush1.bf16.msra.mxu1 %v12659_v50  ;;  %7942 = vmatpush3.bf16.msra.mxu0 %v12658_v6 }
 0x80a   : > { %6592 = vmatprep.mubr.f32.mxu0 %v11212_v38  ;;  %7916 = vmatprep.subr.bf16.mxu1 %v12660_v60 }
 0x80b   : > { %7944 = vmatprep.subr.bf16.mxu0 %v12661_v42  ;;  %3766 = vmatprep.mubr.f32.mxu1 %v12556_v23 }
 0x80d   : > { %7918 = vmatpush1.bf16.msra.mxu1 %v12662_v58  ;;  %7946 = vmatpush3.bf16.msra.mxu0 %v12661_v42 }
 0x80e   : > { %7920 = vmatprep.subr.bf16.mxu1 %v12711_v2  ;;  %7948 = vmatprep.subr.bf16.mxu0 %v12813_v41 }
 0x811   : > { %7922 = vmatpush1.bf16.msra.mxu1 %v12814_v44  ;;  %7950 = vmatpush3.bf16.msra.mxu0 %v12813_v41  ;;  %v12855_v44 = vld [vmem:[#allocation219_spill] sm:$0xff]  ;;  %v12858_v41 = vld [vmem:[#allocation310_spill] sm:$0xff] }
 0x812   : > { %7924 = vmatprep.subr.bf16.mxu1 %v12815_v40  ;;  %7952 = vmatprep.subr.bf16.mxu0 %v12816_v9 }
 0x815   : > { %7926 = vmatpush1.bf16.msra.mxu1 %v12817_v12  ;;  %7954 = vmatpush3.bf16.msra.mxu0 %v12816_v9 }
 0x816   : > { %7928 = vmatprep.subr.bf16.mxu1 %v12818_v57  ;;  %7956 = vmatprep.subr.bf16.mxu0 %v12819_v62 }
 0x819   : > { %7930 = vmatpush1.bf16.msra.mxu1 %v12820_v21  ;;  %7958 = vmatpush3.bf16.msra.mxu0 %v12819_v62 }
 0x81a   : > { %7932 = vmatprep.subr.bf16.mxu1 %v12821_v31  ;;  %7960 = vmatprep.subr.bf16.mxu0 %v12822_v43 }
 0x81d   : > { %7934 = vmatpush1.bf16.msra.mxu1 %v12823_v49  ;;  %7962 = vmatpush3.bf16.msra.mxu0 %v12822_v43 }
 0x81e   : > { %7936 = vmatprep.subr.bf16.mxu1 %v12824_v36  ;;  %7964 = vmatprep.subr.bf16.mxu0 %v12825_v46 }
 0x821   : > { %7938 = vmatpush1.bf16.msra.mxu1 %v12826_v0  ;;  %7966 = vmatpush3.bf16.msra.mxu0 %v12825_v46 }
 0x822   : > { %7968 = vmatprep.subr.bf16.mxu0 %v12827_v3  ;;  %7972 = vmatprep.subr.bf16.mxu1 %v12828_v26  ;;  %v12838_v26 = vld [vmem:[#allocation261_spill] sm:$0xff] }
 0x824   : > { %3767 = vmatmul.mubr.f32.vlgmr.msra.gmra.mrb[46].mxu1 %v11212_v38 }
 0x825   : > { %7970 = vmatpush3.bf16.msra.mxu0 %v12827_v3  ;;  %3772 = vmatprep.mubr.f32.mxu1 %v12556_v23  ;;  %v12840_v3 = vld [vmem:[#allocation262_spill] sm:$0xff] }
 0x826   : > { %7974 = vmatpush1.bf16.msra.mxu1 %v12829_v19  ;;  %8004 = vmatprep.subr.bf16.mxu0 %v12830_v8  ;;  %v12836_v19 = vld [vmem:[#allocation260_spill] sm:$0xff] }
 0x827   : > { %7976 = vmatprep.subr.bf16.mxu1 %v12831_v39  ;;  %v12837_v39 = vld [vmem:[#allocation259_spill] sm:$0xff] }
 0x828   : > { %3773 = vmatmul.mubr.f32.gmra.mrb[48].mxu1 %v11224_v51  ;;  %6593 = vmatmul.mubr.f32.vlgmr.msra.gmra.mrb[36].mxu0 %v11224_v51 }
 0x829   : > { %8006 = vmatpush3.bf16.msra.mxu0 %v12830_v8  ;;  %3966 = vmatprep.mubr.f32.mxu1 %v12556_v23  ;;  %v12839_v8 = vld [vmem:[#allocation263_spill] sm:$0xff] }
 0x82a   : > { %7978 = vmatpush1.bf16.msra.mxu1 %v12832_v11  ;;  %8008 = vmatprep.subr.bf16.mxu0 %v12833_v48  ;;  %v12841_v11 = vld [vmem:[#allocation264_spill] sm:$0xff] }
 0x82b   : > { %7980 = vmatprep.subr.bf16.mxu1 %v12834_v30  ;;  %v12842_v30 = vld [vmem:[#allocation266_spill] sm:$0xff] }
 0x82d   : > { %8010 = vmatpush3.bf16.msra.mxu0 %v12833_v48  ;;  %v12843_v48 = vld [vmem:[#allocation265_spill] sm:$0xff] }
 0x82e   : > { %7982 = vmatpush1.bf16.msra.mxu1 %v12835_v61  ;;  %8012 = vmatprep.subr.bf16.mxu0 %v12836_v19  ;;  %v12844_v61 = vld [vmem:[#allocation267_spill] sm:$0xff] }
 0x82f   : > { %7984 = vmatprep.subr.bf16.mxu1 %v12837_v39  ;;  %v12845_v39 = vld [vmem:[#allocation269_spill] sm:$0xff] }
 0x831   : > { %8014 = vmatpush3.bf16.msra.mxu0 %v12836_v19  ;;  %v12846_v19 = vld [vmem:[#allocation268_spill] sm:$0xff] }
 0x832   : > { %7986 = vmatpush1.bf16.msra.mxu1 %v12838_v26  ;;  %8016 = vmatprep.subr.bf16.mxu0 %v12839_v8  ;;  %v12847_v26 = vld [vmem:[#allocation270_spill] sm:$0xff] }
 0x833   : > { %7988 = vmatprep.subr.bf16.mxu1 %v12840_v3  ;;  %v12848_v3 = vld [vmem:[#allocation272_spill] sm:$0xff] }
 0x835   : > { %8018 = vmatpush3.bf16.msra.mxu0 %v12839_v8  ;;  %v12849_v8 = vld [vmem:[#allocation271_spill] sm:$0xff] }
 0x836   : > { %7990 = vmatpush1.bf16.msra.mxu1 %v12841_v11  ;;  %8020 = vmatprep.subr.bf16.mxu0 %v12842_v30  ;;  %v12850_v11 = vld [vmem:[#allocation273_spill] sm:$0xff] }
 0x837   : > { %7992 = vmatprep.subr.bf16.mxu1 %v12843_v48  ;;  %v12851_v48 = vld [vmem:[#allocation274_spill] sm:$0xff] }
 0x839   : > { %8022 = vmatpush3.bf16.msra.mxu0 %v12842_v30  ;;  %v12852_v30 = vld [vmem:[#allocation275_spill] sm:$0xff] }
 0x83a   : > { %7994 = vmatpush1.bf16.msra.mxu1 %v12844_v61  ;;  %8024 = vmatprep.subr.bf16.mxu0 %v12845_v39 }
 0x83b   : > { %7996 = vmatprep.subr.bf16.mxu1 %v12846_v19 }
 0x83d   : > { %8026 = vmatpush3.bf16.msra.mxu0 %v12845_v39 }
 0x83e   : > { %7998 = vmatpush1.bf16.msra.mxu1 %v12847_v26  ;;  %8028 = vmatprep.subr.bf16.mxu0 %v12848_v3  ;;  %v12853_v26 = vld [vmem:[#allocation226_spill] sm:$0xff] }
 0x83f   : > { %8000 = vmatprep.subr.bf16.mxu1 %v12849_v8  ;;  %v12854_v8 = vld [vmem:[#allocation277_spill] sm:$0xff] }
 0x841   : > { %8030 = vmatpush3.bf16.msra.mxu0 %v12848_v3 }
 0x842   : > { %8002 = vmatpush1.bf16.msra.mxu1 %v12850_v11  ;;  %8032 = vmatprep.subr.bf16.mxu0 %v12851_v48 }
 0x843   : > { %8036 = vmatprep.subr.bf16.mxu1 %v12852_v30 }
 0x845   : > { %8034 = vmatpush3.bf16.msra.mxu0 %v12851_v48 }
 0x846   : > { %8068 = vmatprep.subr.bf16.mxu0 %v12563_v63 }
 0x8bb   : > { %v6524_v19 = vpop.f32.mrb[32].mxu0 }
 0x8bc   : > { %v3451_v39 = vpop.f32.mrb[33].mxu0 }
 0x8d7   : > { %v3526_v61 = vpop.f32.mrb[42].mxu1 }
 0x8d8   : > { %v8516_v0 = vadd.f32 %v12853_v26, %v3526_v61  ;;  %v3528_v46 = vpop.f32.mrb[43].mxu1 }
 0x8d9   : > { %v8518_v49 = vadd.f32 %v12854_v8, %v3528_v46 }
 0x8da   : > { %v5511_v36 = vmul.f32 -1.442695, %v8516_v0 }
 0x8db   : > { %v3532_v3 = vpop.f32.mrb[44].mxu1  ;;  %v6559_v43 = vpop.f32.mrb[34].mxu0  ;;  %v5512_v62 = vmul.f32 -1.442695, %v8518_v49 }
 0x8dc   : > { %8813 = vpow2.f32 %v5511_v36  ;;  %v8520_v11 = vadd.f32 %v12853_v26, %v3532_v3  ;;  %v3534_v31 = vpop.f32.mrb[45].mxu1  ;;  %v3603_v30 = vpop.f32.mrb[35].mxu0 }
 0x8dd   : > { %v8522_v48 = vadd.f32 %v12854_v8, %v3534_v31  ;;  %v3604_v3 = vadd.f32 %v3603_v30, %v12655_v13  ;;  %v3452_v31 = vadd.f32 %v3451_v39, %v12855_v44  ;;  %v12857_v30 = vld [vmem:[#allocation221_spill] sm:$0xff] }
 0x8de   : > { %v5513_v21 = vmul.f32 -1.442695, %v8520_v11 }
 0x8df   : > { %v5514_v57 = vmul.f32 -1.442695, %v8522_v48  ;;  %v3457_v48 = vadd.f32 %v6524_v19, %v12855_v44 }
 0x8e0   : > { %8815 = vpow2.f32 %v5513_v21 }
 0x8e1   : > { %8817 = vpow2.f32 %v5512_v62  ;;  %v3609_v62 = vadd.f32 %v6559_v43, %v12655_v13 }
 0x8e2   : > { %8819 = vpow2.f32 %v5514_v57 }
 0x8e6   : > { %v8814_v12 = vpop.eup %8813 }
 0x8e7   : > { %v3628_v61 = vadd.f32 1.0, %v8814_v12 }
 0x8e9   : > { %8821 = vrcp.f32 %v3628_v61 }
 0x8ea   : > { %v8816_v0 = vpop.eup %8815 }
 0x8eb   : > { %v3630_v46 = vadd.f32 1.0, %v8816_v0  ;;  %v8818_v9 = vpop.eup %8817  ;;  %v12856_v0 = vld [vmem:[#allocation220_spill] sm:$0xff] }
 0x8ec   : > { %v8820_v36 = vpop.eup %8819  ;;  %v3629_v40 = vadd.f32 1.0, %v8818_v9 }
 0x8ed   : > { %8823 = vrcp.f32 %v3630_v46  ;;  %v3631_v11 = vadd.f32 1.0, %v8820_v36 }
 0x8ee   : > { %8825 = vrcp.f32 %v3629_v40  ;;  %v12859_v40 = vld [vmem:[#allocation311_spill] sm:$0xff] }
 0x8ef   : > { %8827 = vrcp.f32 %v3631_v11 }
 0x8f3   : > { %v8822_v26 = vpop.eup %8821 }
 0x8f4   : > { %v3640_v21 = vmul.f32 %v8822_v26, %v3604_v3 }
 0x8f6   : > { %v3642_v49 = vadd.f32 %v3640_v21, %v3452_v31 }
 0x8f7   : > { %v8824_v57 = vpop.eup %8823  ;;  %v3768_v12 = vpop.f32.mrb[46].mxu1 }
 0x8f8   : > { %v3641_v61 = vmul.f32 %v8824_v57, %v3609_v62  ;;  %8829 = vtanh.f32 %v3642_v49  ;;  %v3769_v9 = vadd.f32 %v3768_v12, %v12856_v0  ;;  %v3770_v46 = vpop.f32.mrb[47].mxu1  ;;  %v8826_v49 = vpop.eup %8825  ;;  %v12860_v57 = vld [vmem:[#allocation312_spill] sm:$0xff] }
 0x8f9   : > { %v3771_v8 = vadd.f32 %v3770_v46, %v12857_v30  ;;  %v12861_v46 = vld [vmem:[#allocation280_spill] sm:$0xff] }
 0x8fa   : > { %v3643_v36 = vadd.f32 %v3641_v61, %v3457_v48  ;;  %v3854_v39 = vadd.f32 %v3769_v9, %v12858_v41  ;;  %v8828_v41 = vpop.eup %8827 }
 0x8fb   : > { %v3855_v26 = vadd.f32 %v3771_v8, %v12859_v40  ;;  %v3774_v3 = vpop.f32.mrb[48].mxu1  ;;  %v6594_v43 = vpop.f32.mrb[36].mxu0  ;;  %v3646_v8 = vsub.f32 1.0, %v8826_v49  ;;  %v3647_v44 = vsub.f32 1.0, %v8828_v41 }
 0x8fc   : > { %8831 = vtanh.f32 %v3643_v36  ;;  %v5515_v31 = vmul.f32 -1.442695, %v3854_v39  ;;  %v3775_v11 = vadd.f32 %v3774_v3, %v12856_v0  ;;  %v3776_v21 = vpop.f32.mrb[49].mxu1  ;;  %v3845_v19 = vpop.f32.mrb[37].mxu0  ;;  %v3650_v39 = vmul.f32 %v8826_v49, %v11233_v10 }
 0x8fd   : > { %v3777_v62 = vadd.f32 %v3776_v21, %v12857_v30  ;;  %v5516_v9 = vmul.f32 -1.442695, %v3855_v26 }
 0x8fe   : > { %8833 = vpow2.f32 %v5515_v31  ;;  %v3856_v12 = vadd.f32 %v3775_v11, %v12860_v57  ;;  %v3651_v31 = vmul.f32 %v8828_v41, %v11272_v33  ;;  %v3851_v41 = vadd.f32 %v6594_v43, %v12547_v53 }
 0x8ff   : > { %v3857_v48 = vadd.f32 %v3777_v62, %v12861_v46 }
 0x900   : > { %v5517_v61 = vmul.f32 -1.442695, %v3856_v12 }
 0x901   : > { %v5518_v3 = vmul.f32 -1.442695, %v3857_v48  ;;  %v3846_v48 = vadd.f32 %v3845_v19, %v12547_v53 }
 0x902   : > { %v8830_v40 = vpop.eup %8829  ;;  %8835 = vpow2.f32 %v5517_v61 }
 0x903   : > { %v3648_v36 = vmul.f32 %v8830_v40, %v3646_v8  ;;  %8837 = vpow2.f32 %v5516_v9  ;;  %v12862_v40 = vld [vmem:[#allocation281_spill] sm:$0xff] }
 0x904   : > { %8839 = vpow2.f32 %v5518_v3  ;;  %v12863_v3 = vld [vmem:[#allocation313_spill] sm:$0xff] }
 0x905   : > { %v3652_v0 = vadd.f32 %v3650_v39, %v3648_v36 }
 0x906   : > { %v8832_v21 = vpop.eup %8831 }
 0x907   : > { %v3649_v30 = vmul.f32 %v8832_v21, %v3647_v44 }
 0x908   : > { %v8834_v11 = vpop.eup %8833 }
 0x909   : > { %v3870_v62 = vadd.f32 1.0, %v8834_v11  ;;  %v11364_v57 = vadd.f32 %v3651_v31, %v3649_v30 }
 0x90b   : > { %8841 = vrcp.f32 %v3870_v62 }
 0x90c   : > { %v8836_v26 = vpop.eup %8835 }
 0x90d   : > { %v3872_v12 = vadd.f32 1.0, %v8836_v26  ;;  %v8838_v46 = vpop.eup %8837 }
 0x90e   : > { %v8840_v61 = vpop.eup %8839  ;;  %v3871_v49 = vadd.f32 1.0, %v8838_v46 }
 0x90f   : > { %8843 = vrcp.f32 %v3872_v12  ;;  %v3873_v8 = vadd.f32 1.0, %v8840_v61 }
 0x910   : > { %8845 = vrcp.f32 %v3871_v49 }
 0x911   : > { %8847 = vrcp.f32 %v3873_v8 }
 0x915   : > { %v8842_v9 = vpop.eup %8841 }
 0x916   : > { %v3882_v44 = vmul.f32 %v8842_v9, %v3846_v48 }
 0x918   : > { %v3884_v36 = vadd.f32 %v3882_v44, %v12862_v40  ;;  %v11396_v44 = vsel %vm3106_vm9, %v11233_v10, %v3652_v0  ;;  %v12864_v10 = vld [vmem:[#allocation232_spill] sm:$0xff]  ;;  %v12869_v40 = vld [vmem:[#allocation243_spill] sm:$0xff] }
 0x919   : > { %v8844_v39 = vpop.eup %8843  ;;  %v12866_v0 = vld [vmem:[#allocation240_spill] sm:$0xff] }
 0x91a   : > { %v3883_v30 = vmul.f32 %v8844_v39, %v3851_v41  ;;  %8849 = vtanh.f32 %v3884_v36  ;;  %v8846_v31 = vpop.eup %8845  ;;  %v12868_v41 = vld [vmem:[#allocation242_spill] sm:$0xff]  ;;  %v12871_v39 = vld [vmem:[#allocation245_spill] sm:$0xff] }
 0x91b   : > { %v8848_v11 = vpop.eup %8847  ;;  %v3888_v62 = vsub.f32 1.0, %v8846_v31  ;;  %v3892_v12 = vmul.f32 %v8846_v31, %v11212_v38  ;;  %v12870_v36 = vld [vmem:[#allocation238_spill] sm:$0xff]  ;;  %v12875_v31 = vld [vmem:[#allocation249_spill] sm:$0xff] }
 0x91c   : > { %v3885_v21 = vadd.f32 %v3883_v30, %v12863_v3  ;;  %v3889_v43 = vsub.f32 1.0, %v8848_v11  ;;  %v3893_v9 = vmul.f32 %v8848_v11, %v11224_v51  ;;  %v12872_v30 = vld [vmem:[#allocation246_spill] sm:$0xff]  ;;  %v12873_v3 = vld [vmem:[#allocation241_spill] sm:$0xff]  ;;  %v12876_v11 = vld [vmem:[#allocation244_spill] sm:$0xff] }
 0x91e   : > { %8851 = vtanh.f32 %v3885_v21  ;;  %v12874_v21 = vld [vmem:[#allocation248_spill] sm:$0xff] }
 0x924   : > { %v8850_v26 = vpop.eup %8849 }
 0x925   : > { %v3890_v19 = vmul.f32 %v8850_v26, %v3888_v62  ;;  %v12877_v62 = vld [vmem:[#allocation250_spill] sm:$0xff]  ;;  %v12878_v26 = vld [vmem:[#allocation247_spill] sm:$0xff] }
 0x927   : > { %v3894_v46 = vadd.f32 %v3892_v12, %v3890_v19  ;;  %v12879_v19 = vld [vmem:[#allocation251_spill] sm:$0xff]  ;;  %v12880_v12 = vld [vmem:[#allocation252_spill] sm:$0xff] }
 0x928   : > { %v8852_v61 = vpop.eup %8851 }
 0x929   : > { %v11375_v49 = vsel %vm3700_vm11, %v11212_v38, %v3894_v46  ;;  %v3891_v48 = vmul.f32 %v8852_v61, %v3889_v43  ;;  %v12881_v46 = vld [vmem:[#allocation254_spill] sm:$0xff]  ;;  %v12882_v43 = vld [vmem:[#allocation253_spill] sm:$0xff]  ;;  %v12883_v61 = vld [vmem:[#allocation255_spill] sm:$0xff] }
 0x92a   : > { %3967 = vmatmul.mubr.f32.vlgmr.msra.gmra.mrb[50].mxu1 %v11375_v49  ;;  %6627 = vmatprep.mubr.f32.mxu0 %v11375_v49 }
 0x92b   : > { %8038 = vmatpush1.bf16.msra.mxu1 %v10466_v20  ;;  %3972 = vmatprep.mubr.f32.mxu1 %v12556_v23  ;;  %v3895_v8 = vadd.f32 %v3893_v9, %v3891_v48  ;;  %v12884_v48 = vld [vmem:[#allocation257_spill] sm:$0xff]  ;;  %v12885_v9 = vld [vmem:[#allocation256_spill] sm:$0xff] }
 0x92c   : > { %8040 = vmatprep.subr.bf16.mxu1 %v10470_v56 }
 0x92d   : > { %v11387_v38 = vsel %vm3701_vm12, %v11224_v51, %v3895_v8  ;;  %v11435_v51 = vsel %vm3107_vm10, %v11272_v33, %v11364_v57  ;;  %v12865_v33 = vld [vmem:[#allocation239_spill] sm:$0xff]  ;;  %v12886_v8 = vld [vmem:[#allocation258_spill] sm:$0xff] }
 0x92e   : > { %3973 = vmatmul.mubr.f32.gmra.mrb[52].mxu1 %v11387_v38  ;;  %6628 = vmatmul.mubr.f32.vlgmr.msra.gmra.mrb[38].mxu0 %v11387_v38  ;;  %v12867_v57 = vld [vmem:[#allocation235_spill] sm:$0xff] }
 0x92f   : > { %8042 = vmatpush1.bf16.msra.mxu1 %v10485_v18  ;;  %8070 = vmatpush3.bf16.msra.mxu0 %v12563_v63 }
 0x930   : > { %6662 = vmatprep.mubr.f32.mxu0 %v11396_v44  ;;  %8044 = vmatprep.subr.bf16.mxu1 %v10490_v59 }
 0x931   : > { %8072 = vmatprep.subr.bf16.mxu0 %v10494_v32  ;;  %4118 = vmatprep.mubr.f32.mxu1 %v12556_v23 }
 0x933   : > { %8046 = vmatpush1.bf16.msra.mxu1 %v10507_v37  ;;  %8074 = vmatpush3.bf16.msra.mxu0 %v10494_v32 }
 0x934   : > { %8048 = vmatprep.subr.bf16.mxu1 %v10513_v1  ;;  %8076 = vmatprep.subr.bf16.mxu0 %v10517_v7 }
 0x937   : > { %8050 = vmatpush1.bf16.msra.mxu1 %v10525_v4  ;;  %8078 = vmatpush3.bf16.msra.mxu0 %v10517_v7 }
 0x938   : > { %8052 = vmatprep.subr.bf16.mxu1 %v10531_v17  ;;  %8080 = vmatprep.subr.bf16.mxu0 %v10535_v16 }
 0x93b   : > { %8054 = vmatpush1.bf16.msra.mxu1 %v10541_v47  ;;  %8082 = vmatpush3.bf16.msra.mxu0 %v10535_v16 }
 0x93c   : > { %8056 = vmatprep.subr.bf16.mxu1 %v10547_v25  ;;  %8084 = vmatprep.subr.bf16.mxu0 %v10551_v15 }
 0x93f   : > { %8058 = vmatpush1.bf16.msra.mxu1 %v10557_v28  ;;  %8086 = vmatpush3.bf16.msra.mxu0 %v10551_v15 }
 0x940   : > { %8060 = vmatprep.subr.bf16.mxu1 %v10563_v45  ;;  %8088 = vmatprep.subr.bf16.mxu0 %v10567_v55 }
 0x943   : > { %8062 = vmatpush1.bf16.msra.mxu1 %v10573_v14  ;;  %8090 = vmatpush3.bf16.msra.mxu0 %v10567_v55 }
 0x944   : > { %8064 = vmatprep.subr.bf16.mxu1 %v10579_v52  ;;  %8092 = vmatprep.subr.bf16.mxu0 %v10583_v34 }
 0x947   : > { %8066 = vmatpush1.bf16.msra.mxu1 %v10589_v27  ;;  %8094 = vmatpush3.bf16.msra.mxu0 %v10583_v34 }
 0x948   : > { %8096 = vmatprep.subr.bf16.mxu0 %v10595_v5  ;;  %8100 = vmatprep.subr.bf16.mxu1 %v12598_v35 }
 0x94a   : > { %4119 = vmatmul.mubr.f32.vlgmr.msra.gmra.mrb[50].mxu1 %v11396_v44 }
 0x94b   : > { %8098 = vmatpush3.bf16.msra.mxu0 %v10595_v5  ;;  %8102 = vmatpush1.bf16.msra.mxu1 %v12599_v54 }
 0x94c   : > { %4124 = vmatprep.mubr.f32.mxu1 %v12556_v23  ;;  %8104 = vmatprep.subr.bf16.mxu1 %v12657_v24 }
 0x94d   : > { %8132 = vmatprep.subr.bf16.mxu0 %v12658_v6 }
 0x94e   : > { %4125 = vmatmul.mubr.f32.gmra.mrb[52].mxu1 %v11435_v51  ;;  %6663 = vmatmul.mubr.f32.vlgmr.msra.gmra.mrb[40].mxu0 %v11435_v51 }
 0x94f   : > { %8106 = vmatpush1.bf16.msra.mxu1 %v12659_v50  ;;  %8134 = vmatpush3.bf16.msra.mxu0 %v12658_v6 }
 0x950   : > { %6697 = vmatprep.mubr.f32.mxu0 %v11375_v49  ;;  %8108 = vmatprep.subr.bf16.mxu1 %v12660_v60 }
 0x951   : > { %8136 = vmatprep.subr.bf16.mxu0 %v12661_v42  ;;  %4360 = vmatprep.mubr.f32.mxu1 %v12556_v23 }
 0x953   : > { %8110 = vmatpush1.bf16.msra.mxu1 %v12662_v58  ;;  %8138 = vmatpush3.bf16.msra.mxu0 %v12661_v42 }
 0x954   : > { %8112 = vmatprep.subr.bf16.mxu1 %v12711_v2  ;;  %8140 = vmatprep.subr.bf16.mxu0 %v12864_v10 }
 0x957   : > { %8114 = vmatpush1.bf16.msra.mxu1 %v12865_v33  ;;  %8142 = vmatpush3.bf16.msra.mxu0 %v12864_v10  ;;  %v12906_v33 = vld [vmem:[#allocation219_spill] sm:$0xff]  ;;  %v12909_v10 = vld [vmem:[#allocation282_spill] sm:$0xff] }
 0x958   : > { %8116 = vmatprep.subr.bf16.mxu1 %v12866_v0  ;;  %8144 = vmatprep.subr.bf16.mxu0 %v12867_v57 }
 0x95b   : > { %8118 = vmatpush1.bf16.msra.mxu1 %v12868_v41  ;;  %8146 = vmatpush3.bf16.msra.mxu0 %v12867_v57 }
 0x95c   : > { %8120 = vmatprep.subr.bf16.mxu1 %v12869_v40  ;;  %8148 = vmatprep.subr.bf16.mxu0 %v12870_v36 }
 0x95f   : > { %8122 = vmatpush1.bf16.msra.mxu1 %v12871_v39  ;;  %8150 = vmatpush3.bf16.msra.mxu0 %v12870_v36 }
 0x960   : > { %8124 = vmatprep.subr.bf16.mxu1 %v12872_v30  ;;  %8152 = vmatprep.subr.bf16.mxu0 %v12873_v3 }
 0x963   : > { %8126 = vmatpush1.bf16.msra.mxu1 %v12874_v21  ;;  %8154 = vmatpush3.bf16.msra.mxu0 %v12873_v3 }
 0x964   : > { %8128 = vmatprep.subr.bf16.mxu1 %v12875_v31  ;;  %8156 = vmatprep.subr.bf16.mxu0 %v12876_v11 }
 0x967   : > { %8130 = vmatpush1.bf16.msra.mxu1 %v12877_v62  ;;  %8158 = vmatpush3.bf16.msra.mxu0 %v12876_v11 }
 0x968   : > { %8160 = vmatprep.subr.bf16.mxu0 %v12878_v26  ;;  %8164 = vmatprep.subr.bf16.mxu1 %v12879_v19  ;;  %v12889_v19 = vld [vmem:[#allocation261_spill] sm:$0xff] }
 0x96a   : > { %4361 = vmatmul.mubr.f32.vlgmr.msra.gmra.mrb[54].mxu1 %v11375_v49 }
 0x96b   : > { %8162 = vmatpush3.bf16.msra.mxu0 %v12878_v26  ;;  %4366 = vmatprep.mubr.f32.mxu1 %v12556_v23  ;;  %v12891_v26 = vld [vmem:[#allocation262_spill] sm:$0xff] }
 0x96c   : > { %8166 = vmatpush1.bf16.msra.mxu1 %v12880_v12  ;;  %8196 = vmatprep.subr.bf16.mxu0 %v12881_v46  ;;  %v12887_v12 = vld [vmem:[#allocation260_spill] sm:$0xff] }
 0x96d   : > { %8168 = vmatprep.subr.bf16.mxu1 %v12882_v43  ;;  %v12888_v43 = vld [vmem:[#allocation259_spill] sm:$0xff] }
 0x96e   : > { %4367 = vmatmul.mubr.f32.gmra.mrb[56].mxu1 %v11387_v38  ;;  %6698 = vmatmul.mubr.f32.vlgmr.msra.gmra.mrb[42].mxu0 %v11387_v38 }
 0x96f   : > { %8198 = vmatpush3.bf16.msra.mxu0 %v12881_v46  ;;  %4560 = vmatprep.mubr.f32.mxu1 %v12556_v23  ;;  %v12890_v46 = vld [vmem:[#allocation263_spill] sm:$0xff] }
 0x970   : > { %8170 = vmatpush1.bf16.msra.mxu1 %v12883_v61  ;;  %8200 = vmatprep.subr.bf16.mxu0 %v12884_v48  ;;  %v12892_v61 = vld [vmem:[#allocation264_spill] sm:$0xff] }
 0x971   : > { %8172 = vmatprep.subr.bf16.mxu1 %v12885_v9  ;;  %v12893_v9 = vld [vmem:[#allocation266_spill] sm:$0xff] }
 0x973   : > { %8202 = vmatpush3.bf16.msra.mxu0 %v12884_v48  ;;  %v12894_v48 = vld [vmem:[#allocation265_spill] sm:$0xff] }
 0x974   : > { %8174 = vmatpush1.bf16.msra.mxu1 %v12886_v8  ;;  %8204 = vmatprep.subr.bf16.mxu0 %v12887_v12  ;;  %v12895_v8 = vld [vmem:[#allocation267_spill] sm:$0xff] }
 0x975   : > { %8176 = vmatprep.subr.bf16.mxu1 %v12888_v43  ;;  %v12896_v43 = vld [vmem:[#allocation269_spill] sm:$0xff] }
 0x977   : > { %8206 = vmatpush3.bf16.msra.mxu0 %v12887_v12  ;;  %v12897_v12 = vld [vmem:[#allocation268_spill] sm:$0xff] }
 0x978   : > { %8178 = vmatpush1.bf16.msra.mxu1 %v12889_v19  ;;  %8208 = vmatprep.subr.bf16.mxu0 %v12890_v46  ;;  %v12898_v19 = vld [vmem:[#allocation270_spill] sm:$0xff] }
 0x979   : > { %8180 = vmatprep.subr.bf16.mxu1 %v12891_v26  ;;  %v12899_v26 = vld [vmem:[#allocation272_spill] sm:$0xff] }
 0x97b   : > { %8210 = vmatpush3.bf16.msra.mxu0 %v12890_v46  ;;  %v12900_v46 = vld [vmem:[#allocation271_spill] sm:$0xff] }
 0x97c   : > { %8182 = vmatpush1.bf16.msra.mxu1 %v12892_v61  ;;  %8212 = vmatprep.subr.bf16.mxu0 %v12893_v9  ;;  %v12901_v61 = vld [vmem:[#allocation273_spill] sm:$0xff] }
 0x97d   : > { %8184 = vmatprep.subr.bf16.mxu1 %v12894_v48  ;;  %v12902_v48 = vld [vmem:[#allocation274_spill] sm:$0xff] }
 0x97f   : > { %8214 = vmatpush3.bf16.msra.mxu0 %v12893_v9  ;;  %v12903_v9 = vld [vmem:[#allocation275_spill] sm:$0xff] }
 0x980   : > { %8186 = vmatpush1.bf16.msra.mxu1 %v12895_v8  ;;  %8216 = vmatprep.subr.bf16.mxu0 %v12896_v43 }
 0x981   : > { %8188 = vmatprep.subr.bf16.mxu1 %v12897_v12 }
 0x983   : > { %8218 = vmatpush3.bf16.msra.mxu0 %v12896_v43 }
 0x984   : > { %8190 = vmatpush1.bf16.msra.mxu1 %v12898_v19  ;;  %8220 = vmatprep.subr.bf16.mxu0 %v12899_v26  ;;  %v12904_v19 = vld [vmem:[#allocation226_spill] sm:$0xff] }
 0x985   : > { %8192 = vmatprep.subr.bf16.mxu1 %v12900_v46  ;;  %v12905_v46 = vld [vmem:[#allocation277_spill] sm:$0xff] }
 0x987   : > { %8222 = vmatpush3.bf16.msra.mxu0 %v12899_v26 }
 0x988   : > { %8194 = vmatpush1.bf16.msra.mxu1 %v12901_v61  ;;  %8224 = vmatprep.subr.bf16.mxu0 %v12902_v48 }
 0x989   : > { %8228 = vmatprep.subr.bf16.mxu1 %v12903_v9 }
 0x98b   : > { %8226 = vmatpush3.bf16.msra.mxu0 %v12902_v48 }
 0x98c   : > { %8260 = vmatprep.subr.bf16.mxu0 %v12563_v63 }
 0xa01   : > { %v6629_v12 = vpop.f32.mrb[38].mxu0 }
 0xa02   : > { %v4045_v43 = vpop.f32.mrb[39].mxu0 }
 0xa1d   : > { %v4120_v8 = vpop.f32.mrb[50].mxu1 }
 0xa1e   : > { %v8524_v62 = vadd.f32 %v12904_v19, %v4120_v8  ;;  %v4122_v11 = vpop.f32.mrb[51].mxu1 }
 0xa1f   : > { %v8526_v21 = vadd.f32 %v12905_v46, %v4122_v11 }
 0xa20   : > { %v5519_v31 = vmul.f32 -1.442695, %v8524_v62 }
 0xa21   : > { %v4126_v26 = vpop.f32.mrb[52].mxu1  ;;  %v6664_v3 = vpop.f32.mrb[40].mxu0  ;;  %v5520_v36 = vmul.f32 -1.442695, %v8526_v21 }
 0xa22   : > { %8853 = vpow2.f32 %v5519_v31  ;;  %v8528_v61 = vadd.f32 %v12904_v19, %v4126_v26  ;;  %v4128_v30 = vpop.f32.mrb[53].mxu1  ;;  %v4197_v9 = vpop.f32.mrb[41].mxu0 }
 0xa23   : > { %v8530_v48 = vadd.f32 %v12905_v46, %v4128_v30  ;;  %v4198_v26 = vadd.f32 %v4197_v9, %v12655_v13  ;;  %v4046_v30 = vadd.f32 %v4045_v43, %v12906_v33  ;;  %v12908_v9 = vld [vmem:[#allocation221_spill] sm:$0xff] }
 0xa24   : > { %v5521_v39 = vmul.f32 -1.442695, %v8528_v61 }
 0xa25   : > { %v5522_v40 = vmul.f32 -1.442695, %v8530_v48  ;;  %v4051_v48 = vadd.f32 %v6629_v12, %v12906_v33 }
 0xa26   : > { %8855 = vpow2.f32 %v5521_v39 }
 0xa27   : > { %8857 = vpow2.f32 %v5520_v36  ;;  %v4203_v36 = vadd.f32 %v6664_v3, %v12655_v13 }
 0xa28   : > { %8859 = vpow2.f32 %v5522_v40 }
 0xa2c   : > { %v8854_v41 = vpop.eup %8853 }
 0xa2d   : > { %v4222_v8 = vadd.f32 1.0, %v8854_v41 }
 0xa2f   : > { %8861 = vrcp.f32 %v4222_v8 }
 0xa30   : > { %v8856_v62 = vpop.eup %8855 }
 0xa31   : > { %v4224_v11 = vadd.f32 1.0, %v8856_v62  ;;  %v8858_v57 = vpop.eup %8857  ;;  %v12907_v62 = vld [vmem:[#allocation220_spill] sm:$0xff] }
 0xa32   : > { %v8860_v31 = vpop.eup %8859  ;;  %v4223_v0 = vadd.f32 1.0, %v8858_v57 }
 0xa33   : > { %8863 = vrcp.f32 %v4224_v11  ;;  %v4225_v61 = vadd.f32 1.0, %v8860_v31 }
 0xa34   : > { %8865 = vrcp.f32 %v4223_v0  ;;  %v12910_v0 = vld [vmem:[#allocation283_spill] sm:$0xff] }
 0xa35   : > { %8867 = vrcp.f32 %v4225_v61 }
 0xa39   : > { %v8862_v19 = vpop.eup %8861 }
 0xa3a   : > { %v4234_v39 = vmul.f32 %v8862_v19, %v4198_v26 }
 0xa3c   : > { %v4236_v21 = vadd.f32 %v4234_v39, %v4046_v30 }
 0xa3d   : > { %v8864_v40 = vpop.eup %8863  ;;  %v4362_v41 = vpop.f32.mrb[54].mxu1 }
 0xa3e   : > { %v4235_v8 = vmul.f32 %v8864_v40, %v4203_v36  ;;  %8869 = vtanh.f32 %v4236_v21  ;;  %v4363_v57 = vadd.f32 %v4362_v41, %v12907_v62  ;;  %v4364_v11 = vpop.f32.mrb[55].mxu1  ;;  %v8866_v21 = vpop.eup %8865  ;;  %v12911_v40 = vld [vmem:[#allocation284_spill] sm:$0xff] }
 0xa3f   : > { %v4365_v46 = vadd.f32 %v4364_v11, %v12908_v9  ;;  %v12912_v11 = vld [vmem:[#allocation279_spill] sm:$0xff] }
 0xa40   : > { %v4237_v31 = vadd.f32 %v4235_v8, %v4051_v48  ;;  %v4448_v43 = vadd.f32 %v4363_v57, %v12909_v10  ;;  %v8868_v10 = vpop.eup %8867 }
 0xa41   : > { %v4449_v19 = vadd.f32 %v4365_v46, %v12910_v0  ;;  %v4368_v26 = vpop.f32.mrb[56].mxu1  ;;  %v6699_v3 = vpop.f32.mrb[42].mxu0  ;;  %v4240_v46 = vsub.f32 1.0, %v8866_v21  ;;  %v4241_v33 = vsub.f32 1.0, %v8868_v10 }
 0xa42   : > { %8871 = vtanh.f32 %v4237_v31  ;;  %v5523_v30 = vmul.f32 -1.442695, %v4448_v43  ;;  %v4369_v61 = vadd.f32 %v4368_v26, %v12907_v62  ;;  %v4370_v39 = vpop.f32.mrb[57].mxu1  ;;  %v4439_v12 = vpop.f32.mrb[43].mxu0  ;;  %v4244_v43 = vmul.f32 %v8866_v21, %v11396_v44 }
 0xa43   : > { %v4371_v36 = vadd.f32 %v4370_v39, %v12908_v9  ;;  %v5524_v57 = vmul.f32 -1.442695, %v4449_v19 }
 0xa44   : > { %8873 = vpow2.f32 %v5523_v30  ;;  %v4450_v41 = vadd.f32 %v4369_v61, %v12911_v40  ;;  %v4245_v30 = vmul.f32 %v8868_v10, %v11435_v51  ;;  %v4445_v10 = vadd.f32 %v6699_v3, %v12547_v53 }
 0xa45   : > { %v4451_v48 = vadd.f32 %v4371_v36, %v12912_v11 }
 0xa46   : > { %v5525_v8 = vmul.f32 -1.442695, %v4450_v41 }
 0xa47   : > { %v5526_v26 = vmul.f32 -1.442695, %v4451_v48  ;;  %v4440_v48 = vadd.f32 %v4439_v12, %v12547_v53 }
 0xa48   : > { %v8870_v0 = vpop.eup %8869  ;;  %8875 = vpow2.f32 %v5525_v8 }
 0xa49   : > { %v4242_v31 = vmul.f32 %v8870_v0, %v4240_v46  ;;  %8877 = vpow2.f32 %v5524_v57  ;;  %v12913_v0 = vld [vmem:[#allocation285_spill] sm:$0xff] }
 0xa4a   : > { %8879 = vpow2.f32 %v5526_v26  ;;  %v12914_v26 = vld [vmem:[#allocation291_spill] sm:$0xff] }
 0xa4b   : > { %v4246_v62 = vadd.f32 %v4244_v43, %v4242_v31 }
 0xa4c   : > { %v8872_v39 = vpop.eup %8871 }
 0xa4d   : > { %v4243_v9 = vmul.f32 %v8872_v39, %v4241_v33 }
 0xa4e   : > { %v8874_v61 = vpop.eup %8873 }
 0xa4f   : > { %v4464_v36 = vadd.f32 1.0, %v8874_v61  ;;  %v11527_v40 = vadd.f32 %v4245_v30, %v4243_v9 }
 0xa51   : > { %8881 = vrcp.f32 %v4464_v36 }
 0xa52   : > { %v8876_v19 = vpop.eup %8875 }
 0xa53   : > { %v4466_v41 = vadd.f32 1.0, %v8876_v19  ;;  %v8878_v11 = vpop.eup %8877 }
 0xa54   : > { %v8880_v8 = vpop.eup %8879  ;;  %v4465_v21 = vadd.f32 1.0, %v8878_v11 }
 0xa55   : > { %8883 = vrcp.f32 %v4466_v41  ;;  %v4467_v46 = vadd.f32 1.0, %v8880_v8 }
 0xa56   : > { %8885 = vrcp.f32 %v4465_v21 }
 0xa57   : > { %8887 = vrcp.f32 %v4467_v46 }
 0xa5b   : > { %v8882_v57 = vpop.eup %8881 }
 0xa5c   : > { %v4476_v33 = vmul.f32 %v8882_v57, %v4440_v48 }
 0xa5e   : > { %v4478_v31 = vadd.f32 %v4476_v33, %v12913_v0  ;;  %v11559_v33 = vsel %vm3700_vm11, %v11396_v44, %v4246_v62  ;;  %v12924_v44 = vld [vmem:[#allocation241_spill] sm:$0xff]  ;;  %v12929_v0 = vld [vmem:[#allocation247_spill] sm:$0xff] }
 0xa5f   : > { %v8884_v43 = vpop.eup %8883  ;;  %v12926_v62 = vld [vmem:[#allocation249_spill] sm:$0xff] }
 0xa60   : > { %v4477_v9 = vmul.f32 %v8884_v43, %v4445_v10  ;;  %8889 = vtanh.f32 %v4478_v31  ;;  %v8886_v30 = vpop.eup %8885  ;;  %v12928_v10 = vld [vmem:[#allocation250_spill] sm:$0xff]  ;;  %v12930_v31 = vld [vmem:[#allocation251_spill] sm:$0xff]  ;;  %v12931_v43 = vld [vmem:[#allocation252_spill] sm:$0xff] }
 0xa61   : > { %v8888_v61 = vpop.eup %8887  ;;  %v4482_v36 = vsub.f32 1.0, %v8886_v30  ;;  %v4486_v41 = vmul.f32 %v8886_v30, %v11375_v49  ;;  %v12935_v30 = vld [vmem:[#allocation257_spill] sm:$0xff] }
 0xa62   : > { %v4479_v39 = vadd.f32 %v4477_v9, %v12914_v26  ;;  %v4483_v3 = vsub.f32 1.0, %v8888_v61  ;;  %v4487_v57 = vmul.f32 %v8888_v61, %v11387_v38  ;;  %v12932_v9 = vld [vmem:[#allocation254_spill] sm:$0xff]  ;;  %v12933_v26 = vld [vmem:[#allocation253_spill] sm:$0xff]  ;;  %v12936_v61 = vld [vmem:[#allocation256_spill] sm:$0xff] }
 0xa64   : > { %8891 = vtanh.f32 %v4479_v39  ;;  %v12934_v39 = vld [vmem:[#allocation255_spill] sm:$0xff] }
 0xa6a   : > { %v8890_v19 = vpop.eup %8889 }
 0xa6b   : > { %v4484_v12 = vmul.f32 %v8890_v19, %v4482_v36  ;;  %v12937_v36 = vld [vmem:[#allocation258_spill] sm:$0xff]  ;;  %v12938_v19 = vld [vmem:[#allocation260_spill] sm:$0xff] }
 0xa6d   : > { %v4488_v11 = vadd.f32 %v4486_v41, %v4484_v12  ;;  %v12939_v12 = vld [vmem:[#allocation259_spill] sm:$0xff]  ;;  %v12940_v41 = vld [vmem:[#allocation261_spill] sm:$0xff] }
 0xa6e   : > { %v8892_v8 = vpop.eup %8891 }
 0xa6f   : > { %v11538_v21 = vsel %vm4294_vm13, %v11375_v49, %v4488_v11  ;;  %v4485_v48 = vmul.f32 %v8892_v8, %v4483_v3  ;;  %v12941_v11 = vld [vmem:[#allocation263_spill] sm:$0xff]  ;;  %v12942_v3 = vld [vmem:[#allocation262_spill] sm:$0xff]  ;;  %v12943_v8 = vld [vmem:[#allocation264_spill] sm:$0xff] }
 0xa70   : > { %4561 = vmatmul.mubr.f32.vlgmr.msra.gmra.mrb[58].mxu1 %v11538_v21  ;;  %6732 = vmatprep.mubr.f32.mxu0 %v11538_v21 }
 0xa71   : > { %8230 = vmatpush1.bf16.msra.mxu1 %v10466_v20  ;;  %4566 = vmatprep.mubr.f32.mxu1 %v12556_v23  ;;  %v4489_v46 = vadd.f32 %v4487_v57, %v4485_v48  ;;  %v12944_v48 = vld [vmem:[#allocation266_spill] sm:$0xff]  ;;  %v12945_v57 = vld [vmem:[#allocation265_spill] sm:$0xff] }
 0xa72   : > { %8232 = vmatprep.subr.bf16.mxu1 %v10470_v56 }
 0xa73   : > { %v11550_v49 = vsel %vm4295_vm14, %v11387_v38, %v4489_v46  ;;  %v11598_v38 = vsel %vm3701_vm12, %v11435_v51, %v11527_v40  ;;  %v12925_v51 = vld [vmem:[#allocation248_spill] sm:$0xff]  ;;  %v12946_v46 = vld [vmem:[#allocation267_spill] sm:$0xff] }
 0xa74   : > { %4567 = vmatmul.mubr.f32.gmra.mrb[60].mxu1 %v11550_v49  ;;  %6733 = vmatmul.mubr.f32.vlgmr.msra.gmra.mrb[44].mxu0 %v11550_v49  ;;  %v12927_v40 = vld [vmem:[#allocation244_spill] sm:$0xff] }
 0xa75   : > { %8234 = vmatpush1.bf16.msra.mxu1 %v10485_v18  ;;  %8262 = vmatpush3.bf16.msra.mxu0 %v12563_v63 }
 0xa76   : > { %6767 = vmatprep.mubr.f32.mxu0 %v11559_v33  ;;  %8236 = vmatprep.subr.bf16.mxu1 %v10490_v59 }
 0xa77   : > { %8264 = vmatprep.subr.bf16.mxu0 %v10494_v32  ;;  %4712 = vmatprep.mubr.f32.mxu1 %v12556_v23 }
 0xa79   : > { %8238 = vmatpush1.bf16.msra.mxu1 %v10507_v37  ;;  %8266 = vmatpush3.bf16.msra.mxu0 %v10494_v32 }
 0xa7a   : > { %8240 = vmatprep.subr.bf16.mxu1 %v10513_v1  ;;  %8268 = vmatprep.subr.bf16.mxu0 %v10517_v7 }
 0xa7d   : > { %8242 = vmatpush1.bf16.msra.mxu1 %v10525_v4  ;;  %8270 = vmatpush3.bf16.msra.mxu0 %v10517_v7 }
 0xa7e   : > { %8244 = vmatprep.subr.bf16.mxu1 %v10531_v17  ;;  %8272 = vmatprep.subr.bf16.mxu0 %v10535_v16 }
 0xa81   : > { %8246 = vmatpush1.bf16.msra.mxu1 %v10541_v47  ;;  %8274 = vmatpush3.bf16.msra.mxu0 %v10535_v16 }
 0xa82   : > { %8248 = vmatprep.subr.bf16.mxu1 %v10547_v25  ;;  %8276 = vmatprep.subr.bf16.mxu0 %v10551_v15 }
 0xa85   : > { %8250 = vmatpush1.bf16.msra.mxu1 %v10557_v28  ;;  %8278 = vmatpush3.bf16.msra.mxu0 %v10551_v15 }
 0xa86   : > { %8252 = vmatprep.subr.bf16.mxu1 %v10563_v45  ;;  %8280 = vmatprep.subr.bf16.mxu0 %v10567_v55 }
 0xa89   : > { %8254 = vmatpush1.bf16.msra.mxu1 %v10573_v14  ;;  %8282 = vmatpush3.bf16.msra.mxu0 %v10567_v55 }
 0xa8a   : > { %8256 = vmatprep.subr.bf16.mxu1 %v10579_v52  ;;  %8284 = vmatprep.subr.bf16.mxu0 %v10583_v34 }
 0xa8d   : > { %8258 = vmatpush1.bf16.msra.mxu1 %v10589_v27  ;;  %8286 = vmatpush3.bf16.msra.mxu0 %v10583_v34 }
 0xa8e   : > { %8288 = vmatprep.subr.bf16.mxu0 %v10595_v5  ;;  %8292 = vmatprep.subr.bf16.mxu1 %v12598_v35  ;;  %v12915_v35 = vld [vmem:[#allocation232_spill] sm:$0xff] }
 0xa90   : > { %4713 = vmatmul.mubr.f32.vlgmr.msra.gmra.mrb[58].mxu1 %v11559_v33 }
 0xa91   : > { %8290 = vmatpush3.bf16.msra.mxu0 %v10595_v5  ;;  %8294 = vmatpush1.bf16.msra.mxu1 %v12599_v54  ;;  %v12916_v54 = vld [vmem:[#allocation239_spill] sm:$0xff] }
 0xa92   : > { %4718 = vmatprep.mubr.f32.mxu1 %v12556_v23  ;;  %8296 = vmatprep.subr.bf16.mxu1 %v12657_v24  ;;  %v12917_v24 = vld [vmem:[#allocation240_spill] sm:$0xff] }
 0xa93   : > { %8324 = vmatprep.subr.bf16.mxu0 %v12658_v6 }
 0xa94   : > { %4719 = vmatmul.mubr.f32.gmra.mrb[60].mxu1 %v11598_v38  ;;  %6768 = vmatmul.mubr.f32.vlgmr.msra.gmra.mrb[46].mxu0 %v11598_v38 }
 0xa95   : > { %8298 = vmatpush1.bf16.msra.mxu1 %v12659_v50  ;;  %8326 = vmatpush3.bf16.msra.mxu0 %v12658_v6  ;;  %v12918_v6 = vld [vmem:[#allocation235_spill] sm:$0xff]  ;;  %v12919_v50 = vld [vmem:[#allocation242_spill] sm:$0xff] }
 0xa96   : > { %6802 = vmatprep.mubr.f32.mxu0 %v11538_v21  ;;  %8300 = vmatprep.subr.bf16.mxu1 %v12660_v60  ;;  %v12920_v60 = vld [vmem:[#allocation243_spill] sm:$0xff] }
 0xa97   : > { %8328 = vmatprep.subr.bf16.mxu0 %v12661_v42  ;;  %4954 = vmatprep.mubr.f32.mxu1 %v12556_v23 }
 0xa99   : > { %8302 = vmatpush1.bf16.msra.mxu1 %v12662_v58  ;;  %8330 = vmatpush3.bf16.msra.mxu0 %v12661_v42  ;;  %v12921_v58 = vld [vmem:[#allocation238_spill] sm:$0xff]  ;;  %v12922_v42 = vld [vmem:[#allocation245_spill] sm:$0xff] }
 0xa9a   : > { %8304 = vmatprep.subr.bf16.mxu1 %v12711_v2  ;;  %8332 = vmatprep.subr.bf16.mxu0 %v12915_v35  ;;  %v12923_v2 = vld [vmem:[#allocation246_spill] sm:$0xff] }
 0xa9d   : > { %8306 = vmatpush1.bf16.msra.mxu1 %v12916_v54  ;;  %8334 = vmatpush3.bf16.msra.mxu0 %v12915_v35  ;;  %v12947_v35 = vld [vmem:[#allocation269_spill] sm:$0xff]  ;;  %v12948_v54 = vld [vmem:[#allocation268_spill] sm:$0xff] }
 0xa9e   : > { %8308 = vmatprep.subr.bf16.mxu1 %v12917_v24  ;;  %8336 = vmatprep.subr.bf16.mxu0 %v12918_v6  ;;  %v12949_v24 = vld [vmem:[#allocation270_spill] sm:$0xff] }
 0xaa1   : > { %8310 = vmatpush1.bf16.msra.mxu1 %v12919_v50  ;;  %8338 = vmatpush3.bf16.msra.mxu0 %v12918_v6  ;;  %v12950_v6 = vld [vmem:[#allocation272_spill] sm:$0xff]  ;;  %v12951_v50 = vld [vmem:[#allocation271_spill] sm:$0xff] }
 0xaa2   : > { %8312 = vmatprep.subr.bf16.mxu1 %v12920_v60  ;;  %8340 = vmatprep.subr.bf16.mxu0 %v12921_v58  ;;  %v12952_v60 = vld [vmem:[#allocation273_spill] sm:$0xff] }
 0xaa5   : > { %8314 = vmatpush1.bf16.msra.mxu1 %v12922_v42  ;;  %8342 = vmatpush3.bf16.msra.mxu0 %v12921_v58  ;;  %v12953_v58 = vld [vmem:[#allocation274_spill] sm:$0xff]  ;;  %v12954_v42 = vld [vmem:[#allocation275_spill] sm:$0xff] }
 0xaa6   : > { %8316 = vmatprep.subr.bf16.mxu1 %v12923_v2  ;;  %8344 = vmatprep.subr.bf16.mxu0 %v12924_v44 }
 0xaa9   : > { %8318 = vmatpush1.bf16.msra.mxu1 %v12925_v51  ;;  %8346 = vmatpush3.bf16.msra.mxu0 %v12924_v44 }
 0xaaa   : > { %8320 = vmatprep.subr.bf16.mxu1 %v12926_v62  ;;  %8348 = vmatprep.subr.bf16.mxu0 %v12927_v40  ;;  %v12955_v62 = vld [vmem:[#allocation226_spill] sm:$0xff] }
 0xaad   : > { %8322 = vmatpush1.bf16.msra.mxu1 %v12928_v10  ;;  %8350 = vmatpush3.bf16.msra.mxu0 %v12927_v40 }
 0xaae   : > { %8352 = vmatprep.subr.bf16.mxu0 %v12929_v0  ;;  %8356 = vmatprep.subr.bf16.mxu1 %v12930_v31  ;;  %v12956_v31 = vld [vmem:[#allocation277_spill] sm:$0xff] }
 0xab0   : > { %4955 = vmatmul.mubr.f32.vlgmr.msra.gmra.mrb[62].mxu1 %v11538_v21 }
 0xab1   : > { %8354 = vmatpush3.bf16.msra.mxu0 %v12929_v0  ;;  %4960 = vmatprep.mubr.f32.mxu1 %v12556_v23 }
 0xab2   : > { %8358 = vmatpush1.bf16.msra.mxu1 %v12931_v43  ;;  %8388 = vmatprep.subr.bf16.mxu0 %v12932_v9 }
 0xab3   : > { %8360 = vmatprep.subr.bf16.mxu1 %v12933_v26 }
 0xab4   : > { %4961 = vmatmul.mubr.f32.gmra.mrb[64].mxu1 %v11550_v49  ;;  %6803 = vmatmul.mubr.f32.vlgmr.msra.gmra.mrb[48].mxu0 %v11550_v49 }
 0xab5   : > { %8390 = vmatpush3.bf16.msra.mxu0 %v12932_v9  ;;  %5154 = vmatprep.mubr.f32.mxu1 %v12556_v23 }
 0xab6   : > { %8362 = vmatpush1.bf16.msra.mxu1 %v12934_v39  ;;  %8392 = vmatprep.subr.bf16.mxu0 %v12935_v30 }
 0xab7   : > { %8364 = vmatprep.subr.bf16.mxu1 %v12936_v61 }
 0xab9   : > { %8394 = vmatpush3.bf16.msra.mxu0 %v12935_v30 }
 0xaba   : > { %8366 = vmatpush1.bf16.msra.mxu1 %v12937_v36  ;;  %8396 = vmatprep.subr.bf16.mxu0 %v12938_v19 }
 0xabb   : > { %8368 = vmatprep.subr.bf16.mxu1 %v12939_v12 }
 0xabd   : > { %8398 = vmatpush3.bf16.msra.mxu0 %v12938_v19 }
 0xabe   : > { %8370 = vmatpush1.bf16.msra.mxu1 %v12940_v41  ;;  %8400 = vmatprep.subr.bf16.mxu0 %v12941_v11 }
 0xabf   : > { %8372 = vmatprep.subr.bf16.mxu1 %v12942_v3 }
 0xac1   : > { %8402 = vmatpush3.bf16.msra.mxu0 %v12941_v11 }
 0xac2   : > { %8374 = vmatpush1.bf16.msra.mxu1 %v12943_v8  ;;  %8404 = vmatprep.subr.bf16.mxu0 %v12944_v48 }
 0xac3   : > { %8376 = vmatprep.subr.bf16.mxu1 %v12945_v57 }
 0xac5   : > { %8406 = vmatpush3.bf16.msra.mxu0 %v12944_v48 }
 0xac6   : > { %8378 = vmatpush1.bf16.msra.mxu1 %v12946_v46  ;;  %8408 = vmatprep.subr.bf16.mxu0 %v12947_v35 }
 0xac7   : > { %8380 = vmatprep.subr.bf16.mxu1 %v12948_v54 }
 0xac9   : > { %8410 = vmatpush3.bf16.msra.mxu0 %v12947_v35 }
 0xaca   : > { %8382 = vmatpush1.bf16.msra.mxu1 %v12949_v24  ;;  %8412 = vmatprep.subr.bf16.mxu0 %v12950_v6 }
 0xacb   : > { %8384 = vmatprep.subr.bf16.mxu1 %v12951_v50  ;;  %v12957_v50 = vld [vmem:[#allocation219_spill] sm:$0xff] }
 0xacd   : > { %8414 = vmatpush3.bf16.msra.mxu0 %v12950_v6 }
 0xace   : > { %8386 = vmatpush1.bf16.msra.mxu1 %v12952_v60  ;;  %8416 = vmatprep.subr.bf16.mxu0 %v12953_v58 }
 0xacf   : > { %8420 = vmatprep.subr.bf16.mxu1 %v12954_v42 }
 0xad1   : > { %8418 = vmatpush3.bf16.msra.mxu0 %v12953_v58 }
 0xad2   : > { %8452 = vmatprep.subr.bf16.mxu0 %v12563_v63 }
 0xb47   : > { %v6734_v2 = vpop.f32.mrb[44].mxu0 }
 0xb48   : > { %v4639_v44 = vpop.f32.mrb[45].mxu0 }
 0xb49   : > { %v4640_v60 = vadd.f32 %v4639_v44, %v12957_v50 }
 0xb63   : > { %v4714_v51 = vpop.f32.mrb[58].mxu1 }
 0xb64   : > { %v8532_v40 = vadd.f32 %v12955_v62, %v4714_v51  ;;  %v4716_v10 = vpop.f32.mrb[59].mxu1 }
 0xb65   : > { %v8534_v43 = vadd.f32 %v12956_v31, %v4716_v10 }
 0xb66   : > { %v5527_v0 = vmul.f32 -1.442695, %v8532_v40 }
 0xb67   : > { %v4720_v9 = vpop.f32.mrb[60].mxu1  ;;  %v6769_v26 = vpop.f32.mrb[46].mxu0  ;;  %v5528_v12 = vmul.f32 -1.442695, %v8534_v43 }
 0xb68   : > { %8893 = vpow2.f32 %v5527_v0  ;;  %v8536_v39 = vadd.f32 %v12955_v62, %v4720_v9  ;;  %v4722_v30 = vpop.f32.mrb[61].mxu1  ;;  %v4791_v61 = vpop.f32.mrb[47].mxu0  ;;  %v4797_v42 = vadd.f32 %v6769_v26, %v12655_v13  ;;  %v4645_v0 = vadd.f32 %v6734_v2, %v12957_v50  ;;  %v12958_v9 = vld [vmem:[#allocation220_spill] sm:$0xff] }
 0xb69   : > { %v8538_v19 = vadd.f32 %v12956_v31, %v4722_v30  ;;  %v4792_v54 = vadd.f32 %v4791_v61, %v12655_v13  ;;  %v12959_v61 = vld [vmem:[#allocation221_spill] sm:$0xff] }
 0xb6a   : > { %v5529_v36 = vmul.f32 -1.442695, %v8536_v39 }
 0xb6b   : > { %v5530_v41 = vmul.f32 -1.442695, %v8538_v19 }
 0xb6c   : > { %8895 = vpow2.f32 %v5529_v36 }
 0xb6d   : > { %8897 = vpow2.f32 %v5528_v12  ;;  %v12960_v12 = vld [vmem:[#allocation286_spill] sm:$0xff] }
 0xb6e   : > { %8899 = vpow2.f32 %v5530_v41  ;;  %v12961_v41 = vld [vmem:[#allocation287_spill] sm:$0xff] }
 0xb72   : > { %v8894_v11 = vpop.eup %8893 }
 0xb73   : > { %v4816_v3 = vadd.f32 1.0, %v8894_v11 }
 0xb75   : > { %8901 = vrcp.f32 %v4816_v3 }
 0xb76   : > { %v8896_v8 = vpop.eup %8895 }
 0xb77   : > { %v4818_v48 = vadd.f32 1.0, %v8896_v8  ;;  %v8898_v57 = vpop.eup %8897 }
 0xb78   : > { %v8900_v46 = vpop.eup %8899  ;;  %v4817_v35 = vadd.f32 1.0, %v8898_v57 }
 0xb79   : > { %8903 = vrcp.f32 %v4818_v48  ;;  %v4819_v6 = vadd.f32 1.0, %v8900_v46 }
 0xb7a   : > { %8905 = vrcp.f32 %v4817_v35 }
 0xb7b   : > { %8907 = vrcp.f32 %v4819_v6  ;;  %v12963_v6 = vld [vmem:[#allocation278_spill] sm:$0xff] }
 0xb7f   : > { %v8902_v24 = vpop.eup %8901 }
 0xb80   : > { %v4828_v58 = vmul.f32 %v8902_v24, %v4792_v54  ;;  %v12962_v54 = vld [vmem:[#allocation288_spill] sm:$0xff] }
 0xb82   : > { %v4830_v51 = vadd.f32 %v4828_v58, %v4640_v60 }
 0xb83   : > { %v8904_v40 = vpop.eup %8903  ;;  %v4956_v10 = vpop.f32.mrb[62].mxu1 }
 0xb84   : > { %v4829_v43 = vmul.f32 %v8904_v40, %v4797_v42  ;;  %8909 = vtanh.f32 %v4830_v51  ;;  %v4957_v39 = vadd.f32 %v4956_v10, %v12958_v9  ;;  %v4958_v30 = vpop.f32.mrb[63].mxu1  ;;  %v8906_v35 = vpop.eup %8905 }
 0xb85   : > { %v4959_v36 = vadd.f32 %v4958_v30, %v12959_v61  ;;  %v8908_v42 = vpop.eup %8907  ;;  %v4834_v40 = vsub.f32 1.0, %v8906_v35 }
 0xb86   : > { %v4831_v19 = vadd.f32 %v4829_v43, %v4645_v0  ;;  %v5042_v44 = vadd.f32 %v4957_v39, %v12960_v12  ;;  %v4838_v43 = vmul.f32 %v8906_v35, %v11559_v33 }
 0xb87   : > { %v5043_v11 = vadd.f32 %v4959_v36, %v12961_v41  ;;  %v4962_v3 = vpop.f32.mrb[64].mxu1  ;;  %v6804_v26 = vpop.f32.mrb[48].mxu0  ;;  %v4835_v36 = vsub.f32 1.0, %v8908_v42 }
 0xb88   : > { %8911 = vtanh.f32 %v4831_v19  ;;  %v5531_v8 = vmul.f32 -1.442695, %v5042_v44  ;;  %v4963_v48 = vadd.f32 %v4962_v3, %v12958_v9  ;;  %v4964_v57 = vpop.f32.mrb[65].mxu1  ;;  %v5033_v2 = vpop.f32.mrb[49].mxu0  ;;  %v4839_v44 = vmul.f32 %v8908_v42, %v11598_v38  ;;  %v12964_v42 = vld [vmem:[#allocation290_spill] sm:$0xff] }
 0xb89   : > { %v4965_v46 = vadd.f32 %v4964_v57, %v12959_v61  ;;  %v5532_v51 = vmul.f32 -1.442695, %v5043_v11 }
 0xb8a   : > { %8913 = vpow2.f32 %v5531_v8  ;;  %v5044_v24 = vadd.f32 %v4963_v48, %v12962_v54  ;;  %v5034_v54 = vadd.f32 %v5033_v2, %v12547_v53 }
 0xb8b   : > { %v5045_v60 = vadd.f32 %v4965_v46, %v12963_v6 }
 0xb8c   : > { %v5533_v58 = vmul.f32 -1.442695, %v5044_v24 }
 0xb8d   : > { %v5534_v39 = vmul.f32 -1.442695, %v5045_v60 }
 0xb8e   : > { %v8910_v10 = vpop.eup %8909  ;;  %8915 = vpow2.f32 %v5533_v58  ;;  %v5039_v58 = vadd.f32 %v6804_v26, %v12547_v53 }
 0xb8f   : > { %v4836_v0 = vmul.f32 %v8910_v10, %v4834_v40  ;;  %8917 = vpow2.f32 %v5532_v51 }
 0xb90   : > { %8919 = vpow2.f32 %v5534_v39 }
 0xb91   : > { %v4840_v30 = vadd.f32 %v4838_v43, %v4836_v0  ;;  %v12965_v0 = vld [vmem:[#allocation289_spill] sm:$0xff] }
 0xb92   : > { %v8912_v19 = vpop.eup %8911 }
 0xb93   : > { %v4837_v12 = vmul.f32 %v8912_v19, %v4835_v36 }
 0xb94   : > { %v8914_v41 = vpop.eup %8913 }
 0xb95   : > { %v5058_v3 = vadd.f32 1.0, %v8914_v41  ;;  %v11690_v8 = vadd.f32 %v4839_v44, %v4837_v12 }
 0xb97   : > { %8921 = vrcp.f32 %v5058_v3 }
 0xb98   : > { %v8916_v11 = vpop.eup %8915 }
 0xb99   : > { %v5060_v48 = vadd.f32 1.0, %v8916_v11  ;;  %v8918_v57 = vpop.eup %8917 }
 0xb9a   : > { %v8920_v46 = vpop.eup %8919  ;;  %v5059_v35 = vadd.f32 1.0, %v8918_v57 }
 0xb9b   : > { %8923 = vrcp.f32 %v5060_v48  ;;  %v5061_v6 = vadd.f32 1.0, %v8920_v46 }
 0xb9c   : > { %8925 = vrcp.f32 %v5059_v35 }
 0xb9d   : > { %8927 = vrcp.f32 %v5061_v6 }
 0xba1   : > { %v8922_v24 = vpop.eup %8921 }
 0xba2   : > { %v5070_v60 = vmul.f32 %v8922_v24, %v5034_v54 }
 0xba4   : > { %v5072_v51 = vadd.f32 %v5070_v60, %v12964_v42 }
 0xba5   : > { %v8924_v40 = vpop.eup %8923 }
 0xba6   : > { %v5071_v10 = vmul.f32 %v8924_v40, %v5039_v58  ;;  %8929 = vtanh.f32 %v5072_v51  ;;  %v8926_v39 = vpop.eup %8925 }
 0xba7   : > { %v8928_v36 = vpop.eup %8927  ;;  %v5076_v19 = vsub.f32 1.0, %v8926_v39  ;;  %v5080_v44 = vmul.f32 %v8926_v39, %v11538_v21 }
 0xba8   : > { %v5073_v43 = vadd.f32 %v5071_v10, %v12965_v0  ;;  %v5077_v26 = vsub.f32 1.0, %v8928_v36  ;;  %v5081_v57 = vmul.f32 %v8928_v36, %v11550_v49 }
 0xbaa   : > { %8931 = vtanh.f32 %v5073_v43 }
 0xbb0   : > { %v8930_v12 = vpop.eup %8929 }
 0xbb1   : > { %v5078_v2 = vmul.f32 %v8930_v12, %v5076_v19 }
 0xbb3   : > { %v5082_v41 = vadd.f32 %v5080_v44, %v5078_v2 }
 0xbb4   : > { %v8932_v3 = vpop.eup %8931 }
 0xbb5   : > { %v5088_v11 = vsel %vm4888_vm15, %v11538_v21, %v5082_v41  ;;  %v5079_v48 = vmul.f32 %v8932_v3, %v5077_v26  ;;  %v11714_v21 = vsel %vm4294_vm13, %v11559_v33, %v4840_v30 }
 0xbb6   : > { %5155 = vmatmul.mubr.f32.vlgmr.msra.gmra.mrb[66].mxu1 %v5088_v11  ;;  %6837 = vmatprep.mubr.f32.mxu0 %v5088_v11 }
 0xbb7   : > { %8422 = vmatpush1.bf16.msra.mxu1 %v10466_v20  ;;  %5160 = vmatprep.mubr.f32.mxu1 %v12556_v23  ;;  %v5083_v46 = vadd.f32 %v5081_v57, %v5079_v48 }
 0xbb8   : > { %8424 = vmatprep.subr.bf16.mxu1 %v10470_v56 }
 0xbb9   : > { %v5089_v35 = vsel %vm4889_vm0, %v11550_v49, %v5083_v46 }
 0xbba   : > { %5161 = vmatmul.mubr.f32.gmra.mrb[68].mxu1 %v5089_v35  ;;  %6838 = vmatmul.mubr.f32.vlgmr.msra.gmra.mrb[50].mxu0 %v5089_v35 }
 0xbbb   : > { %8426 = vmatpush1.bf16.msra.mxu1 %v10485_v18  ;;  %8454 = vmatpush3.bf16.msra.mxu0 %v12563_v63 }
 0xbbc   : > { %6872 = vmatprep.mubr.f32.mxu0 %v11714_v21  ;;  %8428 = vmatprep.subr.bf16.mxu1 %v10490_v59 }
 0xbbd   : > { %8456 = vmatprep.subr.bf16.mxu0 %v10494_v32  ;;  %5306 = vmatprep.mubr.f32.mxu1 %v12556_v23 }
 0xbbf   : > { %8430 = vmatpush1.bf16.msra.mxu1 %v10507_v37  ;;  %8458 = vmatpush3.bf16.msra.mxu0 %v10494_v32 }
 0xbc0   : > { %8432 = vmatprep.subr.bf16.mxu1 %v10513_v1  ;;  %8460 = vmatprep.subr.bf16.mxu0 %v10517_v7 }
 0xbc3   : > { %8434 = vmatpush1.bf16.msra.mxu1 %v10525_v4  ;;  %8462 = vmatpush3.bf16.msra.mxu0 %v10517_v7 }
 0xbc4   : > { %8436 = vmatprep.subr.bf16.mxu1 %v10531_v17  ;;  %8464 = vmatprep.subr.bf16.mxu0 %v10535_v16 }
 0xbc7   : > { %8438 = vmatpush1.bf16.msra.mxu1 %v10541_v47  ;;  %8466 = vmatpush3.bf16.msra.mxu0 %v10535_v16  ;;  %v4843_v16 = vsel %vm4295_vm14, %v11598_v38, %v11690_v8 }
 0xbc8   : > { %8440 = vmatprep.subr.bf16.mxu1 %v10547_v25  ;;  %8468 = vmatprep.subr.bf16.mxu0 %v10551_v15 }
 0xbcb   : > { %8442 = vmatpush1.bf16.msra.mxu1 %v10557_v28  ;;  %8470 = vmatpush3.bf16.msra.mxu0 %v10551_v15 }
 0xbcc   : > { %8444 = vmatprep.subr.bf16.mxu1 %v10563_v45  ;;  %8472 = vmatprep.subr.bf16.mxu0 %v10567_v55 }
 0xbcf   : > { %8446 = vmatpush1.bf16.msra.mxu1 %v10573_v14  ;;  %8474 = vmatpush3.bf16.msra.mxu0 %v10567_v55 }
 0xbd0   : > { %8448 = vmatprep.subr.bf16.mxu1 %v10579_v52  ;;  %8476 = vmatprep.subr.bf16.mxu0 %v10583_v34 }
 0xbd3   : > { %8450 = vmatpush1.bf16.msra.mxu1 %v10589_v27  ;;  %8478 = vmatpush3.bf16.msra.mxu0 %v10583_v34 }
 0xbd4   : > { %8480 = vmatprep.subr.bf16.mxu0 %v10595_v5 }
 0xbd6   : > { %5307 = vmatmul.mubr.f32.vlgmr.msra.gmra.mrb[66].mxu1 %v11714_v21 }
 0xbd7   : > { %8482 = vmatpush3.bf16.msra.mxu0 %v10595_v5  ;;  %5312 = vmatprep.mubr.f32.mxu1 %v12556_v23 }
 0xbda   : > { %5313 = vmatmul.mubr.f32.gmra.mrb[68].mxu1 %v4843_v16  ;;  %6873 = vmatmul.mubr.f32.vlgmr.msra.gmra.mrb[52].mxu0 %v4843_v16 }
 0xc8d   : > { %v6839_v4 = vpop.f32.mrb[50].mxu0 }
 0xc8e   : > { %v5233_v20 = vpop.f32.mrb[51].mxu0  ;;  %v5239_v24 = vadd.f32 %v6839_v4, %v12957_v50 }
 0xca9   : > { %v5308_v56 = vpop.f32.mrb[66].mxu1 }
 0xcaa   : > { %v8540_v18 = vadd.f32 %v12955_v62, %v5308_v56  ;;  %v5310_v59 = vpop.f32.mrb[67].mxu1 }
 0xcab   : > { %v8542_v63 = vadd.f32 %v12956_v31, %v5310_v59 }
 0xcac   : > { %v5535_v32 = vmul.f32 -1.442695, %v8540_v18 }
 0xcad   : > { %v5314_v37 = vpop.f32.mrb[68].mxu1  ;;  %v6874_v1 = vpop.f32.mrb[52].mxu0  ;;  %v5536_v15 = vmul.f32 -1.442695, %v8542_v63 }
 0xcae   : > { %8933 = vpow2.f32 %v5535_v32  ;;  %v8544_v23 = vadd.f32 %v12955_v62, %v5314_v37  ;;  %v5316_v7 = vpop.f32.mrb[69].mxu1  ;;  %v5385_v17 = vpop.f32.mrb[53].mxu0  ;;  %v5234_v62 = vadd.f32 %v5233_v20, %v12957_v50  ;;  %v5391_v30 = vadd.f32 %v6874_v1, %v12655_v13 }
 0xcaf   : > { %v8546_v25 = vadd.f32 %v12956_v31, %v5316_v7  ;;  %v5386_v49 = vadd.f32 %v5385_v17, %v12655_v13 }
 0xcb0   : > { %v5537_v47 = vmul.f32 -1.442695, %v8544_v23 }
 0xcb1   : > { %v5538_v28 = vmul.f32 -1.442695, %v8546_v25 }
 0xcb2   : > { %8935 = vpow2.f32 %v5537_v47 }
 0xcb3   : > { %8937 = vpow2.f32 %v5536_v15 }
 0xcb4   : > { %8939 = vpow2.f32 %v5538_v28 }
 0xcb8   : > { %v8934_v45 = vpop.eup %8933 }
 0xcb9   : > { %v5410_v55 = vadd.f32 1.0, %v8934_v45 }
 0xcbb   : > { %8941 = vrcp.f32 %v5410_v55 }
 0xcbc   : > { %v8936_v14 = vpop.eup %8935 }
 0xcbd   : > { %v5412_v52 = vadd.f32 1.0, %v8936_v14  ;;  %v8938_v34 = vpop.eup %8937 }
 0xcbe   : > { %v8940_v27 = vpop.eup %8939  ;;  %v5411_v5 = vadd.f32 1.0, %v8938_v34 }
 0xcbf   : > { %8943 = vrcp.f32 %v5412_v52  ;;  %v5413_v38 = vadd.f32 1.0, %v8940_v27 }
 0xcc0   : > { %8945 = vrcp.f32 %v5411_v5 }
 0xcc1   : > { %8947 = vrcp.f32 %v5413_v38 }
 0xcc5   : > { %v8942_v33 = vpop.eup %8941 }
 0xcc6   : > { %v5422_v31 = vmul.f32 %v8942_v33, %v5386_v49 }
 0xcc8   : > { %v5424_v8 = vadd.f32 %v5422_v31, %v5234_v62 }
 0xcc9   : > { %v8944_v54 = vpop.eup %8943 }
 0xcca   : > { %v5423_v6 = vmul.f32 %v8944_v54, %v5391_v30  ;;  %8949 = vtanh.f32 %v5424_v8  ;;  %v8946_v58 = vpop.eup %8945 }
 0xccb   : > { %v8948_v42 = vpop.eup %8947  ;;  %v5428_v51 = vsub.f32 1.0, %v8946_v58  ;;  %v5432_v10 = vmul.f32 %v8946_v58, %v11714_v21 }
 0xccc   : > { %v5425_v60 = vadd.f32 %v5423_v6, %v5239_v24  ;;  %v5429_v43 = vsub.f32 1.0, %v8948_v42  ;;  %v5433_v12 = vmul.f32 %v8948_v42, %v4843_v16 }
 0xcce   : > { %8951 = vtanh.f32 %v5425_v60 }
 0xcd4   : > { %v8950_v40 = vpop.eup %8949 }
 0xcd5   : > { %v5430_v0 = vmul.f32 %v8950_v40, %v5428_v51 }
 0xcd7   : > { %v5434_v39 = vadd.f32 %v5432_v10, %v5430_v0 }
 0xcd8   : > { %v8952_v36 = vpop.eup %8951  ;;  %369 = sbr.rel (!%p367_p10) target bundleno = 162 (0xa2), region = 71 }
 0xcd9   : > { %v5431_v19 = vmul.f32 %v8952_v36, %v5429_v43  ;;  %v5436_v2 = vsel %vm4888_vm15, %v11714_v21, %v5434_v39  }
 0xcda   : > { %v12967_v1 = vmov %v5436_v2  ;;  %5438 = vst [vmem:[#allocation8] sm:$0xff] (%p367_p10), %v5436_v2 }
 0xcdb   : > { %v5435_v44 = vadd.f32 %v5433_v12, %v5431_v19 }
 0xcdd   : > { %v5437_v41 = vsel %vm4889_vm0, %v4843_v16, %v5435_v44  }
 0xcde   : > { %v12966_v60 = vmov %v5437_v41  ;;  %5439 = vst [vmem:[#allocation8 + $0x8] sm:$0xff] (%p367_p10), %v5437_v41 }
 0xcdf   :  { %9030 = shalt.err (!%p9027_p1)
}
 0xce0   :  { %s9031_s13 = scalar_lea.hbm %s11793_s7, 256 }
 0xce1   :  { %p9032_p2 = scmp.ne.s32.totalorder %s11793_s7, %s9031_s13  ;;  %p9035_p3 = scmp.lt.u32.totalorder %s9031_s13, %s11793_s7 }
 0xce3   :  { %p9037_p4 = pnand %p9035_p3, %p9032_p2 }
 0xce5   :  { %9040 = shalt.err (!%p9037_p4)
}
 0xce6   :  { %5451 = dma.vmem_to_hbm [thread:$0]  %s5446_s30, 256, %s11793_s7, [#allocation4], %s9075_s3, %s9075_s3, %s9076_s25  }
 0xce7   :  { %9057 = dma.done.wait [#allocation4], 256  }
 0xce8   :  { %9058 = vsyncadd [#allocation4], 4294967040 }
 0xce9   :  { %5455 = vsyncpa [#allocation3], 1 }
 0xcea   :  { %5456 = vsyncpa [#allocation6], 1 }
 0xceb   :  { %5457 = vsyncpa [#allocation4], 1 }

</bundles_post_ra>
